<compile_context>
chip_gen: v7x
topology: tpu7x:2x2x1
jax: 0.10.0
libtpu: 0.0.40
codegen_flags: <defaults>
</compile_context>

<pallas_src>
from functools import partial

import jax
import jax.numpy as jnp
from jax.experimental import pallas as pl
from jax.experimental.pallas import tpu as pltpu


# ----------------------------- shared math --------------------------------- #

def _layer_norm(x, w, b, eps=1e-5):
    mu = jnp.mean(x, axis=-1, keepdims=True)
    var = jnp.mean(jnp.square(x - mu), axis=-1, keepdims=True)
    return (x - mu) * jax.lax.rsqrt(var + eps) * w + b


def _gelu_tanh(x):
    # TODO(synk): PyTorch nn.GELU defaults to the exact erf form; the tanh
    # approximation (EUP tanh, guaranteed Mosaic lowering) is used here.
    c = 0.7978845608028654  # sqrt(2/pi)
    return 0.5 * x * (1.0 + jnp.tanh(c * (x + 0.044715 * x * x * x)))


# ------------------------------ the kernel --------------------------------- #

def _block_kernel(x_ref, bias_ref, dp1_ref, dp2_ref,
                  ln1w_ref, ln1b_ref, wqkv_ref, bqkv_ref,
                  wproj_ref, bproj_ref, ln2w_ref, ln2b_ref,
                  wfc1_ref, bfc1_ref, wfc2_ref, bfc2_ref,
                  o_ref, attn_sc,
                  *, num_heads, attn_scale, mlp_chunk):
    bb, N, C = x_ref.shape
    d = C // num_heads
    H = wfc1_ref.shape[1]
    mm = wqkv_ref.dtype                       # native MXU operand dtype
    f32 = jnp.float32

    x = x_ref[...].astype(f32)                # residual stream in f32

    # ------------------- attention branch: proj(attn(LN1(x))) -------------- #
    xn = _layer_norm(x, ln1w_ref[...].astype(f32), ln1b_ref[...].astype(f32))
    qkv = jnp.dot(xn.reshape(bb * N, C).astype(mm), wqkv_ref[...],
                  preferred_element_type=f32) + bqkv_ref[...].astype(f32)
    # fold the softmax scale into q once (bb*N*C elems, not N*N per head)
    q = (qkv[:, 0:C] * attn_scale).reshape(bb, N, C).astype(mm)
    k = qkv[:, C:2 * C].reshape(bb, N, C).astype(mm)
    v = qkv[:, 2 * C:3 * C].reshape(bb, N, C).astype(mm)

    # additive key mask, broadcast once (not once per head)
    bias = jnp.broadcast_to(bias_ref[...].astype(f32), (bb, N, N))

    for h in range(num_heads):                # static unroll over heads
        sl = slice(h * d, (h + 1) * d)
        s = jnp.einsum('bnd,bmd->bnm', q[:, :, sl], k[:, :, sl],
                       preferred_element_type=f32)
        s = s + bias
        s = s - jnp.max(s, axis=-1, keepdims=True)
        p = jnp.exp(s)
        p = p * pl.reciprocal(jnp.sum(p, axis=-1, keepdims=True), approx=True)
        o_h = jnp.einsum('bnm,bmd->bnd', p.astype(mm), v[:, :, sl],
                         preferred_element_type=f32)
        attn_sc[:, :, sl] = o_h.astype(mm)    # write at lane offset, no concat

    y = jnp.dot(attn_sc[...].reshape(bb * N, C), wproj_ref[...],
                preferred_element_type=f32) + bproj_ref[...].astype(f32)
    y = y.reshape(bb, N, C)

    # ---------- residual 1 with fused DropPath (per-sample f32 scale) ------- #
    x1 = x + y * dp1_ref[...]

    # ------------------ MLP branch, hidden dim processed in chunks ---------- #
    xn2 = _layer_norm(x1, ln2w_ref[...].astype(f32), ln2b_ref[...].astype(f32))
    xn2_mm = xn2.reshape(bb * N, C).astype(mm)
    y2 = jnp.zeros((bb * N, C), f32)
    for c in range(H // mlp_chunk):           # static unroll over H chunks
        hs = slice(c * mlp_chunk, (c + 1) * mlp_chunk)
        h1 = jnp.dot(xn2_mm, wfc1_ref[:, hs], preferred_element_type=f32)
        h1 = _gelu_tanh(h1 + bfc1_ref[:, hs].astype(f32)).astype(mm)
        y2 = y2 + jnp.dot(h1, wfc2_ref[hs, :], preferred_element_type=f32)
    y2 = (y2 + bfc2_ref[...].astype(f32)).reshape(bb, N, C)

    # ---------- residual 2 with fused DropPath (per-sample f32 scale) ------- #
    o_ref[...] = (x1 + y2 * dp2_ref[...]).astype(o_ref.dtype)


# ------------------------------ wrappers ------------------------------------ #

def _pick_batch_tile(B, N, max_rows=1024):
    """Largest batch tile with bb*N <= max_rows while keeping >=2 grid steps
    (so both v7x TensorCores get work) whenever B allows it."""
    divs = [d for d in range(1, B + 1) if B % d == 0]
    cands = [d for d in divs if B // d >= 2] or divs
    fits = [d for d in cands if d * N <= max_rows]
    return max(fits) if fits else min(cands)


def _pick_mlp_chunk(H, target=512):
    if H <= target:
        return H
    for c in range(target, 0, -128):
        if c % 128 == 0 and H % c == 0:
            return c
    return H


def drop_path_scale(key, batch, drop_prob, training):
    """Per-sample DropPath scale floor(keep+U)/keep, computed in float32."""
    if drop_prob == 0.0 or not training:
        return jnp.ones((batch, 1, 1), jnp.float32)
    keep = 1.0 - drop_prob
    u = jax.random.uniform(key, (batch, 1, 1), dtype=jnp.float32)
    return jnp.floor(keep + u) * jnp.float32(1.0 / keep)


def attention_bias(length, batch, seq):
    """Additive key mask, same semantics as get_attention_mask (0 / -10000)."""
    if length is None:
        return jnp.zeros((batch, 1, seq), jnp.float32)
    idx = jnp.arange(seq, dtype=length.dtype)[None, :]
    m = jnp.where(idx >= length[:, None], -10000.0, 0.0).astype(jnp.float32)
    return m[:, None, :]                                            # (B, 1, N)


_WEIGHT_ORDER = ('ln1_w', 'ln1_b', 'w_qkv', 'b_qkv', 'w_proj', 'b_proj',
                 'ln2_w', 'ln2_b', 'w_fc1', 'b_fc1', 'w_fc2', 'b_fc2')
_BUFFERED = getattr(pl, "Buffered", None)


def block_pallas(x, params, bias, dp1, dp2, *, num_heads, batch_tile=None,
                 mlp_chunk=None, interpret=False):
    """Pallas forward for Block. x: (B, N, C)."""
    B, N, C = x.shape
    assert C % num_heads == 0
    head_dim = C // num_heads
    attn_scale = float(head_dim) ** -0.5

    weights = [params[k] for k in _WEIGHT_ORDER]
    H = params['w_fc1'].shape[1]
    mm_dtype = params['w_qkv'].dtype

    bb = batch_tile or _pick_batch_tile(B, N)
    assert B % bb == 0
    grid = (B // bb,)
    mlp_chunk = mlp_chunk or _pick_mlp_chunk(H)
    assert H % mlp_chunk == 0

    # Explicit scoped-VMEM budget (resident weights + working set), clamped to
    # [32 MiB, 64 MiB] so it is valid on v5e/v6e (128 MiB) and v7x (64 MiB).
    w_bytes = sum(int(w.size) * w.dtype.itemsize for w in weights)
    act_bytes = 4 * bb * N * (10 * C + 2 * N + mlp_chunk)
    io_bytes = 2 * 2 * bb * N * C * x.dtype.itemsize
    scratch_bytes = bb * N * C * jnp.dtype(mm_dtype).itemsize
    vmem_limit = int(min(64 * 2**20,
                         max(32 * 2**20,
                             2 * w_bytes + act_bytes + io_bytes
                             + scratch_bytes + (4 << 20))))

    def batch_spec(shape):
        nd = len(shape)
        return pl.BlockSpec(shape, lambda i, nd=nd: (i,) + (0,) * (nd - 1))

    def invariant_spec(shape, single_buffer):
        nd = len(shape)
        if single_buffer and _BUFFERED is not None:
            return pl.BlockSpec(shape, lambda i, nd=nd: (0,) * nd,
                                pipeline_mode=_BUFFERED(1))
        return pl.BlockSpec(shape, lambda i, nd=nd: (0,) * nd)

    kernel = partial(_block_kernel, num_heads=num_heads,
                     attn_scale=attn_scale, mlp_chunk=mlp_chunk)

    def run(single_buffer_weights):
        in_specs = ([batch_spec((bb, N, C)),     # x (residual stream)
                     batch_spec((bb, 1, N)),     # attention key bias
                     batch_spec((bb, 1, 1)),     # DropPath scale (attn branch)
                     batch_spec((bb, 1, 1))]     # DropPath scale (mlp branch)
                    + [invariant_spec(w.shape, single_buffer_weights)
                       for w in weights])
        return pl.pallas_call(
            kernel,
            out_shape=jax.ShapeDtypeStruct(x.shape, x.dtype),
            grid=grid,
            in_specs=in_specs,
            out_specs=batch_spec((bb, N, C)),
            scratch_shapes=[pltpu.VMEM((bb, N, C), mm_dtype)],
            input_output_aliases={0: 0},         # residual stream in place
            compiler_params=pltpu.CompilerParams(
                dimension_semantics=("parallel",),
                vmem_limit_bytes=vmem_limit),
            interpret=interpret,
        )(x, bias, dp1.astype(jnp.float32), dp2.astype(jnp.float32), *weights)

    try:
        return run(True)
    except Exception:
        # TODO(synk): pl.Buffered(1) single-buffering of grid-invariant weights
        # is best-effort; fall back to default double-buffering if unsupported.
        return run(False)


# ------------------------- pure-JAX reference ------------------------------- #

def block_reference(x, params, bias, dp1, dp2, num_heads):
    P = jax.lax.Precision.HIGHEST
    B, N, C = x.shape
    d = C // num_heads
    scale = float(d) ** -0.5
    xf = x.astype(jnp.float32)

    xn = _layer_norm(xf, params['ln1_w'], params['ln1_b'])
    qkv = jnp.einsum('bnc,cd->bnd', xn, params['w_qkv'], precision=P) + params['b_qkv']
    q, k, v = qkv[..., :C], qkv[..., C:2 * C], qkv[..., 2 * C:]
    q = q.reshape(B, N, num_heads, d)
    k = k.reshape(B, N, num_heads, d)
    v = v.reshape(B, N, num_heads, d)
    s = jnp.einsum('bnhd,bmhd->bhnm', q, k, precision=P) * scale
    s = s + bias[:, :, None, :]
    a = jax.nn.softmax(s, axis=-1)
    o = jnp.einsum('bhnm,bmhd->bnhd', a, v, precision=P).reshape(B, N, C)
    y = jnp.einsum('bnc,cd->bnd', o, params['w_proj'], precision=P) + params['b_proj']
    x1 = xf + y * dp1
    xn2 = _layer_norm(x1, params['ln2_w'], params['ln2_b'])
    h = _gelu_tanh(jnp.einsum('bnc,ch->bnh', xn2, params['w_fc1'], precision=P)
                   + params['b_fc1'])
    y2 = jnp.einsum('bnh,hc->bnc', h, params['w_fc2'], precision=P) + params['b_fc2']
    return (x1 + y2 * dp2).astype(x.dtype)


# --------------------------------- demo ------------------------------------- #

if __name__ == "__main__":
    key = jax.random.PRNGKey(0)
    keys = jax.random.split(key, 16)

    # Small but lane-friendly shapes: C, 3C, head_dim, MLP hidden all multiples
    # of 128 so every matmul / store is lane-dense.
    B, N, C = 2, 8, 256
    num_heads = 2
    H = int(C * 4.0)
    drop_path_prob = 0.25

    def w_init(k, shape, s=0.05):
        return s * jax.random.normal(k, shape, dtype=jnp.float32)

    params = {
        'ln1_w': 1.0 + 0.1 * jax.random.normal(keys[0], (1, C), jnp.float32),
        'ln1_b': 0.01 * jax.random.normal(keys[1], (1, C), jnp.float32),
        'w_qkv': w_init(keys[2], (C, 3 * C)),
        'b_qkv': 0.01 * jax.random.normal(keys[3], (1, 3 * C), jnp.float32),
        'w_proj': w_init(keys[4], (C, C)),
        'b_proj': 0.01 * jax.random.normal(keys[5], (1, C), jnp.float32),
        'ln2_w': 1.0 + 0.1 * jax.random.normal(keys[6], (1, C), jnp.float32),
        'ln2_b': 0.01 * jax.random.normal(keys[7], (1, C), jnp.float32),
        'w_fc1': w_init(keys[8], (C, H)),
        'b_fc1': 0.01 * jax.random.normal(keys[9], (1, H), jnp.float32),
        'w_fc2': w_init(keys[10], (H, C)),
        'b_fc2': 0.01 * jax.random.normal(keys[11], (1, C), jnp.float32),
    }

    x = jax.random.normal(keys[12], (B, N, C), dtype=jnp.float32)
    length = jnp.array([N, 5], dtype=jnp.int32)     # exercise the key mask
    bias = attention_bias(length, B, N)

    # ---- case 1: f32 weights/activations, training-mode DropPath ---------- #
    k_dp1, k_dp2 = jax.random.split(keys[13])
    dp1 = drop_path_scale(k_dp1, B, drop_path_prob, training=True)
    dp2 = drop_path_scale(k_dp2, B, drop_path_prob, training=True)

    ref = block_reference(x, params, bias, dp1, dp2, num_heads)
    out = jax.block_until_ready(
        block_pallas(x, params, bias, dp1, dp2, num_heads=num_heads))
    assert out.shape == x.shape and out.dtype == x.dtype
    err = float(jnp.max(jnp.abs(out - ref)))
    assert jnp.allclose(out, ref, atol=2e-2, rtol=2e-2), f"f32 max_err={err}"

    # ---- case 2: bf16 weights/activations (native MXU path), eval mode ---- #
    params_bf16 = {k: v.astype(jnp.bfloat16) for k, v in params.items()}
    x_bf16 = x.astype(jnp.bfloat16)
    bias0 = attention_bias(None, B, N)
    dp_eval = drop_path_scale(keys[14], B, drop_path_prob, training=False)

    ref_bf16 = block_reference(x_bf16, params_bf16, bias0, dp_eval, dp_eval, num_heads)
    out_bf16 = jax.block_until_ready(
        block_pallas(x_bf16, params_bf16, bias0, dp_eval, dp_eval, num_heads=num_heads))
    assert out_bf16.shape == x_bf16.shape and out_bf16.dtype == jnp.bfloat16
    err_bf16 = float(jnp.max(jnp.abs(out_bf16.astype(jnp.float32)
                                     - ref_bf16.astype(jnp.float32))))
    assert jnp.allclose(out_bf16.astype(jnp.float32), ref_bf16.astype(jnp.float32),
                        atol=1e-1, rtol=1e-1), f"bf16 max_err={err_bf16}"

    print("KERNEL_OK")
</pallas_src>

<mosaic_0001>
module attributes {stable_mosaic.version = 11 : i64} {
  func.func @_block_kernel(%arg0: i32, %arg1: memref<1x8x256xf32, #tpu.memory_space<vmem>>, %arg2: memref<1x1x8xf32, #tpu.memory_space<vmem>>, %arg3: memref<1x1x1xf32, #tpu.memory_space<vmem>>, %arg4: memref<1x1x1xf32, #tpu.memory_space<vmem>>, %arg5: memref<1x256xf32, #tpu.memory_space<vmem>>, %arg6: memref<1x256xf32, #tpu.memory_space<vmem>>, %arg7: memref<256x768xf32, #tpu.memory_space<vmem>>, %arg8: memref<1x768xf32, #tpu.memory_space<vmem>>, %arg9: memref<256x256xf32, #tpu.memory_space<vmem>>, %arg10: memref<1x256xf32, #tpu.memory_space<vmem>>, %arg11: memref<1x256xf32, #tpu.memory_space<vmem>>, %arg12: memref<1x256xf32, #tpu.memory_space<vmem>>, %arg13: memref<256x1024xf32, #tpu.memory_space<vmem>>, %arg14: memref<1x1024xf32, #tpu.memory_space<vmem>>, %arg15: memref<1024x256xf32, #tpu.memory_space<vmem>>, %arg16: memref<1x256xf32, #tpu.memory_space<vmem>>, %arg17: memref<1x8x256xf32, #tpu.memory_space<vmem>>, %arg18: memref<1x8x256xf32, #tpu.memory_space<vmem>>) attributes {dimension_semantics = [#tpu.dimension_semantics<parallel>], iteration_bounds = array<i64: 2>, scalar_prefetch = 0 : i64, scratch_operands = 1 : i64, tpu.core_type = #tpu.core_type<tc>, window_params = [{transform_indices = @transform_0, window_bounds = array<i64: 1, 8, 256>}, {transform_indices = @transform_1, window_bounds = array<i64: 1, 1, 8>}, {transform_indices = @transform_2, window_bounds = array<i64: 1, 1, 1>}, {transform_indices = @transform_3, window_bounds = array<i64: 1, 1, 1>}, {pipeline_mode = #tpu.pipeline_mode<synchronous>, transform_indices = @transform_4, window_bounds = array<i64: 1, 256>}, {pipeline_mode = #tpu.pipeline_mode<synchronous>, transform_indices = @transform_5, window_bounds = array<i64: 1, 256>}, {pipeline_mode = #tpu.pipeline_mode<synchronous>, transform_indices = @transform_6, window_bounds = array<i64: 256, 768>}, {pipeline_mode = #tpu.pipeline_mode<synchronous>, transform_indices = @transform_7, window_bounds = array<i64: 1, 768>}, {pipeline_mode = #tpu.pipeline_mode<synchronous>, transform_indices = @transform_8, window_bounds = array<i64: 256, 256>}, {pipeline_mode = #tpu.pipeline_mode<synchronous>, transform_indices = @transform_9, window_bounds = array<i64: 1, 256>}, {pipeline_mode = #tpu.pipeline_mode<synchronous>, transform_indices = @transform_10, window_bounds = array<i64: 1, 256>}, {pipeline_mode = #tpu.pipeline_mode<synchronous>, transform_indices = @transform_11, window_bounds = array<i64: 1, 256>}, {pipeline_mode = #tpu.pipeline_mode<synchronous>, transform_indices = @transform_12, window_bounds = array<i64: 256, 1024>}, {pipeline_mode = #tpu.pipeline_mode<synchronous>, transform_indices = @transform_13, window_bounds = array<i64: 1, 1024>}, {pipeline_mode = #tpu.pipeline_mode<synchronous>, transform_indices = @transform_14, window_bounds = array<i64: 1024, 256>}, {pipeline_mode = #tpu.pipeline_mode<synchronous>, transform_indices = @transform_15, window_bounds = array<i64: 1, 256>}, {transform_indices = @transform_16, window_bounds = array<i64: 1, 8, 256>}]} {
    %c0 = arith.constant 0 : index
    %c0_0 = arith.constant 0 : index
    %c0_1 = arith.constant 0 : index
    %0 = vector.load %arg1[%c0, %c0_0, %c0_1] : memref<1x8x256xf32, #tpu.memory_space<vmem>>, vector<1x8x256xf32>
    %c0_2 = arith.constant 0 : index
    %c0_3 = arith.constant 0 : index
    %1 = vector.load %arg5[%c0_2, %c0_3] : memref<1x256xf32, #tpu.memory_space<vmem>>, vector<1x256xf32>
    %c0_4 = arith.constant 0 : index
    %c0_5 = arith.constant 0 : index
    %2 = vector.load %arg6[%c0_4, %c0_5] : memref<1x256xf32, #tpu.memory_space<vmem>>, vector<1x256xf32>
    %cst = arith.constant dense<0.000000e+00> : vector<1x8xf32>
    %3 = vector.multi_reduction <add>, %0, %cst [2] : vector<1x8x256xf32> to vector<1x8xf32>
    %4 = vector.shape_cast %3 : vector<1x8xf32> to vector<1x8x1xf32>
    %cst_6 = arith.constant 2.560000e+02 : f32
    %5 = vector.broadcast %cst_6 : f32 to vector<1x8x1xf32>
    %6 = arith.divf %4, %5 : vector<1x8x1xf32>
    %7 = vector.broadcast %6 : vector<1x8x1xf32> to vector<1x8x256xf32>
    %8 = arith.subf %0, %7 : vector<1x8x256xf32>
    %9 = arith.mulf %8, %8 : vector<1x8x256xf32>
    %cst_7 = arith.constant dense<0.000000e+00> : vector<1x8xf32>
    %10 = vector.multi_reduction <add>, %9, %cst_7 [2] : vector<1x8x256xf32> to vector<1x8xf32>
    %11 = vector.shape_cast %10 : vector<1x8xf32> to vector<1x8x1xf32>
    %cst_8 = arith.constant 2.560000e+02 : f32
    %12 = vector.broadcast %cst_8 : f32 to vector<1x8x1xf32>
    %13 = arith.divf %11, %12 : vector<1x8x1xf32>
    %14 = vector.broadcast %6 : vector<1x8x1xf32> to vector<1x8x256xf32>
    %15 = arith.subf %0, %14 : vector<1x8x256xf32>
    %cst_9 = arith.constant 9.99999974E-6 : f32
    %16 = vector.broadcast %cst_9 : f32 to vector<1x8x1xf32>
    %17 = arith.addf %13, %16 : vector<1x8x1xf32>
    %18 = math.rsqrt %17 : vector<1x8x1xf32>
    %19 = vector.broadcast %18 : vector<1x8x1xf32> to vector<1x8x256xf32>
    %20 = arith.mulf %15, %19 : vector<1x8x256xf32>
    %21 = vector.shape_cast %1 : vector<1x256xf32> to vector<1x1x256xf32>
    %22 = vector.broadcast %21 : vector<1x1x256xf32> to vector<1x8x256xf32>
    %23 = arith.mulf %20, %22 : vector<1x8x256xf32>
    %24 = vector.shape_cast %2 : vector<1x256xf32> to vector<1x1x256xf32>
    %25 = vector.broadcast %24 : vector<1x1x256xf32> to vector<1x8x256xf32>
    %26 = arith.addf %23, %25 : vector<1x8x256xf32>
    %27 = vector.shape_cast %26 : vector<1x8x256xf32> to vector<8x256xf32>
    %c0_10 = arith.constant 0 : index
    %c0_11 = arith.constant 0 : index
    %28 = vector.load %arg7[%c0_10, %c0_11] : memref<256x768xf32, #tpu.memory_space<vmem>>, vector<256x768xf32>
    %cst_12 = arith.constant dense<0.000000e+00> : vector<8x768xf32>
    %29 = tpu.matmul %27, %28, %cst_12 {dimension_numbers = #tpu.dot_dimension_numbers<[1], [0], [0], [1], [0, 0, 1, 1], [], []>} : vector<8x256xf32>, vector<256x768xf32>, vector<8x768xf32> -> vector<8x768xf32>
    %c0_13 = arith.constant 0 : index
    %c0_14 = arith.constant 0 : index
    %30 = vector.load %arg8[%c0_13, %c0_14] : memref<1x768xf32, #tpu.memory_space<vmem>>, vector<1x768xf32>
    %31 = vector.broadcast %30 : vector<1x768xf32> to vector<8x768xf32>
    %32 = arith.addf %29, %31 : vector<8x768xf32>
    %33 = vector.extract_strided_slice %32 {offsets = [0, 0], sizes = [8, 256], strides = [1, 1]} : vector<8x768xf32> to vector<8x256xf32>
    %cst_15 = arith.constant 0.0883883461 : f32
    %34 = vector.broadcast %cst_15 : f32 to vector<8x256xf32>
    %35 = arith.mulf %33, %34 : vector<8x256xf32>
    %36 = vector.shape_cast %35 : vector<8x256xf32> to vector<1x8x256xf32>
    %37 = vector.extract_strided_slice %32 {offsets = [0, 256], sizes = [8, 256], strides = [1, 1]} : vector<8x768xf32> to vector<8x256xf32>
    %38 = vector.shape_cast %37 : vector<8x256xf32> to vector<1x8x256xf32>
    %39 = vector.extract_strided_slice %32 {offsets = [0, 512], sizes = [8, 256], strides = [1, 1]} : vector<8x768xf32> to vector<8x256xf32>
    %40 = vector.shape_cast %39 : vector<8x256xf32> to vector<1x8x256xf32>
    %c0_16 = arith.constant 0 : index
    %c0_17 = arith.constant 0 : index
    %c0_18 = arith.constant 0 : index
    %41 = vector.load %arg2[%c0_16, %c0_17, %c0_18] : memref<1x1x8xf32, #tpu.memory_space<vmem>>, vector<1x1x8xf32>
    %42 = vector.shape_cast %41 : vector<1x1x8xf32> to vector<1x1x8xf32>
    %43 = vector.broadcast %42 : vector<1x1x8xf32> to vector<1x8x8xf32>
    %44 = vector.extract_strided_slice %36 {offsets = [0, 0, 0], sizes = [1, 8, 128], strides = [1, 1, 1]} : vector<1x8x256xf32> to vector<1x8x128xf32>
    %45 = vector.extract_strided_slice %38 {offsets = [0, 0, 0], sizes = [1, 8, 128], strides = [1, 1, 1]} : vector<1x8x256xf32> to vector<1x8x128xf32>
    "tpu.trace_start"() <{level = 10 : i32, message = "bnd,bmd->bnm"}> : () -> ()
    %cst_19 = arith.constant dense<0.000000e+00> : vector<1x8x8xf32>
    %46 = tpu.matmul %44, %45, %cst_19 {dimension_numbers = #tpu.dot_dimension_numbers<[2], [2], [1], [1], [0, 0, 0, 1, 1, 1], [0], [0]>} : vector<1x8x128xf32>, vector<1x8x128xf32>, vector<1x8x8xf32> -> vector<1x8x8xf32>
    "tpu.trace_stop"() : () -> ()
    %47 = arith.addf %46, %43 : vector<1x8x8xf32>
    %cst_20 = arith.constant dense<0xFF800000> : vector<1x8xf32>
    %48 = vector.multi_reduction <maximumf>, %47, %cst_20 [2] : vector<1x8x8xf32> to vector<1x8xf32>
    %49 = vector.shape_cast %48 : vector<1x8xf32> to vector<1x8x1xf32>
    %50 = vector.broadcast %49 : vector<1x8x1xf32> to vector<1x8x8xf32>
    %51 = arith.subf %47, %50 : vector<1x8x8xf32>
    %52 = math.exp %51 : vector<1x8x8xf32>
    %cst_21 = arith.constant dense<0.000000e+00> : vector<1x8xf32>
    %53 = vector.multi_reduction <add>, %52, %cst_21 [2] : vector<1x8x8xf32> to vector<1x8xf32>
    %54 = vector.shape_cast %53 : vector<1x8xf32> to vector<1x8x1xf32>
    %55 = tpu.reciprocal %54 {approx = true} : vector<1x8x1xf32> -> vector<1x8x1xf32>
    %56 = vector.broadcast %55 : vector<1x8x1xf32> to vector<1x8x8xf32>
    %57 = arith.mulf %52, %56 : vector<1x8x8xf32>
    %58 = vector.extract_strided_slice %40 {offsets = [0, 0, 0], sizes = [1, 8, 128], strides = [1, 1, 1]} : vector<1x8x256xf32> to vector<1x8x128xf32>
    "tpu.trace_start"() <{level = 10 : i32, message = "bnm,bmd->bnd"}> : () -> ()
    %cst_22 = arith.constant dense<0.000000e+00> : vector<1x8x128xf32>
    %59 = tpu.matmul %57, %58, %cst_22 {dimension_numbers = #tpu.dot_dimension_numbers<[2], [1], [1], [2], [0, 0, 0, 1, 1, 2], [0], [0]>} : vector<1x8x8xf32>, vector<1x8x128xf32>, vector<1x8x128xf32> -> vector<1x8x128xf32>
    "tpu.trace_stop"() : () -> ()
    %c0_23 = arith.constant 0 : index
    %c0_24 = arith.constant 0 : index
    %c0_25 = arith.constant 0 : index
    %60 = vector.load %arg18[%c0_23, %c0_24, %c0_25] : memref<1x8x256xf32, #tpu.memory_space<vmem>>, vector<1x8x128xf32>
    tpu.vector_store %arg18[%c0_23, %c0_24, %c0_25], %59 {strides = array<i32>} : memref<1x8x256xf32, #tpu.memory_space<vmem>>, vector<1x8x128xf32>,
    %61 = vector.extract_strided_slice %36 {offsets = [0, 0, 128], sizes = [1, 8, 128], strides = [1, 1, 1]} : vector<1x8x256xf32> to vector<1x8x128xf32>
    %62 = vector.extract_strided_slice %38 {offsets = [0, 0, 128], sizes = [1, 8, 128], strides = [1, 1, 1]} : vector<1x8x256xf32> to vector<1x8x128xf32>
    "tpu.trace_start"() <{level = 10 : i32, message = "bnd,bmd->bnm"}> : () -> ()
    %cst_26 = arith.constant dense<0.000000e+00> : vector<1x8x8xf32>
    %63 = tpu.matmul %61, %62, %cst_26 {dimension_numbers = #tpu.dot_dimension_numbers<[2], [2], [1], [1], [0, 0, 0, 1, 1, 1], [0], [0]>} : vector<1x8x128xf32>, vector<1x8x128xf32>, vector<1x8x8xf32> -> vector<1x8x8xf32>
    "tpu.trace_stop"() : () -> ()
    %64 = arith.addf %63, %43 : vector<1x8x8xf32>
    %cst_27 = arith.constant dense<0xFF800000> : vector<1x8xf32>
    %65 = vector.multi_reduction <maximumf>, %64, %cst_27 [2] : vector<1x8x8xf32> to vector<1x8xf32>
    %66 = vector.shape_cast %65 : vector<1x8xf32> to vector<1x8x1xf32>
    %67 = vector.broadcast %66 : vector<1x8x1xf32> to vector<1x8x8xf32>
    %68 = arith.subf %64, %67 : vector<1x8x8xf32>
    %69 = math.exp %68 : vector<1x8x8xf32>
    %cst_28 = arith.constant dense<0.000000e+00> : vector<1x8xf32>
    %70 = vector.multi_reduction <add>, %69, %cst_28 [2] : vector<1x8x8xf32> to vector<1x8xf32>
    %71 = vector.shape_cast %70 : vector<1x8xf32> to vector<1x8x1xf32>
    %72 = tpu.reciprocal %71 {approx = true} : vector<1x8x1xf32> -> vector<1x8x1xf32>
    %73 = vector.broadcast %72 : vector<1x8x1xf32> to vector<1x8x8xf32>
    %74 = arith.mulf %69, %73 : vector<1x8x8xf32>
    %75 = vector.extract_strided_slice %40 {offsets = [0, 0, 128], sizes = [1, 8, 128], strides = [1, 1, 1]} : vector<1x8x256xf32> to vector<1x8x128xf32>
    "tpu.trace_start"() <{level = 10 : i32, message = "bnm,bmd->bnd"}> : () -> ()
    %cst_29 = arith.constant dense<0.000000e+00> : vector<1x8x128xf32>
    %76 = tpu.matmul %74, %75, %cst_29 {dimension_numbers = #tpu.dot_dimension_numbers<[2], [1], [1], [2], [0, 0, 0, 1, 1, 2], [0], [0]>} : vector<1x8x8xf32>, vector<1x8x128xf32>, vector<1x8x128xf32> -> vector<1x8x128xf32>
    "tpu.trace_stop"() : () -> ()
    %c0_30 = arith.constant 0 : index
    %c0_31 = arith.constant 0 : index
    %c128 = arith.constant 128 : index
    %77 = vector.load %arg18[%c0_30, %c0_31, %c128] : memref<1x8x256xf32, #tpu.memory_space<vmem>>, vector<1x8x128xf32>
    tpu.vector_store %arg18[%c0_30, %c0_31, %c128], %76 {strides = array<i32>} : memref<1x8x256xf32, #tpu.memory_space<vmem>>, vector<1x8x128xf32>,
    %c0_32 = arith.constant 0 : index
    %c0_33 = arith.constant 0 : index
    %c0_34 = arith.constant 0 : index
    %78 = vector.load %arg18[%c0_32, %c0_33, %c0_34] : memref<1x8x256xf32, #tpu.memory_space<vmem>>, vector<1x8x256xf32>
    %79 = vector.shape_cast %78 : vector<1x8x256xf32> to vector<8x256xf32>
    %c0_35 = arith.constant 0 : index
    %c0_36 = arith.constant 0 : index
    %80 = vector.load %arg9[%c0_35, %c0_36] : memref<256x256xf32, #tpu.memory_space<vmem>>, vector<256x256xf32>
    %cst_37 = arith.constant dense<0.000000e+00> : vector<8x256xf32>
    %81 = tpu.matmul %79, %80, %cst_37 {dimension_numbers = #tpu.dot_dimension_numbers<[1], [0], [0], [1], [0, 0, 1, 1], [], []>} : vector<8x256xf32>, vector<256x256xf32>, vector<8x256xf32> -> vector<8x256xf32>
    %c0_38 = arith.constant 0 : index
    %c0_39 = arith.constant 0 : index
    %82 = vector.load %arg10[%c0_38, %c0_39] : memref<1x256xf32, #tpu.memory_space<vmem>>, vector<1x256xf32>
    %83 = vector.broadcast %82 : vector<1x256xf32> to vector<8x256xf32>
    %84 = arith.addf %81, %83 : vector<8x256xf32>
    %85 = vector.shape_cast %84 : vector<8x256xf32> to vector<1x8x256xf32>
    %c0_40 = arith.constant 0 : index
    %c0_41 = arith.constant 0 : index
    %c0_42 = arith.constant 0 : index
    %86 = vector.load %arg3[%c0_40, %c0_41, %c0_42] : memref<1x1x1xf32, #tpu.memory_space<vmem>>, vector<1x1x1xf32>
    %87 = vector.broadcast %86 : vector<1x1x1xf32> to vector<1x8x256xf32>
    %88 = arith.mulf %85, %87 : vector<1x8x256xf32>
    %89 = arith.addf %0, %88 : vector<1x8x256xf32>
    %c0_43 = arith.constant 0 : index
    %c0_44 = arith.constant 0 : index
    %90 = vector.load %arg11[%c0_43, %c0_44] : memref<1x256xf32, #tpu.memory_space<vmem>>, vector<1x256xf32>
    %c0_45 = arith.constant 0 : index
    %c0_46 = arith.constant 0 : index
    %91 = vector.load %arg12[%c0_45, %c0_46] : memref<1x256xf32, #tpu.memory_space<vmem>>, vector<1x256xf32>
    %cst_47 = arith.constant dense<0.000000e+00> : vector<1x8xf32>
    %92 = vector.multi_reduction <add>, %89, %cst_47 [2] : vector<1x8x256xf32> to vector<1x8xf32>
    %93 = vector.shape_cast %92 : vector<1x8xf32> to vector<1x8x1xf32>
    %cst_48 = arith.constant 2.560000e+02 : f32
    %94 = vector.broadcast %cst_48 : f32 to vector<1x8x1xf32>
    %95 = arith.divf %93, %94 : vector<1x8x1xf32>
    %96 = vector.broadcast %95 : vector<1x8x1xf32> to vector<1x8x256xf32>
    %97 = arith.subf %89, %96 : vector<1x8x256xf32>
    %98 = arith.mulf %97, %97 : vector<1x8x256xf32>
    %cst_49 = arith.constant dense<0.000000e+00> : vector<1x8xf32>
    %99 = vector.multi_reduction <add>, %98, %cst_49 [2] : vector<1x8x256xf32> to vector<1x8xf32>
    %100 = vector.shape_cast %99 : vector<1x8xf32> to vector<1x8x1xf32>
    %cst_50 = arith.constant 2.560000e+02 : f32
    %101 = vector.broadcast %cst_50 : f32 to vector<1x8x1xf32>
    %102 = arith.divf %100, %101 : vector<1x8x1xf32>
    %103 = vector.broadcast %95 : vector<1x8x1xf32> to vector<1x8x256xf32>
    %104 = arith.subf %89, %103 : vector<1x8x256xf32>
    %cst_51 = arith.constant 9.99999974E-6 : f32
    %105 = vector.broadcast %cst_51 : f32 to vector<1x8x1xf32>
    %106 = arith.addf %102, %105 : vector<1x8x1xf32>
    %107 = math.rsqrt %106 : vector<1x8x1xf32>
    %108 = vector.broadcast %107 : vector<1x8x1xf32> to vector<1x8x256xf32>
    %109 = arith.mulf %104, %108 : vector<1x8x256xf32>
    %110 = vector.shape_cast %90 : vector<1x256xf32> to vector<1x1x256xf32>
    %111 = vector.broadcast %110 : vector<1x1x256xf32> to vector<1x8x256xf32>
    %112 = arith.mulf %109, %111 : vector<1x8x256xf32>
    %113 = vector.shape_cast %91 : vector<1x256xf32> to vector<1x1x256xf32>
    %114 = vector.broadcast %113 : vector<1x1x256xf32> to vector<1x8x256xf32>
    %115 = arith.addf %112, %114 : vector<1x8x256xf32>
    %116 = vector.shape_cast %115 : vector<1x8x256xf32> to vector<8x256xf32>
    %cst_52 = arith.constant 0.000000e+00 : f32
    %117 = vector.broadcast %cst_52 : f32 to vector<8x256xf32>
    %c0_53 = arith.constant 0 : index
    %c0_54 = arith.constant 0 : index
    %118 = vector.load %arg13[%c0_53, %c0_54] : memref<256x1024xf32, #tpu.memory_space<vmem>>, vector<256x512xf32>
    %cst_55 = arith.constant dense<0.000000e+00> : vector<8x512xf32>
    %119 = tpu.matmul %116, %118, %cst_55 {dimension_numbers = #tpu.dot_dimension_numbers<[1], [0], [0], [1], [0, 0, 1, 1], [], []>} : vector<8x256xf32>, vector<256x512xf32>, vector<8x512xf32> -> vector<8x512xf32>
    %c0_56 = arith.constant 0 : index
    %c0_57 = arith.constant 0 : index
    %120 = vector.load %arg14[%c0_56, %c0_57] : memref<1x1024xf32, #tpu.memory_space<vmem>>, vector<1x512xf32>
    %121 = vector.broadcast %120 : vector<1x512xf32> to vector<8x512xf32>
    %122 = arith.addf %119, %121 : vector<8x512xf32>
    %cst_58 = arith.constant 5.000000e-01 : f32
    %123 = vector.broadcast %cst_58 : f32 to vector<8x512xf32>
    %124 = arith.mulf %123, %122 : vector<8x512xf32>
    %cst_59 = arith.constant 4.471500e-02 : f32
    %125 = vector.broadcast %cst_59 : f32 to vector<8x512xf32>
    %126 = arith.mulf %125, %122 : vector<8x512xf32>
    %127 = arith.mulf %126, %122 : vector<8x512xf32>
    %128 = arith.mulf %127, %122 : vector<8x512xf32>
    %129 = arith.addf %122, %128 : vector<8x512xf32>
    %cst_60 = arith.constant 0.797884583 : f32
    %130 = vector.broadcast %cst_60 : f32 to vector<8x512xf32>
    %131 = arith.mulf %130, %129 : vector<8x512xf32>
    %132 = math.tanh %131 : vector<8x512xf32>
    %cst_61 = arith.constant 1.000000e+00 : f32
    %133 = vector.broadcast %cst_61 : f32 to vector<8x512xf32>
    %134 = arith.addf %133, %132 : vector<8x512xf32>
    %135 = arith.mulf %124, %134 : vector<8x512xf32>
    %c0_62 = arith.constant 0 : index
    %c0_63 = arith.constant 0 : index
    %136 = vector.load %arg15[%c0_62, %c0_63] : memref<1024x256xf32, #tpu.memory_space<vmem>>, vector<512x256xf32>
    %cst_64 = arith.constant dense<0.000000e+00> : vector<8x256xf32>
    %137 = tpu.matmul %135, %136, %cst_64 {dimension_numbers = #tpu.dot_dimension_numbers<[1], [0], [0], [1], [0, 0, 1, 1], [], []>} : vector<8x512xf32>, vector<512x256xf32>, vector<8x256xf32> -> vector<8x256xf32>
    %138 = arith.addf %117, %137 : vector<8x256xf32>
    %c0_65 = arith.constant 0 : index
    %c512 = arith.constant 512 : index
    %139 = vector.load %arg13[%c0_65, %c512] : memref<256x1024xf32, #tpu.memory_space<vmem>>, vector<256x512xf32>
    %cst_66 = arith.constant dense<0.000000e+00> : vector<8x512xf32>
    %140 = tpu.matmul %116, %139, %cst_66 {dimension_numbers = #tpu.dot_dimension_numbers<[1], [0], [0], [1], [0, 0, 1, 1], [], []>} : vector<8x256xf32>, vector<256x512xf32>, vector<8x512xf32> -> vector<8x512xf32>
    %c0_67 = arith.constant 0 : index
    %c512_68 = arith.constant 512 : index
    %141 = vector.load %arg14[%c0_67, %c512_68] : memref<1x1024xf32, #tpu.memory_space<vmem>>, vector<1x512xf32>
    %142 = vector.broadcast %141 : vector<1x512xf32> to vector<8x512xf32>
    %143 = arith.addf %140, %142 : vector<8x512xf32>
    %cst_69 = arith.constant 5.000000e-01 : f32
    %144 = vector.broadcast %cst_69 : f32 to vector<8x512xf32>
    %145 = arith.mulf %144, %143 : vector<8x512xf32>
    %cst_70 = arith.constant 4.471500e-02 : f32
    %146 = vector.broadcast %cst_70 : f32 to vector<8x512xf32>
    %147 = arith.mulf %146, %143 : vector<8x512xf32>
    %148 = arith.mulf %147, %143 : vector<8x512xf32>
    %149 = arith.mulf %148, %143 : vector<8x512xf32>
    %150 = arith.addf %143, %149 : vector<8x512xf32>
    %cst_71 = arith.constant 0.797884583 : f32
    %151 = vector.broadcast %cst_71 : f32 to vector<8x512xf32>
    %152 = arith.mulf %151, %150 : vector<8x512xf32>
    %153 = math.tanh %152 : vector<8x512xf32>
    %cst_72 = arith.constant 1.000000e+00 : f32
    %154 = vector.broadcast %cst_72 : f32 to vector<8x512xf32>
    %155 = arith.addf %154, %153 : vector<8x512xf32>
    %156 = arith.mulf %145, %155 : vector<8x512xf32>
    %c512_73 = arith.constant 512 : index
    %c0_74 = arith.constant 0 : index
    %157 = vector.load %arg15[%c512_73, %c0_74] : memref<1024x256xf32, #tpu.memory_space<vmem>>, vector<512x256xf32>
    %cst_75 = arith.constant dense<0.000000e+00> : vector<8x256xf32>
    %158 = tpu.matmul %156, %157, %cst_75 {dimension_numbers = #tpu.dot_dimension_numbers<[1], [0], [0], [1], [0, 0, 1, 1], [], []>} : vector<8x512xf32>, vector<512x256xf32>, vector<8x256xf32> -> vector<8x256xf32>
    %159 = arith.addf %138, %158 : vector<8x256xf32>
    %c0_76 = arith.constant 0 : index
    %c0_77 = arith.constant 0 : index
    %160 = vector.load %arg16[%c0_76, %c0_77] : memref<1x256xf32, #tpu.memory_space<vmem>>, vector<1x256xf32>
    %161 = vector.broadcast %160 : vector<1x256xf32> to vector<8x256xf32>
    %162 = arith.addf %159, %161 : vector<8x256xf32>
    %163 = vector.shape_cast %162 : vector<8x256xf32> to vector<1x8x256xf32>
    %c0_78 = arith.constant 0 : index
    %c0_79 = arith.constant 0 : index
    %c0_80 = arith.constant 0 : index
    %164 = vector.load %arg4[%c0_78, %c0_79, %c0_80] : memref<1x1x1xf32, #tpu.memory_space<vmem>>, vector<1x1x1xf32>
    %165 = vector.broadcast %164 : vector<1x1x1xf32> to vector<1x8x256xf32>
    %166 = arith.mulf %163, %165 : vector<1x8x256xf32>
    %167 = arith.addf %89, %166 : vector<1x8x256xf32>
    %c0_81 = arith.constant 0 : index
    %c0_82 = arith.constant 0 : index
    %c0_83 = arith.constant 0 : index
    %168 = vector.load %arg17[%c0_81, %c0_82, %c0_83] : memref<1x8x256xf32, #tpu.memory_space<vmem>>, vector<1x8x256xf32>
    tpu.vector_store %arg17[%c0_81, %c0_82, %c0_83], %167 {strides = array<i32>} : memref<1x8x256xf32, #tpu.memory_space<vmem>>, vector<1x8x256xf32>,
    return
  }
  func.func @transform_0(%arg0: i32) -> (i32, i32, i32) {
    %c0_i32 = arith.constant 0 : i32
    %c0_i32_0 = arith.constant 0 : i32
    %c0_i32_1 = arith.constant 0 : i32
    return %arg0, %c0_i32, %c0_i32_0 : i32, i32, i32
  }
  func.func @transform_1(%arg0: i32) -> (i32, i32, i32) {
    %c0_i32 = arith.constant 0 : i32
    %c0_i32_0 = arith.constant 0 : i32
    %c0_i32_1 = arith.constant 0 : i32
    return %arg0, %c0_i32, %c0_i32_0 : i32, i32, i32
  }
  func.func @transform_2(%arg0: i32) -> (i32, i32, i32) {
    %c0_i32 = arith.constant 0 : i32
    %c0_i32_0 = arith.constant 0 : i32
    %c0_i32_1 = arith.constant 0 : i32
    return %arg0, %c0_i32, %c0_i32_0 : i32, i32, i32
  }
  func.func @transform_3(%arg0: i32) -> (i32, i32, i32) {
    %c0_i32 = arith.constant 0 : i32
    %c0_i32_0 = arith.constant 0 : i32
    %c0_i32_1 = arith.constant 0 : i32
    return %arg0, %c0_i32, %c0_i32_0 : i32, i32, i32
  }
  func.func @transform_4(%arg0: i32) -> (i32, i32) {
    %c0_i32 = arith.constant 0 : i32
    %c0_i32_0 = arith.constant 0 : i32
    %c0_i32_1 = arith.constant 0 : i32
    return %c0_i32, %c0_i32_0 : i32, i32
  }
  func.func @transform_5(%arg0: i32) -> (i32, i32) {
    %c0_i32 = arith.constant 0 : i32
    %c0_i32_0 = arith.constant 0 : i32
    %c0_i32_1 = arith.constant 0 : i32
    return %c0_i32, %c0_i32_0 : i32, i32
  }
  func.func @transform_6(%arg0: i32) -> (i32, i32) {
    %c0_i32 = arith.constant 0 : i32
    %c0_i32_0 = arith.constant 0 : i32
    %c0_i32_1 = arith.constant 0 : i32
    return %c0_i32, %c0_i32_0 : i32, i32
  }
  func.func @transform_7(%arg0: i32) -> (i32, i32) {
    %c0_i32 = arith.constant 0 : i32
    %c0_i32_0 = arith.constant 0 : i32
    %c0_i32_1 = arith.constant 0 : i32
    return %c0_i32, %c0_i32_0 : i32, i32
  }
  func.func @transform_8(%arg0: i32) -> (i32, i32) {
    %c0_i32 = arith.constant 0 : i32
    %c0_i32_0 = arith.constant 0 : i32
    %c0_i32_1 = arith.constant 0 : i32
    return %c0_i32, %c0_i32_0 : i32, i32
  }
  func.func @transform_9(%arg0: i32) -> (i32, i32) {
    %c0_i32 = arith.constant 0 : i32
    %c0_i32_0 = arith.constant 0 : i32
    %c0_i32_1 = arith.constant 0 : i32
    return %c0_i32, %c0_i32_0 : i32, i32
  }
  func.func @transform_10(%arg0: i32) -> (i32, i32) {
    %c0_i32 = arith.constant 0 : i32
    %c0_i32_0 = arith.constant 0 : i32
    %c0_i32_1 = arith.constant 0 : i32
    return %c0_i32, %c0_i32_0 : i32, i32
  }
  func.func @transform_11(%arg0: i32) -> (i32, i32) {
    %c0_i32 = arith.constant 0 : i32
    %c0_i32_0 = arith.constant 0 : i32
    %c0_i32_1 = arith.constant 0 : i32
    return %c0_i32, %c0_i32_0 : i32, i32
  }
  func.func @transform_12(%arg0: i32) -> (i32, i32) {
    %c0_i32 = arith.constant 0 : i32
    %c0_i32_0 = arith.constant 0 : i32
    %c0_i32_1 = arith.constant 0 : i32
    return %c0_i32, %c0_i32_0 : i32, i32
  }
  func.func @transform_13(%arg0: i32) -> (i32, i32) {
    %c0_i32 = arith.constant 0 : i32
    %c0_i32_0 = arith.constant 0 : i32
    %c0_i32_1 = arith.constant 0 : i32
    return %c0_i32, %c0_i32_0 : i32, i32
  }
  func.func @transform_14(%arg0: i32) -> (i32, i32) {
    %c0_i32 = arith.constant 0 : i32
    %c0_i32_0 = arith.constant 0 : i32
    %c0_i32_1 = arith.constant 0 : i32
    return %c0_i32, %c0_i32_0 : i32, i32
  }
  func.func @transform_15(%arg0: i32) -> (i32, i32) {
    %c0_i32 = arith.constant 0 : i32
    %c0_i32_0 = arith.constant 0 : i32
    %c0_i32_1 = arith.constant 0 : i32
    return %c0_i32, %c0_i32_0 : i32, i32
  }
  func.func @transform_16(%arg0: i32) -> (i32, i32, i32) {
    %c0_i32 = arith.constant 0 : i32
    %c0_i32_0 = arith.constant 0 : i32
    %c0_i32_1 = arith.constant 0 : i32
    return %arg0, %c0_i32, %c0_i32_0 : i32, i32, i32
  }
}

module attributes {stable_mosaic.version = 11 : i64} {
  func.func @_block_kernel(%arg0: i32, %arg1: memref<1x8x256xf32, #tpu.memory_space<vmem>>, %arg2: memref<1x1x8xf32, #tpu.memory_space<vmem>>, %arg3: memref<1x1x1xf32, #tpu.memory_space<vmem>>, %arg4: memref<1x1x1xf32, #tpu.memory_space<vmem>>, %arg5: memref<1x256xf32, #tpu.memory_space<vmem>>, %arg6: memref<1x256xf32, #tpu.memory_space<vmem>>, %arg7: memref<256x768xf32, #tpu.memory_space<vmem>>, %arg8: memref<1x768xf32, #tpu.memory_space<vmem>>, %arg9: memref<256x256xf32, #tpu.memory_space<vmem>>, %arg10: memref<1x256xf32, #tpu.memory_space<vmem>>, %arg11: memref<1x256xf32, #tpu.memory_space<vmem>>, %arg12: memref<1x256xf32, #tpu.memory_space<vmem>>, %arg13: memref<256x1024xf32, #tpu.memory_space<vmem>>, %arg14: memref<1x1024xf32, #tpu.memory_space<vmem>>, %arg15: memref<1024x256xf32, #tpu.memory_space<vmem>>, %arg16: memref<1x256xf32, #tpu.memory_space<vmem>>, %arg17: memref<1x8x256xf32, #tpu.memory_space<vmem>>, %arg18: memref<1x8x256xf32, #tpu.memory_space<vmem>>) attributes {dimension_semantics = [#tpu.dimension_semantics<parallel>], iteration_bounds = array<i64: 2>, scalar_prefetch = 0 : i64, scratch_operands = 1 : i64, tpu.core_type = #tpu.core_type<tc>, window_params = [{transform_indices = @transform_0, window_bounds = array<i64: 1, 8, 256>}, {transform_indices = @transform_1, window_bounds = array<i64: 1, 1, 8>}, {transform_indices = @transform_2, window_bounds = array<i64: 1, 1, 1>}, {transform_indices = @transform_3, window_bounds = array<i64: 1, 1, 1>}, {pipeline_mode = #tpu.pipeline_mode<synchronous>, transform_indices = @transform_4, window_bounds = array<i64: 1, 256>}, {pipeline_mode = #tpu.pipeline_mode<synchronous>, transform_indices = @transform_5, window_bounds = array<i64: 1, 256>}, {pipeline_mode = #tpu.pipeline_mode<synchronous>, transform_indices = @transform_6, window_bounds = array<i64: 256, 768>}, {pipeline_mode = #tpu.pipeline_mode<synchronous>, transform_indices = @transform_7, window_bounds = array<i64: 1, 768>}, {pipeline_mode = #tpu.pipeline_mode<synchronous>, transform_indices = @transform_8, window_bounds = array<i64: 256, 256>}, {pipeline_mode = #tpu.pipeline_mode<synchronous>, transform_indices = @transform_9, window_bounds = array<i64: 1, 256>}, {pipeline_mode = #tpu.pipeline_mode<synchronous>, transform_indices = @transform_10, window_bounds = array<i64: 1, 256>}, {pipeline_mode = #tpu.pipeline_mode<synchronous>, transform_indices = @transform_11, window_bounds = array<i64: 1, 256>}, {pipeline_mode = #tpu.pipeline_mode<synchronous>, transform_indices = @transform_12, window_bounds = array<i64: 256, 1024>}, {pipeline_mode = #tpu.pipeline_mode<synchronous>, transform_indices = @transform_13, window_bounds = array<i64: 1, 1024>}, {pipeline_mode = #tpu.pipeline_mode<synchronous>, transform_indices = @transform_14, window_bounds = array<i64: 1024, 256>}, {pipeline_mode = #tpu.pipeline_mode<synchronous>, transform_indices = @transform_15, window_bounds = array<i64: 1, 256>}, {transform_indices = @transform_16, window_bounds = array<i64: 1, 8, 256>}]} {
    %c0 = arith.constant 0 : index
    %c0_0 = arith.constant 0 : index
    %c0_1 = arith.constant 0 : index
    %0 = vector.load %arg1[%c0, %c0_0, %c0_1] : memref<1x8x256xf32, #tpu.memory_space<vmem>>, vector<1x8x256xf32>
    %c0_2 = arith.constant 0 : index
    %c0_3 = arith.constant 0 : index
    %1 = vector.load %arg5[%c0_2, %c0_3] : memref<1x256xf32, #tpu.memory_space<vmem>>, vector<1x256xf32>
    %c0_4 = arith.constant 0 : index
    %c0_5 = arith.constant 0 : index
    %2 = vector.load %arg6[%c0_4, %c0_5] : memref<1x256xf32, #tpu.memory_space<vmem>>, vector<1x256xf32>
    %cst = arith.constant dense<0.000000e+00> : vector<1x8xf32>
    %3 = vector.multi_reduction <add>, %0, %cst [2] : vector<1x8x256xf32> to vector<1x8xf32>
    %4 = vector.shape_cast %3 : vector<1x8xf32> to vector<1x8x1xf32>
    %cst_6 = arith.constant 2.560000e+02 : f32
    %5 = vector.broadcast %cst_6 : f32 to vector<1x8x1xf32>
    %6 = arith.divf %4, %5 : vector<1x8x1xf32>
    %7 = vector.broadcast %6 : vector<1x8x1xf32> to vector<1x8x256xf32>
    %8 = arith.subf %0, %7 : vector<1x8x256xf32>
    %9 = arith.mulf %8, %8 : vector<1x8x256xf32>
    %cst_7 = arith.constant dense<0.000000e+00> : vector<1x8xf32>
    %10 = vector.multi_reduction <add>, %9, %cst_7 [2] : vector<1x8x256xf32> to vector<1x8xf32>
    %11 = vector.shape_cast %10 : vector<1x8xf32> to vector<1x8x1xf32>
    %cst_8 = arith.constant 2.560000e+02 : f32
    %12 = vector.broadcast %cst_8 : f32 to vector<1x8x1xf32>
    %13 = arith.divf %11, %12 : vector<1x8x1xf32>
    %14 = vector.broadcast %6 : vector<1x8x1xf32> to vector<1x8x256xf32>
    %15 = arith.subf %0, %14 : vector<1x8x256xf32>
    %cst_9 = arith.constant 9.99999974E-6 : f32
    %16 = vector.broadcast %cst_9 : f32 to vector<1x8x1xf32>
    %17 = arith.addf %13, %16 : vector<1x8x1xf32>
    %18 = math.rsqrt %17 : vector<1x8x1xf32>
    %19 = vector.broadcast %18 : vector<1x8x1xf32> to vector<1x8x256xf32>
    %20 = arith.mulf %15, %19 : vector<1x8x256xf32>
    %21 = vector.shape_cast %1 : vector<1x256xf32> to vector<1x1x256xf32>
    %22 = vector.broadcast %21 : vector<1x1x256xf32> to vector<1x8x256xf32>
    %23 = arith.mulf %20, %22 : vector<1x8x256xf32>
    %24 = vector.shape_cast %2 : vector<1x256xf32> to vector<1x1x256xf32>
    %25 = vector.broadcast %24 : vector<1x1x256xf32> to vector<1x8x256xf32>
    %26 = arith.addf %23, %25 : vector<1x8x256xf32>
    %27 = vector.shape_cast %26 : vector<1x8x256xf32> to vector<8x256xf32>
    %c0_10 = arith.constant 0 : index
    %c0_11 = arith.constant 0 : index
    %28 = vector.load %arg7[%c0_10, %c0_11] : memref<256x768xf32, #tpu.memory_space<vmem>>, vector<256x768xf32>
    %cst_12 = arith.constant dense<0.000000e+00> : vector<8x768xf32>
    %29 = tpu.matmul %27, %28, %cst_12 {dimension_numbers = #tpu.dot_dimension_numbers<[1], [0], [0], [1], [0, 0, 1, 1], [], []>} : vector<8x256xf32>, vector<256x768xf32>, vector<8x768xf32> -> vector<8x768xf32>
    %c0_13 = arith.constant 0 : index
    %c0_14 = arith.constant 0 : index
    %30 = vector.load %arg8[%c0_13, %c0_14] : memref<1x768xf32, #tpu.memory_space<vmem>>, vector<1x768xf32>
    %31 = vector.broadcast %30 : vector<1x768xf32> to vector<8x768xf32>
    %32 = arith.addf %29, %31 : vector<8x768xf32>
    %33 = vector.extract_strided_slice %32 {offsets = [0, 0], sizes = [8, 256], strides = [1, 1]} : vector<8x768xf32> to vector<8x256xf32>
    %cst_15 = arith.constant 0.0883883461 : f32
    %34 = vector.broadcast %cst_15 : f32 to vector<8x256xf32>
    %35 = arith.mulf %33, %34 : vector<8x256xf32>
    %36 = vector.shape_cast %35 : vector<8x256xf32> to vector<1x8x256xf32>
    %37 = vector.extract_strided_slice %32 {offsets = [0, 256], sizes = [8, 256], strides = [1, 1]} : vector<8x768xf32> to vector<8x256xf32>
    %38 = vector.shape_cast %37 : vector<8x256xf32> to vector<1x8x256xf32>
    %39 = vector.extract_strided_slice %32 {offsets = [0, 512], sizes = [8, 256], strides = [1, 1]} : vector<8x768xf32> to vector<8x256xf32>
    %40 = vector.shape_cast %39 : vector<8x256xf32> to vector<1x8x256xf32>
    %c0_16 = arith.constant 0 : index
    %c0_17 = arith.constant 0 : index
    %c0_18 = arith.constant 0 : index
    %41 = vector.load %arg2[%c0_16, %c0_17, %c0_18] : memref<1x1x8xf32, #tpu.memory_space<vmem>>, vector<1x1x8xf32>
    %42 = vector.shape_cast %41 : vector<1x1x8xf32> to vector<1x1x8xf32>
    %43 = vector.broadcast %42 : vector<1x1x8xf32> to vector<1x8x8xf32>
    %44 = vector.extract_strided_slice %36 {offsets = [0, 0, 0], sizes = [1, 8, 128], strides = [1, 1, 1]} : vector<1x8x256xf32> to vector<1x8x128xf32>
    %45 = vector.extract_strided_slice %38 {offsets = [0, 0, 0], sizes = [1, 8, 128], strides = [1, 1, 1]} : vector<1x8x256xf32> to vector<1x8x128xf32>
    "tpu.trace_start"() <{level = 10 : i32, message = "bnd,bmd->bnm"}> : () -> ()
    %cst_19 = arith.constant dense<0.000000e+00> : vector<1x8x8xf32>
    %46 = tpu.matmul %44, %45, %cst_19 {dimension_numbers = #tpu.dot_dimension_numbers<[2], [2], [1], [1], [0, 0, 0, 1, 1, 1], [0], [0]>} : vector<1x8x128xf32>, vector<1x8x128xf32>, vector<1x8x8xf32> -> vector<1x8x8xf32>
    "tpu.trace_stop"() : () -> ()
    %47 = arith.addf %46, %43 : vector<1x8x8xf32>
    %cst_20 = arith.constant dense<0xFF800000> : vector<1x8xf32>
    %48 = vector.multi_reduction <maximumf>, %47, %cst_20 [2] : vector<1x8x8xf32> to vector<1x8xf32>
    %49 = vector.shape_cast %48 : vector<1x8xf32> to vector<1x8x1xf32>
    %50 = vector.broadcast %49 : vector<1x8x1xf32> to vector<1x8x8xf32>
    %51 = arith.subf %47, %50 : vector<1x8x8xf32>
    %52 = math.exp %51 : vector<1x8x8xf32>
    %cst_21 = arith.constant dense<0.000000e+00> : vector<1x8xf32>
    %53 = vector.multi_reduction <add>, %52, %cst_21 [2] : vector<1x8x8xf32> to vector<1x8xf32>
    %54 = vector.shape_cast %53 : vector<1x8xf32> to vector<1x8x1xf32>
    %55 = tpu.reciprocal %54 {approx = true} : vector<1x8x1xf32> -> vector<1x8x1xf32>
    %56 = vector.broadcast %55 : vector<1x8x1xf32> to vector<1x8x8xf32>
    %57 = arith.mulf %52, %56 : vector<1x8x8xf32>
    %58 = vector.extract_strided_slice %40 {offsets = [0, 0, 0], sizes = [1, 8, 128], strides = [1, 1, 1]} : vector<1x8x256xf32> to vector<1x8x128xf32>
    "tpu.trace_start"() <{level = 10 : i32, message = "bnm,bmd->bnd"}> : () -> ()
    %cst_22 = arith.constant dense<0.000000e+00> : vector<1x8x128xf32>
    %59 = tpu.matmul %57, %58, %cst_22 {dimension_numbers = #tpu.dot_dimension_numbers<[2], [1], [1], [2], [0, 0, 0, 1, 1, 2], [0], [0]>} : vector<1x8x8xf32>, vector<1x8x128xf32>, vector<1x8x128xf32> -> vector<1x8x128xf32>
    "tpu.trace_stop"() : () -> ()
    %c0_23 = arith.constant 0 : index
    %c0_24 = arith.constant 0 : index
    %c0_25 = arith.constant 0 : index
    %60 = vector.load %arg18[%c0_23, %c0_24, %c0_25] : memref<1x8x256xf32, #tpu.memory_space<vmem>>, vector<1x8x128xf32>
    tpu.vector_store %arg18[%c0_23, %c0_24, %c0_25], %59 {strides = array<i32>} : memref<1x8x256xf32, #tpu.memory_space<vmem>>, vector<1x8x128xf32>,
    %61 = vector.extract_strided_slice %36 {offsets = [0, 0, 128], sizes = [1, 8, 128], strides = [1, 1, 1]} : vector<1x8x256xf32> to vector<1x8x128xf32>
    %62 = vector.extract_strided_slice %38 {offsets = [0, 0, 128], sizes = [1, 8, 128], strides = [1, 1, 1]} : vector<1x8x256xf32> to vector<1x8x128xf32>
    "tpu.trace_start"() <{level = 10 : i32, message = "bnd,bmd->bnm"}> : () -> ()
    %cst_26 = arith.constant dense<0.000000e+00> : vector<1x8x8xf32>
    %63 = tpu.matmul %61, %62, %cst_26 {dimension_numbers = #tpu.dot_dimension_numbers<[2], [2], [1], [1], [0, 0, 0, 1, 1, 1], [0], [0]>} : vector<1x8x128xf32>, vector<1x8x128xf32>, vector<1x8x8xf32> -> vector<1x8x8xf32>
    "tpu.trace_stop"() : () -> ()
    %64 = arith.addf %63, %43 : vector<1x8x8xf32>
    %cst_27 = arith.constant dense<0xFF800000> : vector<1x8xf32>
    %65 = vector.multi_reduction <maximumf>, %64, %cst_27 [2] : vector<1x8x8xf32> to vector<1x8xf32>
    %66 = vector.shape_cast %65 : vector<1x8xf32> to vector<1x8x1xf32>
    %67 = vector.broadcast %66 : vector<1x8x1xf32> to vector<1x8x8xf32>
    %68 = arith.subf %64, %67 : vector<1x8x8xf32>
    %69 = math.exp %68 : vector<1x8x8xf32>
    %cst_28 = arith.constant dense<0.000000e+00> : vector<1x8xf32>
    %70 = vector.multi_reduction <add>, %69, %cst_28 [2] : vector<1x8x8xf32> to vector<1x8xf32>
    %71 = vector.shape_cast %70 : vector<1x8xf32> to vector<1x8x1xf32>
    %72 = tpu.reciprocal %71 {approx = true} : vector<1x8x1xf32> -> vector<1x8x1xf32>
    %73 = vector.broadcast %72 : vector<1x8x1xf32> to vector<1x8x8xf32>
    %74 = arith.mulf %69, %73 : vector<1x8x8xf32>
    %75 = vector.extract_strided_slice %40 {offsets = [0, 0, 128], sizes = [1, 8, 128], strides = [1, 1, 1]} : vector<1x8x256xf32> to vector<1x8x128xf32>
    "tpu.trace_start"() <{level = 10 : i32, message = "bnm,bmd->bnd"}> : () -> ()
    %cst_29 = arith.constant dense<0.000000e+00> : vector<1x8x128xf32>
    %76 = tpu.matmul %74, %75, %cst_29 {dimension_numbers = #tpu.dot_dimension_numbers<[2], [1], [1], [2], [0, 0, 0, 1, 1, 2], [0], [0]>} : vector<1x8x8xf32>, vector<1x8x128xf32>, vector<1x8x128xf32> -> vector<1x8x128xf32>
    "tpu.trace_stop"() : () -> ()
    %c0_30 = arith.constant 0 : index
    %c0_31 = arith.constant 0 : index
    %c128 = arith.constant 128 : index
    %77 = vector.load %arg18[%c0_30, %c0_31, %c128] : memref<1x8x256xf32, #tpu.memory_space<vmem>>, vector<1x8x128xf32>
    tpu.vector_store %arg18[%c0_30, %c0_31, %c128], %76 {strides = array<i32>} : memref<1x8x256xf32, #tpu.memory_space<vmem>>, vector<1x8x128xf32>,
    %c0_32 = arith.constant 0 : index
    %c0_33 = arith.constant 0 : index
    %c0_34 = arith.constant 0 : index
    %78 = vector.load %arg18[%c0_32, %c0_33, %c0_34] : memref<1x8x256xf32, #tpu.memory_space<vmem>>, vector<1x8x256xf32>
    %79 = vector.shape_cast %78 : vector<1x8x256xf32> to vector<8x256xf32>
    %c0_35 = arith.constant 0 : index
    %c0_36 = arith.constant 0 : index
    %80 = vector.load %arg9[%c0_35, %c0_36] : memref<256x256xf32, #tpu.memory_space<vmem>>, vector<256x256xf32>
    %cst_37 = arith.constant dense<0.000000e+00> : vector<8x256xf32>
    %81 = tpu.matmul %79, %80, %cst_37 {dimension_numbers = #tpu.dot_dimension_numbers<[1], [0], [0], [1], [0, 0, 1, 1], [], []>} : vector<8x256xf32>, vector<256x256xf32>, vector<8x256xf32> -> vector<8x256xf32>
    %c0_38 = arith.constant 0 : index
    %c0_39 = arith.constant 0 : index
    %82 = vector.load %arg10[%c0_38, %c0_39] : memref<1x256xf32, #tpu.memory_space<vmem>>, vector<1x256xf32>
    %83 = vector.broadcast %82 : vector<1x256xf32> to vector<8x256xf32>
    %84 = arith.addf %81, %83 : vector<8x256xf32>
    %85 = vector.shape_cast %84 : vector<8x256xf32> to vector<1x8x256xf32>
    %c0_40 = arith.constant 0 : index
    %c0_41 = arith.constant 0 : index
    %c0_42 = arith.constant 0 : index
    %86 = vector.load %arg3[%c0_40, %c0_41, %c0_42] : memref<1x1x1xf32, #tpu.memory_space<vmem>>, vector<1x1x1xf32>
    %87 = vector.broadcast %86 : vector<1x1x1xf32> to vector<1x8x256xf32>
    %88 = arith.mulf %85, %87 : vector<1x8x256xf32>
    %89 = arith.addf %0, %88 : vector<1x8x256xf32>
    %c0_43 = arith.constant 0 : index
    %c0_44 = arith.constant 0 : index
    %90 = vector.load %arg11[%c0_43, %c0_44] : memref<1x256xf32, #tpu.memory_space<vmem>>, vector<1x256xf32>
    %c0_45 = arith.constant 0 : index
    %c0_46 = arith.constant 0 : index
    %91 = vector.load %arg12[%c0_45, %c0_46] : memref<1x256xf32, #tpu.memory_space<vmem>>, vector<1x256xf32>
    %cst_47 = arith.constant dense<0.000000e+00> : vector<1x8xf32>
    %92 = vector.multi_reduction <add>, %89, %cst_47 [2] : vector<1x8x256xf32> to vector<1x8xf32>
    %93 = vector.shape_cast %92 : vector<1x8xf32> to vector<1x8x1xf32>
    %cst_48 = arith.constant 2.560000e+02 : f32
    %94 = vector.broadcast %cst_48 : f32 to vector<1x8x1xf32>
    %95 = arith.divf %93, %94 : vector<1x8x1xf32>
    %96 = vector.broadcast %95 : vector<1x8x1xf32> to vector<1x8x256xf32>
    %97 = arith.subf %89, %96 : vector<1x8x256xf32>
    %98 = arith.mulf %97, %97 : vector<1x8x256xf32>
    %cst_49 = arith.constant dense<0.000000e+00> : vector<1x8xf32>
    %99 = vector.multi_reduction <add>, %98, %cst_49 [2] : vector<1x8x256xf32> to vector<1x8xf32>
    %100 = vector.shape_cast %99 : vector<1x8xf32> to vector<1x8x1xf32>
    %cst_50 = arith.constant 2.560000e+02 : f32
    %101 = vector.broadcast %cst_50 : f32 to vector<1x8x1xf32>
    %102 = arith.divf %100, %101 : vector<1x8x1xf32>
    %103 = vector.broadcast %95 : vector<1x8x1xf32> to vector<1x8x256xf32>
    %104 = arith.subf %89, %103 : vector<1x8x256xf32>
    %cst_51 = arith.constant 9.99999974E-6 : f32
    %105 = vector.broadcast %cst_51 : f32 to vector<1x8x1xf32>
    %106 = arith.addf %102, %105 : vector<1x8x1xf32>
    %107 = math.rsqrt %106 : vector<1x8x1xf32>
    %108 = vector.broadcast %107 : vector<1x8x1xf32> to vector<1x8x256xf32>
    %109 = arith.mulf %104, %108 : vector<1x8x256xf32>
    %110 = vector.shape_cast %90 : vector<1x256xf32> to vector<1x1x256xf32>
    %111 = vector.broadcast %110 : vector<1x1x256xf32> to vector<1x8x256xf32>
    %112 = arith.mulf %109, %111 : vector<1x8x256xf32>
    %113 = vector.shape_cast %91 : vector<1x256xf32> to vector<1x1x256xf32>
    %114 = vector.broadcast %113 : vector<1x1x256xf32> to vector<1x8x256xf32>
    %115 = arith.addf %112, %114 : vector<1x8x256xf32>
    %116 = vector.shape_cast %115 : vector<1x8x256xf32> to vector<8x256xf32>
    %cst_52 = arith.constant 0.000000e+00 : f32
    %117 = vector.broadcast %cst_52 : f32 to vector<8x256xf32>
    %c0_53 = arith.constant 0 : index
    %c0_54 = arith.constant 0 : index
    %118 = vector.load %arg13[%c0_53, %c0_54] : memref<256x1024xf32, #tpu.memory_space<vmem>>, vector<256x512xf32>
    %cst_55 = arith.constant dense<0.000000e+00> : vector<8x512xf32>
    %119 = tpu.matmul %116, %118, %cst_55 {dimension_numbers = #tpu.dot_dimension_numbers<[1], [0], [0], [1], [0, 0, 1, 1], [], []>} : vector<8x256xf32>, vector<256x512xf32>, vector<8x512xf32> -> vector<8x512xf32>
    %c0_56 = arith.constant 0 : index
    %c0_57 = arith.constant 0 : index
    %120 = vector.load %arg14[%c0_56, %c0_57] : memref<1x1024xf32, #tpu.memory_space<vmem>>, vector<1x512xf32>
    %121 = vector.broadcast %120 : vector<1x512xf32> to vector<8x512xf32>
    %122 = arith.addf %119, %121 : vector<8x512xf32>
    %cst_58 = arith.constant 5.000000e-01 : f32
    %123 = vector.broadcast %cst_58 : f32 to vector<8x512xf32>
    %124 = arith.mulf %123, %122 : vector<8x512xf32>
    %cst_59 = arith.constant 4.471500e-02 : f32
    %125 = vector.broadcast %cst_59 : f32 to vector<8x512xf32>
    %126 = arith.mulf %125, %122 : vector<8x512xf32>
    %127 = arith.mulf %126, %122 : vector<8x512xf32>
    %128 = arith.mulf %127, %122 : vector<8x512xf32>
    %129 = arith.addf %122, %128 : vector<8x512xf32>
    %cst_60 = arith.constant 0.797884583 : f32
    %130 = vector.broadcast %cst_60 : f32 to vector<8x512xf32>
    %131 = arith.mulf %130, %129 : vector<8x512xf32>
    %132 = math.tanh %131 : vector<8x512xf32>
    %cst_61 = arith.constant 1.000000e+00 : f32
    %133 = vector.broadcast %cst_61 : f32 to vector<8x512xf32>
    %134 = arith.addf %133, %132 : vector<8x512xf32>
    %135 = arith.mulf %124, %134 : vector<8x512xf32>
    %c0_62 = arith.constant 0 : index
    %c0_63 = arith.constant 0 : index
    %136 = vector.load %arg15[%c0_62, %c0_63] : memref<1024x256xf32, #tpu.memory_space<vmem>>, vector<512x256xf32>
    %cst_64 = arith.constant dense<0.000000e+00> : vector<8x256xf32>
    %137 = tpu.matmul %135, %136, %cst_64 {dimension_numbers = #tpu.dot_dimension_numbers<[1], [0], [0], [1], [0, 0, 1, 1], [], []>} : vector<8x512xf32>, vector<512x256xf32>, vector<8x256xf32> -> vector<8x256xf32>
    %138 = arith.addf %117, %137 : vector<8x256xf32>
    %c0_65 = arith.constant 0 : index
    %c512 = arith.constant 512 : index
    %139 = vector.load %arg13[%c0_65, %c512] : memref<256x1024xf32, #tpu.memory_space<vmem>>, vector<256x512xf32>
    %cst_66 = arith.constant dense<0.000000e+00> : vector<8x512xf32>
    %140 = tpu.matmul %116, %139, %cst_66 {dimension_numbers = #tpu.dot_dimension_numbers<[1], [0], [0], [1], [0, 0, 1, 1], [], []>} : vector<8x256xf32>, vector<256x512xf32>, vector<8x512xf32> -> vector<8x512xf32>
    %c0_67 = arith.constant 0 : index
    %c512_68 = arith.constant 512 : index
    %141 = vector.load %arg14[%c0_67, %c512_68] : memref<1x1024xf32, #tpu.memory_space<vmem>>, vector<1x512xf32>
    %142 = vector.broadcast %141 : vector<1x512xf32> to vector<8x512xf32>
    %143 = arith.addf %140, %142 : vector<8x512xf32>
    %cst_69 = arith.constant 5.000000e-01 : f32
    %144 = vector.broadcast %cst_69 : f32 to vector<8x512xf32>
    %145 = arith.mulf %144, %143 : vector<8x512xf32>
    %cst_70 = arith.constant 4.471500e-02 : f32
    %146 = vector.broadcast %cst_70 : f32 to vector<8x512xf32>
    %147 = arith.mulf %146, %143 : vector<8x512xf32>
    %148 = arith.mulf %147, %143 : vector<8x512xf32>
    %149 = arith.mulf %148, %143 : vector<8x512xf32>
    %150 = arith.addf %143, %149 : vector<8x512xf32>
    %cst_71 = arith.constant 0.797884583 : f32
    %151 = vector.broadcast %cst_71 : f32 to vector<8x512xf32>
    %152 = arith.mulf %151, %150 : vector<8x512xf32>
    %153 = math.tanh %152 : vector<8x512xf32>
    %cst_72 = arith.constant 1.000000e+00 : f32
    %154 = vector.broadcast %cst_72 : f32 to vector<8x512xf32>
    %155 = arith.addf %154, %153 : vector<8x512xf32>
    %156 = arith.mulf %145, %155 : vector<8x512xf32>
    %c512_73 = arith.constant 512 : index
    %c0_74 = arith.constant 0 : index
    %157 = vector.load %arg15[%c512_73, %c0_74] : memref<1024x256xf32, #tpu.memory_space<vmem>>, vector<512x256xf32>
    %cst_75 = arith.constant dense<0.000000e+00> : vector<8x256xf32>
    %158 = tpu.matmul %156, %157, %cst_75 {dimension_numbers = #tpu.dot_dimension_numbers<[1], [0], [0], [1], [0, 0, 1, 1], [], []>} : vector<8x512xf32>, vector<512x256xf32>, vector<8x256xf32> -> vector<8x256xf32>
    %159 = arith.addf %138, %158 : vector<8x256xf32>
    %c0_76 = arith.constant 0 : index
    %c0_77 = arith.constant 0 : index
    %160 = vector.load %arg16[%c0_76, %c0_77] : memref<1x256xf32, #tpu.memory_space<vmem>>, vector<1x256xf32>
    %161 = vector.broadcast %160 : vector<1x256xf32> to vector<8x256xf32>
    %162 = arith.addf %159, %161 : vector<8x256xf32>
    %163 = vector.shape_cast %162 : vector<8x256xf32> to vector<1x8x256xf32>
    %c0_78 = arith.constant 0 : index
    %c0_79 = arith.constant 0 : index
    %c0_80 = arith.constant 0 : index
    %164 = vector.load %arg4[%c0_78, %c0_79, %c0_80] : memref<1x1x1xf32, #tpu.memory_space<vmem>>, vector<1x1x1xf32>
    %165 = vector.broadcast %164 : vector<1x1x1xf32> to vector<1x8x256xf32>
    %166 = arith.mulf %163, %165 : vector<1x8x256xf32>
    %167 = arith.addf %89, %166 : vector<1x8x256xf32>
    %c0_81 = arith.constant 0 : index
    %c0_82 = arith.constant 0 : index
    %c0_83 = arith.constant 0 : index
    %168 = vector.load %arg17[%c0_81, %c0_82, %c0_83] : memref<1x8x256xf32, #tpu.memory_space<vmem>>, vector<1x8x256xf32>
    tpu.vector_store %arg17[%c0_81, %c0_82, %c0_83], %167 {strides = array<i32>} : memref<1x8x256xf32, #tpu.memory_space<vmem>>, vector<1x8x256xf32>,
    return
  }
  func.func @transform_0(%arg0: i32) -> (i32, i32, i32) {
    %c0_i32 = arith.constant 0 : i32
    %c0_i32_0 = arith.constant 0 : i32
    %c0_i32_1 = arith.constant 0 : i32
    return %arg0, %c0_i32, %c0_i32_0 : i32, i32, i32
  }
  func.func @transform_1(%arg0: i32) -> (i32, i32, i32) {
    %c0_i32 = arith.constant 0 : i32
    %c0_i32_0 = arith.constant 0 : i32
    %c0_i32_1 = arith.constant 0 : i32
    return %arg0, %c0_i32, %c0_i32_0 : i32, i32, i32
  }
  func.func @transform_2(%arg0: i32) -> (i32, i32, i32) {
    %c0_i32 = arith.constant 0 : i32
    %c0_i32_0 = arith.constant 0 : i32
    %c0_i32_1 = arith.constant 0 : i32
    return %arg0, %c0_i32, %c0_i32_0 : i32, i32, i32
  }
  func.func @transform_3(%arg0: i32) -> (i32, i32, i32) {
    %c0_i32 = arith.constant 0 : i32
    %c0_i32_0 = arith.constant 0 : i32
    %c0_i32_1 = arith.constant 0 : i32
    return %arg0, %c0_i32, %c0_i32_0 : i32, i32, i32
  }
  func.func @transform_4(%arg0: i32) -> (i32, i32) {
    %c0_i32 = arith.constant 0 : i32
    %c0_i32_0 = arith.constant 0 : i32
    %c0_i32_1 = arith.constant 0 : i32
    return %c0_i32, %c0_i32_0 : i32, i32
  }
  func.func @transform_5(%arg0: i32) -> (i32, i32) {
    %c0_i32 = arith.constant 0 : i32
    %c0_i32_0 = arith.constant 0 : i32
    %c0_i32_1 = arith.constant 0 : i32
    return %c0_i32, %c0_i32_0 : i32, i32
  }
  func.func @transform_6(%arg0: i32) -> (i32, i32) {
    %c0_i32 = arith.constant 0 : i32
    %c0_i32_0 = arith.constant 0 : i32
    %c0_i32_1 = arith.constant 0 : i32
    return %c0_i32, %c0_i32_0 : i32, i32
  }
  func.func @transform_7(%arg0: i32) -> (i32, i32) {
    %c0_i32 = arith.constant 0 : i32
    %c0_i32_0 = arith.constant 0 : i32
    %c0_i32_1 = arith.constant 0 : i32
    return %c0_i32, %c0_i32_0 : i32, i32
  }
  func.func @transform_8(%arg0: i32) -> (i32, i32) {
    %c0_i32 = arith.constant 0 : i32
    %c0_i32_0 = arith.constant 0 : i32
    %c0_i32_1 = arith.constant 0 : i32
    return %c0_i32, %c0_i32_0 : i32, i32
  }
  func.func @transform_9(%arg0: i32) -> (i32, i32) {
    %c0_i32 = arith.constant 0 : i32
    %c0_i32_0 = arith.constant 0 : i32
    %c0_i32_1 = arith.constant 0 : i32
    return %c0_i32, %c0_i32_0 : i32, i32
  }
  func.func @transform_10(%arg0: i32) -> (i32, i32) {
    %c0_i32 = arith.constant 0 : i32
    %c0_i32_0 = arith.constant 0 : i32
    %c0_i32_1 = arith.constant 0 : i32
    return %c0_i32, %c0_i32_0 : i32, i32
  }
  func.func @transform_11(%arg0: i32) -> (i32, i32) {
    %c0_i32 = arith.constant 0 : i32
    %c0_i32_0 = arith.constant 0 : i32
    %c0_i32_1 = arith.constant 0 : i32
    return %c0_i32, %c0_i32_0 : i32, i32
  }
  func.func @transform_12(%arg0: i32) -> (i32, i32) {
    %c0_i32 = arith.constant 0 : i32
    %c0_i32_0 = arith.constant 0 : i32
    %c0_i32_1 = arith.constant 0 : i32
    return %c0_i32, %c0_i32_0 : i32, i32
  }
  func.func @transform_13(%arg0: i32) -> (i32, i32) {
    %c0_i32 = arith.constant 0 : i32
    %c0_i32_0 = arith.constant 0 : i32
    %c0_i32_1 = arith.constant 0 : i32
    return %c0_i32, %c0_i32_0 : i32, i32
  }
  func.func @transform_14(%arg0: i32) -> (i32, i32) {
    %c0_i32 = arith.constant 0 : i32
    %c0_i32_0 = arith.constant 0 : i32
    %c0_i32_1 = arith.constant 0 : i32
    return %c0_i32, %c0_i32_0 : i32, i32
  }
  func.func @transform_15(%arg0: i32) -> (i32, i32) {
    %c0_i32 = arith.constant 0 : i32
    %c0_i32_0 = arith.constant 0 : i32
    %c0_i32_1 = arith.constant 0 : i32
    return %c0_i32, %c0_i32_0 : i32, i32
  }
  func.func @transform_16(%arg0: i32) -> (i32, i32, i32) {
    %c0_i32 = arith.constant 0 : i32
    %c0_i32_0 = arith.constant 0 : i32
    %c0_i32_1 = arith.constant 0 : i32
    return %arg0, %c0_i32, %c0_i32_0 : i32, i32, i32
  }
}

</mosaic_0001>

<bundles_post_ra>
// kernel: tpu_custom_call.1
= control target key start
LH: loop header
LB: loop body
LE: loop exit
PB: predicated region body
PF: predicated region fallthrough
CT: control target
= control target key end

     0   :  { %s4783_s0 = inlined_call_operand.hbm [shape: f32[2,8,256], index: 0, kind: input, shape index: {}, may-alias: {0,16}]   ;;  %s4784_s1 = inlined_call_operand.vmem [shape: f32[2,1,8], index: 1, kind: input, shape index: {}]   ;;  %s4785_s2 = inlined_call_operand.vmem [shape: f32[2,1,1], index: 2, kind: input, shape index: {}]   ;;  %s4786_s3 = inlined_call_operand.vmem [shape: f32[2,1,1], index: 3, kind: input, shape index: {}]   ;;  %s4787_s4 = inlined_call_operand.vmem [shape: f32[1,256], index: 4, kind: input, shape index: {}]   ;;  %s4788_s5 = inlined_call_operand.vmem [shape: f32[1,256], index: 5, kind: input, shape index: {}]   ;;  %s4789_s6 = inlined_call_operand.hbm [shape: f32[256,768], index: 6, kind: input, shape index: {}]   ;;  %s4790_s7 = inlined_call_operand.vmem [shape: f32[1,768], index: 7, kind: input, shape index: {}]   ;;  %s4791_s8 = inlined_call_operand.hbm [shape: f32[256,256], index: 8, kind: input, shape index: {}]   ;;  %s4792_s9 = inlined_call_operand.vmem [shape: f32[1,256], index: 9, kind: input, shape index: {}]   ;;  %s4793_s10 = inlined_call_operand.vmem [shape: f32[1,256], index: 10, kind: input, shape index: {}]   ;;  %s4794_s11 = inlined_call_operand.vmem [shape: f32[1,256], index: 11, kind: input, shape index: {}]   ;;  %s4795_s12 = inlined_call_operand.hbm [shape: f32[256,1024], index: 12, kind: input, shape index: {}]   ;;  %s4796_s13 = inlined_call_operand.vmem [shape: f32[1,1024], index: 13, kind: input, shape index: {}]   ;;  %s4797_s14 = inlined_call_operand.hbm [shape: f32[1024,256], index: 14, kind: input, shape index: {}]   ;;  %s4798_s15 = inlined_call_operand.vmem [shape: f32[1,256], index: 15, kind: input, shape index: {}]   ;;  %s4799_s16 = inlined_call_operand.hbm [shape: f32[2,8,256], index: 16, kind: output, shape index: {}, may-alias: {0,16}]  }
   0x1   :  { %4806 = sst [smem:[#allocation17_spill]] %s4783_s0 }
   0x2   :  { %4807 = sst [smem:[#allocation18_spill]] %s4786_s3 }
   0x3   :  { %4808 = sst [smem:[#allocation19_spill]] %s4789_s6 }
   0x4   :  { %4809 = sst [smem:[#allocation20_spill]] %s4791_s8 }
   0x5   :  { %4810 = sst [smem:[#allocation21_spill]] %s4792_s9 }
   0x6   :  { %4811 = sst [smem:[#allocation22_spill]] %s4793_s10 }
   0x7   :  { %4812 = sst [smem:[#allocation23_spill]] %s4794_s11 }
   0x8   :  { %4813 = sst [smem:[#allocation24_spill]] %s4796_s13 }
   0x9   :  { %4814 = sst [smem:[#allocation25_spill]] %s4798_s15 }
   0xa   :  { %4815 = sst [smem:[#allocation26_spill]] %s4799_s16 }
   0xb   :  { %21 = vsyncpa [#allocation4], 0 }
   0xc   :  { %23 = vsyncpa [#allocation4 + $0x1], 0 }
   0xd   :  { %24 = vsyncpa [#allocation7], 0 }
   0xe   :  { %25 = vsyncpa [#allocation10], 0 }
   0xf   :  { %26 = vsyncpa [#allocation5], 0 }
  0x10   :  { %28 = vsyncpa [#allocation5 + $0x1], 0  ;;  %s4302_s21 = smov 0   ;;  %s4304_s22 = smov 0  }
  0x11   :  { %s4306_s23 = smov 0   ;;  %s4308_s24 = smov 0  }
  0x12 LB: > { %s4202_s25 = smov [#allocation6]   ;;  %s4323_s27 = sadd.s32 4294967295, %s4200_s24   ;;  %s4200_s24 = sphi %s4308_s24, %s4846_s24   ;;  %s4196_s23 = sphi %s4306_s23, %s4845_s23   ;;  %s4192_s22 = sphi %s4304_s22, %s4844_s22   ;;  %s4188_s21 = sphi %s4302_s21, %s4843_s21  }
  0x13   : > { %s439_s26 = sshll.u32 %s4202_s25, 4  ;;  %p3026_p0 = scmp.ge.s32.totalorder %s4200_s24, 1  ;;  %s4328_s26 = int_to_ptr.vmem [resolvable:$true] %s439_s26 }
  0x14   : > { %p4803_p1 = scmp.eq.s32.totalorder %s4323_s27, 0  ;;  %p421_p2 = scmp.lt.s32.totalorder %s4200_s24, 3 }
  0x15   : > { %s4203_s29 = smov [#allocation9]   ;;  %s4204_s17 = smov [#allocation8]  }
  0x16   : > { %p4330_p3 = pnand %p3026_p0, %p421_p2  ;;  %s477_s30 = sshll.u32 %s4203_s29, 4  ;;  %s4343_s30 = int_to_ptr.vmem [resolvable:$true] %s477_s30 }
  0x17   : > { %s4345_s18 = sshll.u32 %s4204_s17, 4  ;;  %s4818_s6 = sld [smem:[#allocation19_spill]]  ;;  %s456_s18 = int_to_ptr.vmem [resolvable:$true] %s4345_s18 }
  0x18   : > { %s4816_s28 = scalar_select %p4330_p3, 1, 0 }
  0x19   : > { %p3876_p5 = pneg %p4330_p3 }
  0x1b   : > { %p4339_p6 = pnand %p3876_p5, %p4803_p1 }
  0x1d   : > { %s3984_s25 = scalar_lea.hbm %s4818_s6, 24576  ;;  %p4355_p8 = pneg %p4339_p6 }
  0x1e   : > { %p3985_p7 = scmp.ne.s32.totalorder %s4818_s6, %s3984_s25  ;;  %p3991_p11 = scmp.lt.u32.totalorder %s3984_s25, %s4818_s6 }
  0x20   : > { %p3987_p9 = pnand %p4355_p8, %p3985_p7 }
  0x22   : > { %p3988_p10 = pneg %p3987_p9 }
  0x24   : > { %p3993_p12 = pnand %p3991_p11, %p3988_p10 }
  0x26   : > { %3996 = shalt.err (!%p3993_p12)
}
  0x27   : > { %s3997_s15 = scalar_lea.vmem %s4328_s26, 24576  ;;  %p4005_p5 = scmp.lt.s32.totalorder %s4328_s26, %s4328_s26 }
  0x28   : > { %p3998_p13 = scmp.ne.s32.totalorder %s4328_s26, %s3997_s15  ;;  %p4006_p4 = scmp.lt.s32.totalorder %s3997_s15, %s3997_s15 }
  0x2a   : > { %p4000_p0 = pnand %p3998_p13, %p4355_p8  ;;  %p4007_p7 = por %p4006_p4, %p4005_p5 }
  0x2c   : > { %p4001_p2 = pneg %p4000_p0 }
  0x2e   : > { %p4008_p9 = pnand %p4007_p7, %p4001_p2 }
  0x30   : > { %4011 = shalt.err (!%p4008_p9)
}
  0x31   : > { %s4205_s16 = smov 768   ;;  %s4206_s3 = smov 48  }
  0x32   : > { %3879 = dma.hbm_to_vmem [thread:$0]  (!%p4339_p6), %s4818_s6, 24576, %s4328_s26, [#allocation7], %s4205_s16, %s4205_s16, %s4206_s3  }
  0x33   : > { %s4012_s13 = scalar_lea.hbm %s4795_s12, 32768 }
  0x34   : > { %p4013_p4 = scmp.ne.s32.totalorder %s4795_s12, %s4012_s13  ;;  %p4019_p12 = scmp.lt.u32.totalorder %s4012_s13, %s4795_s12 }
  0x36   : > { %p4015_p10 = pnand %p4013_p4, %p4355_p8 }
  0x38   : > { %p4016_p11 = pneg %p4015_p10 }
  0x3a   : > { %p4021_p13 = pnand %p4019_p12, %p4016_p11 }
  0x3c   : > { %4024 = shalt.err (!%p4021_p13)
}
  0x3d   : > { %s4025_s26 = scalar_lea.vmem %s4343_s30, 32768  ;;  %p4033_p7 = scmp.lt.s32.totalorder %s4343_s30, %s4343_s30 }
  0x3e   : > { %p4026_p0 = scmp.ne.s32.totalorder %s4343_s30, %s4025_s26  ;;  %p4034_p9 = scmp.lt.s32.totalorder %s4025_s26, %s4025_s26 }
  0x40   : > { %p4028_p2 = pnand %p4026_p0, %p4355_p8  ;;  %p4035_p4 = por %p4034_p9, %p4033_p7 }
  0x42   : > { %p4029_p5 = pneg %p4028_p2 }
  0x44   : > { %p4036_p10 = pnand %p4035_p4, %p4029_p5 }
  0x46   : > { %4039 = shalt.err (!%p4036_p10)
}
  0x47   : > { %s4207_s10 = smov 1024   ;;  %s4208_s9 = smov 64  }
  0x48   : > { %3885 = dma.hbm_to_vmem [thread:$0]  (!%p4339_p6), %s4795_s12, 32768, %s4343_s30, [#allocation10], %s4207_s10, %s4207_s10, %s4208_s9  }
  0x49   : > { %s4820_s8 = sld [smem:[#allocation20_spill]] }
  0x4f   : > { %s4040_s19 = scalar_lea.hbm %s4820_s8, 8192 }
  0x50   : > { %p4041_p11 = scmp.ne.s32.totalorder %s4820_s8, %s4040_s19  ;;  %p4047_p0 = scmp.lt.u32.totalorder %s4040_s19, %s4820_s8 }
  0x52   : > { %p4043_p12 = pnand %p4041_p11, %p4355_p8 }
  0x54   : > { %p4044_p13 = pneg %p4043_p12 }
  0x56   : > { %p4049_p2 = pnand %p4047_p0, %p4044_p13 }
  0x58   : > { %4052 = shalt.err (!%p4049_p2)
}
  0x59   : > { %s4053_s26 = scalar_lea.vmem %s456_s18, 8192  ;;  %p4061_p4 = scmp.lt.s32.totalorder %s456_s18, %s456_s18 }
  0x5a   : > { %p4054_p5 = scmp.ne.s32.totalorder %s456_s18, %s4053_s26  ;;  %p4062_p10 = scmp.lt.s32.totalorder %s4053_s26, %s4053_s26 }
  0x5c   : > { %p4056_p7 = pnand %p4054_p5, %p4355_p8  ;;  %p4063_p1 = por %p4062_p10, %p4061_p4 }
  0x5e   : > { %p4057_p9 = pneg %p4056_p7 }
  0x60   : > { %p4064_p3 = pnand %p4063_p1, %p4057_p9 }
  0x62   : > { %4067 = shalt.err (!%p4064_p3)
}
  0x63   : > { %s4209_s30 = smov 256   ;;  %s4210_s10 = smov 16  }
  0x64   : > { %3882 = dma.hbm_to_vmem [thread:$0]  (!%p4339_p6), %s4820_s8, 8192, %s456_s18, [#allocation7], %s4209_s30, %s4209_s30, %s4210_s10  }
  0x65   : > { %s4211_s13 = smov [#allocation11]   ;;  %s4068_s20 = scalar_lea.hbm %s4797_s14, 32768 }
  0x66   : > { %s493_s16 = sshll.u32 %s4211_s13, 4  ;;  %p4069_p1 = scmp.ne.s32.totalorder %s4797_s14, %s4068_s20  ;;  %s494_s16 = int_to_ptr.vmem [resolvable:$true] %s493_s16 }
  0x67   : > { %p4075_p12 = scmp.lt.u32.totalorder %s4068_s20, %s4797_s14 }
  0x68   : > { %p4071_p3 = pnand %p4069_p1, %p4355_p8 }
  0x6a   : > { %p4072_p11 = pneg %p4071_p3 }
  0x6c   : > { %p4077_p13 = pnand %p4075_p12, %p4072_p11 }
  0x6e   : > { %4080 = shalt.err (!%p4077_p13)
}
  0x6f   : > { %s4081_s18 = scalar_lea.vmem %s494_s16, 32768  ;;  %p4089_p7 = scmp.lt.s32.totalorder %s494_s16, %s494_s16 }
  0x70   : > { %p4082_p0 = scmp.ne.s32.totalorder %s494_s16, %s4081_s18  ;;  %p4090_p9 = scmp.lt.s32.totalorder %s4081_s18, %s4081_s18 }
  0x72   : > { %p4084_p2 = pnand %p4082_p0, %p4355_p8  ;;  %p4091_p4 = por %p4090_p9, %p4089_p7 }
  0x74   : > { %p4085_p5 = pneg %p4084_p2 }
  0x76   : > { %p4092_p10 = pnand %p4091_p4, %p4085_p5 }
  0x78   : > { %4095 = shalt.err (!%p4092_p10)
}
  0x79   : > { %3888 = dma.hbm_to_vmem [thread:$0]  (!%p4339_p6), %s4797_s14, 32768, %s494_s16, [#allocation10], %s4209_s30, %s4209_s30, %s4210_s10  }
  0x7a   : > { %s3025_s29 = sadd.s32 4294967294, %s4200_s24   ;;  %s4438_s0 = sadd.s32 1, %s4200_s24  }
  0x7b   : > { %s38_s13 = ssub.s32 %s4200_s24, %s4438_s0  ;;  %s41_s3 = sadd.s32 1, %s4196_s23 }
  0x7c   : > { %p39_p8 = scmp.eq.s32.totalorder %s38_s13, 0  ;;  %p48_p1 = scmp.ne.s32.totalorder %s4196_s23, %s4192_s22 }
  0x7d   : > { %p49_p3 = scmp.eq.s32.totalorder %s4200_s24, 0  ;;  %p54_p11 = scmp.ne.s32.totalorder %s4192_s22, %s4188_s21 }
  0x7e   : > { %s4449_s19 = scalar_select %p39_p8, %s4196_s23, %s41_s3  }
  0x7f   : > { %p4451_p12 = por %p49_p3, %p48_p1  ;;  %p4822_p13 = scmp.eq.s32.totalorder %s4323_s27, 0 }
  0x80   : > { %p408_p0 = scmp.eq.s32.totalorder %s4323_s27, 1  ;;  %p414_p2 = scmp.eq.s32.totalorder %s3025_s29, 1 }
  0x81   : > { %p4457_p6 = por %p4822_p13, %p54_p11  ;;  %p3901_p5 = scmp.lt.s32.totalorder %s4200_s24, 2 }
  0x82   : > { %s510_s10 = sand.u32 1, %s4196_s23   ;;  %p4464_p7 = por %p408_p0, %p48_p1 }
  0x83   : > { %p4468_p9 = por %p414_p2, %p54_p11  ;;  %s3032_s17 = sshll.u32 %s510_s10, 4 }
  0x84   : > { %s4824_s16 = scalar_select %p4464_p7, 1, 0 }
  0x85   : > { %s4825_s25 = scalar_select %p4468_p9, 1, 0 }
  0x86   : > { %s3052_s15 = sshll.u32 %s4200_s24, 8  ;;  %s4826_s9 = sld [smem:[#allocation17_spill]] }
  0x87   : > { %s514_s29 = scalar_lea.vmem [#allocation3], %s3032_s17  ;;  %p4482_p4 = pnand %p3901_p5, %p4451_p12 }
  0x88   : > { %s522_s13 = sshll.u32 %s514_s29, 4  ;;  %s511_s6 = scalar_lea.sflag [#allocation4], %s510_s10  ;;  %s4478_s13 = int_to_ptr.vmem [resolvable:$true] %s522_s13 }
  0x89   : > { %p4098_p8 = pneg %p4482_p4 }
  0x8c   : > { %s4476_s11 = scalar_lea.hbm %s4826_s9, %s3052_s15  ;;  %s4101_s26 = scalar_lea.hbm %s4826_s9, 512 }
  0x8d   : > { %s4096_s8 = scalar_lea.hbm %s4476_s11, 256  ;;  %p4102_p11 = scmp.lt.u32.totalorder %s4476_s11, %s4826_s9 }
  0x8e   : > { %p4097_p10 = scmp.ne.s32.totalorder %s4476_s11, %s4096_s8  ;;  %p4103_p12 = scmp.lt.u32.totalorder %s4101_s26, %s4096_s8 }
  0x8f   : > { %p4105_p0 = scmp.lt.u32.totalorder %s4096_s8, %s4476_s11 }
  0x90   : > { %p4099_p1 = pnand %p4098_p8, %p4097_p10  ;;  %p4104_p13 = por %p4103_p12, %p4102_p11 }
  0x92   : > { %p4100_p3 = pneg %p4099_p1  ;;  %p4106_p2 = por %p4105_p0, %p4104_p13 }
  0x94   : > { %p4107_p5 = pnand %p4106_p2, %p4100_p3 }
  0x96   : > { %4110 = shalt.err (!%p4107_p5)
}
  0x97   : > { %s4111_s10 = scalar_lea.vmem %s4478_s13, 256  ;;  %s4212_s29 = smov [#allocation3]  }
  0x98   : > { %p4112_p10 = scmp.ne.s32.totalorder %s4478_s13, %s4111_s10  ;;  %s4116_s17 = sshll.u32 %s4212_s29, 4  ;;  %s4117_s17 = int_to_ptr.vmem [resolvable:$false] %s4116_s17 }
  0x99   : > { %s4118_s15 = scalar_lea.vmem %s4117_s17, 512  ;;  %p4119_p7 = scmp.lt.s32.totalorder %s4478_s13, %s4117_s17 }
  0x9a   : > { %p4114_p1 = pnand %p4112_p10, %p4098_p8  ;;  %p4120_p11 = scmp.lt.s32.totalorder %s4118_s15, %s4111_s10 }
  0x9c   : > { %p4115_p9 = pneg %p4114_p1  ;;  %p4121_p12 = por %p4120_p11, %p4119_p7 }
  0x9e   : > { %p4122_p13 = pnand %p4121_p12, %p4115_p9 }
  0xa0   : > { %4125 = shalt.err (!%p4122_p13)
}
  0xa1   : > { %3892 = dma.hbm_to_vmem [thread:$0]  (!%p4482_p4), %s4476_s11, 256, %s4478_s13, %s511_s6  }
  0xa2   : > { %p4828_p3 = scmp.ne.s32.totalorder %s4816_s28, 0 }
  0xa3   : > { %s4514_s8 = sand.u32 (!%p4828_p3), 1, %s4192_s22  }
  0xa4   : > { %549 = sbr.rel (%p4828_p3) target bundleno = 2786 (0xae2), region = 84  ;;  %s3036_s26 = sshll.u32 (!%p4828_p3), %s4514_s8, 4 }
  0xa5   : > { %s552_s20 = scalar_lea.sflag (!%p4828_p3), [#allocation4], %s4514_s8  ;;  %s4520_s18 = scalar_lea.vmem (!%p4828_p3), [#allocation3], %s3036_s26 }
  0xab   : > { %4171 = dma.done.wait (%p4457_p6), %s552_s20, 256  }
  0xac   : > { %4173 = vsyncadd (%p4457_p6), %s552_s20, 4294967040  ;;  %p4829_p7 = scmp.eq.s32.totalorder %s4323_s27, 0 }
  0xae   : > { %4175 = dma.done.wait (%p4829_p7), [#allocation7], 32768   ;;  %p4830_p9 = pmov %p4829_p7 }
  0xaf   : > { %p4831_p4 = pmov %p4829_p7 }
  0xb0   : > { %4177 = vsyncadd (%p4830_p9), [#allocation7], 4294934528 }
  0xb1   : > { %4179 = dma.done.wait (%p4831_p4), [#allocation10], 65536   ;;  %p4832_p8 = pmov %p4831_p4 }
  0xb2   : > { %v4535_v0 = vld [vmem:[%s4520_s18] sm:$0xff]  ;;  %v4538_v1 = vld [vmem:[%s4520_s18 + $0x8] sm:$0xff]  ;;  %vm4214_vm0 = vmmov 0   ;;  %p629_p6 = scmp.lt.s32.totalorder %s4323_s27, 1  ;;  %vm1201_vm1 = vcmask 64512   ;;  %s4833_s13 = sld [smem:[#allocation21_spill]] }
  0xb3   : > { %4181 = vsyncadd (%p4832_p8), [#allocation10], 4294901760  ;;  %v642_v2 = vadd.f32 %v4538_v1, %v4535_v0  ;;  %v686_v3 = vld [vmem:[#allocation6 + $0x8] sm:$0xff]  ;;  %v692_v4 = vld [vmem:[#allocation6 + $0x38] sm:$0xff]  ;;  %s4834_s29 = sld [smem:[#allocation22_spill]]  ;;  %s4835_s20 = sld [smem:[#allocation23_spill]] }
  0xb4   : > { %v685_v5 = vld [vmem:[#allocation6] sm:$0xff]  ;;  %v3082_v6 = vpack.c.bf16 %v692_v4, %v686_v3  ;;  %v691_v7 = vld [vmem:[#allocation6 + $0x30] sm:$0xff]  ;;  %v698_v8 = vld [vmem:[#allocation6 + $0x68] sm:$0xff]  ;;  %s4598_s10 = scalar_select %p629_p6, %s4323_s27, 1 }
  0xb5   : > { %643 = vadd.xlane.f32.xlu0 %v642_v2  ;;  %v704_v9 = vld [vmem:[#allocation6 + $0x98] sm:$0xff]  ;;  %v3084_v10 = vpack.c.bf16 %v691_v7, %v685_v5  ;;  %v697_v12 = vld [vmem:[#allocation6 + $0x60] sm:$0xff]  ;;  %v703_v13 = vld [vmem:[#allocation6 + $0x90] sm:$0xff]  ;;  %s4836_s30 = sld [smem:[#allocation24_spill]]  ;;  %s3053_s6 = sshll.u32 %s4323_s27, 8 }
  0xb6   : > { %v3086_v11 = vpack.c.bf16 %v704_v9, %v698_v8  ;;  %v710_v14 = vld [vmem:[#allocation6 + $0xc8] sm:$0xff]  ;;  %3083 = vmatprep.subr.bf16.mxu1 %v3082_v6  ;;  %v716_v15 = vld [vmem:[#allocation6 + $0xf8] sm:$0xff]  ;;  %v3088_v16 = vpack.c.bf16 %v703_v13, %v697_v12  ;;  %v709_v18 = vld [vmem:[#allocation6 + $0xc0] sm:$0xff]  ;;  %s631_s15 = scalar_lea.vmem %s4784_s1, %s4598_s10  ;;  %s634_s28 = scalar_lea.vmem %s4785_s2, %s4598_s10 }
  0xb7   : > { %3085 = vmatpush1.bf16.msra.mxu1 %v3084_v10  ;;  %v3090_v17 = vpack.c.bf16 %v716_v15, %v710_v14  ;;  %v715_v19 = vld [vmem:[#allocation6 + $0xf0] sm:$0xff]  ;;  %v722_v20 = vld [vmem:[#allocation6 + $0x128] sm:$0xff]  ;;  %v728_v21 = vld [vmem:[#allocation6 + $0x158] sm:$0xff]  ;;  %s4839_s3 = sld [smem:[#allocation26_spill]]  ;;  %s2876_s27 = scalar_lea.sflag [#allocation5], %s4514_s8 }
  0xb8   : > { %3087 = vmatprep.subr.bf16.mxu1 %v3086_v11  ;;  %v3092_v22 = vpack.c.bf16 %v715_v19, %v709_v18  ;;  %v3094_v23 = vpack.c.bf16 %v728_v21, %v722_v20  ;;  %v721_v24 = vld [vmem:[#allocation6 + $0x120] sm:$0xff]  ;;  %v727_v25 = vld [vmem:[#allocation6 + $0x150] sm:$0xff]  ;;  %v734_v26 = vld [vmem:[#allocation6 + $0x188] sm:$0xff]  ;;  %p4840_p2 = scmp.ne.s32.totalorder %s4824_s16, 0 }
  0xb9   : > { %v740_v27 = vld [vmem:[#allocation6 + $0x1b8] sm:$0xff]  ;;  %v3096_v28 = vpack.c.bf16 %v727_v25, %v721_v24  ;;  %v733_v30 = vld [vmem:[#allocation6 + $0x180] sm:$0xff]  ;;  %v739_v31 = vld [vmem:[#allocation6 + $0x1b0] sm:$0xff] }
  0xba   : > { %v3098_v29 = vpack.c.bf16 %v740_v27, %v734_v26  ;;  %v746_v32 = vld [vmem:[#allocation6 + $0x1e8] sm:$0xff]  ;;  %v752_v33 = vld [vmem:[#allocation6 + $0x218] sm:$0xff]  ;;  %v3100_v34 = vpack.c.bf16 %v739_v31, %v733_v30  ;;  %v745_v36 = vld [vmem:[#allocation6 + $0x1e0] sm:$0xff] }
  0xbb   : > { %3089 = vmatpush1.bf16.msra.mxu1 %v3088_v16  ;;  %v3102_v35 = vpack.c.bf16 %v752_v33, %v746_v32  ;;  %v751_v37 = vld [vmem:[#allocation6 + $0x210] sm:$0xff]  ;;  %v758_v38 = vld [vmem:[#allocation6 + $0x248] sm:$0xff]  ;;  %v764_v39 = vld [vmem:[#allocation6 + $0x278] sm:$0xff] }
  0xbc   : > { %3091 = vmatprep.subr.bf16.mxu1 %v3090_v17  ;;  %v3104_v40 = vpack.c.bf16 %v751_v37, %v745_v36  ;;  %v3106_v41 = vpack.c.bf16 %v764_v39, %v758_v38  ;;  %v757_v42 = vld [vmem:[#allocation6 + $0x240] sm:$0xff]  ;;  %v763_v43 = vld [vmem:[#allocation6 + $0x270] sm:$0xff]  ;;  %v770_v44 = vld [vmem:[#allocation6 + $0x2a8] sm:$0xff] }
  0xbd   : > { %v776_v45 = vld [vmem:[#allocation6 + $0x2d8] sm:$0xff]  ;;  %v3108_v46 = vpack.c.bf16 %v763_v43, %v757_v42  ;;  %v769_v48 = vld [vmem:[#allocation6 + $0x2a0] sm:$0xff]  ;;  %v775_v49 = vld [vmem:[#allocation6 + $0x2d0] sm:$0xff] }
  0xbe   : > { %v3110_v47 = vpack.c.bf16 %v776_v45, %v770_v44  ;;  %v782_v50 = vld [vmem:[#allocation6 + $0x308] sm:$0xff]  ;;  %v788_v51 = vld [vmem:[#allocation6 + $0x338] sm:$0xff]  ;;  %v3112_v52 = vpack.c.bf16 %v775_v49, %v769_v48  ;;  %v781_v54 = vld [vmem:[#allocation6 + $0x300] sm:$0xff] }
  0xbf   : > { %3093 = vmatpush1.bf16.msra.mxu1 %v3092_v22  ;;  %v3114_v53 = vpack.c.bf16 %v788_v51, %v782_v50  ;;  %v787_v55 = vld [vmem:[#allocation6 + $0x330] sm:$0xff]  ;;  %v794_v56 = vld [vmem:[#allocation6 + $0x368] sm:$0xff]  ;;  %v800_v57 = vld [vmem:[#allocation6 + $0x398] sm:$0xff] }
  0xc0   : > { %3095 = vmatprep.subr.bf16.mxu1 %v3094_v23  ;;  %v3116_v58 = vpack.c.bf16 %v787_v55, %v781_v54  ;;  %v3118_v59 = vpack.c.bf16 %v800_v57, %v794_v56  ;;  %v793_v60 = vld [vmem:[#allocation6 + $0x360] sm:$0xff]  ;;  %v799_v61 = vld [vmem:[#allocation6 + $0x390] sm:$0xff]  ;;  %v806_v62 = vld [vmem:[#allocation6 + $0x3c8] sm:$0xff] }
  0xc1   : > { %v812_v63 = vld [vmem:[#allocation6 + $0x3f8] sm:$0xff]  ;;  %v3120_v2 = vpack.c.bf16 %v799_v61, %v793_v60  ;;  %v805_v4 = vld [vmem:[#allocation6 + $0x3c0] sm:$0xff]  ;;  %v811_v5 = vld [vmem:[#allocation6 + $0x3f0] sm:$0xff] }
  0xc2   : > { %v3122_v3 = vpack.c.bf16 %v812_v63, %v806_v62  ;;  %v3124_v6 = vpack.c.bf16 %v811_v5, %v805_v4  ;;  %v818_v14 = vld [vmem:[#allocation6 + $0x428] sm:$0xff]  ;;  %v824_v15 = vld [vmem:[#allocation6 + $0x458] sm:$0xff]  ;;  %v817_v17 = vld [vmem:[#allocation6 + $0x420] sm:$0xff] }
  0xc3   : > { %3097 = vmatpush1.bf16.msra.mxu1 %v3096_v28  ;;  %v3126_v16 = vpack.c.bf16 %v824_v15, %v818_v14  ;;  %v823_v18 = vld [vmem:[#allocation6 + $0x450] sm:$0xff]  ;;  %v830_v20 = vld [vmem:[#allocation6 + $0x488] sm:$0xff]  ;;  %v836_v21 = vld [vmem:[#allocation6 + $0x4b8] sm:$0xff] }
  0xc4   : > { %3099 = vmatprep.subr.bf16.mxu1 %v3098_v29  ;;  %v3128_v19 = vpack.c.bf16 %v823_v18, %v817_v17  ;;  %v829_v22 = vld [vmem:[#allocation6 + $0x480] sm:$0xff]  ;;  %v835_v23 = vld [vmem:[#allocation6 + $0x4b0] sm:$0xff]  ;;  %v842_v24 = vld [vmem:[#allocation6 + $0x4e8] sm:$0xff] }
  0xc5   : > { %v848_v25 = vld [vmem:[#allocation6 + $0x518] sm:$0xff]  ;;  %v841_v26 = vld [vmem:[#allocation6 + $0x4e0] sm:$0xff]  ;;  %v847_v28 = vld [vmem:[#allocation6 + $0x510] sm:$0xff] }
  0xc6   : > { %v3134_v27 = vpack.c.bf16 %v848_v25, %v842_v24  ;;  %v854_v29 = vld [vmem:[#allocation6 + $0x548] sm:$0xff]  ;;  %v860_v30 = vld [vmem:[#allocation6 + $0x578] sm:$0xff]  ;;  %v3136_v31 = vpack.c.bf16 %v847_v28, %v841_v26  ;;  %v853_v33 = vld [vmem:[#allocation6 + $0x540] sm:$0xff] }
  0xc7   : > { %3101 = vmatpush1.bf16.msra.mxu1 %v3100_v34  ;;  %v3138_v32 = vpack.c.bf16 %v860_v30, %v854_v29  ;;  %v859_v34 = vld [vmem:[#allocation6 + $0x570] sm:$0xff]  ;;  %v872_v36 = vld [vmem:[#allocation6 + $0x5d8] sm:$0xff]  ;;  %v865_v39 = vld [vmem:[#allocation6 + $0x5a0] sm:$0xff] }
  0xc8   : > { %3103 = vmatprep.subr.bf16.mxu1 %v3102_v35  ;;  %v866_v35 = vld [vmem:[#allocation6 + $0x5a8] sm:$0xff]  ;;  %v3140_v37 = vpack.c.bf16 %v859_v34, %v853_v33  ;;  %v688_v42 = vld [vmem:[#allocation6 + $0x18] sm:$0xff]  ;;  %v687_v61 = vld [vmem:[#allocation6 + $0x10] sm:$0xff] }
  0xc9   : > { %v3142_v38 = vpack.c.bf16 %v872_v36, %v866_v35  ;;  %v694_v43 = vld [vmem:[#allocation6 + $0x48] sm:$0xff]  ;;  %v693_v62 = vld [vmem:[#allocation6 + $0x40] sm:$0xff]  ;;  %v711_v15 = vld [vmem:[#allocation6 + $0xd0] sm:$0xff] }
  0xca   : > { %v3146_v44 = vpack.c.bf16 %v694_v43, %v688_v42  ;;  %v706_v4 = vld [vmem:[#allocation6 + $0xa8] sm:$0xff]  ;;  %v724_v17 = vld [vmem:[#allocation6 + $0x138] sm:$0xff]  ;;  %v735_v25 = vld [vmem:[#allocation6 + $0x190] sm:$0xff] }
  0xcb   : > { %3105 = vmatpush1.bf16.msra.mxu1 %v3104_v40  ;;  %v871_v40 = vld [vmem:[#allocation6 + $0x5d0] sm:$0xff]  ;;  %v730_v18 = vld [vmem:[#allocation6 + $0x168] sm:$0xff]  ;;  %v741_v26 = vld [vmem:[#allocation6 + $0x1c0] sm:$0xff] }
  0xcc   : > { %3107 = vmatprep.subr.bf16.mxu1 %v3106_v41  ;;  %v3144_v41 = vpack.c.bf16 %v871_v40, %v865_v39  ;;  %v754_v28 = vld [vmem:[#allocation6 + $0x228] sm:$0xff]  ;;  %v3164_v29 = vpack.c.bf16 %v741_v26, %v735_v25  ;;  %v760_v33 = vld [vmem:[#allocation6 + $0x258] sm:$0xff]  ;;  %v771_v43 = vld [vmem:[#allocation6 + $0x2b0] sm:$0xff] }
  0xcd   : > { %v766_v34 = vld [vmem:[#allocation6 + $0x288] sm:$0xff]  ;;  %v772_v39 = vld [vmem:[#allocation6 + $0x2b8] sm:$0xff]  ;;  %v855_v26 = vld [vmem:[#allocation6 + $0x550] sm:$0xff] }
  0xce   : > { %v3170_v36 = vpack.c.bf16 %v766_v34, %v760_v33  ;;  %v778_v40 = vld [vmem:[#allocation6 + $0x2e8] sm:$0xff]  ;;  %v873_v33 = vld [vmem:[#allocation6 + $0x5e0] sm:$0xff] }
  0xcf   : > { %3109 = vmatpush1.bf16.msra.mxu1 %v3108_v46  ;;  %v3174_v42 = vpack.c.bf16 %v778_v40, %v772_v39  ;;  %v690_v34 = vld [vmem:[#allocation6 + $0x28] sm:$0xff]  ;;  %v695_v39 = vld [vmem:[#allocation6 + $0x50] sm:$0xff] }
  0xd0   : > { %3111 = vmatprep.subr.bf16.mxu1 %v3110_v47  ;;  %v660_v47 = vlaneseq  ;;  %v702_v40 = vld [vmem:[#allocation6 + $0x88] sm:$0xff] }
  0xd2   : > { %v4548_v49 = vshrl.u32 %v660_v47, 7 }
  0xd3   : > { %3113 = vmatpush1.bf16.msra.mxu1 %v3112_v52  ;;  %v640_v52 = vld [vmem:[%s4787_s4] sm:$0x3] }
  0xd4   : > { %3115 = vmatprep.subr.bf16.mxu1 %v3114_v53  ;;  %v4551_v50 = vsub.s32 1, %v4548_v49  ;;  %v4554_v51 = vsub.s32 0, %v4548_v49  ;;  %v641_v53 = vld [vmem:[%s4788_s5] sm:$0x3] }
  0xd6   : > { %v667_v54 = vrot.slane %v640_v52, %v4551_v50  ;;  %v663_v55 = vrot.slane %v640_v52, %v4554_v51  ;;  %v676_v60 = vrot.slane %v641_v53, %v4554_v51  ;;  %v783_v52 = vld [vmem:[#allocation6 + $0x310] sm:$0xff] }
  0xd7   : > { %3117 = vmatpush1.bf16.msra.mxu1 %v3116_v58  ;;  %v680_v58 = vrot.slane %v641_v53, %v4551_v50  ;;  %v789_v53 = vld [vmem:[#allocation6 + $0x340] sm:$0xff] }
  0xd8   : > { %3119 = vmatprep.subr.bf16.mxu1 %v3118_v59 }
  0xdb   : > { %3121 = vmatpush1.bf16.msra.mxu1 %v3120_v2 }
  0xdc   : > { %3123 = vmatprep.subr.bf16.mxu1 %v3122_v3  ;;  %v700_v3 = vld [vmem:[#allocation6 + $0x78] sm:$0xff] }
  0xdf   : > { %3125 = vmatpush1.bf16.msra.mxu1 %v3124_v6 }
  0xe0   : > { %3127 = vmatprep.subr.bf16.mxu1 %v3126_v16  ;;  %v717_v16 = vld [vmem:[#allocation6 + $0x100] sm:$0xff] }
  0xe3   : > { %3129 = vmatpush1.bf16.msra.mxu1 %v3128_v19  ;;  %v3156_v19 = vpack.c.bf16 %v717_v16, %v711_v15  ;;  %v831_v16 = vld [vmem:[#allocation6 + $0x490] sm:$0xff] }
 0x142   : > { %v644_v7 = vpop.xlane.xlu0 %643 }
 0x143   : > { %v646_v8 = vmul.f32 0.00390625, %v644_v7  ;;  %v3148_v7 = vpack.c.bf16 %v693_v62, %v687_v61  ;;  %v814_v61 = vld [vmem:[#allocation6 + $0x408] sm:$0xff] }
 0x145   : > { %v4543_v9 = vsub.f32 %v4535_v0, %v646_v8  ;;  %v648_v10 = vsub.f32 %v4538_v1, %v646_v8  ;;  %v3130_v0 = vpack.c.bf16 %v836_v21, %v830_v20  ;;  %v3132_v1 = vpack.c.bf16 %v835_v23, %v829_v22  ;;  %v723_v21 = vld [vmem:[#allocation6 + $0x130] sm:$0xff]  ;;  %v736_v22 = vld [vmem:[#allocation6 + $0x198] sm:$0xff]  ;;  %v742_v23 = vld [vmem:[#allocation6 + $0x1c8] sm:$0xff] }
 0x146   : > { %v3150_v8 = vpack.c.bf16 %v706_v4, %v700_v3  ;;  %v3158_v20 = vpack.c.bf16 %v730_v18, %v724_v17  ;;  %v3162_v24 = vpack.c.bf16 %v742_v23, %v736_v22  ;;  %v813_v3 = vld [vmem:[#allocation6 + $0x400] sm:$0xff]  ;;  %v820_v4 = vld [vmem:[#allocation6 + $0x438] sm:$0xff] }
 0x147   : > { %v649_v11 = vmul.f32 %v4543_v9, %v4543_v9  ;;  %v650_v12 = vmul.f32 %v648_v10, %v648_v10  ;;  %3131 = vmatprep.subr.bf16.mxu1 %v3130_v0  ;;  %v729_v0 = vld [vmem:[#allocation6 + $0x160] sm:$0xff]  ;;  %v844_v18 = vld [vmem:[#allocation6 + $0x4f8] sm:$0xff] }
 0x148   : > { %3133 = vmatpush1.bf16.msra.mxu1 %v3132_v1  ;;  %v3160_v1 = vpack.c.bf16 %v729_v0, %v723_v21  ;;  %v837_v17 = vld [vmem:[#allocation6 + $0x4c0] sm:$0xff]  ;;  %v843_v0 = vld [vmem:[#allocation6 + $0x4f0] sm:$0xff]  ;;  %v856_v23 = vld [vmem:[#allocation6 + $0x558] sm:$0xff] }
 0x149   : > { %v651_v13 = vadd.f32 %v650_v12, %v649_v11  ;;  %3135 = vmatprep.subr.bf16.mxu1 %v3134_v27  ;;  %v699_v11 = vld [vmem:[#allocation6 + $0x70] sm:$0xff]  ;;  %v712_v12 = vld [vmem:[#allocation6 + $0xd8] sm:$0xff]  ;;  %v849_v22 = vld [vmem:[#allocation6 + $0x520] sm:$0xff] }
 0x14a   : > { %v748_v27 = vld [vmem:[#allocation6 + $0x1f8] sm:$0xff] }
 0x14b   : > { %652 = vadd.xlane.f32.xlu0 %v651_v13  ;;  %v3166_v30 = vpack.c.bf16 %v754_v28, %v748_v27  ;;  %v861_v27 = vld [vmem:[#allocation6 + $0x580] sm:$0xff]  ;;  %v868_v28 = vld [vmem:[#allocation6 + $0x5b8] sm:$0xff] }
 0x14c   : > { %3137 = vmatpush1.bf16.msra.mxu1 %v3136_v31  ;;  %v747_v31 = vld [vmem:[#allocation6 + $0x1f0] sm:$0xff] }
 0x14d   : > { %3139 = vmatprep.subr.bf16.mxu1 %v3138_v32  ;;  %v753_v32 = vld [vmem:[#allocation6 + $0x220] sm:$0xff] }
 0x14e   : > { %v3168_v35 = vpack.c.bf16 %v753_v32, %v747_v31  ;;  %v867_v32 = vld [vmem:[#allocation6 + $0x5b0] sm:$0xff] }
 0x150   : > { %3141 = vmatpush1.bf16.msra.mxu1 %v3140_v37  ;;  %v759_v37 = vld [vmem:[#allocation6 + $0x250] sm:$0xff] }
 0x151   : > { %3143 = vmatprep.subr.bf16.mxu1 %v3142_v38  ;;  %v765_v38 = vld [vmem:[#allocation6 + $0x280] sm:$0xff] }
 0x154   : > { %3145 = vmatpush1.bf16.msra.mxu1 %v3144_v41  ;;  %v3172_v41 = vpack.c.bf16 %v765_v38, %v759_v37  ;;  %v689_v38 = vld [vmem:[#allocation6 + $0x20] sm:$0xff] }
 0x155   : > { %3147 = vmatprep.subr.bf16.mxu1 %v3146_v44  ;;  %v777_v44 = vld [vmem:[#allocation6 + $0x2e0] sm:$0xff] }
 0x156   : > { %v3176_v47 = vpack.c.bf16 %v777_v44, %v771_v43  ;;  %v701_v44 = vld [vmem:[#allocation6 + $0x80] sm:$0xff] }
 0x1d8   : > { %v653_v45 = vpop.xlane.xlu0 %652 }
 0x1d9   : > { %v654_v46 = vmul.f32 0.00390625, %v653_v45  ;;  %v784_v45 = vld [vmem:[#allocation6 + $0x318] sm:$0xff] }
 0x1db   : > { %v655_v48 = vadd.f32 1e-05, %v654_v46  ;;  %v790_v46 = vld [vmem:[#allocation6 + $0x348] sm:$0xff] }
 0x1dd   : > { %3954 = vrsqrt.f32 %v655_v48  ;;  %v3178_v48 = vpack.c.bf16 %v790_v46, %v784_v45  ;;  %v707_v45 = vld [vmem:[#allocation6 + $0xb0] sm:$0xff]  ;;  %v714_v46 = vld [vmem:[#allocation6 + $0xe8] sm:$0xff] }
 0x1e7   : > { %v3955_v56 = vpop.eup %3954 }
 0x1e8   : > { %v658_v57 = vmul.f32 %v3955_v56, %v648_v10  ;;  %v657_v59 = vmul.f32 %v3955_v56, %v4543_v9  ;;  %v705_v10 = vld [vmem:[#allocation6 + $0xa0] sm:$0xff]  ;;  %v718_v9 = vld [vmem:[#allocation6 + $0x108] sm:$0xff]  ;;  %v3180_v56 = vpack.c.bf16 %v789_v53, %v783_v52 }
 0x1e9   : > { %v3152_v13 = vpack.c.bf16 %v705_v10, %v699_v11  ;;  %v3154_v14 = vpack.c.bf16 %v718_v9, %v712_v12  ;;  %v819_v10 = vld [vmem:[#allocation6 + $0x430] sm:$0xff]  ;;  %v825_v12 = vld [vmem:[#allocation6 + $0x460] sm:$0xff]  ;;  %v832_v9 = vld [vmem:[#allocation6 + $0x498] sm:$0xff] }
 0x1ea   : > { %v671_v63 = vmul.f32 %v667_v54, %v658_v57  ;;  %v670_v2 = vmul.f32 %v663_v55, %v657_v59  ;;  %v796_v54 = vld [vmem:[#allocation6 + $0x378] sm:$0xff]  ;;  %v802_v55 = vld [vmem:[#allocation6 + $0x3a8] sm:$0xff]  ;;  %v801_v59 = vld [vmem:[#allocation6 + $0x3a0] sm:$0xff] }
 0x1eb   : > { %v3182_v57 = vpack.c.bf16 %v802_v55, %v796_v54  ;;  %v713_v53 = vld [vmem:[#allocation6 + $0xe0] sm:$0xff]  ;;  %v719_v54 = vld [vmem:[#allocation6 + $0x110] sm:$0xff]  ;;  %v726_v55 = vld [vmem:[#allocation6 + $0x148] sm:$0xff] }
 0x1ec   : > { %v4567_v5 = vadd.f32 %v680_v58, %v671_v63  ;;  %v4569_v6 = vadd.f32 %v676_v60, %v670_v2  ;;  %v795_v58 = vld [vmem:[#allocation6 + $0x370] sm:$0xff]  ;;  %v808_v60 = vld [vmem:[#allocation6 + $0x3d8] sm:$0xff] }
 0x1ed   : > { %v3184_v62 = vpack.c.bf16 %v801_v59, %v795_v58  ;;  %v3186_v63 = vpack.c.bf16 %v814_v61, %v808_v60  ;;  %v807_v2 = vld [vmem:[#allocation6 + $0x3d0] sm:$0xff]  ;;  %v725_v59 = vld [vmem:[#allocation6 + $0x140] sm:$0xff]  ;;  %v738_v61 = vld [vmem:[#allocation6 + $0x1a8] sm:$0xff] }
 0x1ee   : > { %973 = vmatprep.mubr.f32.mxu1 %v4567_v5  ;;  %v731_v60 = vld [vmem:[#allocation6 + $0x170] sm:$0xff] }
 0x1ef   : > { %974 = vmatmul.mubr.f32.vlgmr.msra.gmra.mrb[0].mxu1 %v4569_v6 }
 0x1f0   : > { %3149 = vmatpush1.bf16.msra.mxu1 %v3148_v7  ;;  %1044 = vmatprep.mubr.f32.mxu1 %v4567_v5  ;;  %v826_v7 = vld [vmem:[#allocation6 + $0x468] sm:$0xff] }
 0x1f1   : > { %3151 = vmatprep.subr.bf16.mxu1 %v3150_v8  ;;  %v3188_v8 = vpack.c.bf16 %v813_v3, %v807_v2  ;;  %v3190_v11 = vpack.c.bf16 %v826_v7, %v820_v4  ;;  %v743_v3 = vld [vmem:[#allocation6 + $0x1d0] sm:$0xff]  ;;  %v750_v4 = vld [vmem:[#allocation6 + $0x208] sm:$0xff]  ;;  %v756_v7 = vld [vmem:[#allocation6 + $0x238] sm:$0xff] }
 0x1f4   : > { %3153 = vmatpush1.bf16.msra.mxu1 %v3152_v13  ;;  %v838_v13 = vld [vmem:[#allocation6 + $0x4c8] sm:$0xff] }
 0x1f5   : > { %3155 = vmatprep.subr.bf16.mxu1 %v3154_v14  ;;  %v3192_v14 = vpack.c.bf16 %v825_v12, %v819_v10  ;;  %v3194_v15 = vpack.c.bf16 %v838_v13, %v832_v9  ;;  %v749_v10 = vld [vmem:[#allocation6 + $0x200] sm:$0xff]  ;;  %v755_v12 = vld [vmem:[#allocation6 + $0x230] sm:$0xff]  ;;  %v762_v9 = vld [vmem:[#allocation6 + $0x268] sm:$0xff] }
 0x1f6   : > { %v768_v13 = vld [vmem:[#allocation6 + $0x298] sm:$0xff] }
 0x1f8   : > { %3157 = vmatpush1.bf16.msra.mxu1 %v3156_v19  ;;  %v850_v19 = vld [vmem:[#allocation6 + $0x528] sm:$0xff] }
 0x1f9   : > { %3159 = vmatprep.subr.bf16.mxu1 %v3158_v20  ;;  %v3196_v20 = vpack.c.bf16 %v837_v17, %v831_v16  ;;  %v3198_v21 = vpack.c.bf16 %v850_v19, %v844_v18  ;;  %v761_v16 = vld [vmem:[#allocation6 + $0x260] sm:$0xff]  ;;  %v767_v17 = vld [vmem:[#allocation6 + $0x290] sm:$0xff]  ;;  %v774_v18 = vld [vmem:[#allocation6 + $0x2c8] sm:$0xff] }
 0x1fa   : > { %v780_v19 = vld [vmem:[#allocation6 + $0x2f8] sm:$0xff] }
 0x1fc   : > { %3161 = vmatpush1.bf16.msra.mxu1 %v3160_v1  ;;  %v862_v1 = vld [vmem:[#allocation6 + $0x588] sm:$0xff] }
 0x1fd   : > { %3163 = vmatprep.subr.bf16.mxu1 %v3162_v24  ;;  %v3200_v24 = vpack.c.bf16 %v849_v22, %v843_v0  ;;  %v3202_v25 = vpack.c.bf16 %v862_v1, %v856_v23  ;;  %v773_v0 = vld [vmem:[#allocation6 + $0x2c0] sm:$0xff]  ;;  %v779_v22 = vld [vmem:[#allocation6 + $0x2f0] sm:$0xff]  ;;  %v786_v23 = vld [vmem:[#allocation6 + $0x328] sm:$0xff] }
 0x1fe   : > { %v792_v1 = vld [vmem:[#allocation6 + $0x358] sm:$0xff] }
 0x200   : > { %3165 = vmatpush1.bf16.msra.mxu1 %v3164_v29  ;;  %v874_v29 = vld [vmem:[#allocation6 + $0x5e8] sm:$0xff] }
 0x201   : > { %3167 = vmatprep.subr.bf16.mxu1 %v3166_v30  ;;  %v3204_v30 = vpack.c.bf16 %v861_v27, %v855_v26  ;;  %v3206_v31 = vpack.c.bf16 %v874_v29, %v868_v28  ;;  %v785_v26 = vld [vmem:[#allocation6 + $0x320] sm:$0xff]  ;;  %v791_v27 = vld [vmem:[#allocation6 + $0x350] sm:$0xff]  ;;  %v798_v28 = vld [vmem:[#allocation6 + $0x388] sm:$0xff] }
 0x202   : > { %v804_v29 = vld [vmem:[#allocation6 + $0x3b8] sm:$0xff] }
 0x204   : > { %3169 = vmatpush1.bf16.msra.mxu1 %v3168_v35  ;;  %v696_v35 = vld [vmem:[#allocation6 + $0x58] sm:$0xff] }
 0x205   : > { %3171 = vmatprep.subr.bf16.mxu1 %v3170_v36  ;;  %v3208_v36 = vpack.c.bf16 %v873_v33, %v867_v32  ;;  %v3210_v37 = vpack.c.bf16 %v696_v35, %v690_v34  ;;  %v797_v32 = vld [vmem:[#allocation6 + $0x380] sm:$0xff]  ;;  %v803_v33 = vld [vmem:[#allocation6 + $0x3b0] sm:$0xff]  ;;  %v810_v34 = vld [vmem:[#allocation6 + $0x3e8] sm:$0xff] }
 0x206   : > { %v816_v35 = vld [vmem:[#allocation6 + $0x418] sm:$0xff] }
 0x208   : > { %3173 = vmatpush1.bf16.msra.mxu1 %v3172_v41  ;;  %v708_v41 = vld [vmem:[#allocation6 + $0xb8] sm:$0xff] }
 0x209   : > { %3175 = vmatprep.subr.bf16.mxu1 %v3174_v42  ;;  %v3212_v42 = vpack.c.bf16 %v695_v39, %v689_v38  ;;  %v3214_v43 = vpack.c.bf16 %v708_v41, %v702_v40  ;;  %v809_v38 = vld [vmem:[#allocation6 + $0x3e0] sm:$0xff]  ;;  %v815_v39 = vld [vmem:[#allocation6 + $0x410] sm:$0xff]  ;;  %v822_v40 = vld [vmem:[#allocation6 + $0x448] sm:$0xff] }
 0x20a   : > { %v828_v41 = vld [vmem:[#allocation6 + $0x478] sm:$0xff] }
 0x20c   : > { %3177 = vmatpush1.bf16.msra.mxu1 %v3176_v47  ;;  %v720_v47 = vld [vmem:[#allocation6 + $0x118] sm:$0xff] }
 0x20d   : > { %3179 = vmatprep.subr.bf16.mxu1 %v3178_v48  ;;  %v3216_v48 = vpack.c.bf16 %v707_v45, %v701_v44  ;;  %v3218_v52 = vpack.c.bf16 %v720_v47, %v714_v46  ;;  %v821_v44 = vld [vmem:[#allocation6 + $0x440] sm:$0xff]  ;;  %v827_v45 = vld [vmem:[#allocation6 + $0x470] sm:$0xff]  ;;  %v834_v46 = vld [vmem:[#allocation6 + $0x4a8] sm:$0xff] }
 0x20e   : > { %v840_v47 = vld [vmem:[#allocation6 + $0x4d8] sm:$0xff] }
 0x210   : > { %3181 = vmatpush1.bf16.msra.mxu1 %v3180_v56  ;;  %v732_v56 = vld [vmem:[#allocation6 + $0x178] sm:$0xff] }
 0x211   : > { %3183 = vmatprep.subr.bf16.mxu1 %v3182_v57  ;;  %v3220_v57 = vpack.c.bf16 %v719_v54, %v713_v53  ;;  %v3222_v58 = vpack.c.bf16 %v732_v56, %v726_v55  ;;  %v833_v53 = vld [vmem:[#allocation6 + $0x4a0] sm:$0xff]  ;;  %v839_v54 = vld [vmem:[#allocation6 + $0x4d0] sm:$0xff]  ;;  %v846_v55 = vld [vmem:[#allocation6 + $0x508] sm:$0xff] }
 0x212   : > { %v852_v56 = vld [vmem:[#allocation6 + $0x538] sm:$0xff] }
 0x214   : > { %3185 = vmatpush1.bf16.msra.mxu1 %v3184_v62  ;;  %v744_v62 = vld [vmem:[#allocation6 + $0x1d8] sm:$0xff] }
 0x215   : > { %3187 = vmatprep.subr.bf16.mxu1 %v3186_v63  ;;  %v3224_v63 = vpack.c.bf16 %v731_v60, %v725_v59  ;;  %v3226_v2 = vpack.c.bf16 %v744_v62, %v738_v61  ;;  %v845_v59 = vld [vmem:[#allocation6 + $0x500] sm:$0xff]  ;;  %v851_v60 = vld [vmem:[#allocation6 + $0x530] sm:$0xff]  ;;  %v858_v61 = vld [vmem:[#allocation6 + $0x568] sm:$0xff] }
 0x216   : > { %v864_v62 = vld [vmem:[#allocation6 + $0x598] sm:$0xff] }
 0x218   : > { %3189 = vmatpush1.bf16.msra.mxu1 %v3188_v8 }
 0x219   : > { %3191 = vmatprep.subr.bf16.mxu1 %v3190_v11  ;;  %v3230_v11 = vpack.c.bf16 %v756_v7, %v750_v4  ;;  %v870_v4 = vld [vmem:[#allocation6 + $0x5c8] sm:$0xff]  ;;  %v876_v7 = vld [vmem:[#allocation6 + $0x5f8] sm:$0xff] }
 0x21c   : > { %3193 = vmatpush1.bf16.msra.mxu1 %v3192_v14  ;;  %v3232_v14 = vpack.c.bf16 %v755_v12, %v749_v10  ;;  %v869_v10 = vld [vmem:[#allocation6 + $0x5c0] sm:$0xff]  ;;  %v875_v12 = vld [vmem:[#allocation6 + $0x5f0] sm:$0xff] }
 0x21d   : > { %3195 = vmatprep.subr.bf16.mxu1 %v3194_v15  ;;  %v3234_v15 = vpack.c.bf16 %v768_v13, %v762_v9  ;;  %v3272_v9 = vpack.c.bf16 %v875_v12, %v869_v10  ;;  %v4213_v13 = vmov 0.0   ;;  %v1450_v10 = vld [vmem:[#allocation8 + $0x30] sm:$0xff]  ;;  %v1453_v12 = vld [vmem:[#allocation8 + $0x48] sm:$0xff] }
 0x21e   : > { %3062 = vmatprep.subr.mxu0 %v4213_v13  ;;  %3064 = vmatprep.mubr.msk.f32.mxu0 %vm4214_vm0, %v4213_v13 }
 0x220   : > { %3197 = vmatpush1.bf16.msra.mxu1 %v3196_v20  ;;  %v3236_v20 = vpack.c.bf16 %v767_v17, %v761_v16  ;;  %v877_v16 = vld [vmem:[%s4790_s7] sm:$0x3f]  ;;  %v4583_v17 = vsub.s32 2, %v4548_v49 }
 0x221   : > { %3199 = vmatprep.subr.bf16.mxu1 %v3198_v21  ;;  %v3238_v21 = vpack.c.bf16 %v780_v19, %v774_v18  ;;  %v4586_v18 = vsub.s32 3, %v4548_v49  ;;  %v886_v19 = vrot.slane %v877_v16, %v4551_v50 }
 0x224   : > { %3201 = vmatpush1.bf16.msra.mxu1 %v3200_v24  ;;  %v3240_v24 = vpack.c.bf16 %v779_v22, %v773_v0 }
 0x225   : > { %3203 = vmatprep.subr.bf16.mxu1 %v3202_v25  ;;  %v3242_v25 = vpack.c.bf16 %v792_v1, %v786_v23 }
 0x228   : > { %3205 = vmatpush1.bf16.msra.mxu1 %v3204_v30  ;;  %v3244_v30 = vpack.c.bf16 %v791_v27, %v785_v26 }
 0x229   : > { %3207 = vmatprep.subr.bf16.mxu1 %v3206_v31  ;;  %v3246_v31 = vpack.c.bf16 %v804_v29, %v798_v28  ;;  %v897_v28 = vsub.s32 4, %v4548_v49  ;;  %v901_v29 = vsub.s32 5, %v4548_v49 }
 0x22c   : > { %3209 = vmatpush1.bf16.msra.mxu1 %v3208_v36  ;;  %v3248_v36 = vpack.c.bf16 %v803_v33, %v797_v32 }
 0x22d   : > { %3211 = vmatprep.subr.bf16.mxu1 %v3210_v37  ;;  %v3250_v37 = vpack.c.bf16 %v816_v35, %v810_v34 }
 0x22f   : > { %1045 = vmatmul.mubr.f32.vlgmr.msra.gmra.mrb[2].mxu1 %v4569_v6 }
 0x230   : > { %3213 = vmatpush1.bf16.msra.mxu1 %v3212_v42  ;;  %1115 = vmatprep.mubr.f32.mxu1 %v4567_v5  ;;  %v737_v5 = vld [vmem:[#allocation6 + $0x1a0] sm:$0xff]  ;;  %v3252_v42 = vpack.c.bf16 %v815_v39, %v809_v38 }
 0x231   : > { %3215 = vmatprep.subr.bf16.mxu1 %v3214_v43  ;;  %v3228_v8 = vpack.c.bf16 %v743_v3, %v737_v5  ;;  %v3254_v43 = vpack.c.bf16 %v828_v41, %v822_v40  ;;  %v857_v5 = vld [vmem:[#allocation6 + $0x560] sm:$0xff]  ;;  %v863_v3 = vld [vmem:[#allocation6 + $0x590] sm:$0xff] }
 0x234   : > { %3217 = vmatpush1.bf16.msra.mxu1 %v3216_v48  ;;  %v3256_v48 = vpack.c.bf16 %v827_v45, %v821_v44 }
 0x235   : > { %3219 = vmatprep.subr.bf16.mxu1 %v3218_v52  ;;  %v3258_v52 = vpack.c.bf16 %v840_v47, %v834_v46 }
 0x238   : > { %3221 = vmatpush1.bf16.msra.mxu1 %v3220_v57  ;;  %v3260_v57 = vpack.c.bf16 %v839_v54, %v833_v53 }
 0x239   : > { %3223 = vmatprep.subr.bf16.mxu1 %v3222_v58  ;;  %v3262_v58 = vpack.c.bf16 %v852_v56, %v846_v55 }
 0x23c   : > { %3225 = vmatpush1.bf16.msra.mxu1 %v3224_v63  ;;  %v3264_v63 = vpack.c.bf16 %v851_v60, %v845_v59 }
 0x23d   : > { %3227 = vmatprep.subr.bf16.mxu1 %v3226_v2  ;;  %v3266_v2 = vpack.c.bf16 %v864_v62, %v858_v61  ;;  %v1444_v62 = vld [vmem:[#allocation8] sm:$0xff] }
 0x240   : > { %3229 = vmatpush1.bf16.msra.mxu1 %v3228_v8  ;;  %v3268_v8 = vpack.c.bf16 %v863_v3, %v857_v5  ;;  %v1451_v5 = vld [vmem:[#allocation8 + $0x38] sm:$0xff] }
 0x241   : > { %3231 = vmatprep.subr.bf16.mxu1 %v3230_v11  ;;  %v3270_v11 = vpack.c.bf16 %v876_v7, %v870_v4 }
 0x244   : > { %3233 = vmatpush1.bf16.msra.mxu1 %v3232_v14 }
 0x245   : > { %3235 = vmatprep.subr.bf16.mxu1 %v3234_v15 }
 0x248   : > { %3237 = vmatpush1.bf16.msra.mxu1 %v3236_v20  ;;  %v890_v20 = vrot.slane %v877_v16, %v4583_v17 }
 0x249   : > { %3239 = vmatprep.subr.bf16.mxu1 %v3238_v21  ;;  %v894_v21 = vrot.slane %v877_v16, %v4586_v18 }
 0x24c   : > { %3241 = vmatpush1.bf16.msra.mxu1 %v3240_v24 }
 0x24d   : > { %3243 = vmatprep.subr.bf16.mxu1 %v3242_v25 }
 0x250   : > { %3245 = vmatpush1.bf16.msra.mxu1 %v3244_v30  ;;  %v898_v30 = vrot.slane %v877_v16, %v897_v28  ;;  %v1460_v28 = vld [vmem:[#allocation8 + $0x80] sm:$0xff] }
 0x251   : > { %3247 = vmatprep.subr.bf16.mxu1 %v3246_v31  ;;  %v902_v31 = vrot.slane %v877_v16, %v901_v29  ;;  %v1462_v29 = vld [vmem:[#allocation8 + $0x90] sm:$0xff] }
 0x254   : > { %3249 = vmatpush1.bf16.msra.mxu1 %v3248_v36  ;;  %v3042_v36 = vld [vmem:[%s631_s15] ss:$0 sm:$0xff] }
 0x255   : > { %3251 = vmatprep.subr.bf16.mxu1 %v3250_v37 }
 0x258   : > { %3253 = vmatpush1.bf16.msra.mxu1 %v3252_v42 }
 0x259   : > { %3255 = vmatprep.subr.bf16.mxu1 %v3254_v43 }
 0x25c   : > { %3257 = vmatpush1.bf16.msra.mxu1 %v3256_v48 }
 0x25d   : > { %3259 = vmatprep.subr.bf16.mxu1 %v3258_v52 }
 0x260   : > { %3261 = vmatpush1.bf16.msra.mxu1 %v3260_v57  ;;  %v1445_v57 = vld [vmem:[#allocation8 + $0x8] sm:$0xff] }
 0x261   : > { %3263 = vmatprep.subr.bf16.mxu1 %v3262_v58  ;;  %v1447_v58 = vld [vmem:[#allocation8 + $0x18] sm:$0xff] }
 0x262   : > { %v3274_v59 = vpack.c.bf16 %v1447_v58, %v1445_v57  ;;  %v1483_v57 = vld [vmem:[#allocation8 + $0x138] sm:$0xff] }
 0x264   : > { %3265 = vmatpush1.bf16.msra.mxu1 %v3264_v63  ;;  %v1446_v63 = vld [vmem:[#allocation8 + $0x10] sm:$0xff] }
 0x265   : > { %3267 = vmatprep.subr.bf16.mxu1 %v3266_v2  ;;  %v1449_v2 = vld [vmem:[#allocation8 + $0x28] sm:$0xff]  ;;  %v3276_v4 = vpack.c.bf16 %v1446_v63, %v1444_v62  ;;  %v1487_v63 = vld [vmem:[#allocation8 + $0x158] sm:$0xff] }
 0x266   : > { %v1485_v62 = vld [vmem:[#allocation8 + $0x148] sm:$0xff] }
 0x268   : > { %3269 = vmatpush1.bf16.msra.mxu1 %v3268_v8  ;;  %v3278_v8 = vpack.c.bf16 %v1451_v5, %v1449_v2  ;;  %v3314_v5 = vpack.c.bf16 %v1487_v63, %v1485_v62  ;;  %v1652_v62 = vld [vmem:[#allocation9 + $0x18] sm:$0xff] }
 0x269   : > { %3271 = vmatprep.subr.bf16.mxu1 %v3270_v11  ;;  %v1448_v11 = vld [vmem:[#allocation8 + $0x20] sm:$0xff] }
 0x26c   : > { %3273 = vmatpush1.bf16.msra.mxu1 %v3272_v9  ;;  %v1455_v9 = vld [vmem:[#allocation8 + $0x58] sm:$0xff] }
 0x26d   : > { %3072 = vmatprep.subr.mxu1 %v4213_v13 }
 0x26f   : > { %1116 = vmatmul.mubr.f32.vlgmr.msra.gmra.mrb[4].mxu1 %v4569_v6  ;;  %v882_v6 = vrot.slane %v877_v16, %v4554_v51  ;;  %v3282_v16 = vpack.c.bf16 %v1455_v9, %v1453_v12  ;;  %v1488_v12 = vld [vmem:[#allocation8 + $0x160] sm:$0xff]  ;;  %v1490_v9 = vld [vmem:[#allocation8 + $0x170] sm:$0xff] }
 0x270   : > { %3074 = vmatprep.mubr.msk.f32.mxu1 %vm4214_vm0, %v4213_v13 }
 0x2c2   : > { %v975_v14 = vpop.f32.mrb[0].mxu1 }
 0x2c3   : > { %v977_v15 = vpop.f32.mrb[1].mxu1  ;;  %v976_v0 = vadd.f32 %v975_v14, %v882_v6  ;;  %v3280_v14 = vpack.c.bf16 %v1450_v10, %v1448_v11  ;;  %v1452_v6 = vld [vmem:[#allocation8 + $0x40] sm:$0xff] }
 0x2c4   : > { %v978_v23 = vadd.f32 %v977_v15, %v886_v19  ;;  %v1454_v19 = vld [vmem:[#allocation8 + $0x50] sm:$0xff] }
 0x2c5   : > { %v1122_v26 = vmul.f32 0.088388346, %v976_v0  ;;  %v3284_v0 = vpack.c.bf16 %v1454_v19, %v1452_v6  ;;  %v1492_v6 = vld [vmem:[#allocation8 + $0x180] sm:$0xff]  ;;  %v1494_v19 = vld [vmem:[#allocation8 + $0x190] sm:$0xff] }
 0x2c6   : > { %v1123_v27 = vmul.f32 0.088388346, %v978_v23  ;;  %v1456_v23 = vld [vmem:[#allocation8 + $0x60] sm:$0xff] }
 0x302   : > { %v1046_v22 = vpop.f32.mrb[2].mxu1 }
 0x303   : > { %v1047_v1 = vadd.f32 %v1046_v22, %v890_v20  ;;  %v1048_v24 = vpop.f32.mrb[3].mxu1  ;;  %v1457_v20 = vld [vmem:[#allocation8 + $0x68] sm:$0xff] }
 0x304   : > { %v1049_v25 = vadd.f32 %v1048_v24, %v894_v21  ;;  %v1459_v21 = vld [vmem:[#allocation8 + $0x78] sm:$0xff]  ;;  %v1461_v24 = vld [vmem:[#allocation8 + $0x88] sm:$0xff] }
 0x305   : > { %3063 = vmatpush3.xpose.msra.mxu0 %v1047_v1  ;;  %v3286_v22 = vpack.c.bf16 %v1459_v21, %v1457_v20  ;;  %v1458_v1 = vld [vmem:[#allocation8 + $0x70] sm:$0xff]  ;;  %v1497_v20 = vld [vmem:[#allocation8 + $0x1a8] sm:$0xff]  ;;  %v1499_v21 = vld [vmem:[#allocation8 + $0x1b8] sm:$0xff] }
 0x306   : > { %3073 = vmatpush3.xpose.msra.mxu1 %v1049_v25  ;;  %3067 = vmatprep.subr.mxu0 %v4213_v13  ;;  %v1463_v25 = vld [vmem:[#allocation8 + $0x98] sm:$0xff] }
 0x307   : > { %3077 = vmatprep.subr.mxu1 %v4213_v13 }
 0x308   : > { %3065 = vmatmul.mubr.f32.vlgmr.msra.gmra.mrb[0].mxu0 %v1122_v26  ;;  %v3288_v26 = vpack.c.bf16 %v1458_v1, %v1456_v23  ;;  %v1496_v23 = vld [vmem:[#allocation8 + $0x1a0] sm:$0xff]  ;;  %v1498_v1 = vld [vmem:[#allocation8 + $0x1b0] sm:$0xff] }
 0x309   : > { %3075 = vmatmul.mubr.f32.vlgmr.msra.gmra.mrb[6].mxu1 %v1123_v27  ;;  %3069 = vmatprep.mubr.msk.f32.mxu0 %vm4214_vm0, %v4213_v13  ;;  %v3290_v27 = vpack.c.bf16 %v1463_v25, %v1461_v24  ;;  %v1501_v24 = vld [vmem:[#allocation8 + $0x1c8] sm:$0xff]  ;;  %v1503_v25 = vld [vmem:[#allocation8 + $0x1d8] sm:$0xff] }
 0x30a   : > { %3079 = vmatprep.mubr.msk.f32.mxu1 %vm4214_vm0, %v4213_v13 }
 0x342   : > { %v1117_v32 = vpop.f32.mrb[4].mxu1 }
 0x343   : > { %v1118_v33 = vadd.f32 %v1117_v32, %v898_v30  ;;  %v1119_v34 = vpop.f32.mrb[5].mxu1  ;;  %v1465_v30 = vld [vmem:[#allocation8 + $0xa8] sm:$0xff]  ;;  %v3292_v32 = vpack.c.bf16 %v1462_v29, %v1460_v28  ;;  %v1500_v28 = vld [vmem:[#allocation8 + $0x1c0] sm:$0xff]  ;;  %v1502_v29 = vld [vmem:[#allocation8 + $0x1d0] sm:$0xff] }
 0x344   : > { %v1120_v35 = vadd.f32 %v1119_v34, %v902_v31  ;;  %v1467_v31 = vld [vmem:[#allocation8 + $0xb8] sm:$0xff]  ;;  %v1464_v34 = vld [vmem:[#allocation8 + $0xa0] sm:$0xff] }
 0x345   : > { %3068 = vmatpush3.msra.mxu0 %v1118_v33  ;;  %v3294_v33 = vpack.c.bf16 %v1467_v31, %v1465_v30  ;;  %v3332_v30 = vpack.c.bf16 %v1502_v29, %v1500_v28  ;;  %v1505_v31 = vld [vmem:[#allocation8 + $0x1e8] sm:$0xff]  ;;  %v1669_v29 = vld [vmem:[#allocation9 + $0x140] sm:$0xff] }
 0x346   : > { %3078 = vmatpush3.msra.mxu1 %v1120_v35  ;;  %v1466_v35 = vld [vmem:[#allocation8 + $0xb0] sm:$0xff] }
 0x347   : > { %3275 = vmatprep.subr.bf16.mxu1 %v3274_v59 }
 0x3db   : > { %v1197_v37 = vpop.f32.mrb[0].mxu0 }
 0x3dc   : > { %v3066_v38 = vpop.f32.mrb[1].mxu0  ;;  %v1353_v49 = vpop.f32.mrb[6].mxu1  ;;  %v1198_v41 = vadd.f32 %v3042_v36, %v1197_v37  ;;  %v1471_v37 = vld [vmem:[#allocation8 + $0xd8] sm:$0xff] }
 0x3dd   : > { %v1354_v39 = vadd.f32 %v3042_v36, %v1353_v49  ;;  %v3076_v40 = vpop.f32.mrb[7].mxu1  ;;  %v1469_v36 = vld [vmem:[#allocation8 + $0xc8] sm:$0xff]  ;;  %v3296_v38 = vpack.c.bf16 %v1466_v35, %v1464_v34  ;;  %v1504_v34 = vld [vmem:[#allocation8 + $0x1e0] sm:$0xff]  ;;  %v1506_v35 = vld [vmem:[#allocation8 + $0x1f0] sm:$0xff] }
 0x3de   : > { %v1202_v43 = vsel %vm1201_vm1, %v1198_v41, -inf  ;;  %v3298_v49 = vpack.c.bf16 %v1471_v37, %v1469_v36  ;;  %v1470_v40 = vld [vmem:[#allocation8 + $0xd0] sm:$0xff]  ;;  %v3336_v36 = vpack.c.bf16 %v1506_v35, %v1504_v34  ;;  %v4215_v37 = vmov 0   ;;  %v1678_v34 = vld [vmem:[#allocation9 + $0x1c8] sm:$0xff]  ;;  %v1676_v35 = vld [vmem:[#allocation9 + $0x198] sm:$0xff] }
 0x3df   : > { %v1357_v42 = vsel %vm1201_vm1, %v1354_v39, -inf  ;;  %3952 = vset.pattern.permute.xlu0 %v4215_v37  ;;  %3953 = vset.pattern.permute.xlu1 %v4215_v37 }
 0x3e0   : > { %1358 = vmax.xlane.f32.xlu1 %v1357_v42  ;;  %v1475_v42 = vld [vmem:[#allocation8 + $0xf8] sm:$0xff] }
 0x3e4   : > { %1203 = vmax.xlane.f32.xlu1 %v1202_v43 }
 0x46d   : > { %v1359_v44 = vpop.xlane.xlu1 %1358 }
 0x46e   : > { %v1360_v45 = vsub.f32 %v1354_v39, %v1359_v44  ;;  %v1468_v39 = vld [vmem:[#allocation8 + $0xc0] sm:$0xff] }
 0x46f   : > { %v3300_v43 = vpack.c.bf16 %v1470_v40, %v1468_v39 }
 0x470   : > { %v1361_v46 = vmul.f32 1.442695, %v1360_v45  ;;  %v1472_v45 = vld [vmem:[#allocation8 + $0xe0] sm:$0xff] }
 0x471   : > { %v1204_v47 = vpop.xlane.xlu1 %1203 }
 0x472   : > { %3956 = vpow2.f32 %v1361_v46  ;;  %v1205_v48 = vsub.f32 %v1198_v41, %v1204_v47  ;;  %v1473_v41 = vld [vmem:[#allocation8 + $0xe8] sm:$0xff]  ;;  %v1474_v46 = vld [vmem:[#allocation8 + $0xf0] sm:$0xff] }
 0x473   : > { %v3302_v44 = vpack.c.bf16 %v1475_v42, %v1473_v41  ;;  %v1477_v47 = vld [vmem:[#allocation8 + $0x108] sm:$0xff]  ;;  %v1508_v42 = vld [vmem:[%s4833_s13] sm:$0x3] }
 0x474   : > { %v1206_v52 = vmul.f32 1.442695, %v1205_v48  ;;  %v1479_v48 = vld [vmem:[#allocation8 + $0x118] sm:$0xff] }
 0x476   : > { %3958 = vpow2.f32 %v1206_v52  ;;  %v3304_v52 = vpack.c.bf16 %v1474_v46, %v1472_v45 }
 0x47c   : > { %v3957_v53 = vpop.eup %3956 }
 0x47d   : > { %v1363_v54 = vsel %vm1201_vm1, %v3957_v53, 0.0 }
 0x47e   : > { %1364 = vadd.xlane.f32.xlu0 %v1363_v54  ;;  %v1476_v54 = vld [vmem:[#allocation8 + $0x100] sm:$0xff] }
 0x480   : > { %v3959_v55 = vpop.eup %3958 }
 0x481   : > { %v1208_v56 = vsel %vm1201_vm1, %v3959_v55, 0.0 }
 0x482   : > { %1209 = vadd.xlane.f32.xlu1 %v1208_v56  ;;  %v1481_v56 = vld [vmem:[#allocation8 + $0x128] sm:$0xff] }
 0x483   : > { %v3310_v59 = vpack.c.bf16 %v1483_v57, %v1481_v56  ;;  %v3983_v57 = vld [vmem:[%s4520_s18 + $0x8] sm:$0xff] }
 0x50b   : > { %v1365_v60 = vpop.xlane.xlu0 %1364 }
 0x50c   : > { %3960 = vrcp.f32 %v1365_v60  ;;  %v1480_v60 = vld [vmem:[#allocation8 + $0x120] sm:$0xff] }
 0x50f   : > { %v1210_v61 = vpop.xlane.xlu1 %1209 }
 0x510   : > { %3962 = vrcp.f32 %v1210_v61  ;;  %v1482_v61 = vld [vmem:[#allocation8 + $0x130] sm:$0xff] }
 0x511   : > { %v3312_v2 = vpack.c.bf16 %v1482_v61, %v1480_v60  ;;  %v1650_v60 = vld [vmem:[#allocation9 + $0x8] sm:$0xff] }
 0x512   : > { %v1654_v61 = vld [vmem:[#allocation9 + $0x48] sm:$0xff] }
 0x513   : > { %v3338_v63 = vpack.c.bf16 %v1654_v61, %v1650_v60  ;;  %v1690_v60 = vld [vmem:[#allocation9 + $0x288] sm:$0xff] }
 0x514   : > { %v1694_v61 = vld [vmem:[#allocation9 + $0x2c8] sm:$0xff] }
 0x515   : > { %3339 = vmatprep.subr.bf16.mxu0 %v3338_v63  ;;  %v1696_v63 = vld [vmem:[#allocation9 + $0x2d8] sm:$0xff] }
 0x516   : > { %v3961_v3 = vpop.eup %3960 }
 0x517   : > { %v1367_v7 = vmul.f32 %v3961_v3, %v3957_v53  ;;  %v3306_v53 = vpack.c.bf16 %v1479_v48, %v1477_v47  ;;  %v1484_v3 = vld [vmem:[#allocation8 + $0x140] sm:$0xff] }
 0x519   : > { %3080 = vmatmul.mubr.msk.f32.vlgmr.msra.gmra.mrb[8].mxu1 %vm1201_vm1, %v1367_v7  ;;  %v1489_v7 = vld [vmem:[#allocation8 + $0x168] sm:$0xff] }
 0x51a   : > { %v3963_v13 = vpop.eup %3962  ;;  %3277 = vmatpush1.bf16.msra.mxu1 %v3276_v4  ;;  %v1486_v4 = vld [vmem:[#allocation8 + $0x150] sm:$0xff] }
 0x51b   : > { %v1212_v15 = vmul.f32 %v3963_v13, %v3959_v55  ;;  %3279 = vmatprep.subr.bf16.mxu1 %v3278_v8  ;;  %v1478_v55 = vld [vmem:[#allocation8 + $0x110] sm:$0xff]  ;;  %v1491_v8 = vld [vmem:[#allocation8 + $0x178] sm:$0xff]  ;;  %v3316_v11 = vpack.c.bf16 %v1486_v4, %v1484_v3  ;;  %v1493_v13 = vld [vmem:[#allocation8 + $0x188] sm:$0xff] }
 0x51c   : > { %v3308_v58 = vpack.c.bf16 %v1478_v55, %v1476_v54  ;;  %v3318_v10 = vpack.c.bf16 %v1491_v8, %v1489_v7  ;;  %v3982_v55 = vld [vmem:[%s4520_s18] sm:$0xff] }
 0x51d   : > { %3070 = vmatmul.mubr.msk.f32.vlgmr.msra.gmra.mrb[2].mxu0 %vm1201_vm1, %v1212_v15  ;;  %v3320_v15 = vpack.c.bf16 %v1490_v9, %v1488_v12  ;;  %v1653_v3 = vld [vmem:[#allocation9 + $0x40] sm:$0xff]  ;;  %v1651_v8 = vld [vmem:[#allocation9 + $0x10] sm:$0xff]  ;;  %v1662_v9 = vld [vmem:[#allocation9 + $0xc8] sm:$0xff] }
 0x51e   : > { %3281 = vmatpush1.bf16.msra.mxu1 %v3280_v14  ;;  %v1495_v14 = vld [vmem:[#allocation8 + $0x198] sm:$0xff] }
 0x51f   : > { %3283 = vmatprep.subr.bf16.mxu1 %v3282_v16  ;;  %v3322_v16 = vpack.c.bf16 %v1495_v14, %v1493_v13  ;;  %v1660_v13 = vld [vmem:[#allocation9 + $0x98] sm:$0xff] }
 0x520   : > { %v1664_v14 = vld [vmem:[#allocation9 + $0xd8] sm:$0xff] }
 0x522   : > { %3285 = vmatpush1.bf16.msra.mxu1 %v3284_v0  ;;  %v3324_v0 = vpack.c.bf16 %v1494_v19, %v1492_v6  ;;  %v1657_v6 = vld [vmem:[#allocation9 + $0x80] sm:$0xff] }
 0x523   : > { %3287 = vmatprep.subr.bf16.mxu1 %v3286_v22  ;;  %v3326_v22 = vpack.c.bf16 %v1499_v21, %v1497_v20  ;;  %v1661_v19 = vld [vmem:[#allocation9 + $0xc0] sm:$0xff]  ;;  %v1659_v20 = vld [vmem:[#allocation9 + $0x90] sm:$0xff] }
 0x524   : > { %v3344_v21 = vpack.c.bf16 %v1661_v19, %v1657_v6  ;;  %v1697_v19 = vld [vmem:[#allocation9 + $0x300] sm:$0xff] }
 0x526   : > { %3289 = vmatpush1.bf16.msra.mxu1 %v3288_v26  ;;  %v3328_v26 = vpack.c.bf16 %v1498_v1, %v1496_v23  ;;  %v1670_v23 = vld [vmem:[#allocation9 + $0x148] sm:$0xff] }
 0x527   : > { %3291 = vmatprep.subr.bf16.mxu1 %v3290_v27  ;;  %v3330_v27 = vpack.c.bf16 %v1503_v25, %v1501_v24  ;;  %v1668_v25 = vld [vmem:[#allocation9 + $0x118] sm:$0xff] }
 0x52a   : > { %3293 = vmatpush1.bf16.msra.mxu1 %v3292_v32  ;;  %v1507_v32 = vld [vmem:[#allocation8 + $0x1f8] sm:$0xff] }
 0x52b   : > { %3295 = vmatprep.subr.bf16.mxu1 %v3294_v33  ;;  %v3334_v33 = vpack.c.bf16 %v1507_v32, %v1505_v31  ;;  %v1671_v31 = vld [vmem:[#allocation9 + $0x150] sm:$0xff] }
 0x52e   : > { %3297 = vmatpush1.bf16.msra.mxu1 %v3296_v38  ;;  %v3045_v38 = vld [vmem:[%s634_s28] ss:$0 sm:$0xff]  ;;  %s628_s28 = scalar_lea.vmem [#allocation12], %s3036_s26 }
 0x52f   : > { %3299 = vmatprep.subr.bf16.mxu1 %v3298_v49  ;;  %1598 = vperm.xlu0 %3952, %v3045_v38   ;;  %v1680_v38 = vld [vmem:[#allocation9 + $0x1d8] sm:$0xff]  ;;  %s2890_s11 = sshll.u32 %s628_s28, 4  ;;  %s4741_s11 = int_to_ptr.vmem [resolvable:$true] %s2890_s11 }
 0x530   : > { %s4126_s26 = scalar_lea.vmem %s4741_s11, 256 }
 0x531   : > { %p4127_p0 = scmp.ne.s32.totalorder %s4741_s11, %s4126_s26 }
 0x532   : > { %3301 = vmatpush1.bf16.msra.mxu1 %v3300_v43  ;;  %v1513_v43 = vrot.slane %v1508_v42, %v4554_v51 }
 0x533   : > { %3303 = vmatprep.subr.bf16.mxu1 %v3302_v44  ;;  %v1517_v44 = vrot.slane %v1508_v42, %v4551_v50  ;;  %v1679_v42 = vld [vmem:[#allocation9 + $0x1d0] sm:$0xff]  ;;  %p4128_p5 = pnand %p4127_p0, %p4840_p2 }
 0x535   : > { %p4129_p10 = pneg %p4128_p5 }
 0x536   : > { %3305 = vmatpush1.bf16.msra.mxu1 %v3304_v52 }
 0x537   : > { %3307 = vmatprep.subr.bf16.mxu1 %v3306_v53 }
 0x53a   : > { %3309 = vmatpush1.bf16.msra.mxu1 %v3308_v58 }
 0x53b   : > { %3311 = vmatprep.subr.bf16.mxu1 %v3310_v59 }
 0x53e   : > { %3313 = vmatpush1.bf16.msra.mxu1 %v3312_v2  ;;  %v1656_v2 = vld [vmem:[#allocation9 + $0x58] sm:$0xff] }
 0x53f   : > { %3315 = vmatprep.subr.bf16.mxu1 %v3314_v5  ;;  %v1649_v5 = vld [vmem:[#allocation9] sm:$0xff]  ;;  %v3402_v4 = vpack.c.bf16 %v1656_v2, %v1652_v62  ;;  %v1692_v62 = vld [vmem:[#allocation9 + $0x298] sm:$0xff] }
 0x540   : > { %v3340_v7 = vpack.c.bf16 %v1653_v3, %v1649_v5  ;;  %v3358_v3 = vpack.c.bf16 %v1694_v61, %v1690_v60  ;;  %v1727_v61 = vld [vmem:[#allocation9 + $0x4d0] sm:$0xff] }
 0x542   : > { %3317 = vmatpush1.bf16.msra.mxu1 %v3316_v11  ;;  %v1655_v11 = vld [vmem:[#allocation9 + $0x50] sm:$0xff]  ;;  %3341 = vmatpush1.bf16.msra.mxu0 %v3340_v7  ;;  %v1693_v7 = vld [vmem:[#allocation9 + $0x2c0] sm:$0xff] }
 0x543   : > { %3319 = vmatprep.subr.bf16.mxu1 %v3318_v10  ;;  %v1658_v10 = vld [vmem:[#allocation9 + $0x88] sm:$0xff]  ;;  %v3404_v12 = vpack.c.bf16 %v1655_v11, %v1651_v8  ;;  %v1691_v8 = vld [vmem:[#allocation9 + $0x290] sm:$0xff]  ;;  %v3422_v11 = vpack.c.bf16 %v1696_v63, %v1692_v62 }
 0x544   : > { %v1730_v62 = vld [vmem:[#allocation9 + $0x508] sm:$0xff] }
 0x545   : > { %v1734_v63 = vld [vmem:[#allocation9 + $0x548] sm:$0xff] }
 0x546   : > { %3321 = vmatpush1.bf16.msra.mxu1 %v3320_v15  ;;  %v3342_v15 = vpack.c.bf16 %v1662_v9, %v1658_v10  ;;  %v1695_v10 = vld [vmem:[#allocation9 + $0x2d0] sm:$0xff]  ;;  %v1702_v9 = vld [vmem:[#allocation9 + $0x348] sm:$0xff] }
 0x547   : > { %3323 = vmatprep.subr.bf16.mxu1 %v3322_v16  ;;  %v3406_v16 = vpack.c.bf16 %v1664_v14, %v1660_v13  ;;  %v1700_v13 = vld [vmem:[#allocation9 + $0x318] sm:$0xff] }
 0x548   : > { %3343 = vmatprep.subr.bf16.mxu0 %v3342_v15  ;;  %v1704_v14 = vld [vmem:[#allocation9 + $0x358] sm:$0xff] }
 0x549   : > { %3345 = vmatpush1.bf16.msra.mxu0 %v3344_v21  ;;  %v1699_v21 = vld [vmem:[#allocation9 + $0x310] sm:$0xff] }
 0x54a   : > { %3325 = vmatpush1.bf16.msra.mxu1 %v3324_v0  ;;  %v1663_v0 = vld [vmem:[#allocation9 + $0xd0] sm:$0xff] }
 0x54b   : > { %3327 = vmatprep.subr.bf16.mxu1 %v3326_v22  ;;  %v1666_v22 = vld [vmem:[#allocation9 + $0x108] sm:$0xff]  ;;  %v3408_v1 = vpack.c.bf16 %v1663_v0, %v1659_v20  ;;  %v1701_v20 = vld [vmem:[#allocation9 + $0x340] sm:$0xff]  ;;  %v3426_v0 = vpack.c.bf16 %v1704_v14, %v1700_v13 }
 0x54c   : > { %v3346_v24 = vpack.c.bf16 %v1670_v23, %v1666_v22  ;;  %v1703_v22 = vld [vmem:[#allocation9 + $0x350] sm:$0xff]  ;;  %v1706_v23 = vld [vmem:[#allocation9 + $0x388] sm:$0xff] }
 0x54e   : > { %3329 = vmatpush1.bf16.msra.mxu1 %v3328_v26  ;;  %v1672_v26 = vld [vmem:[#allocation9 + $0x158] sm:$0xff]  ;;  %3347 = vmatprep.subr.bf16.mxu0 %v3346_v24 }
 0x54f   : > { %3331 = vmatprep.subr.bf16.mxu1 %v3330_v27  ;;  %v1665_v27 = vld [vmem:[#allocation9 + $0x100] sm:$0xff]  ;;  %v3410_v28 = vpack.c.bf16 %v1672_v26, %v1668_v25  ;;  %v1708_v24 = vld [vmem:[#allocation9 + $0x398] sm:$0xff]  ;;  %v3364_v26 = vpack.c.bf16 %v1701_v20, %v1697_v19 }
 0x550   : > { %v3348_v32 = vpack.c.bf16 %v1669_v29, %v1665_v27  ;;  %v1712_v25 = vld [vmem:[#allocation9 + $0x3d8] sm:$0xff]  ;;  %v3428_v27 = vpack.c.bf16 %v1703_v22, %v1699_v21  ;;  %v1705_v29 = vld [vmem:[#allocation9 + $0x380] sm:$0xff]  ;;  %v1738_v22 = vld [vmem:[#allocation9 + $0x588] sm:$0xff] }
 0x552   : > { %3333 = vmatpush1.bf16.msra.mxu1 %v3332_v30  ;;  %v1667_v30 = vld [vmem:[#allocation9 + $0x110] sm:$0xff]  ;;  %3349 = vmatpush1.bf16.msra.mxu0 %v3348_v32  ;;  %v3430_v32 = vpack.c.bf16 %v1712_v25, %v1708_v24  ;;  %v1744_v25 = vld [vmem:[#allocation9 + $0x5d8] sm:$0xff] }
 0x553   : > { %3335 = vmatprep.subr.bf16.mxu1 %v3334_v33  ;;  %v1674_v33 = vld [vmem:[#allocation9 + $0x188] sm:$0xff] }
 0x554   : > { %v3350_v37 = vpack.c.bf16 %v1678_v34, %v1674_v33  ;;  %v1711_v33 = vld [vmem:[#allocation9 + $0x3d0] sm:$0xff]  ;;  %v1714_v34 = vld [vmem:[#allocation9 + $0x408] sm:$0xff] }
 0x556   : > { %3337 = vmatpush1.bf16.msra.mxu1 %v3336_v36  ;;  %v3412_v36 = vpack.c.bf16 %v1671_v31, %v1667_v30  ;;  %3351 = vmatprep.subr.bf16.mxu0 %v3350_v37  ;;  %v1709_v30 = vld [vmem:[#allocation9 + $0x3c0] sm:$0xff]  ;;  %v1707_v31 = vld [vmem:[#allocation9 + $0x390] sm:$0xff]  ;;  %v1720_v37 = vld [vmem:[#allocation9 + $0x458] sm:$0xff] }
 0x557   : > { %3403 = vmatprep.subr.bf16.mxu1 %v3402_v4  ;;  %v1689_v4 = vld [vmem:[#allocation9 + $0x280] sm:$0xff] }
 0x558   : > { %v3360_v15 = vpack.c.bf16 %v1693_v7, %v1689_v4  ;;  %v3378_v7 = vpack.c.bf16 %v1734_v63, %v1730_v62 }
 0x5ae   : > { %v1599_v46 = vpop.permute.xlu0 %1598 }
 0x5ec   : > { %v1437_v49 = vpop.f32.mrb[8].mxu1 }
 0x5ed   : > { %v3081_v39 = vpop.f32.mrb[9].mxu1  ;;  %1584 = vmatprep.mubr.f32.mxu1 %v1437_v49  ;;  %v1673_v49 = vld [vmem:[#allocation9 + $0x180] sm:$0xff] }
 0x5ee   : > { %v1677_v39 = vld [vmem:[#allocation9 + $0x1c0] sm:$0xff] }
 0x5f0   : > { %v1282_v40 = vpop.f32.mrb[2].mxu0 }
 0x5f1   : > { %v3071_v41 = vpop.f32.mrb[3].mxu0  ;;  %1585 = vmatmul.mubr.f32.vlgmr.msra.gmra.mrb[10].mxu1 %v1282_v40  ;;  %v3414_v40 = vpack.c.bf16 %v1680_v38, %v1676_v35  ;;  %v1718_v35 = vld [vmem:[#allocation9 + $0x448] sm:$0xff]  ;;  %v3368_v38 = vpack.c.bf16 %v1709_v30, %v1705_v29  ;;  %v1739_v30 = vld [vmem:[#allocation9 + $0x590] sm:$0xff] }
 0x5f2   : > { %3405 = vmatpush1.bf16.msra.mxu1 %v3404_v12  ;;  %v1675_v41 = vld [vmem:[#allocation9 + $0x190] sm:$0xff]  ;;  %v1698_v12 = vld [vmem:[#allocation9 + $0x308] sm:$0xff] }
 0x5f3   : > { %3407 = vmatprep.subr.bf16.mxu1 %v3406_v16  ;;  %v3424_v16 = vpack.c.bf16 %v1695_v10, %v1691_v8  ;;  %v3362_v6 = vpack.c.bf16 %v1702_v9, %v1698_v12  ;;  %v1729_v8 = vld [vmem:[#allocation9 + $0x500] sm:$0xff]  ;;  %v1731_v12 = vld [vmem:[#allocation9 + $0x510] sm:$0xff] }
 0x5f4   : > { %v1735_v9 = vld [vmem:[#allocation9 + $0x550] sm:$0xff] }
 0x5f5   : > { %v3444_v14 = vpack.c.bf16 %v1735_v9, %v1731_v12  ;;  %v1770_v12 = vld [vmem:[#allocation9 + $0x788] sm:$0xff] }
 0x5f6   : > { %3409 = vmatpush1.bf16.msra.mxu1 %v3408_v1  ;;  %v1710_v1 = vld [vmem:[#allocation9 + $0x3c8] sm:$0xff] }
 0x5f7   : > { %3411 = vmatprep.subr.bf16.mxu1 %v3410_v28  ;;  %v3366_v28 = vpack.c.bf16 %v1710_v1, %v1706_v23  ;;  %v1742_v23 = vld [vmem:[#allocation9 + $0x5c8] sm:$0xff]  ;;  %v1740_v1 = vld [vmem:[#allocation9 + $0x598] sm:$0xff] }
 0x5f8   : > { %v3382_v24 = vpack.c.bf16 %v1742_v23, %v1738_v22  ;;  %v1774_v9 = vld [vmem:[#allocation9 + $0x7c8] sm:$0xff]  ;;  %v1771_v22 = vld [vmem:[#allocation9 + $0x790] sm:$0xff] }
 0x5f9   : > { %v1775_v23 = vld [vmem:[#allocation9 + $0x7d0] sm:$0xff] }
 0x5fa   : > { %3413 = vmatpush1.bf16.msra.mxu1 %v3412_v36  ;;  %v1716_v36 = vld [vmem:[#allocation9 + $0x418] sm:$0xff] }
 0x5fb   : > { %3415 = vmatprep.subr.bf16.mxu1 %v3414_v40  ;;  %v1713_v40 = vld [vmem:[#allocation9 + $0x400] sm:$0xff] }
 0x6c4   : > { %v1586_v45 = vpop.f32.mrb[10].mxu1 }
 0x6c5   : > { %v1587_v47 = vadd.f32 %v1586_v45, %v1513_v43  ;;  %v1588_v48 = vpop.f32.mrb[11].mxu1  ;;  %v1682_v43 = vld [vmem:[#allocation9 + $0x208] sm:$0xff]  ;;  %v1684_v45 = vld [vmem:[#allocation9 + $0x218] sm:$0xff] }
 0x6c6   : > { %v1589_v52 = vadd.f32 %v1588_v48, %v1517_v44  ;;  %v1686_v44 = vld [vmem:[#allocation9 + $0x248] sm:$0xff]  ;;  %v3416_v48 = vpack.c.bf16 %v1679_v42, %v1675_v41  ;;  %v1717_v41 = vld [vmem:[#allocation9 + $0x440] sm:$0xff]  ;;  %v1715_v42 = vld [vmem:[#allocation9 + $0x410] sm:$0xff] }
 0x6c7   : > { %v1601_v53 = vmul.f32 %v1599_v46, %v1587_v47  ;;  %v3352_v47 = vpack.c.bf16 %v1677_v39, %v1673_v49  ;;  %v3432_v49 = vpack.c.bf16 %v1711_v33, %v1707_v31  ;;  %v3370_v39 = vpack.c.bf16 %v1718_v35, %v1714_v34  ;;  %v1743_v31 = vld [vmem:[#allocation9 + $0x5d0] sm:$0xff]  ;;  %v1746_v33 = vld [vmem:[#allocation9 + $0x608] sm:$0xff]  ;;  %v1748_v35 = vld [vmem:[#allocation9 + $0x618] sm:$0xff] }
 0x6c8   : > { %v1602_v54 = vmul.f32 %v1599_v46, %v1589_v52  ;;  %v1688_v46 = vld [vmem:[#allocation9 + $0x258] sm:$0xff]  ;;  %v3354_v52 = vpack.c.bf16 %v1686_v44, %v1682_v43  ;;  %3417 = vmatpush1.bf16.msra.mxu1 %v3416_v48  ;;  %v3434_v43 = vpack.c.bf16 %v1720_v37, %v1716_v36  ;;  %v1719_v44 = vld [vmem:[#allocation9 + $0x450] sm:$0xff]  ;;  %v1750_v34 = vld [vmem:[#allocation9 + $0x648] sm:$0xff] }
 0x6c9   : > { %v4620_v56 = vadd.f32 %v3982_v55, %v1601_v53  ;;  %v1681_v53 = vld [vmem:[#allocation9 + $0x200] sm:$0xff]  ;;  %v1683_v55 = vld [vmem:[#allocation9 + $0x210] sm:$0xff]  ;;  %3353 = vmatpush1.bf16.msra.mxu0 %v3352_v47  ;;  %v1724_v47 = vld [vmem:[#allocation9 + $0x498] sm:$0xff]  ;;  %v3386_v36 = vpack.c.bf16 %v1750_v34, %v1746_v33 }
 0x6ca   : > { %v4623_v58 = vadd.f32 %v3983_v57, %v1602_v54  ;;  %v1685_v54 = vld [vmem:[#allocation9 + $0x240] sm:$0xff]  ;;  %v3418_v57 = vpack.c.bf16 %v1688_v46, %v1684_v45  ;;  %3355 = vmatprep.subr.bf16.mxu0 %v3354_v52  ;;  %v1722_v45 = vld [vmem:[#allocation9 + $0x488] sm:$0xff]  ;;  %v1728_v48 = vld [vmem:[#allocation9 + $0x4d8] sm:$0xff]  ;;  %v3372_v52 = vpack.c.bf16 %v1717_v41, %v1713_v40 }
 0x6cb   : > { %v3356_v2 = vpack.c.bf16 %v1685_v54, %v1681_v53  ;;  %v1726_v46 = vld [vmem:[#allocation9 + $0x4c8] sm:$0xff]  ;;  %v3436_v53 = vpack.c.bf16 %v1719_v44, %v1715_v42  ;;  %v3438_v60 = vpack.c.bf16 %v1728_v48, %v1724_v47  ;;  %v1752_v37 = vld [vmem:[#allocation9 + $0x658] sm:$0xff]  ;;  %v1747_v41 = vld [vmem:[#allocation9 + $0x610] sm:$0xff] }
 0x6cc   : > { %v1607_v59 = vadd.f32 %v4623_v58, %v4620_v56  ;;  %3419 = vmatprep.subr.bf16.mxu1 %v3418_v57  ;;  %v3374_v54 = vpack.c.bf16 %v1726_v46, %v1722_v45  ;;  %v1725_v57 = vld [vmem:[#allocation9 + $0x4c0] sm:$0xff]  ;;  %v1751_v42 = vld [vmem:[#allocation9 + $0x650] sm:$0xff]  ;;  %v1758_v45 = vld [vmem:[#allocation9 + $0x6c8] sm:$0xff] }
 0x6cd   : > { %3357 = vmatpush1.bf16.msra.mxu0 %v3356_v2  ;;  %v1732_v2 = vld [vmem:[#allocation9 + $0x518] sm:$0xff]  ;;  %v3452_v44 = vpack.c.bf16 %v1751_v42, %v1747_v41  ;;  %v1605_v34 = vld [vmem:[%s4834_s29] sm:$0x3]  ;;  %s4837_s29 = sld [smem:[#allocation18_spill]] }
 0x6ce   : > { %1608 = vadd.xlane.f32.xlu1 %v1607_v59  ;;  %v1687_v59 = vld [vmem:[#allocation9 + $0x250] sm:$0xff]  ;;  %3359 = vmatprep.subr.bf16.mxu0 %v3358_v3  ;;  %v1756_v46 = vld [vmem:[#allocation9 + $0x698] sm:$0xff]  ;;  %v2105_v42 = vld [vmem:[#allocation9 + $0x20] sm:$0xff] }
 0x6cf   : > { %v3420_v5 = vpack.c.bf16 %v1687_v59, %v1683_v55  ;;  %v1721_v55 = vld [vmem:[#allocation9 + $0x480] sm:$0xff]  ;;  %v1723_v59 = vld [vmem:[#allocation9 + $0x490] sm:$0xff]  ;;  %v1760_v47 = vld [vmem:[#allocation9 + $0x6d8] sm:$0xff] }
 0x6d0   : > { %v3376_v3 = vpack.c.bf16 %v1725_v57, %v1721_v55  ;;  %v3440_v4 = vpack.c.bf16 %v1727_v61, %v1723_v59  ;;  %v1755_v55 = vld [vmem:[#allocation9 + $0x690] sm:$0xff]  ;;  %v1766_v61 = vld [vmem:[#allocation9 + $0x748] sm:$0xff] }
 0x6d1   : > { %3421 = vmatpush1.bf16.msra.mxu1 %v3420_v5  ;;  %3361 = vmatpush1.bf16.msra.mxu0 %v3360_v15  ;;  %v1736_v5 = vld [vmem:[#allocation9 + $0x558] sm:$0xff]  ;;  %v1759_v59 = vld [vmem:[#allocation9 + $0x6d0] sm:$0xff] }
 0x6d2   : > { %3423 = vmatprep.subr.bf16.mxu1 %v3422_v11  ;;  %3363 = vmatprep.subr.bf16.mxu0 %v3362_v6  ;;  %v1733_v11 = vld [vmem:[#allocation9 + $0x540] sm:$0xff]  ;;  %v3442_v10 = vpack.c.bf16 %v1736_v5, %v1732_v2  ;;  %v3456_v62 = vpack.c.bf16 %v1759_v59, %v1755_v55  ;;  %v1764_v2 = vld [vmem:[#allocation9 + $0x718] sm:$0xff] }
 0x6d3   : > { %v3380_v13 = vpack.c.bf16 %v1733_v11, %v1729_v8  ;;  %v1768_v5 = vld [vmem:[#allocation9 + $0x758] sm:$0xff]  ;;  %v1763_v8 = vld [vmem:[#allocation9 + $0x710] sm:$0xff]  ;;  %s637_s17 = scalar_lea.vmem %s4837_s29, %s4598_s10  ;;  %s4739_s29 = scalar_lea.hbm %s4839_s3, %s3053_s6 }
 0x6d4   : > { %v1767_v11 = vld [vmem:[#allocation9 + $0x750] sm:$0xff] }
 0x6d5   : > { %3425 = vmatpush1.bf16.msra.mxu1 %v3424_v16  ;;  %3365 = vmatpush1.bf16.msra.mxu0 %v3364_v26  ;;  %v1737_v26 = vld [vmem:[#allocation9 + $0x580] sm:$0xff] }
 0x6d6   : > { %3427 = vmatprep.subr.bf16.mxu1 %v3426_v0  ;;  %3367 = vmatprep.subr.bf16.mxu0 %v3366_v28  ;;  %v3446_v28 = vpack.c.bf16 %v1744_v25, %v1740_v1  ;;  %v2106_v25 = vld [vmem:[#allocation9 + $0x28] sm:$0xff] }
 0x6d9   : > { %3429 = vmatpush1.bf16.msra.mxu1 %v3428_v27  ;;  %3369 = vmatpush1.bf16.msra.mxu0 %v3368_v38  ;;  %v1741_v27 = vld [vmem:[#allocation9 + $0x5c0] sm:$0xff] }
 0x6da   : > { %3431 = vmatprep.subr.bf16.mxu1 %v3430_v32  ;;  %3371 = vmatprep.subr.bf16.mxu0 %v3370_v39  ;;  %v3384_v29 = vpack.c.bf16 %v1741_v27, %v1737_v26  ;;  %v3448_v32 = vpack.c.bf16 %v1743_v31, %v1739_v30  ;;  %v1745_v38 = vld [vmem:[#allocation9 + $0x600] sm:$0xff]  ;;  %v3450_v39 = vpack.c.bf16 %v1752_v37, %v1748_v35  ;;  %v2110_v26 = vld [vmem:[#allocation9 + $0x68] sm:$0xff]  ;;  %v2108_v27 = vld [vmem:[#allocation9 + $0x38] sm:$0xff] }
 0x6db   : > { %v1606_v35 = vld [vmem:[%s4835_s20] sm:$0x3]  ;;  %v1627_v37 = vrot.slane %v1605_v34, %v4554_v51  ;;  %s4838_s20 = sld [smem:[#allocation25_spill]] }
 0x6dc   : > { %v1640_v41 = vrot.slane %v1606_v35, %v4554_v51 }
 0x6dd   : > { %3433 = vmatpush1.bf16.msra.mxu1 %v3432_v49  ;;  %3373 = vmatpush1.bf16.msra.mxu0 %v3372_v52  ;;  %v1749_v49 = vld [vmem:[#allocation9 + $0x640] sm:$0xff]  ;;  %v3454_v52 = vpack.c.bf16 %v1760_v47, %v1756_v46 }
 0x6de   : > { %3435 = vmatprep.subr.bf16.mxu1 %v3434_v43  ;;  %3375 = vmatprep.subr.bf16.mxu0 %v3374_v54  ;;  %v3388_v40 = vpack.c.bf16 %v1749_v49, %v1745_v38  ;;  %v1754_v43 = vld [vmem:[#allocation9 + $0x688] sm:$0xff]  ;;  %v1757_v54 = vld [vmem:[#allocation9 + $0x6c0] sm:$0xff] }
 0x6df   : > { %v3390_v48 = vpack.c.bf16 %v1758_v45, %v1754_v43  ;;  %v2109_v43 = vld [vmem:[#allocation9 + $0x60] sm:$0xff]  ;;  %v2111_v45 = vld [vmem:[#allocation9 + $0x70] sm:$0xff] }
 0x6e1   : > { %3437 = vmatpush1.bf16.msra.mxu1 %v3436_v53  ;;  %3377 = vmatpush1.bf16.msra.mxu0 %v3376_v3  ;;  %v1753_v53 = vld [vmem:[#allocation9 + $0x680] sm:$0xff] }
 0x6e2   : > { %3439 = vmatprep.subr.bf16.mxu1 %v3438_v60  ;;  %3379 = vmatprep.subr.bf16.mxu0 %v3378_v7  ;;  %v3392_v57 = vpack.c.bf16 %v1757_v54, %v1753_v53  ;;  %v1762_v60 = vld [vmem:[#allocation9 + $0x708] sm:$0xff]  ;;  %v1761_v3 = vld [vmem:[#allocation9 + $0x700] sm:$0xff]  ;;  %v2116_v53 = vld [vmem:[#allocation9 + $0xb8] sm:$0xff] }
 0x6e3   : > { %v3394_v63 = vpack.c.bf16 %v1766_v61, %v1762_v60  ;;  %v1765_v7 = vld [vmem:[#allocation9 + $0x740] sm:$0xff]  ;;  %v2120_v54 = vld [vmem:[#allocation9 + $0xf8] sm:$0xff] }
 0x6e4   : > { %v2113_v60 = vld [vmem:[#allocation9 + $0xa0] sm:$0xff] }
 0x6e5   : > { %3441 = vmatpush1.bf16.msra.mxu1 %v3440_v4  ;;  %3381 = vmatpush1.bf16.msra.mxu0 %v3380_v13  ;;  %v3458_v4 = vpack.c.bf16 %v1768_v5, %v1764_v2  ;;  %v1772_v13 = vld [vmem:[#allocation9 + $0x798] sm:$0xff]  ;;  %v2117_v61 = vld [vmem:[#allocation9 + $0xe0] sm:$0xff]  ;;  %v3534_v5 = vpack.c.bf16 %v2120_v54, %v2116_v53  ;;  %v2147_v53 = vld [vmem:[#allocation9 + $0x2b0] sm:$0xff] }
 0x6e6   : > { %3443 = vmatprep.subr.bf16.mxu1 %v3442_v10  ;;  %3383 = vmatprep.subr.bf16.mxu0 %v3382_v24  ;;  %v3396_v10 = vpack.c.bf16 %v1765_v7, %v1761_v3  ;;  %v3464_v24 = vpack.c.bf16 %v1775_v23, %v1771_v22  ;;  %v2126_v3 = vld [vmem:[#allocation9 + $0x168] sm:$0xff]  ;;  %v2128_v7 = vld [vmem:[#allocation9 + $0x178] sm:$0xff]  ;;  %v2151_v54 = vld [vmem:[#allocation9 + $0x2f0] sm:$0xff] }
 0x6e9   : > { %3445 = vmatpush1.bf16.msra.mxu1 %v3444_v14  ;;  %3385 = vmatpush1.bf16.msra.mxu0 %v3384_v29  ;;  %v3460_v14 = vpack.c.bf16 %v1767_v11, %v1763_v8  ;;  %v2112_v29 = vld [vmem:[#allocation9 + $0x78] sm:$0xff]  ;;  %v3472_v8 = vpack.c.bf16 %v2117_v61, %v2113_v60 }
 0x6ea   : > { %3447 = vmatprep.subr.bf16.mxu1 %v3446_v28  ;;  %3387 = vmatprep.subr.bf16.mxu0 %v3386_v36  ;;  %v3466_v28 = vpack.c.bf16 %v2110_v26, %v2106_v25  ;;  %v3530_v30 = vpack.c.bf16 %v2112_v29, %v2108_v27  ;;  %v1631_v36 = vrot.slane %v1605_v34, %v4551_v50  ;;  %v2131_v27 = vld [vmem:[#allocation9 + $0x1b0] sm:$0xff]  ;;  %v2138_v29 = vld [vmem:[#allocation9 + $0x228] sm:$0xff]  ;;  %v2160_v60 = vld [vmem:[#allocation9 + $0x378] sm:$0xff] }
 0x6ed   : > { %3449 = vmatpush1.bf16.msra.mxu1 %v3448_v32  ;;  %3389 = vmatpush1.bf16.msra.mxu0 %v3388_v40 }
 0x6ee   : > { %3451 = vmatprep.subr.bf16.mxu1 %v3450_v39  ;;  %3391 = vmatprep.subr.bf16.mxu0 %v3390_v48  ;;  %v1644_v39 = vrot.slane %v1606_v35, %v4551_v50  ;;  %v2114_v48 = vld [vmem:[#allocation9 + $0xa8] sm:$0xff]  ;;  %v2137_v35 = vld [vmem:[#allocation9 + $0x220] sm:$0xff] }
 0x6f1   : > { %3453 = vmatpush1.bf16.msra.mxu1 %v3452_v44  ;;  %3393 = vmatpush1.bf16.msra.mxu0 %v3392_v57  ;;  %v2107_v44 = vld [vmem:[#allocation9 + $0x30] sm:$0xff] }
 0x6f2   : > { %3455 = vmatprep.subr.bf16.mxu1 %v3454_v52  ;;  %3395 = vmatprep.subr.bf16.mxu0 %v3394_v63  ;;  %v2118_v52 = vld [vmem:[#allocation9 + $0xe8] sm:$0xff]  ;;  %v3532_v59 = vpack.c.bf16 %v2111_v45, %v2107_v44 }
 0x6f3   : > { %v2122_v63 = vld [vmem:[#allocation9 + $0x128] sm:$0xff]  ;;  %v3470_v2 = vpack.c.bf16 %v2118_v52, %v2114_v48 }
 0x6f5   : > { %3457 = vmatpush1.bf16.msra.mxu1 %v3456_v62  ;;  %3397 = vmatpush1.bf16.msra.mxu0 %v3396_v10  ;;  %v2119_v62 = vld [vmem:[#allocation9 + $0xf0] sm:$0xff]  ;;  %v2121_v10 = vld [vmem:[#allocation9 + $0x120] sm:$0xff] }
 0x6f6   : > { %3459 = vmatprep.subr.bf16.mxu1 %v3458_v4  ;;  %v2124_v4 = vld [vmem:[#allocation9 + $0x138] sm:$0xff] }
 0x6f9   : > { %3461 = vmatpush1.bf16.msra.mxu1 %v3460_v14  ;;  %v2123_v14 = vld [vmem:[#allocation9 + $0x130] sm:$0xff] }
 0x75b   : > { %v1609_v15 = vpop.xlane.xlu1 %1608 }
 0x75c   : > { %v1610_v16 = vmul.f32 0.00390625, %v1609_v15  ;;  %v3398_v15 = vpack.c.bf16 %v1774_v9, %v1770_v12  ;;  %v2125_v12 = vld [vmem:[#allocation9 + $0x160] sm:$0xff]  ;;  %v3474_v9 = vpack.c.bf16 %v2126_v3, %v2122_v63  ;;  %v2155_v3 = vld [vmem:[#allocation9 + $0x330] sm:$0xff] }
 0x75d   : > { %v3476_v22 = vpack.c.bf16 %v2125_v12, %v2121_v10  ;;  %v2157_v63 = vld [vmem:[#allocation9 + $0x360] sm:$0xff]  ;;  %v2168_v10 = vld [vmem:[#allocation9 + $0x3f8] sm:$0xff] }
 0x75e   : > { %v4628_v6 = vsub.f32 %v4620_v56, %v1610_v16  ;;  %v4631_v19 = vsub.f32 %v4623_v58, %v1610_v16  ;;  %v1776_v16 = vld [vmem:[#allocation9 + $0x7d8] sm:$0xff]  ;;  %3399 = vmatprep.subr.bf16.mxu0 %v3398_v15  ;;  %v2127_v15 = vld [vmem:[#allocation9 + $0x170] sm:$0xff] }
 0x75f   : > { %v3540_v23 = vpack.c.bf16 %v2127_v15, %v2123_v14  ;;  %v2165_v14 = vld [vmem:[#allocation9 + $0x3e0] sm:$0xff] }
 0x760   : > { %v1613_v20 = vmul.f32 %v4628_v6, %v4628_v6  ;;  %v1614_v21 = vmul.f32 %v4631_v19, %v4631_v19 }
 0x762   : > { %v1615_v0 = vadd.f32 %v1614_v21, %v1613_v20  ;;  %v1769_v20 = vld [vmem:[#allocation9 + $0x780] sm:$0xff] }
 0x763   : > { %v1773_v21 = vld [vmem:[#allocation9 + $0x7c0] sm:$0xff] }
 0x764   : > { %1616 = vadd.xlane.f32.xlu1 %v1615_v0  ;;  %v3462_v0 = vpack.c.bf16 %v1776_v16, %v1772_v13  ;;  %v3400_v1 = vpack.c.bf16 %v1773_v21, %v1769_v20  ;;  %v3538_v13 = vpack.c.bf16 %v2128_v7, %v2124_v4  ;;  %v2130_v16 = vld [vmem:[#allocation9 + $0x1a8] sm:$0xff]  ;;  %v2132_v21 = vld [vmem:[#allocation9 + $0x1b8] sm:$0xff]  ;;  %v2159_v4 = vld [vmem:[#allocation9 + $0x370] sm:$0xff] }
 0x765   : > { %v2134_v20 = vld [vmem:[#allocation9 + $0x1e8] sm:$0xff] }
 0x766   : > { %3463 = vmatprep.subr.bf16.mxu1 %v3462_v0  ;;  %3401 = vmatpush1.bf16.msra.mxu0 %v3400_v1  ;;  %v2136_v0 = vld [vmem:[#allocation9 + $0x1f8] sm:$0xff]  ;;  %v2129_v1 = vld [vmem:[#allocation9 + $0x1a0] sm:$0xff]  ;;  %v3478_v25 = vpack.c.bf16 %v2134_v20, %v2130_v16  ;;  %v2162_v7 = vld [vmem:[#allocation9 + $0x3a8] sm:$0xff] }
 0x767   : > { %3465 = vmatpush1.bf16.msra.mxu1 %v3464_v24  ;;  %3467 = vmatprep.subr.bf16.mxu0 %v3466_v28  ;;  %v2133_v24 = vld [vmem:[#allocation9 + $0x1e0] sm:$0xff]  ;;  %v3542_v26 = vpack.c.bf16 %v2136_v0, %v2132_v21  ;;  %v2135_v28 = vld [vmem:[#allocation9 + $0x1f0] sm:$0xff]  ;;  %v2170_v0 = vld [vmem:[#allocation9 + $0x428] sm:$0xff] }
 0x768   : > { %3531 = vmatprep.subr.bf16.mxu1 %v3530_v30  ;;  %v2142_v30 = vld [vmem:[#allocation9 + $0x268] sm:$0xff]  ;;  %v3544_v34 = vpack.c.bf16 %v2135_v28, %v2131_v27  ;;  %v2163_v20 = vld [vmem:[#allocation9 + $0x3b0] sm:$0xff]  ;;  %v2173_v27 = vld [vmem:[#allocation9 + $0x460] sm:$0xff] }
 0x769   : > { %v2167_v21 = vld [vmem:[#allocation9 + $0x3f0] sm:$0xff] }
 0x7f1   : > { %v1617_v31 = vpop.xlane.xlu1 %1616 }
 0x7f2   : > { %v1618_v32 = vmul.f32 0.00390625, %v1617_v31  ;;  %v2140_v31 = vld [vmem:[#allocation9 + $0x238] sm:$0xff] }
 0x7f4   : > { %v1619_v33 = vadd.f32 1e-05, %v1618_v32  ;;  %v2144_v32 = vld [vmem:[#allocation9 + $0x278] sm:$0xff] }
 0x7f6   : > { %3964 = vrsqrt.f32 %v1619_v33  ;;  %v3480_v33 = vpack.c.bf16 %v2133_v24, %v2129_v1  ;;  %v2176_v1 = vld [vmem:[#allocation9 + $0x478] sm:$0xff] }
 0x800   : > { %v3965_v38 = vpop.eup %3964 }
 0x801   : > { %v1622_v49 = vmul.f32 %v3965_v38, %v4631_v19  ;;  %v1621_v40 = vmul.f32 %v3965_v38, %v4628_v6  ;;  %v3468_v19 = vpack.c.bf16 %v2109_v43, %v2105_v42  ;;  %v2115_v6 = vld [vmem:[#allocation9 + $0xb0] sm:$0xff]  ;;  %v3546_v38 = vpack.c.bf16 %v2144_v32, %v2140_v31  ;;  %v2148_v42 = vld [vmem:[#allocation9 + $0x2b8] sm:$0xff]  ;;  %v2178_v32 = vld [vmem:[#allocation9 + $0x4a8] sm:$0xff] }
 0x802   : > { %v3536_v11 = vpack.c.bf16 %v2119_v62, %v2115_v6  ;;  %v2152_v43 = vld [vmem:[#allocation9 + $0x2f8] sm:$0xff]  ;;  %v3552_v6 = vpack.c.bf16 %v2151_v54, %v2147_v53  ;;  %v2153_v62 = vld [vmem:[#allocation9 + $0x320] sm:$0xff]  ;;  %v2175_v31 = vld [vmem:[#allocation9 + $0x470] sm:$0xff] }
 0x803   : > { %v1635_v46 = vmul.f32 %v1631_v36, %v1622_v49  ;;  %v1634_v47 = vmul.f32 %v1627_v37, %v1621_v40  ;;  %v2141_v36 = vld [vmem:[#allocation9 + $0x260] sm:$0xff]  ;;  %v3482_v37 = vpack.c.bf16 %v2142_v30, %v2138_v29  ;;  %v2139_v49 = vld [vmem:[#allocation9 + $0x230] sm:$0xff]  ;;  %v2146_v40 = vld [vmem:[#allocation9 + $0x2a8] sm:$0xff]  ;;  %v3550_v52 = vpack.c.bf16 %v2152_v43, %v2148_v42 }
 0x804   : > { %v3484_v44 = vpack.c.bf16 %v2141_v36, %v2137_v35  ;;  %v3492_v12 = vpack.c.bf16 %v2157_v63, %v2153_v62  ;;  %v2171_v30 = vld [vmem:[#allocation9 + $0x430] sm:$0xff]  ;;  %v2184_v35 = vld [vmem:[#allocation9 + $0x4f8] sm:$0xff]  ;;  %v2186_v43 = vld [vmem:[#allocation9 + $0x528] sm:$0xff] }
 0x805   : > { %v1648_v55 = vadd.f32 %v1644_v39, %v1635_v46  ;;  %v4649_v57 = vadd.f32 %v1640_v41, %v1634_v47  ;;  %v2143_v39 = vld [vmem:[#allocation9 + $0x270] sm:$0xff]  ;;  %v2150_v41 = vld [vmem:[#allocation9 + $0x2e8] sm:$0xff]  ;;  %v2145_v46 = vld [vmem:[#allocation9 + $0x2a0] sm:$0xff] }
 0x806   : > { %v3548_v45 = vpack.c.bf16 %v2143_v39, %v2139_v49  ;;  %v2149_v47 = vld [vmem:[#allocation9 + $0x2e0] sm:$0xff]  ;;  %v3486_v48 = vpack.c.bf16 %v2150_v41, %v2146_v40  ;;  %v2179_v41 = vld [vmem:[#allocation9 + $0x4b0] sm:$0xff]  ;;  %v2200_v62 = vld [vmem:[#allocation9 + $0x5f8] sm:$0xff] }
 0x807   : > { %1863 = vmatprep.mubr.f32.mxu0 %v1648_v55  ;;  %1934 = vmatprep.mubr.f32.mxu1 %v1648_v55  ;;  %v3488_v61 = vpack.c.bf16 %v2149_v47, %v2145_v46  ;;  %v2181_v49 = vld [vmem:[#allocation9 + $0x4e0] sm:$0xff]  ;;  %v2183_v42 = vld [vmem:[#allocation9 + $0x4f0] sm:$0xff]  ;;  %v2192_v46 = vld [vmem:[#allocation9 + $0x578] sm:$0xff] }
 0x808   : > { %1864 = vmatmul.mubr.f32.vlgmr.msra.gmra.mrb[4].mxu0 %v4649_v57  ;;  %1935 = vmatmul.mubr.f32.vlgmr.msra.gmra.mrb[12].mxu1 %v4649_v57  ;;  %v2189_v53 = vld [vmem:[#allocation9 + $0x560] sm:$0xff] }
 0x809   : > { %3469 = vmatpush1.bf16.msra.mxu0 %v3468_v19  ;;  %3533 = vmatpush1.bf16.msra.mxu1 %v3532_v59  ;;  %v2158_v19 = vld [vmem:[#allocation9 + $0x368] sm:$0xff]  ;;  %v2156_v59 = vld [vmem:[#allocation9 + $0x338] sm:$0xff] }
 0x80a   : > { %2319 = vmatprep.mubr.f32.mxu0 %v1648_v55  ;;  %2390 = vmatprep.mubr.f32.mxu1 %v1648_v55  ;;  %v2154_v55 = vld [vmem:[#allocation9 + $0x328] sm:$0xff] }
 0x80b   : > { %3471 = vmatprep.subr.bf16.mxu0 %v3470_v2  ;;  %3535 = vmatprep.subr.bf16.mxu1 %v3534_v5  ;;  %v3490_v2 = vpack.c.bf16 %v2158_v19, %v2154_v55  ;;  %v3554_v5 = vpack.c.bf16 %v2160_v60, %v2156_v59  ;;  %v2187_v19 = vld [vmem:[#allocation9 + $0x530] sm:$0xff]  ;;  %v2194_v60 = vld [vmem:[#allocation9 + $0x5a8] sm:$0xff] }
 0x80c   : > { %v2191_v59 = vld [vmem:[#allocation9 + $0x570] sm:$0xff] }
 0x80d   : > { %3473 = vmatpush1.bf16.msra.mxu0 %v3472_v8  ;;  %3537 = vmatpush1.bf16.msra.mxu1 %v3536_v11  ;;  %v2166_v8 = vld [vmem:[#allocation9 + $0x3e8] sm:$0xff]  ;;  %v2164_v11 = vld [vmem:[#allocation9 + $0x3b8] sm:$0xff] }
 0x80e   : > { %3475 = vmatprep.subr.bf16.mxu0 %v3474_v9  ;;  %3539 = vmatprep.subr.bf16.mxu1 %v3538_v13  ;;  %v3556_v9 = vpack.c.bf16 %v2159_v4, %v2155_v3  ;;  %v2161_v13 = vld [vmem:[#allocation9 + $0x3a0] sm:$0xff]  ;;  %v3494_v15 = vpack.c.bf16 %v2166_v8, %v2162_v7  ;;  %v3558_v16 = vpack.c.bf16 %v2168_v10, %v2164_v11  ;;  %v2195_v8 = vld [vmem:[#allocation9 + $0x5b0] sm:$0xff]  ;;  %v2202_v10 = vld [vmem:[#allocation9 + $0x628] sm:$0xff] }
 0x80f   : > { %v3496_v24 = vpack.c.bf16 %v2165_v14, %v2161_v13  ;;  %v2197_v3 = vld [vmem:[#allocation9 + $0x5e0] sm:$0xff]  ;;  %v2199_v11 = vld [vmem:[#allocation9 + $0x5f0] sm:$0xff]  ;;  %v2208_v13 = vld [vmem:[#allocation9 + $0x678] sm:$0xff] }
 0x811   : > { %3477 = vmatpush1.bf16.msra.mxu0 %v3476_v22  ;;  %3541 = vmatpush1.bf16.msra.mxu1 %v3540_v23  ;;  %v2174_v22 = vld [vmem:[#allocation9 + $0x468] sm:$0xff]  ;;  %v2172_v23 = vld [vmem:[#allocation9 + $0x438] sm:$0xff] }
 0x812   : > { %3479 = vmatprep.subr.bf16.mxu0 %v3478_v25  ;;  %3543 = vmatprep.subr.bf16.mxu1 %v3542_v26  ;;  %v3560_v25 = vpack.c.bf16 %v2167_v21, %v2163_v20  ;;  %v2169_v26 = vld [vmem:[#allocation9 + $0x420] sm:$0xff]  ;;  %v3498_v28 = vpack.c.bf16 %v2174_v22, %v2170_v0  ;;  %v3562_v29 = vpack.c.bf16 %v2176_v1, %v2172_v23  ;;  %v2203_v22 = vld [vmem:[#allocation9 + $0x630] sm:$0xff]  ;;  %v2210_v1 = vld [vmem:[#allocation9 + $0x6a8] sm:$0xff] }
 0x813   : > { %v3500_v36 = vpack.c.bf16 %v2173_v27, %v2169_v26  ;;  %v2205_v20 = vld [vmem:[#allocation9 + $0x660] sm:$0xff]  ;;  %v2207_v23 = vld [vmem:[#allocation9 + $0x670] sm:$0xff]  ;;  %v2216_v26 = vld [vmem:[#allocation9 + $0x6f8] sm:$0xff] }
 0x815   : > { %3481 = vmatpush1.bf16.msra.mxu0 %v3480_v33  ;;  %3545 = vmatpush1.bf16.msra.mxu1 %v3544_v34  ;;  %v2182_v33 = vld [vmem:[#allocation9 + $0x4e8] sm:$0xff]  ;;  %v2180_v34 = vld [vmem:[#allocation9 + $0x4b8] sm:$0xff] }
 0x816   : > { %3483 = vmatprep.subr.bf16.mxu0 %v3482_v37  ;;  %3547 = vmatprep.subr.bf16.mxu1 %v3546_v38  ;;  %v3564_v37 = vpack.c.bf16 %v2175_v31, %v2171_v30  ;;  %v2177_v38 = vld [vmem:[#allocation9 + $0x4a0] sm:$0xff]  ;;  %v3502_v39 = vpack.c.bf16 %v2182_v33, %v2178_v32  ;;  %v3566_v40 = vpack.c.bf16 %v2184_v35, %v2180_v34  ;;  %v2211_v33 = vld [vmem:[#allocation9 + $0x6b0] sm:$0xff]  ;;  %v2218_v35 = vld [vmem:[#allocation9 + $0x728] sm:$0xff] }
 0x817   : > { %v3504_v47 = vpack.c.bf16 %v2181_v49, %v2177_v38  ;;  %v2213_v30 = vld [vmem:[#allocation9 + $0x6e0] sm:$0xff]  ;;  %v2215_v34 = vld [vmem:[#allocation9 + $0x6f0] sm:$0xff]  ;;  %v2224_v38 = vld [vmem:[#allocation9 + $0x778] sm:$0xff] }
 0x819   : > { %3485 = vmatpush1.bf16.msra.mxu0 %v3484_v44  ;;  %3549 = vmatpush1.bf16.msra.mxu1 %v3548_v45  ;;  %v2190_v44 = vld [vmem:[#allocation9 + $0x568] sm:$0xff]  ;;  %v2188_v45 = vld [vmem:[#allocation9 + $0x538] sm:$0xff] }
 0x81a   : > { %3487 = vmatprep.subr.bf16.mxu0 %v3486_v48  ;;  %3551 = vmatprep.subr.bf16.mxu1 %v3550_v52  ;;  %v3568_v48 = vpack.c.bf16 %v2183_v42, %v2179_v41  ;;  %v2185_v52 = vld [vmem:[#allocation9 + $0x520] sm:$0xff]  ;;  %v3506_v54 = vpack.c.bf16 %v2190_v44, %v2186_v43  ;;  %v3570_v55 = vpack.c.bf16 %v2192_v46, %v2188_v45  ;;  %v2219_v44 = vld [vmem:[#allocation9 + $0x730] sm:$0xff]  ;;  %v2226_v46 = vld [vmem:[#allocation9 + $0x7a8] sm:$0xff] }
 0x81b   : > { %v3508_v63 = vpack.c.bf16 %v2189_v53, %v2185_v52  ;;  %v2221_v41 = vld [vmem:[#allocation9 + $0x760] sm:$0xff]  ;;  %v2223_v45 = vld [vmem:[#allocation9 + $0x770] sm:$0xff]  ;;  %v2232_v52 = vld [vmem:[#allocation9 + $0x7f8] sm:$0xff] }
 0x81d   : > { %3489 = vmatpush1.bf16.msra.mxu0 %v3488_v61  ;;  %3553 = vmatpush1.bf16.msra.mxu1 %v3552_v6  ;;  %v2198_v61 = vld [vmem:[#allocation9 + $0x5e8] sm:$0xff]  ;;  %v2196_v6 = vld [vmem:[#allocation9 + $0x5b8] sm:$0xff] }
 0x81e   : > { %3491 = vmatprep.subr.bf16.mxu0 %v3490_v2  ;;  %3555 = vmatprep.subr.bf16.mxu1 %v3554_v5  ;;  %v3572_v2 = vpack.c.bf16 %v2191_v59, %v2187_v19  ;;  %v2193_v5 = vld [vmem:[#allocation9 + $0x5a0] sm:$0xff]  ;;  %v3510_v4 = vpack.c.bf16 %v2198_v61, %v2194_v60  ;;  %v3574_v7 = vpack.c.bf16 %v2200_v62, %v2196_v6  ;;  %v2227_v61 = vld [vmem:[#allocation9 + $0x7b0] sm:$0xff] }
 0x81f   : > { %v3512_v14 = vpack.c.bf16 %v2197_v3, %v2193_v5  ;;  %v2229_v60 = vld [vmem:[#allocation9 + $0x7e0] sm:$0xff]  ;;  %v2231_v6 = vld [vmem:[#allocation9 + $0x7f0] sm:$0xff]  ;;  %v2436_v5 = vld [vmem:[#allocation11 + $0x418] sm:$0xff] }
 0x820   : > { %v2433_v3 = vld [vmem:[#allocation11 + $0x400] sm:$0xff] }
 0x821   : > { %3493 = vmatpush1.bf16.msra.mxu0 %v3492_v12  ;;  %3557 = vmatpush1.bf16.msra.mxu1 %v3556_v9  ;;  %v2206_v12 = vld [vmem:[#allocation9 + $0x668] sm:$0xff]  ;;  %v2204_v9 = vld [vmem:[#allocation9 + $0x638] sm:$0xff] }
 0x822   : > { %3495 = vmatprep.subr.bf16.mxu0 %v3494_v15  ;;  %3559 = vmatprep.subr.bf16.mxu1 %v3558_v16  ;;  %v3576_v15 = vpack.c.bf16 %v2199_v11, %v2195_v8  ;;  %v2201_v16 = vld [vmem:[#allocation9 + $0x620] sm:$0xff]  ;;  %v3514_v21 = vpack.c.bf16 %v2206_v12, %v2202_v10  ;;  %v3578_v0 = vpack.c.bf16 %v2208_v13, %v2204_v9  ;;  %v2438_v8 = vld [vmem:[#allocation11 + $0x428] sm:$0xff]  ;;  %v2440_v11 = vld [vmem:[#allocation11 + $0x438] sm:$0xff] }
 0x823   : > { %v3516_v27 = vpack.c.bf16 %v2205_v20, %v2201_v16  ;;  %v3598_v12 = vpack.c.bf16 %v2440_v11, %v2438_v8  ;;  %v2437_v9 = vld [vmem:[#allocation11 + $0x420] sm:$0xff]  ;;  %v2439_v13 = vld [vmem:[#allocation11 + $0x430] sm:$0xff] }
 0x824   : > { %v3600_v16 = vpack.c.bf16 %v2439_v13, %v2437_v9  ;;  %v2473_v8 = vld [vmem:[#allocation11 + $0x540] sm:$0xff]  ;;  %v2475_v11 = vld [vmem:[#allocation11 + $0x550] sm:$0xff]  ;;  %v2480_v9 = vld [vmem:[#allocation11 + $0x578] sm:$0xff] }
 0x825   : > { %3497 = vmatpush1.bf16.msra.mxu0 %v3496_v24  ;;  %3561 = vmatpush1.bf16.msra.mxu1 %v3560_v25  ;;  %v2214_v24 = vld [vmem:[#allocation9 + $0x6e8] sm:$0xff]  ;;  %v2212_v25 = vld [vmem:[#allocation9 + $0x6b8] sm:$0xff] }
 0x826   : > { %3499 = vmatprep.subr.bf16.mxu0 %v3498_v28  ;;  %3563 = vmatprep.subr.bf16.mxu1 %v3562_v29  ;;  %v3580_v28 = vpack.c.bf16 %v2207_v23, %v2203_v22  ;;  %v2209_v29 = vld [vmem:[#allocation9 + $0x6a0] sm:$0xff]  ;;  %v3518_v31 = vpack.c.bf16 %v2214_v24, %v2210_v1  ;;  %v3582_v32 = vpack.c.bf16 %v2216_v26, %v2212_v25  ;;  %v2448_v22 = vld [vmem:[#allocation11 + $0x478] sm:$0xff]  ;;  %v2447_v25 = vld [vmem:[#allocation11 + $0x470] sm:$0xff] }
 0x827   : > { %v3520_v49 = vpack.c.bf16 %v2213_v30, %v2209_v29  ;;  %v2445_v24 = vld [vmem:[#allocation11 + $0x460] sm:$0xff]  ;;  %v2450_v26 = vld [vmem:[#allocation11 + $0x488] sm:$0xff] }
 0x828   : > { %v2449_v30 = vld [vmem:[#allocation11 + $0x480] sm:$0xff] }
 0x829   : > { %3501 = vmatpush1.bf16.msra.mxu0 %v3500_v36  ;;  %3565 = vmatpush1.bf16.msra.mxu1 %v3564_v37  ;;  %v2222_v36 = vld [vmem:[#allocation9 + $0x768] sm:$0xff]  ;;  %v2220_v37 = vld [vmem:[#allocation9 + $0x738] sm:$0xff] }
 0x82a   : > { %3503 = vmatprep.subr.bf16.mxu0 %v3502_v39  ;;  %3567 = vmatprep.subr.bf16.mxu1 %v3566_v40  ;;  %v3584_v39 = vpack.c.bf16 %v2215_v34, %v2211_v33  ;;  %v2217_v40 = vld [vmem:[#allocation9 + $0x720] sm:$0xff]  ;;  %v3522_v42 = vpack.c.bf16 %v2222_v36, %v2218_v35  ;;  %v3586_v43 = vpack.c.bf16 %v2224_v38, %v2220_v37  ;;  %v2456_v33 = vld [vmem:[#allocation11 + $0x4b8] sm:$0xff]  ;;  %v2455_v37 = vld [vmem:[#allocation11 + $0x4b0] sm:$0xff] }
 0x82b   : > { %v3524_v53 = vpack.c.bf16 %v2221_v41, %v2217_v40  ;;  %v2453_v36 = vld [vmem:[#allocation11 + $0x4a0] sm:$0xff]  ;;  %v2458_v38 = vld [vmem:[#allocation11 + $0x4c8] sm:$0xff] }
 0x82c   : > { %v2457_v41 = vld [vmem:[#allocation11 + $0x4c0] sm:$0xff] }
 0x82d   : > { %3505 = vmatpush1.bf16.msra.mxu0 %v3504_v47  ;;  %3569 = vmatpush1.bf16.msra.mxu1 %v3568_v48  ;;  %v2230_v47 = vld [vmem:[#allocation9 + $0x7e8] sm:$0xff]  ;;  %v2228_v48 = vld [vmem:[#allocation9 + $0x7b8] sm:$0xff] }
 0x82e   : > { %3507 = vmatprep.subr.bf16.mxu0 %v3506_v54  ;;  %3571 = vmatprep.subr.bf16.mxu1 %v3570_v55  ;;  %v3588_v54 = vpack.c.bf16 %v2223_v45, %v2219_v44  ;;  %v2225_v55 = vld [vmem:[#allocation9 + $0x7a0] sm:$0xff]  ;;  %v3526_v19 = vpack.c.bf16 %v2230_v47, %v2226_v46  ;;  %v3590_v59 = vpack.c.bf16 %v2232_v52, %v2228_v48  ;;  %v2464_v44 = vld [vmem:[#allocation11 + $0x4f8] sm:$0xff]  ;;  %v2463_v48 = vld [vmem:[#allocation11 + $0x4f0] sm:$0xff] }
 0x82f   : > { %v3528_v62 = vpack.c.bf16 %v2229_v60, %v2225_v55  ;;  %v2461_v47 = vld [vmem:[#allocation11 + $0x4e0] sm:$0xff]  ;;  %v2466_v52 = vld [vmem:[#allocation11 + $0x508] sm:$0xff] }
 0x831   : > { %3509 = vmatpush1.bf16.msra.mxu0 %v3508_v63  ;;  %3573 = vmatpush1.bf16.msra.mxu1 %v3572_v2  ;;  %v3592_v63 = vpack.c.bf16 %v2231_v6, %v2227_v61  ;;  %v2434_v2 = vld [vmem:[#allocation11 + $0x408] sm:$0xff]  ;;  %v2472_v6 = vld [vmem:[#allocation11 + $0x538] sm:$0xff] }
 0x832   : > { %3511 = vmatprep.subr.bf16.mxu0 %v3510_v4  ;;  %3575 = vmatprep.subr.bf16.mxu1 %v3574_v7  ;;  %v3594_v4 = vpack.c.bf16 %v2436_v5, %v2434_v2  ;;  %v2435_v7 = vld [vmem:[#allocation11 + $0x410] sm:$0xff]  ;;  %v2470_v61 = vld [vmem:[#allocation11 + $0x528] sm:$0xff] }
 0x833   : > { %v3596_v10 = vpack.c.bf16 %v2435_v7, %v2433_v3  ;;  %v2471_v2 = vld [vmem:[#allocation11 + $0x530] sm:$0xff]  ;;  %v2474_v3 = vld [vmem:[#allocation11 + $0x548] sm:$0xff] }
 0x835   : > { %3513 = vmatpush1.bf16.msra.mxu0 %v3512_v14  ;;  %3577 = vmatpush1.bf16.msra.mxu1 %v3576_v15  ;;  %v2442_v14 = vld [vmem:[#allocation11 + $0x448] sm:$0xff]  ;;  %v2444_v15 = vld [vmem:[#allocation11 + $0x458] sm:$0xff] }
 0x836   : > { %3515 = vmatprep.subr.bf16.mxu0 %v3514_v21  ;;  %3579 = vmatprep.subr.bf16.mxu1 %v3578_v0  ;;  %v3602_v20 = vpack.c.bf16 %v2444_v15, %v2442_v14  ;;  %v2441_v21 = vld [vmem:[#allocation11 + $0x440] sm:$0xff]  ;;  %v2446_v0 = vld [vmem:[#allocation11 + $0x468] sm:$0xff]  ;;  %v2479_v15 = vld [vmem:[#allocation11 + $0x570] sm:$0xff] }
 0x837   : > { %v3606_v1 = vpack.c.bf16 %v2448_v22, %v2446_v0  ;;  %v2477_v14 = vld [vmem:[#allocation11 + $0x560] sm:$0xff]  ;;  %v2483_v22 = vld [vmem:[#allocation11 + $0x590] sm:$0xff] }
 0x839   : > { %3517 = vmatpush1.bf16.msra.mxu0 %v3516_v27  ;;  %3581 = vmatpush1.bf16.msra.mxu1 %v3580_v28  ;;  %v2452_v27 = vld [vmem:[#allocation11 + $0x498] sm:$0xff]  ;;  %v3608_v28 = vpack.c.bf16 %v2447_v25, %v2445_v24 }
 0x83a   : > { %3519 = vmatprep.subr.bf16.mxu0 %v3518_v31  ;;  %3583 = vmatprep.subr.bf16.mxu1 %v3582_v32  ;;  %v3610_v29 = vpack.c.bf16 %v2452_v27, %v2450_v26  ;;  %v2451_v31 = vld [vmem:[#allocation11 + $0x490] sm:$0xff]  ;;  %v2454_v32 = vld [vmem:[#allocation11 + $0x4a8] sm:$0xff]  ;;  %v2485_v26 = vld [vmem:[#allocation11 + $0x5a0] sm:$0xff] }
 0x83b   : > { %v3612_v34 = vpack.c.bf16 %v2451_v31, %v2449_v30  ;;  %v3614_v35 = vpack.c.bf16 %v2456_v33, %v2454_v32  ;;  %v2487_v27 = vld [vmem:[#allocation11 + $0x5b0] sm:$0xff]  ;;  %v2489_v32 = vld [vmem:[#allocation11 + $0x5c0] sm:$0xff] }
 0x83c   : > { %v3648_v30 = vpack.c.bf16 %v2487_v27, %v2485_v26  ;;  %v2491_v33 = vld [vmem:[#allocation11 + $0x5d0] sm:$0xff]  ;;  %v2502_v26 = vld [vmem:[#allocation11 + $0x628] sm:$0xff]  ;;  %v2504_v27 = vld [vmem:[#allocation11 + $0x638] sm:$0xff] }
 0x83d   : > { %3521 = vmatpush1.bf16.msra.mxu0 %v3520_v49  ;;  %3585 = vmatpush1.bf16.msra.mxu1 %v3584_v39  ;;  %v2460_v49 = vld [vmem:[#allocation11 + $0x4d8] sm:$0xff]  ;;  %v3616_v39 = vpack.c.bf16 %v2455_v37, %v2453_v36  ;;  %v3652_v36 = vpack.c.bf16 %v2491_v33, %v2489_v32 }
 0x83e   : > { %3523 = vmatprep.subr.bf16.mxu0 %v3522_v42  ;;  %3587 = vmatprep.subr.bf16.mxu1 %v3586_v43  ;;  %v3618_v40 = vpack.c.bf16 %v2460_v49, %v2458_v38  ;;  %v2459_v42 = vld [vmem:[#allocation11 + $0x4d0] sm:$0xff]  ;;  %v2462_v43 = vld [vmem:[#allocation11 + $0x4e8] sm:$0xff]  ;;  %v2493_v38 = vld [vmem:[#allocation11 + $0x5e0] sm:$0xff] }
 0x83f   : > { %v3620_v45 = vpack.c.bf16 %v2459_v42, %v2457_v41  ;;  %v3622_v46 = vpack.c.bf16 %v2464_v44, %v2462_v43  ;;  %v2495_v49 = vld [vmem:[#allocation11 + $0x5f0] sm:$0xff]  ;;  %v2500_v41 = vld [vmem:[#allocation11 + $0x618] sm:$0xff] }
 0x841   : > { %3525 = vmatpush1.bf16.msra.mxu0 %v3524_v53  ;;  %3589 = vmatpush1.bf16.msra.mxu1 %v3588_v54  ;;  %v2468_v53 = vld [vmem:[#allocation11 + $0x518] sm:$0xff]  ;;  %v3624_v54 = vpack.c.bf16 %v2463_v48, %v2461_v47  ;;  %v2233_v47 = vld [vmem:[%s4836_s30 + $0x4] sm:$0xf] }
 0x842   : > { %3527 = vmatprep.subr.bf16.mxu0 %v3526_v19  ;;  %3591 = vmatprep.subr.bf16.mxu1 %v3590_v59  ;;  %v3626_v55 = vpack.c.bf16 %v2468_v53, %v2466_v52  ;;  %v2465_v19 = vld [vmem:[#allocation11 + $0x500] sm:$0xff]  ;;  %v2467_v59 = vld [vmem:[#allocation11 + $0x510] sm:$0xff]  ;;  %v2238_v48 = vrot.slane %v2233_v47, %v4554_v51  ;;  %v2246_v52 = vrot.slane %v2233_v47, %v4583_v17 }
 0x843   : > { %v3628_v60 = vpack.c.bf16 %v2467_v59, %v2465_v19  ;;  %v2242_v53 = vrot.slane %v2233_v47, %v4551_v50 }
 0x845   : > { %3529 = vmatpush1.bf16.msra.mxu0 %v3528_v62  ;;  %3593 = vmatpush1.bf16.msra.mxu1 %v3592_v63  ;;  %v3630_v62 = vpack.c.bf16 %v2472_v6, %v2470_v61  ;;  %v2469_v63 = vld [vmem:[#allocation11 + $0x520] sm:$0xff] }
 0x846   : > { %3595 = vmatprep.subr.bf16.mxu0 %v3594_v4  ;;  %v3632_v5 = vpack.c.bf16 %v2471_v2, %v2469_v63  ;;  %v2476_v4 = vld [vmem:[#allocation11 + $0x558] sm:$0xff] }
 0x847   : > { %v3634_v7 = vpack.c.bf16 %v2476_v4, %v2474_v3 }
 0x848   : > { %2320 = vmatmul.mubr.f32.vlgmr.msra.gmra.mrb[6].mxu0 %v4649_v57  ;;  %2391 = vmatmul.mubr.f32.vlgmr.msra.gmra.mrb[14].mxu1 %v4649_v57  ;;  %v2443_v57 = vld [vmem:[#allocation11 + $0x450] sm:$0xff] }
 0x849   : > { %3597 = vmatpush1.bf16.msra.mxu0 %v3596_v10  ;;  %v3604_v23 = vpack.c.bf16 %v2443_v57, %v2441_v21  ;;  %v3636_v10 = vpack.c.bf16 %v2475_v11, %v2473_v8  ;;  %v2484_v21 = vld [vmem:[#allocation11 + $0x598] sm:$0xff]  ;;  %v2481_v57 = vld [vmem:[#allocation11 + $0x580] sm:$0xff] }
 0x84a   : > { %3599 = vmatprep.subr.bf16.mxu0 %v3598_v12  ;;  %v2478_v12 = vld [vmem:[#allocation11 + $0x568] sm:$0xff]  ;;  %v3644_v24 = vpack.c.bf16 %v2483_v22, %v2481_v57  ;;  %v2497_v22 = vld [vmem:[#allocation11 + $0x600] sm:$0xff] }
 0x84b   : > { %v3638_v13 = vpack.c.bf16 %v2480_v9, %v2478_v12 }
 0x84d   : > { %3601 = vmatpush1.bf16.msra.mxu0 %v3600_v16  ;;  %v3640_v16 = vpack.c.bf16 %v2479_v15, %v2477_v14 }
 0x84e   : > { %3603 = vmatprep.subr.bf16.mxu0 %v3602_v20  ;;  %v2482_v20 = vld [vmem:[#allocation11 + $0x588] sm:$0xff] }
 0x84f   : > { %v3642_v0 = vpack.c.bf16 %v2484_v21, %v2482_v20 }
 0x851   : > { %3605 = vmatpush1.bf16.msra.mxu0 %v3604_v23  ;;  %v2486_v23 = vld [vmem:[#allocation11 + $0x5a8] sm:$0xff] }
 0x852   : > { %3607 = vmatprep.subr.bf16.mxu0 %v3606_v1  ;;  %v2488_v1 = vld [vmem:[#allocation11 + $0x5b8] sm:$0xff] }
 0x853   : > { %v3646_v25 = vpack.c.bf16 %v2488_v1, %v2486_v23  ;;  %v2499_v23 = vld [vmem:[#allocation11 + $0x610] sm:$0xff] }
 0x855   : > { %3609 = vmatpush1.bf16.msra.mxu0 %v3608_v28  ;;  %v2490_v28 = vld [vmem:[#allocation11 + $0x5c8] sm:$0xff] }
 0x856   : > { %3611 = vmatprep.subr.bf16.mxu0 %v3610_v29  ;;  %v2492_v29 = vld [vmem:[#allocation11 + $0x5d8] sm:$0xff] }
 0x857   : > { %v3650_v31 = vpack.c.bf16 %v2492_v29, %v2490_v28 }
 0x859   : > { %3613 = vmatpush1.bf16.msra.mxu0 %v3612_v34  ;;  %v2494_v34 = vld [vmem:[#allocation11 + $0x5e8] sm:$0xff] }
 0x85a   : > { %3615 = vmatprep.subr.bf16.mxu0 %v3614_v35  ;;  %v2496_v35 = vld [vmem:[#allocation11 + $0x5f8] sm:$0xff] }
 0x85b   : > { %v3654_v37 = vpack.c.bf16 %v2496_v35, %v2494_v34  ;;  %v3662_v34 = vpack.c.bf16 %v2504_v27, %v2502_v26  ;;  %v2501_v35 = vld [vmem:[#allocation11 + $0x620] sm:$0xff] }
 0x85d   : > { %3617 = vmatpush1.bf16.msra.mxu0 %v3616_v39  ;;  %v3656_v39 = vpack.c.bf16 %v2495_v49, %v2493_v38  ;;  %v2506_v38 = vld [vmem:[#allocation11 + $0x648] sm:$0xff]  ;;  %v2508_v49 = vld [vmem:[#allocation11 + $0x658] sm:$0xff] }
 0x85e   : > { %3619 = vmatprep.subr.bf16.mxu0 %v3618_v40  ;;  %v2498_v40 = vld [vmem:[#allocation11 + $0x608] sm:$0xff] }
 0x85f   : > { %v3658_v42 = vpack.c.bf16 %v2500_v41, %v2498_v40  ;;  %v3666_v40 = vpack.c.bf16 %v2508_v49, %v2506_v38  ;;  %v2505_v41 = vld [vmem:[#allocation11 + $0x640] sm:$0xff]  ;;  %v2535_v38 = vld [vmem:[#allocation11 + $0x730] sm:$0xff]  ;;  %v2538_v49 = vld [vmem:[#allocation11 + $0x748] sm:$0xff] }
 0x861   : > { %3621 = vmatpush1.bf16.msra.mxu0 %v3620_v45 }
 0x862   : > { %3623 = vmatprep.subr.bf16.mxu0 %v3622_v46 }
 0x865   : > { %3625 = vmatpush1.bf16.msra.mxu0 %v3624_v54  ;;  %v2250_v54 = vrot.slane %v2233_v47, %v4586_v18  ;;  %v2510_v47 = vld [vmem:[#allocation11 + $0x668] sm:$0xff] }
 0x866   : > { %3627 = vmatprep.subr.bf16.mxu0 %v3626_v55 }
 0x869   : > { %3629 = vmatpush1.bf16.msra.mxu0 %v3628_v60 }
 0x86a   : > { %3631 = vmatprep.subr.bf16.mxu0 %v3630_v62 }
 0x86d   : > { %3633 = vmatpush1.bf16.msra.mxu0 %v3632_v5 }
 0x86e   : > { %3635 = vmatprep.subr.bf16.mxu0 %v3634_v7 }
 0x871   : > { %3637 = vmatpush1.bf16.msra.mxu0 %v3636_v10 }
 0x872   : > { %3639 = vmatprep.subr.bf16.mxu0 %v3638_v13 }
 0x875   : > { %3641 = vmatpush1.bf16.msra.mxu0 %v3640_v16 }
 0x876   : > { %3643 = vmatprep.subr.bf16.mxu0 %v3642_v0 }
 0x879   : > { %3645 = vmatpush1.bf16.msra.mxu0 %v3644_v24 }
 0x87a   : > { %3647 = vmatprep.subr.bf16.mxu0 %v3646_v25 }
 0x87d   : > { %3649 = vmatpush1.bf16.msra.mxu0 %v3648_v30 }
 0x87e   : > { %3651 = vmatprep.subr.bf16.mxu0 %v3650_v31  ;;  %v3660_v31 = vpack.c.bf16 %v2499_v23, %v2497_v22  ;;  %v2525_v23 = vld [vmem:[#allocation11 + $0x6e0] sm:$0xff] }
 0x881   : > { %3653 = vmatpush1.bf16.msra.mxu0 %v3652_v36  ;;  %v2503_v36 = vld [vmem:[#allocation11 + $0x630] sm:$0xff] }
 0x882   : > { %3655 = vmatprep.subr.bf16.mxu0 %v3654_v37 }
 0x885   : > { %3657 = vmatpush1.bf16.msra.mxu0 %v3656_v39  ;;  %v3664_v39 = vpack.c.bf16 %v2503_v36, %v2501_v35 }
 0x886   : > { %3659 = vmatprep.subr.bf16.mxu0 %v3658_v42  ;;  %v2507_v42 = vld [vmem:[#allocation11 + $0x650] sm:$0xff] }
 0x8db   : > { %v4655_v43 = vpop.f32.mrb[4].mxu0  ;;  %v4657_v44 = vpop.f32.mrb[12].mxu1 }
 0x8dc   : > { %v4659_v45 = vpop.f32.mrb[5].mxu0  ;;  %v4661_v46 = vpop.f32.mrb[13].mxu1 }
 0x91b   : > { %v2321_v55 = vpop.f32.mrb[6].mxu0  ;;  %v2392_v19 = vpop.f32.mrb[14].mxu1 }
 0x91c   : > { %v2322_v59 = vadd.f32 %v2321_v55, %v2238_v48  ;;  %v4670_v60 = vadd.f32 %v2392_v19, %v2246_v52  ;;  %v2323_v61 = vpop.f32.mrb[7].mxu0  ;;  %v2394_v6 = vpop.f32.mrb[15].mxu1  ;;  %v2512_v48 = vld [vmem:[#allocation11 + $0x678] sm:$0xff]  ;;  %v3668_v52 = vpack.c.bf16 %v2507_v42, %v2505_v41  ;;  %v2511_v55 = vld [vmem:[#allocation11 + $0x670] sm:$0xff]  ;;  %v2514_v19 = vld [vmem:[#allocation11 + $0x688] sm:$0xff] }
 0x91d   : > { %v2324_v62 = vadd.f32 %v2323_v61, %v2242_v53  ;;  %v2395_v63 = vadd.f32 %v2394_v6, %v2250_v54  ;;  %v3670_v53 = vpack.c.bf16 %v2512_v48, %v2510_v47  ;;  %v2509_v54 = vld [vmem:[#allocation11 + $0x660] sm:$0xff]  ;;  %v2539_v48 = vld [vmem:[#allocation11 + $0x750] sm:$0xff] }
 0x91e   : > { %v2401_v2 = vmul.f32 0.044715, %v2322_v59  ;;  %v2397_v28 = vmul.f32 0.5, %v2322_v59  ;;  %v3672_v61 = vpack.c.bf16 %v2511_v55, %v2509_v54  ;;  %v2403_v26 = vmul.f32 0.044715, %v4670_v60  ;;  %v2537_v47 = vld [vmem:[#allocation11 + $0x740] sm:$0xff] }
 0x91f   : > { %v2402_v5 = vmul.f32 0.044715, %v2324_v62  ;;  %v2404_v3 = vmul.f32 0.044715, %v2395_v63  ;;  %v2398_v24 = vmul.f32 0.5, %v2324_v62  ;;  %v2400_v32 = vmul.f32 0.5, %v2395_v63 }
 0x920   : > { %v2405_v4 = vmul.f32 %v2401_v2, %v2322_v59  ;;  %v2518_v2 = vld [vmem:[#allocation11 + $0x6a8] sm:$0xff]  ;;  %v2544_v54 = vld [vmem:[#allocation11 + $0x778] sm:$0xff] }
 0x921   : > { %v2406_v7 = vmul.f32 %v2402_v5, %v2324_v62  ;;  %v2408_v8 = vmul.f32 %v2404_v3, %v2395_v63  ;;  %v2520_v5 = vld [vmem:[#allocation11 + $0x6b8] sm:$0xff] }
 0x922   : > { %v2409_v11 = vmul.f32 %v2405_v4, %v2322_v59  ;;  %v3678_v4 = vpack.c.bf16 %v2520_v5, %v2518_v2  ;;  %v2548_v2 = vld [vmem:[#allocation11 + $0x798] sm:$0xff] }
 0x923   : > { %v2410_v10 = vmul.f32 %v2406_v7, %v2324_v62  ;;  %v2412_v12 = vmul.f32 %v2408_v8, %v2395_v63  ;;  %v2517_v7 = vld [vmem:[#allocation11 + $0x6a0] sm:$0xff]  ;;  %v2519_v8 = vld [vmem:[#allocation11 + $0x6b0] sm:$0xff] }
 0x924   : > { %v2413_v9 = vadd.f32 %v2409_v11, %v2322_v59  ;;  %v2516_v59 = vld [vmem:[#allocation11 + $0x698] sm:$0xff]  ;;  %v4675_v11 = vld [vmem:[%s4836_s30] sm:$0xf] }
 0x925   : > { %v2414_v13 = vadd.f32 %v2410_v10, %v2324_v62  ;;  %v2416_v14 = vadd.f32 %v2412_v12, %v2395_v63  ;;  %v3674_v6 = vpack.c.bf16 %v2516_v59, %v2514_v19  ;;  %v2513_v62 = vld [vmem:[#allocation11 + $0x680] sm:$0xff]  ;;  %v2515_v63 = vld [vmem:[#allocation11 + $0x690] sm:$0xff]  ;;  %v2522_v10 = vld [vmem:[#allocation11 + $0x6c8] sm:$0xff]  ;;  %v3700_v19 = vpack.c.bf16 %v2539_v48, %v2537_v47 }
 0x926   : > { %v2417_v15 = vmul.f32 0.7978846, %v2413_v9  ;;  %v3676_v3 = vpack.c.bf16 %v2515_v63, %v2513_v62  ;;  %v2524_v12 = vld [vmem:[#allocation11 + $0x6d8] sm:$0xff]  ;;  %v3680_v9 = vpack.c.bf16 %v2519_v8, %v2517_v7  ;;  %v2546_v63 = vld [vmem:[#allocation11 + $0x788] sm:$0xff]  ;;  %v2545_v7 = vld [vmem:[#allocation11 + $0x780] sm:$0xff] }
 0x927   : > { %v2418_v16 = vmul.f32 0.7978846, %v2414_v13  ;;  %v2420_v20 = vmul.f32 0.7978846, %v2416_v14  ;;  %v1786_v13 = vrot.slane %v4675_v11, %v4551_v50  ;;  %v3682_v14 = vpack.c.bf16 %v2524_v12, %v2522_v10  ;;  %v2547_v8 = vld [vmem:[#allocation11 + $0x790] sm:$0xff]  ;;  %v2550_v12 = vld [vmem:[#allocation11 + $0x7a8] sm:$0xff] }
 0x928   : > { %3966 = vtanh.f32 %v2417_v15  ;;  %v2521_v15 = vld [vmem:[#allocation11 + $0x6c0] sm:$0xff] }
 0x929   : > { %3968 = vtanh.f32 %v2418_v16  ;;  %v2523_v16 = vld [vmem:[#allocation11 + $0x6d0] sm:$0xff] }
 0x92a   : > { %3970 = vtanh.f32 %v2420_v20  ;;  %v2526_v20 = vld [vmem:[#allocation11 + $0x6e8] sm:$0xff] }
 0x932   : > { %v3967_v21 = vpop.eup %3966 }
 0x933   : > { %v3969_v57 = vpop.eup %3968  ;;  %v2425_v0 = vadd.f32 1.0, %v3967_v21  ;;  %v2528_v21 = vld [vmem:[#allocation11 + $0x6f8] sm:$0xff] }
 0x934   : > { %v3971_v1 = vpop.eup %3970  ;;  %v2426_v25 = vadd.f32 1.0, %v3969_v57  ;;  %v3684_v57 = vpack.c.bf16 %v2523_v16, %v2521_v15  ;;  %v3686_v22 = vpack.c.bf16 %v2528_v21, %v2526_v20  ;;  %v2549_v15 = vld [vmem:[#allocation11 + $0x7a0] sm:$0xff]  ;;  %v2551_v16 = vld [vmem:[#allocation11 + $0x7b0] sm:$0xff]  ;;  %v2554_v20 = vld [vmem:[#allocation11 + $0x7c8] sm:$0xff] }
 0x935   : > { %v2428_v29 = vadd.f32 1.0, %v3971_v1  ;;  %v2429_v33 = vmul.f32 %v2425_v0, %v2397_v28  ;;  %v4680_v0 = vadd.f32 %v4659_v45, %v1786_v13  ;;  %v2527_v1 = vld [vmem:[#allocation11 + $0x6f0] sm:$0xff]  ;;  %v2407_v45 = vmul.f32 %v2403_v26, %v4670_v60  ;;  %v2556_v21 = vld [vmem:[#allocation11 + $0x7d8] sm:$0xff] }
 0x936   : > { %v2430_v30 = vmul.f32 %v2426_v25, %v2398_v24  ;;  %v2530_v24 = vld [vmem:[#allocation11 + $0x708] sm:$0xff]  ;;  %v2532_v25 = vld [vmem:[#allocation11 + $0x718] sm:$0xff]  ;;  %v3688_v27 = vpack.c.bf16 %v2527_v1, %v2525_v23  ;;  %v3708_v13 = vpack.c.bf16 %v2547_v8, %v2545_v7  ;;  %v2553_v23 = vld [vmem:[#allocation11 + $0x7c0] sm:$0xff] }
 0x937   : > { %v2432_v37 = vmul.f32 %v2428_v29, %v2400_v32  ;;  %v1946_v28 = vmul.f32 0.044715, %v4680_v0  ;;  %v3690_v29 = vpack.c.bf16 %v2532_v25, %v2530_v24  ;;  %v2534_v32 = vld [vmem:[#allocation11 + $0x728] sm:$0xff]  ;;  %v2555_v1 = vld [vmem:[#allocation11 + $0x7d0] sm:$0xff]  ;;  %v2560_v25 = vld [vmem:[#allocation11 + $0x7f8] sm:$0xff] }
 0x938   : > { %2625 = vmatprep.mubr.f32.mxu0 %v2430_v30  ;;  %v2529_v30 = vld [vmem:[#allocation11 + $0x700] sm:$0xff]  ;;  %v2558_v24 = vld [vmem:[#allocation11 + $0x7e8] sm:$0xff]  ;;  %v3716_v26 = vpack.c.bf16 %v2555_v1, %v2553_v23  ;;  %v1996_v8 = vld [vmem:[#allocation11 + $0x98] sm:$0xff]  ;;  %v1782_v1 = vrot.slane %v4675_v11, %v4554_v51 }
 0x939   : > { %2626 = vmatmul.mubr.f32.vlgmr.msra.gmra.mrb[8].mxu0 %v2429_v33  ;;  %v2536_v33 = vld [vmem:[#allocation11 + $0x738] sm:$0xff]  ;;  %v1950_v35 = vmul.f32 %v1946_v28, %v4680_v0  ;;  %v2557_v28 = vld [vmem:[#allocation11 + $0x7e0] sm:$0xff]  ;;  %v1994_v7 = vld [vmem:[#allocation11 + $0x88] sm:$0xff] }
 0x93a   : > { %3661 = vmatpush1.bf16.msra.mxu0 %v3660_v31  ;;  %2696 = vmatprep.mubr.f32.mxu0 %v2432_v37  ;;  %v2531_v31 = vld [vmem:[#allocation11 + $0x710] sm:$0xff]  ;;  %v3694_v36 = vpack.c.bf16 %v2536_v33, %v2534_v32  ;;  %v2533_v37 = vld [vmem:[#allocation11 + $0x720] sm:$0xff]  ;;  %v1980_v32 = vld [vmem:[#allocation11 + $0x18] sm:$0xff] }
 0x93b   : > { %3663 = vmatprep.subr.bf16.mxu0 %v3662_v34  ;;  %v3692_v34 = vpack.c.bf16 %v2531_v31, %v2529_v30  ;;  %v3696_v41 = vpack.c.bf16 %v2535_v38, %v2533_v37  ;;  %v1978_v31 = vld [vmem:[#allocation11 + $0x8] sm:$0xff]  ;;  %v1979_v37 = vld [vmem:[#allocation11 + $0x10] sm:$0xff]  ;;  %v2004_v23 = vld [vmem:[#allocation11 + $0xd8] sm:$0xff] }
 0x93e   : > { %3665 = vmatpush1.bf16.msra.mxu0 %v3664_v39  ;;  %v2540_v39 = vld [vmem:[#allocation11 + $0x758] sm:$0xff] }
 0x93f   : > { %3667 = vmatprep.subr.bf16.mxu0 %v3666_v40  ;;  %v2411_v40 = vmul.f32 %v2407_v45, %v4670_v60  ;;  %v3698_v42 = vpack.c.bf16 %v2540_v39, %v2538_v49  ;;  %v1982_v49 = vld [vmem:[#allocation11 + $0x28] sm:$0xff]  ;;  %v1984_v39 = vld [vmem:[#allocation11 + $0x38] sm:$0xff] }
 0x940   : > { %v3726_v48 = vpack.c.bf16 %v1984_v39, %v1982_v49  ;;  %v2009_v39 = vld [vmem:[#allocation11 + $0x100] sm:$0xff] }
 0x941   : > { %v2415_v55 = vadd.f32 %v2411_v40, %v4670_v60  ;;  %v2399_v40 = vmul.f32 0.5, %v4670_v60 }
 0x942   : > { %3669 = vmatpush1.bf16.msra.mxu0 %v3668_v52  ;;  %v1954_v52 = vmul.f32 %v1950_v35, %v4680_v0  ;;  %v3722_v35 = vpack.c.bf16 %v1980_v32, %v1978_v31  ;;  %v4701_v31 = vadd.f32 %v4655_v43, %v1782_v1 }
 0x943   : > { %3671 = vmatprep.subr.bf16.mxu0 %v3670_v53  ;;  %v2542_v53 = vld [vmem:[#allocation11 + $0x768] sm:$0xff] }
 0x944   : > { %v3702_v59 = vpack.c.bf16 %v2544_v54, %v2542_v53  ;;  %v1958_v62 = vadd.f32 %v1954_v52, %v4680_v0  ;;  %v1981_v52 = vld [vmem:[#allocation11 + $0x20] sm:$0xff]  ;;  %v1983_v53 = vld [vmem:[#allocation11 + $0x30] sm:$0xff] }
 0x945   : > { %v3728_v60 = vpack.c.bf16 %v1983_v53, %v1981_v52  ;;  %v2013_v53 = vld [vmem:[#allocation11 + $0x120] sm:$0xff] }
 0x946   : > { %3673 = vmatpush1.bf16.msra.mxu0 %v3672_v61  ;;  %v2541_v61 = vld [vmem:[#allocation11 + $0x760] sm:$0xff]  ;;  %v1962_v10 = vmul.f32 0.7978846, %v1958_v62  ;;  %v1990_v62 = vld [vmem:[#allocation11 + $0x68] sm:$0xff] }
 0x947   : > { %3675 = vmatprep.subr.bf16.mxu0 %v3674_v6  ;;  %v2543_v6 = vld [vmem:[#allocation11 + $0x770] sm:$0xff] }
 0x948   : > { %v3704_v5 = vpack.c.bf16 %v2543_v6, %v2541_v61  ;;  %v1987_v6 = vld [vmem:[#allocation11 + $0x50] sm:$0xff] }
 0x94a   : > { %3677 = vmatpush1.bf16.msra.mxu0 %v3676_v3  ;;  %v2419_v3 = vmul.f32 0.7978846, %v2415_v55  ;;  %v1986_v55 = vld [vmem:[#allocation11 + $0x48] sm:$0xff] }
 0x94b   : > { %3679 = vmatprep.subr.bf16.mxu0 %v3678_v4  ;;  %v3706_v4 = vpack.c.bf16 %v2548_v2, %v2546_v63  ;;  %v1992_v63 = vld [vmem:[#allocation11 + $0x78] sm:$0xff] }
 0x94c   : > { %3972 = vtanh.f32 %v2419_v3  ;;  %v1989_v3 = vld [vmem:[#allocation11 + $0x60] sm:$0xff] }
 0x94d   : > { %3974 = vtanh.f32 %v1962_v10 }
 0x94e   : > { %3681 = vmatpush1.bf16.msra.mxu0 %v3680_v9  ;;  %v2552_v9 = vld [vmem:[#allocation11 + $0x7b8] sm:$0xff] }
 0x94f   : > { %3683 = vmatprep.subr.bf16.mxu0 %v3682_v14  ;;  %v3710_v14 = vpack.c.bf16 %v2552_v9, %v2550_v12  ;;  %v3738_v12 = vpack.c.bf16 %v1996_v8, %v1994_v7  ;;  %v1993_v9 = vld [vmem:[#allocation11 + $0x80] sm:$0xff]  ;;  %v2023_v8 = vld [vmem:[#allocation11 + $0x170] sm:$0xff] }
 0x950   : > { %v2021_v7 = vld [vmem:[#allocation11 + $0x160] sm:$0xff] }
 0x952   : > { %3685 = vmatpush1.bf16.msra.mxu0 %v3684_v57  ;;  %v3712_v57 = vpack.c.bf16 %v2551_v16, %v2549_v15  ;;  %v2000_v15 = vld [vmem:[#allocation11 + $0xb8] sm:$0xff] }
 0x953   : > { %3687 = vmatprep.subr.bf16.mxu0 %v3686_v22  ;;  %v3714_v22 = vpack.c.bf16 %v2556_v21, %v2554_v20  ;;  %v1997_v21 = vld [vmem:[#allocation11 + $0xa0] sm:$0xff] }
 0x956   : > { %3689 = vmatpush1.bf16.msra.mxu0 %v3688_v27  ;;  %v3718_v27 = vpack.c.bf16 %v2560_v25, %v2558_v24  ;;  %v3973_v30 = vpop.eup %3972  ;;  %v1794_v25 = vrot.slane %v4675_v11, %v4586_v18  ;;  %v2012_v18 = vld [vmem:[#allocation11 + $0x118] sm:$0xff] }
 0x957   : > { %3691 = vmatprep.subr.bf16.mxu0 %v3690_v29  ;;  %v2559_v29 = vld [vmem:[#allocation11 + $0x7f0] sm:$0xff]  ;;  %v3975_v33 = vpop.eup %3974 }
 0x958   : > { %v3720_v45 = vpack.c.bf16 %v2559_v29, %v2557_v28  ;;  %v1970_v38 = vadd.f32 1.0, %v3975_v33  ;;  %v2003_v28 = vld [vmem:[#allocation11 + $0xd0] sm:$0xff]  ;;  %v2006_v29 = vld [vmem:[#allocation11 + $0xe8] sm:$0xff]  ;;  %v4704_v33 = vadd.f32 %v4661_v46, %v1794_v25 }
 0x959   : > { %v2031_v25 = vld [vmem:[#allocation11 + $0x1b0] sm:$0xff] }
 0x95a   : > { %3693 = vmatpush1.bf16.msra.mxu0 %v3692_v34  ;;  %v2427_v34 = vadd.f32 1.0, %v3973_v30  ;;  %v2008_v30 = vld [vmem:[#allocation11 + $0xf8] sm:$0xff]  ;;  %v1948_v49 = vmul.f32 0.044715, %v4704_v33 }
 0x95b   : > { %3695 = vmatprep.subr.bf16.mxu0 %v3694_v36  ;;  %v1977_v36 = vld [vmem:[#allocation11] sm:$0xff] }
 0x95c   : > { %v2431_v47 = vmul.f32 %v2427_v34, %v2399_v40  ;;  %v2005_v34 = vld [vmem:[#allocation11 + $0xe0] sm:$0xff]  ;;  %v2011_v40 = vld [vmem:[#allocation11 + $0x110] sm:$0xff] }
 0x95e   : > { %3697 = vmatpush1.bf16.msra.mxu0 %v3696_v41  ;;  %v3724_v41 = vpack.c.bf16 %v1979_v37, %v1977_v36  ;;  %v2010_v36 = vld [vmem:[#allocation11 + $0x108] sm:$0xff]  ;;  %v1945_v37 = vmul.f32 0.044715, %v4701_v31 }
 0x95f   : > { %3699 = vmatprep.subr.bf16.mxu0 %v3698_v42  ;;  %v1942_v42 = vmul.f32 0.5, %v4680_v0  ;;  %v1985_v0 = vld [vmem:[#allocation11 + $0x40] sm:$0xff]  ;;  %v3754_v43 = vpack.c.bf16 %v2012_v18, %v2010_v36 }
 0x960   : > { %v3732_v2 = vpack.c.bf16 %v1987_v6, %v1985_v0  ;;  %v1949_v46 = vmul.f32 %v1945_v37, %v4701_v31  ;;  %v2017_v0 = vld [vmem:[#allocation11 + $0x140] sm:$0xff]  ;;  %v2019_v6 = vld [vmem:[#allocation11 + $0x150] sm:$0xff] }
 0x961   : > { %v1974_v54 = vmul.f32 %v1970_v38, %v1942_v42  ;;  %v2016_v42 = vld [vmem:[#allocation11 + $0x138] sm:$0xff]  ;;  %v2037_v18 = vld [vmem:[#allocation11 + $0x1e0] sm:$0xff]  ;;  %v2039_v37 = vld [vmem:[#allocation11 + $0x1f0] sm:$0xff] }
 0x962   : > { %3701 = vmatpush1.bf16.msra.mxu0 %v3700_v19  ;;  %v1988_v19 = vld [vmem:[#allocation11 + $0x58] sm:$0xff] }
 0x963   : > { %3703 = vmatprep.subr.bf16.mxu0 %v3702_v59  ;;  %v3046_v59 = vld [vmem:[%s637_s17] ss:$0 sm:$0xff]  ;;  %v3730_v61 = vpack.c.bf16 %v1988_v19, %v1986_v55  ;;  %v2018_v55 = vld [vmem:[#allocation11 + $0x148] sm:$0xff]  ;;  %v2020_v19 = vld [vmem:[#allocation11 + $0x158] sm:$0xff]  ;;  %s4216_s17 = smov [#allocation12]  }
 0x964   : > { %2866 = vperm.xlu1 %3953, %v3046_v59   ;;  %s4130_s10 = sshll.u32 %s4216_s17, 4  ;;  %s4131_s10 = int_to_ptr.vmem [resolvable:$false] %s4130_s10 }
 0x965   : > { %s4132_s15 = scalar_lea.vmem %s4131_s10, 512  ;;  %p4133_p1 = scmp.lt.s32.totalorder %s4741_s11, %s4131_s10 }
 0x966   : > { %3705 = vmatpush1.bf16.msra.mxu0 %v3704_v5  ;;  %v3734_v5 = vpack.c.bf16 %v1992_v63, %v1990_v62  ;;  %v2022_v63 = vld [vmem:[#allocation11 + $0x168] sm:$0xff]  ;;  %p4134_p11 = scmp.lt.s32.totalorder %s4132_s15, %s4126_s26 }
 0x967   : > { %3707 = vmatprep.subr.bf16.mxu0 %v3706_v4  ;;  %v1991_v4 = vld [vmem:[#allocation11 + $0x70] sm:$0xff] }
 0x968   : > { %v3736_v10 = vpack.c.bf16 %v1991_v4, %v1989_v3  ;;  %v3764_v3 = vpack.c.bf16 %v2019_v6, %v2017_v0  ;;  %v2047_v0 = vld [vmem:[#allocation11 + $0x230] sm:$0xff]  ;;  %p4135_p12 = por %p4134_p11, %p4133_p1 }
 0x96a   : > { %3709 = vmatpush1.bf16.msra.mxu0 %v3708_v13  ;;  %v1995_v13 = vld [vmem:[#allocation11 + $0x90] sm:$0xff]  ;;  %p4136_p13 = pnand %p4135_p12, %p4129_p10 }
 0x96b   : > { %3711 = vmatprep.subr.bf16.mxu0 %v3710_v14  ;;  %v1998_v14 = vld [vmem:[#allocation11 + $0xa8] sm:$0xff]  ;;  %v3740_v16 = vpack.c.bf16 %v1995_v13, %v1993_v9  ;;  %v2028_v9 = vld [vmem:[#allocation11 + $0x198] sm:$0xff]  ;;  %v3768_v13 = vpack.c.bf16 %v2023_v8, %v2021_v7 }
 0x96c   : > { %v3742_v20 = vpack.c.bf16 %v2000_v15, %v1998_v14  ;;  %v2056_v7 = vld [vmem:[#allocation11 + $0x278] sm:$0xff] }
 0x96e   : > { %3713 = vmatpush1.bf16.msra.mxu0 %v3712_v57  ;;  %v1999_v57 = vld [vmem:[#allocation11 + $0xb0] sm:$0xff] }
 0x96f   : > { %3715 = vmatprep.subr.bf16.mxu0 %v3714_v22  ;;  %v2002_v22 = vld [vmem:[#allocation11 + $0xc8] sm:$0xff]  ;;  %v3744_v24 = vpack.c.bf16 %v1999_v57, %v1997_v21 }
 0x970   : > { %v2030_v57 = vld [vmem:[#allocation11 + $0x1a8] sm:$0xff] }
 0x972   : > { %3717 = vmatpush1.bf16.msra.mxu0 %v3716_v26  ;;  %v3746_v26 = vpack.c.bf16 %v2004_v23, %v2002_v22  ;;  %v2032_v22 = vld [vmem:[#allocation11 + $0x1b8] sm:$0xff] }
 0x973   : > { %3719 = vmatprep.subr.bf16.mxu0 %v3718_v27  ;;  %v2001_v27 = vld [vmem:[#allocation11 + $0xc0] sm:$0xff]  ;;  %v3774_v1 = vpack.c.bf16 %v2032_v22, %v2030_v57  ;;  %v2064_v57 = vld [vmem:[#allocation11 + $0x2b8] sm:$0xff] }
 0x974   : > { %v3748_v32 = vpack.c.bf16 %v2003_v28, %v2001_v27  ;;  %v2036_v27 = vld [vmem:[#allocation11 + $0x1d8] sm:$0xff] }
 0x976   : > { %3721 = vmatpush1.bf16.msra.mxu0 %v3720_v45  ;;  %v3750_v45 = vpack.c.bf16 %v2008_v30, %v2006_v29  ;;  %v2033_v30 = vld [vmem:[#allocation11 + $0x1c0] sm:$0xff] }
 0x977   : > { %3723 = vmatprep.subr.bf16.mxu0 %v3722_v35  ;;  %v2007_v35 = vld [vmem:[#allocation11 + $0xf0] sm:$0xff] }
 0x978   : > { %v3752_v38 = vpack.c.bf16 %v2007_v35, %v2005_v34  ;;  %v2040_v34 = vld [vmem:[#allocation11 + $0x1f8] sm:$0xff] }
 0x979   : > { %2697 = vmatmul.mubr.f32.vlgmr.msra.gmra.mrb[8].mxu0 %v2431_v47  ;;  %v3756_v47 = vpack.c.bf16 %v2011_v40, %v2009_v39  ;;  %v3784_v40 = vpack.c.bf16 %v2039_v37, %v2037_v18  ;;  %v2069_v37 = vld [vmem:[#allocation11 + $0x2e0] sm:$0xff] }
 0x97a   : > { %3725 = vmatpush1.bf16.msra.mxu0 %v3724_v41  ;;  %2767 = vmatprep.mubr.f32.mxu0 %v1974_v54  ;;  %v2014_v41 = vld [vmem:[#allocation11 + $0x128] sm:$0xff]  ;;  %v2015_v54 = vld [vmem:[#allocation11 + $0x130] sm:$0xff] }
 0x97b   : > { %3727 = vmatprep.subr.bf16.mxu0 %v3726_v48  ;;  %v1952_v48 = vmul.f32 %v1948_v49, %v4704_v33  ;;  %v3758_v52 = vpack.c.bf16 %v2016_v42, %v2014_v41  ;;  %v3760_v59 = vpack.c.bf16 %v2015_v54, %v2013_v53  ;;  %v2042_v49 = vld [vmem:[#allocation11 + $0x208] sm:$0xff]  ;;  %v2048_v53 = vld [vmem:[#allocation11 + $0x238] sm:$0xff]  ;;  %v1941_v54 = vmul.f32 0.5, %v4701_v31 }
 0x97d   : > { %v1956_v62 = vmul.f32 %v1952_v48, %v4704_v33 }
 0x97e   : > { %3729 = vmatpush1.bf16.msra.mxu0 %v3728_v60  ;;  %v1953_v60 = vmul.f32 %v1949_v46, %v4701_v31  ;;  %v2041_v46 = vld [vmem:[#allocation11 + $0x200] sm:$0xff] }
 0x97f   : > { %3731 = vmatprep.subr.bf16.mxu0 %v3730_v61  ;;  %v3762_v61 = vpack.c.bf16 %v2020_v19, %v2018_v55  ;;  %v1944_v19 = vmul.f32 0.5, %v4704_v33 }
 0x982   : > { %3733 = vmatpush1.bf16.msra.mxu0 %v3732_v2  ;;  %v2024_v2 = vld [vmem:[#allocation11 + $0x178] sm:$0xff] }
 0x983   : > { %3735 = vmatprep.subr.bf16.mxu0 %v3734_v5  ;;  %v1957_v5 = vadd.f32 %v1953_v60, %v4701_v31  ;;  %v3766_v4 = vpack.c.bf16 %v2024_v2, %v2022_v63  ;;  %v2052_v63 = vld [vmem:[#allocation11 + $0x258] sm:$0xff]  ;;  %v2051_v31 = vld [vmem:[#allocation11 + $0x250] sm:$0xff] }
 0x985   : > { %v1961_v14 = vmul.f32 0.7978846, %v1957_v5 }
 0x986   : > { %3737 = vmatpush1.bf16.msra.mxu0 %v3736_v10  ;;  %v1960_v10 = vadd.f32 %v1956_v62, %v4704_v33  ;;  %v2050_v62 = vld [vmem:[#allocation11 + $0x248] sm:$0xff] }
 0x987   : > { %3739 = vmatprep.subr.bf16.mxu0 %v3738_v12  ;;  %v2026_v12 = vld [vmem:[#allocation11 + $0x188] sm:$0xff]  ;;  %3976 = vtanh.f32 %v1961_v14  ;;  %v3794_v5 = vpack.c.bf16 %v2052_v63, %v2050_v62  ;;  %v2088_v62 = vld [vmem:[#allocation11 + $0x378] sm:$0xff] }
 0x988   : > { %v3770_v15 = vpack.c.bf16 %v2028_v9, %v2026_v12  ;;  %v1964_v21 = vmul.f32 0.7978846, %v1960_v10  ;;  %v2053_v10 = vld [vmem:[#allocation11 + $0x260] sm:$0xff]  ;;  %v2055_v12 = vld [vmem:[#allocation11 + $0x270] sm:$0xff]  ;;  %v2058_v9 = vld [vmem:[#allocation11 + $0x288] sm:$0xff] }
 0x989   : > { %v3800_v14 = vpack.c.bf16 %v2055_v12, %v2053_v10  ;;  %v2089_v12 = vld [vmem:[#allocation11 + $0x380] sm:$0xff] }
 0x98a   : > { %3741 = vmatpush1.bf16.msra.mxu0 %v3740_v16  ;;  %v2025_v16 = vld [vmem:[#allocation11 + $0x180] sm:$0xff]  ;;  %3978 = vtanh.f32 %v1964_v21  ;;  %v2062_v21 = vld [vmem:[#allocation11 + $0x2a8] sm:$0xff] }
 0x98b   : > { %3743 = vmatprep.subr.bf16.mxu0 %v3742_v20  ;;  %v2027_v20 = vld [vmem:[#allocation11 + $0x190] sm:$0xff] }
 0x98c   : > { %v3772_v23 = vpack.c.bf16 %v2027_v20, %v2025_v16  ;;  %v2057_v16 = vld [vmem:[#allocation11 + $0x280] sm:$0xff]  ;;  %v2059_v20 = vld [vmem:[#allocation11 + $0x290] sm:$0xff] }
 0x98d   : > { %v3804_v22 = vpack.c.bf16 %v2059_v20, %v2057_v16  ;;  %v2093_v20 = vld [vmem:[#allocation11 + $0x3a0] sm:$0xff] }
 0x98e   : > { %3745 = vmatpush1.bf16.msra.mxu0 %v3744_v24  ;;  %v2029_v24 = vld [vmem:[#allocation11 + $0x1a0] sm:$0xff] }
 0x98f   : > { %3747 = vmatprep.subr.bf16.mxu0 %v3746_v26  ;;  %v2034_v26 = vld [vmem:[#allocation11 + $0x1c8] sm:$0xff]  ;;  %v3776_v28 = vpack.c.bf16 %v2031_v25, %v2029_v24  ;;  %v2063_v24 = vld [vmem:[#allocation11 + $0x2b0] sm:$0xff] }
 0x990   : > { %v3778_v29 = vpack.c.bf16 %v2036_v27, %v2034_v26  ;;  %v2066_v25 = vld [vmem:[#allocation11 + $0x2c8] sm:$0xff]  ;;  %v2068_v26 = vld [vmem:[#allocation11 + $0x2d8] sm:$0xff]  ;;  %v1790_v27 = vrot.slane %v4675_v11, %v4583_v17 }
 0x992   : > { %3749 = vmatpush1.bf16.msra.mxu0 %v3748_v32  ;;  %v2035_v32 = vld [vmem:[#allocation11 + $0x1d0] sm:$0xff] }
 0x993   : > { %3751 = vmatprep.subr.bf16.mxu0 %v3750_v45  ;;  %v2038_v45 = vld [vmem:[#allocation11 + $0x1e8] sm:$0xff]  ;;  %v3780_v35 = vpack.c.bf16 %v2035_v32, %v2033_v30  ;;  %v2065_v30 = vld [vmem:[#allocation11 + $0x2c0] sm:$0xff]  ;;  %v2067_v32 = vld [vmem:[#allocation11 + $0x2d0] sm:$0xff] }
 0x994   : > { %v3782_v36 = vpack.c.bf16 %v2040_v34, %v2038_v45  ;;  %v2070_v45 = vld [vmem:[#allocation11 + $0x2e8] sm:$0xff]  ;;  %v2072_v34 = vld [vmem:[#allocation11 + $0x2f8] sm:$0xff] }
 0x995   : > { %v3814_v18 = vpack.c.bf16 %v2072_v34, %v2070_v45 }
 0x996   : > { %3753 = vmatpush1.bf16.msra.mxu0 %v3752_v38  ;;  %v3977_v38 = vpop.eup %3976 }
 0x997   : > { %3755 = vmatprep.subr.bf16.mxu0 %v3754_v43  ;;  %v2044_v43 = vld [vmem:[#allocation11 + $0x218] sm:$0xff]  ;;  %v3979_v39 = vpop.eup %3978  ;;  %v1969_v41 = vadd.f32 1.0, %v3977_v38  ;;  %v2071_v38 = vld [vmem:[#allocation11 + $0x2f0] sm:$0xff] }
 0x998   : > { %v3786_v42 = vpack.c.bf16 %v2044_v43, %v2042_v49  ;;  %v1972_v48 = vadd.f32 1.0, %v3979_v39  ;;  %v2074_v49 = vld [vmem:[#allocation11 + $0x308] sm:$0xff]  ;;  %v2076_v43 = vld [vmem:[#allocation11 + $0x318] sm:$0xff]  ;;  %v3816_v11 = vpack.c.bf16 %v2071_v38, %v2069_v37  ;;  %v2845_v38 = vld [vmem:[%s4838_s20] sm:$0x3] }
 0x999   : > { %v1973_v60 = vmul.f32 %v1969_v41, %v1941_v54  ;;  %v3818_v39 = vpack.c.bf16 %v2076_v43, %v2074_v49  ;;  %v2075_v41 = vld [vmem:[#allocation11 + $0x310] sm:$0xff]  ;;  %v2082_v54 = vld [vmem:[#allocation11 + $0x348] sm:$0xff]  ;;  %v2850_v49 = vrot.slane %v2845_v38, %v4554_v51  ;;  %v2854_v43 = vrot.slane %v2845_v38, %v4551_v50 }
 0x99a   : > { %3757 = vmatpush1.bf16.msra.mxu0 %v3756_v47  ;;  %v2043_v47 = vld [vmem:[#allocation11 + $0x210] sm:$0xff]  ;;  %v1976_v6 = vmul.f32 %v1972_v48, %v1944_v19 }
 0x99b   : > { %3759 = vmatprep.subr.bf16.mxu0 %v3758_v52  ;;  %v2046_v52 = vld [vmem:[#allocation11 + $0x228] sm:$0xff]  ;;  %v3788_v55 = vpack.c.bf16 %v2043_v47, %v2041_v46  ;;  %v2080_v46 = vld [vmem:[#allocation11 + $0x338] sm:$0xff] }
 0x99e   : > { %3761 = vmatpush1.bf16.msra.mxu0 %v3760_v59  ;;  %v3790_v59 = vpack.c.bf16 %v2048_v53, %v2046_v52  ;;  %v2077_v52 = vld [vmem:[#allocation11 + $0x320] sm:$0xff]  ;;  %v2079_v53 = vld [vmem:[#allocation11 + $0x330] sm:$0xff] }
 0x99f   : > { %3763 = vmatprep.subr.bf16.mxu0 %v3762_v61  ;;  %v2045_v61 = vld [vmem:[#allocation11 + $0x220] sm:$0xff] }
 0x9a0   : > { %v3792_v2 = vpack.c.bf16 %v2047_v0, %v2045_v61  ;;  %v2081_v61 = vld [vmem:[#allocation11 + $0x340] sm:$0xff]  ;;  %v2083_v0 = vld [vmem:[#allocation11 + $0x350] sm:$0xff] }
 0x9a2   : > { %3765 = vmatpush1.bf16.msra.mxu0 %v3764_v3  ;;  %v2049_v3 = vld [vmem:[#allocation11 + $0x240] sm:$0xff] }
 0x9a3   : > { %3767 = vmatprep.subr.bf16.mxu0 %v3766_v4  ;;  %v2054_v4 = vld [vmem:[#allocation11 + $0x268] sm:$0xff]  ;;  %v3796_v33 = vpack.c.bf16 %v2051_v31, %v2049_v3  ;;  %v2085_v3 = vld [vmem:[#allocation11 + $0x360] sm:$0xff]  ;;  %v2087_v31 = vld [vmem:[#allocation11 + $0x370] sm:$0xff] }
 0x9a4   : > { %v3798_v8 = vpack.c.bf16 %v2056_v7, %v2054_v4  ;;  %v2090_v4 = vld [vmem:[#allocation11 + $0x388] sm:$0xff]  ;;  %v2092_v7 = vld [vmem:[#allocation11 + $0x398] sm:$0xff] }
 0x9a5   : > { %v3834_v10 = vpack.c.bf16 %v2092_v7, %v2090_v4 }
 0x9a6   : > { %3769 = vmatpush1.bf16.msra.mxu0 %v3768_v13  ;;  %v2060_v13 = vld [vmem:[#allocation11 + $0x298] sm:$0xff] }
 0x9a7   : > { %3771 = vmatprep.subr.bf16.mxu0 %v3770_v15  ;;  %v3802_v15 = vpack.c.bf16 %v2060_v13, %v2058_v9  ;;  %v2091_v9 = vld [vmem:[#allocation11 + $0x390] sm:$0xff]  ;;  %v2094_v13 = vld [vmem:[#allocation11 + $0x3a8] sm:$0xff] }
 0x9aa   : > { %3773 = vmatpush1.bf16.msra.mxu0 %v3772_v23  ;;  %v3806_v23 = vpack.c.bf16 %v2064_v57, %v2062_v21  ;;  %v2095_v21 = vld [vmem:[#allocation11 + $0x3b0] sm:$0xff]  ;;  %v2098_v57 = vld [vmem:[#allocation11 + $0x3c8] sm:$0xff] }
 0x9ab   : > { %3775 = vmatprep.subr.bf16.mxu0 %v3774_v1  ;;  %v2061_v1 = vld [vmem:[#allocation11 + $0x2a0] sm:$0xff] }
 0x9ae   : > { %3777 = vmatpush1.bf16.msra.mxu0 %v3776_v28  ;;  %v3808_v28 = vpack.c.bf16 %v2063_v24, %v2061_v1  ;;  %v2097_v24 = vld [vmem:[#allocation11 + $0x3c0] sm:$0xff] }
 0x9af   : > { %3779 = vmatprep.subr.bf16.mxu0 %v3778_v29  ;;  %v3810_v29 = vpack.c.bf16 %v2068_v26, %v2066_v25  ;;  %v2099_v25 = vld [vmem:[#allocation11 + $0x3d0] sm:$0xff]  ;;  %v2102_v26 = vld [vmem:[#allocation11 + $0x3e8] sm:$0xff] }
 0x9b2   : > { %3781 = vmatpush1.bf16.msra.mxu0 %v3780_v35  ;;  %v4719_v35 = vadd.f32 %v4657_v44, %v1790_v27  ;;  %v2104_v27 = vld [vmem:[#allocation11 + $0x3f8] sm:$0xff] }
 0x9b3   : > { %3783 = vmatprep.subr.bf16.mxu0 %v3782_v36  ;;  %v3812_v36 = vpack.c.bf16 %v2067_v32, %v2065_v30  ;;  %v2101_v30 = vld [vmem:[#allocation11 + $0x3e0] sm:$0xff]  ;;  %v2103_v32 = vld [vmem:[#allocation11 + $0x3f0] sm:$0xff] }
 0x9b4   : > { %v1947_v17 = vmul.f32 0.044715, %v4719_v35  ;;  %v3848_v34 = vpack.c.bf16 %v2103_v32, %v2101_v30 }
 0x9b6   : > { %3785 = vmatpush1.bf16.msra.mxu0 %v3784_v40  ;;  %v2073_v40 = vld [vmem:[#allocation11 + $0x300] sm:$0xff]  ;;  %v1951_v44 = vmul.f32 %v1947_v17, %v4719_v35 }
 0x9b7   : > { %3787 = vmatprep.subr.bf16.mxu0 %v3786_v42  ;;  %v2078_v42 = vld [vmem:[#allocation11 + $0x328] sm:$0xff]  ;;  %v3820_v47 = vpack.c.bf16 %v2075_v41, %v2073_v40 }
 0x9b8   : > { %v3822_v48 = vpack.c.bf16 %v2080_v46, %v2078_v42  ;;  %v1955_v19 = vmul.f32 %v1951_v44, %v4719_v35 }
 0x9b9   : > { %2768 = vmatmul.mubr.f32.vlgmr.msra.gmra.mrb[8].mxu0 %v1973_v60  ;;  %v3824_v60 = vpack.c.bf16 %v2079_v53, %v2077_v52 }
 0x9ba   : > { %3789 = vmatpush1.bf16.msra.mxu0 %v3788_v55  ;;  %2838 = vmatprep.mubr.f32.mxu0 %v1976_v6  ;;  %v2084_v55 = vld [vmem:[#allocation11 + $0x358] sm:$0xff]  ;;  %v2086_v6 = vld [vmem:[#allocation11 + $0x368] sm:$0xff]  ;;  %v1959_v63 = vadd.f32 %v1955_v19, %v4719_v35 }
 0x9bb   : > { %3791 = vmatprep.subr.bf16.mxu0 %v3790_v59  ;;  %v3826_v59 = vpack.c.bf16 %v2084_v55, %v2082_v54 }
 0x9be   : > { %3793 = vmatpush1.bf16.msra.mxu0 %v3792_v2  ;;  %v3828_v2 = vpack.c.bf16 %v2083_v0, %v2081_v61 }
 0x9bf   : > { %3795 = vmatprep.subr.bf16.mxu0 %v3794_v5  ;;  %v3830_v5 = vpack.c.bf16 %v2088_v62, %v2086_v6 }
 0x9c2   : > { %3797 = vmatpush1.bf16.msra.mxu0 %v3796_v33  ;;  %v3832_v33 = vpack.c.bf16 %v2087_v31, %v2085_v3 }
 0x9c3   : > { %3799 = vmatprep.subr.bf16.mxu0 %v3798_v8  ;;  %v1963_v8 = vmul.f32 0.7978846, %v1959_v63 }
 0x9c5   : > { %3980 = vtanh.f32 %v1963_v8 }
 0x9c6   : > { %3801 = vmatpush1.bf16.msra.mxu0 %v3800_v14  ;;  %v2096_v14 = vld [vmem:[#allocation11 + $0x3b8] sm:$0xff] }
 0x9c7   : > { %3803 = vmatprep.subr.bf16.mxu0 %v3802_v15  ;;  %v3836_v15 = vpack.c.bf16 %v2091_v9, %v2089_v12  ;;  %v3838_v16 = vpack.c.bf16 %v2096_v14, %v2094_v13 }
 0x9ca   : > { %3805 = vmatpush1.bf16.msra.mxu0 %v3804_v22  ;;  %v2100_v22 = vld [vmem:[#allocation11 + $0x3d8] sm:$0xff] }
 0x9cb   : > { %3807 = vmatprep.subr.bf16.mxu0 %v3806_v23  ;;  %v3840_v23 = vpack.c.bf16 %v2095_v21, %v2093_v20  ;;  %v3842_v1 = vpack.c.bf16 %v2100_v22, %v2098_v57 }
 0x9ce   : > { %3809 = vmatpush1.bf16.msra.mxu0 %v3808_v28  ;;  %v3844_v28 = vpack.c.bf16 %v2099_v25, %v2097_v24 }
 0x9cf   : > { %3811 = vmatprep.subr.bf16.mxu0 %v3810_v29  ;;  %v3846_v29 = vpack.c.bf16 %v2104_v27, %v2102_v26  ;;  %v3981_v45 = vpop.eup %3980 }
 0x9d2   : > { %3813 = vmatpush1.bf16.msra.mxu0 %v3812_v36  ;;  %v1971_v36 = vadd.f32 1.0, %v3981_v45 }
 0x9d3   : > { %3815 = vmatprep.subr.bf16.mxu0 %v3814_v18  ;;  %v1943_v18 = vmul.f32 0.5, %v4719_v35 }
 0x9d5   : > { %v1975_v37 = vmul.f32 %v1971_v36, %v1943_v18 }
 0x9d6   : > { %3817 = vmatpush1.bf16.msra.mxu0 %v3816_v11 }
 0x9d7   : > { %3819 = vmatprep.subr.bf16.mxu0 %v3818_v39 }
 0x9da   : > { %3821 = vmatpush1.bf16.msra.mxu0 %v3820_v47 }
 0x9db   : > { %3823 = vmatprep.subr.bf16.mxu0 %v3822_v48 }
 0x9de   : > { %3825 = vmatpush1.bf16.msra.mxu0 %v3824_v60 }
 0x9df   : > { %3827 = vmatprep.subr.bf16.mxu0 %v3826_v59 }
 0x9e2   : > { %3829 = vmatpush1.bf16.msra.mxu0 %v3828_v2 }
 0x9e3   : > { %3831 = vmatprep.subr.bf16.mxu0 %v3830_v5  ;;  %v2867_v11 = vpop.permute.xlu1 %2866 }
 0x9e6   : > { %3833 = vmatpush1.bf16.msra.mxu0 %v3832_v33 }
 0x9e7   : > { %3835 = vmatprep.subr.bf16.mxu0 %v3834_v10 }
 0x9ea   : > { %3837 = vmatpush1.bf16.msra.mxu0 %v3836_v15 }
 0x9eb   : > { %3839 = vmatprep.subr.bf16.mxu0 %v3838_v16 }
 0x9ee   : > { %3841 = vmatpush1.bf16.msra.mxu0 %v3840_v23 }
 0x9ef   : > { %3843 = vmatprep.subr.bf16.mxu0 %v3842_v1 }
 0x9f2   : > { %3845 = vmatpush1.bf16.msra.mxu0 %v3844_v28 }
 0x9f3   : > { %3847 = vmatprep.subr.bf16.mxu0 %v3846_v29 }
 0x9f6   : > { %3849 = vmatpush1.bf16.msra.mxu0 %v3848_v34 }
 0x9f9   : > { %2839 = vmatmul.mubr.f32.vlgmr.msra.gmra.mrb[8].mxu0 %v1975_v37 }
 0xacc   : > { %v2840_v17 = vpop.f32.mrb[8].mxu0 }
 0xacd   : > { %v2857_v39 = vadd.f32 %v2850_v49, %v2840_v17  ;;  %v2842_v40 = vpop.f32.mrb[9].mxu0 }
 0xace   : > { %v2858_v41 = vadd.f32 %v2854_v43, %v2842_v40 }
 0xacf   : > { %v2869_v42 = vmul.f32 %v2867_v11, %v2857_v39 }
 0xad0   : > { %v2870_v35 = vmul.f32 %v2867_v11, %v2858_v41 }
 0xad1   : > { %v2871_v46 = vadd.f32 %v2869_v42, %v4620_v56 }
 0xad2   : > { %v2872_v44 = vadd.f32 %v2870_v35, %v4623_v58 }
 0xad3   : > { %2873 = vst [vmem:[%s628_s28] sm:$0xff] %v2871_v46 }
 0xad4   : > { %2874 = vst [vmem:[%s628_s28 + $0x8] sm:$0xff] %v2872_v44 }
 0xad5   : > { %4139 = shalt.err (!%p4136_p13)
}
 0xad6   : > { %s4140_s8 = scalar_lea.hbm %s4739_s29, 256  ;;  %s4144_s28 = scalar_lea.hbm %s4839_s3, 512 }
 0xad7   : > { %p4141_p3 = scmp.ne.s32.totalorder %s4739_s29, %s4140_s8  ;;  %p4145_p4 = scmp.lt.u32.totalorder %s4739_s29, %s4839_s3 }
 0xad8   : > { %p4146_p8 = scmp.lt.u32.totalorder %s4144_s28, %s4140_s8  ;;  %p4148_p0 = scmp.lt.u32.totalorder %s4140_s8, %s4739_s29 }
 0xad9   : > { %p4142_p7 = pnand %p4141_p3, %p4840_p2 }
 0xada   : > { %p4147_p6 = por %p4146_p8, %p4145_p4 }
 0xadb   : > { %p4143_p9 = pneg %p4142_p7 }
 0xadc   : > { %p4149_p5 = por %p4148_p0, %p4147_p6 }
 0xade   : > { %p4150_p10 = pnand %p4149_p5, %p4143_p9 }
 0xae0   : > { %4153 = shalt.err (!%p4150_p10)
}
 0xae1   : > { %3874 = dma.vmem_to_hbm [thread:$0]  (%p4840_p2), %s4741_s11, 256, %s4739_s29, %s2876_s27  }
 0xae2 PF: > { %s2902_s26 = sand.u32 1, %s4188_s21   ;;  %p4841_p1 = scmp.ne.s32.totalorder %s4825_s25, 0 }
 0xae3   : > { %p4842_p11 = scmp.ge.s32.totalorder %s4200_s24, 2  ;;  %s2903_s17 = scalar_lea.sflag [#allocation5], %s2902_s26 }
 0xae5   : > { %p3894_p12 = pnand %p4842_p11, %p4841_p1 }
 0xae7   : > { %4183 = dma.done.wait (!%p3894_p12), %s2903_s17, 256  }
 0xae8   : > { %4185 = vsyncadd (!%p3894_p12), %s2903_s17, 4294967040  ;;  %p31_p13 = scmp.ge.s32.totalorder %s4438_s0, 4   ;;  %s4843_s21 = smov %s4192_s22 }
 0xae9   : > { %s4844_s22 = smov %s4196_s23  ;;  %s4845_s23 = smov %s4449_s19 }
 0xaea   : > { %s4846_s24 = smov %s4438_s0  ;;  %33 = sbr.rel (!%p31_p13) target bundleno = 18 (0x12), region = 154 }
 0xaf1   :  { %2908 = vsyncpa [#allocation4], 1 }
 0xaf2   :  { %2910 = vsyncpa [#allocation4 + $0x1], 1 }
 0xaf3   :  { %2911 = vsyncpa [#allocation7], 1 }
 0xaf4   :  { %2912 = vsyncpa [#allocation10], 1 }
 0xaf5   :  { %2913 = vsyncpa [#allocation5], 1 }
 0xaf6   :  { %2915 = vsyncpa [#allocation5 + $0x1], 1 }

// kernel: tpu_custom_call.1
= control target key start
LH: loop header
LB: loop body
LE: loop exit
PB: predicated region body
PF: predicated region fallthrough
CT: control target
= control target key end

     0   :  { %s4783_s0 = inlined_call_operand.hbm [shape: f32[2,8,256], index: 0, kind: input, shape index: {}, may-alias: {0,16}]   ;;  %s4784_s1 = inlined_call_operand.vmem [shape: f32[2,1,8], index: 1, kind: input, shape index: {}]   ;;  %s4785_s2 = inlined_call_operand.vmem [shape: f32[2,1,1], index: 2, kind: input, shape index: {}]   ;;  %s4786_s3 = inlined_call_operand.vmem [shape: f32[2,1,1], index: 3, kind: input, shape index: {}]   ;;  %s4787_s4 = inlined_call_operand.vmem [shape: f32[1,256], index: 4, kind: input, shape index: {}]   ;;  %s4788_s5 = inlined_call_operand.vmem [shape: f32[1,256], index: 5, kind: input, shape index: {}]   ;;  %s4789_s6 = inlined_call_operand.hbm [shape: f32[256,768], index: 6, kind: input, shape index: {}]   ;;  %s4790_s7 = inlined_call_operand.vmem [shape: f32[1,768], index: 7, kind: input, shape index: {}]   ;;  %s4791_s8 = inlined_call_operand.hbm [shape: f32[256,256], index: 8, kind: input, shape index: {}]   ;;  %s4792_s9 = inlined_call_operand.vmem [shape: f32[1,256], index: 9, kind: input, shape index: {}]   ;;  %s4793_s10 = inlined_call_operand.vmem [shape: f32[1,256], index: 10, kind: input, shape index: {}]   ;;  %s4794_s11 = inlined_call_operand.vmem [shape: f32[1,256], index: 11, kind: input, shape index: {}]   ;;  %s4795_s12 = inlined_call_operand.hbm [shape: f32[256,1024], index: 12, kind: input, shape index: {}]   ;;  %s4796_s13 = inlined_call_operand.vmem [shape: f32[1,1024], index: 13, kind: input, shape index: {}]   ;;  %s4797_s14 = inlined_call_operand.hbm [shape: f32[1024,256], index: 14, kind: input, shape index: {}]   ;;  %s4798_s15 = inlined_call_operand.vmem [shape: f32[1,256], index: 15, kind: input, shape index: {}]   ;;  %s4799_s16 = inlined_call_operand.hbm [shape: f32[2,8,256], index: 16, kind: output, shape index: {}, may-alias: {0,16}]  }
   0x1   :  { %4806 = sst [smem:[#allocation17_spill]] %s4783_s0 }
   0x2   :  { %4807 = sst [smem:[#allocation18_spill]] %s4786_s3 }
   0x3   :  { %4808 = sst [smem:[#allocation19_spill]] %s4789_s6 }
   0x4   :  { %4809 = sst [smem:[#allocation20_spill]] %s4791_s8 }
   0x5   :  { %4810 = sst [smem:[#allocation21_spill]] %s4792_s9 }
   0x6   :  { %4811 = sst [smem:[#allocation22_spill]] %s4793_s10 }
   0x7   :  { %4812 = sst [smem:[#allocation23_spill]] %s4794_s11 }
   0x8   :  { %4813 = sst [smem:[#allocation24_spill]] %s4796_s13 }
   0x9   :  { %4814 = sst [smem:[#allocation25_spill]] %s4798_s15 }
   0xa   :  { %4815 = sst [smem:[#allocation26_spill]] %s4799_s16 }
   0xb   :  { %21 = vsyncpa [#allocation4], 0 }
   0xc   :  { %23 = vsyncpa [#allocation4 + $0x1], 0 }
   0xd   :  { %24 = vsyncpa [#allocation7], 0 }
   0xe   :  { %25 = vsyncpa [#allocation10], 0 }
   0xf   :  { %26 = vsyncpa [#allocation5], 0 }
  0x10   :  { %28 = vsyncpa [#allocation5 + $0x1], 0  ;;  %s4302_s21 = smov 0   ;;  %s4304_s22 = smov 0  }
  0x11   :  { %s4306_s23 = smov 0   ;;  %s4308_s24 = smov 0  }
  0x12 LB: > { %s4202_s25 = smov [#allocation6]   ;;  %s4323_s27 = sadd.s32 4294967295, %s4200_s24   ;;  %s4200_s24 = sphi %s4308_s24, %s4846_s24   ;;  %s4196_s23 = sphi %s4306_s23, %s4845_s23   ;;  %s4192_s22 = sphi %s4304_s22, %s4844_s22   ;;  %s4188_s21 = sphi %s4302_s21, %s4843_s21  }
  0x13   : > { %s439_s26 = sshll.u32 %s4202_s25, 4  ;;  %p3026_p0 = scmp.ge.s32.totalorder %s4200_s24, 1  ;;  %s4328_s26 = int_to_ptr.vmem [resolvable:$true] %s439_s26 }
  0x14   : > { %p4803_p1 = scmp.eq.s32.totalorder %s4323_s27, 0  ;;  %p421_p2 = scmp.lt.s32.totalorder %s4200_s24, 3 }
  0x15   : > { %s4203_s29 = smov [#allocation9]   ;;  %s4204_s17 = smov [#allocation8]  }
  0x16   : > { %p4330_p3 = pnand %p3026_p0, %p421_p2  ;;  %s477_s30 = sshll.u32 %s4203_s29, 4  ;;  %s4343_s30 = int_to_ptr.vmem [resolvable:$true] %s477_s30 }
  0x17   : > { %s4345_s18 = sshll.u32 %s4204_s17, 4  ;;  %s4818_s6 = sld [smem:[#allocation19_spill]]  ;;  %s456_s18 = int_to_ptr.vmem [resolvable:$true] %s4345_s18 }
  0x18   : > { %s4816_s28 = scalar_select %p4330_p3, 1, 0 }
  0x19   : > { %p3876_p5 = pneg %p4330_p3 }
  0x1b   : > { %p4339_p6 = pnand %p3876_p5, %p4803_p1 }
  0x1d   : > { %s3984_s25 = scalar_lea.hbm %s4818_s6, 24576  ;;  %p4355_p8 = pneg %p4339_p6 }
  0x1e   : > { %p3985_p7 = scmp.ne.s32.totalorder %s4818_s6, %s3984_s25  ;;  %p3991_p11 = scmp.lt.u32.totalorder %s3984_s25, %s4818_s6 }
  0x20   : > { %p3987_p9 = pnand %p4355_p8, %p3985_p7 }
  0x22   : > { %p3988_p10 = pneg %p3987_p9 }
  0x24   : > { %p3993_p12 = pnand %p3991_p11, %p3988_p10 }
  0x26   : > { %3996 = shalt.err (!%p3993_p12)
}
  0x27   : > { %s3997_s15 = scalar_lea.vmem %s4328_s26, 24576  ;;  %p4005_p5 = scmp.lt.s32.totalorder %s4328_s26, %s4328_s26 }
  0x28   : > { %p3998_p13 = scmp.ne.s32.totalorder %s4328_s26, %s3997_s15  ;;  %p4006_p4 = scmp.lt.s32.totalorder %s3997_s15, %s3997_s15 }
  0x2a   : > { %p4000_p0 = pnand %p3998_p13, %p4355_p8  ;;  %p4007_p7 = por %p4006_p4, %p4005_p5 }
  0x2c   : > { %p4001_p2 = pneg %p4000_p0 }
  0x2e   : > { %p4008_p9 = pnand %p4007_p7, %p4001_p2 }
  0x30   : > { %4011 = shalt.err (!%p4008_p9)
}
  0x31   : > { %s4205_s16 = smov 768   ;;  %s4206_s3 = smov 48  }
  0x32   : > { %3879 = dma.hbm_to_vmem [thread:$0]  (!%p4339_p6), %s4818_s6, 24576, %s4328_s26, [#allocation7], %s4205_s16, %s4205_s16, %s4206_s3  }
  0x33   : > { %s4012_s13 = scalar_lea.hbm %s4795_s12, 32768 }
  0x34   : > { %p4013_p4 = scmp.ne.s32.totalorder %s4795_s12, %s4012_s13  ;;  %p4019_p12 = scmp.lt.u32.totalorder %s4012_s13, %s4795_s12 }
  0x36   : > { %p4015_p10 = pnand %p4013_p4, %p4355_p8 }
  0x38   : > { %p4016_p11 = pneg %p4015_p10 }
  0x3a   : > { %p4021_p13 = pnand %p4019_p12, %p4016_p11 }
  0x3c   : > { %4024 = shalt.err (!%p4021_p13)
}
  0x3d   : > { %s4025_s26 = scalar_lea.vmem %s4343_s30, 32768  ;;  %p4033_p7 = scmp.lt.s32.totalorder %s4343_s30, %s4343_s30 }
  0x3e   : > { %p4026_p0 = scmp.ne.s32.totalorder %s4343_s30, %s4025_s26  ;;  %p4034_p9 = scmp.lt.s32.totalorder %s4025_s26, %s4025_s26 }
  0x40   : > { %p4028_p2 = pnand %p4026_p0, %p4355_p8  ;;  %p4035_p4 = por %p4034_p9, %p4033_p7 }
  0x42   : > { %p4029_p5 = pneg %p4028_p2 }
  0x44   : > { %p4036_p10 = pnand %p4035_p4, %p4029_p5 }
  0x46   : > { %4039 = shalt.err (!%p4036_p10)
}
  0x47   : > { %s4207_s10 = smov 1024   ;;  %s4208_s9 = smov 64  }
  0x48   : > { %3885 = dma.hbm_to_vmem [thread:$0]  (!%p4339_p6), %s4795_s12, 32768, %s4343_s30, [#allocation10], %s4207_s10, %s4207_s10, %s4208_s9  }
  0x49   : > { %s4820_s8 = sld [smem:[#allocation20_spill]] }
  0x4f   : > { %s4040_s19 = scalar_lea.hbm %s4820_s8, 8192 }
  0x50   : > { %p4041_p11 = scmp.ne.s32.totalorder %s4820_s8, %s4040_s19  ;;  %p4047_p0 = scmp.lt.u32.totalorder %s4040_s19, %s4820_s8 }
  0x52   : > { %p4043_p12 = pnand %p4041_p11, %p4355_p8 }
  0x54   : > { %p4044_p13 = pneg %p4043_p12 }
  0x56   : > { %p4049_p2 = pnand %p4047_p0, %p4044_p13 }
  0x58   : > { %4052 = shalt.err (!%p4049_p2)
}
  0x59   : > { %s4053_s26 = scalar_lea.vmem %s456_s18, 8192  ;;  %p4061_p4 = scmp.lt.s32.totalorder %s456_s18, %s456_s18 }
  0x5a   : > { %p4054_p5 = scmp.ne.s32.totalorder %s456_s18, %s4053_s26  ;;  %p4062_p10 = scmp.lt.s32.totalorder %s4053_s26, %s4053_s26 }
  0x5c   : > { %p4056_p7 = pnand %p4054_p5, %p4355_p8  ;;  %p4063_p1 = por %p4062_p10, %p4061_p4 }
  0x5e   : > { %p4057_p9 = pneg %p4056_p7 }
  0x60   : > { %p4064_p3 = pnand %p4063_p1, %p4057_p9 }
  0x62   : > { %4067 = shalt.err (!%p4064_p3)
}
  0x63   : > { %s4209_s30 = smov 256   ;;  %s4210_s10 = smov 16  }
  0x64   : > { %3882 = dma.hbm_to_vmem [thread:$0]  (!%p4339_p6), %s4820_s8, 8192, %s456_s18, [#allocation7], %s4209_s30, %s4209_s30, %s4210_s10  }
  0x65   : > { %s4211_s13 = smov [#allocation11]   ;;  %s4068_s20 = scalar_lea.hbm %s4797_s14, 32768 }
  0x66   : > { %s493_s16 = sshll.u32 %s4211_s13, 4  ;;  %p4069_p1 = scmp.ne.s32.totalorder %s4797_s14, %s4068_s20  ;;  %s494_s16 = int_to_ptr.vmem [resolvable:$true] %s493_s16 }
  0x67   : > { %p4075_p12 = scmp.lt.u32.totalorder %s4068_s20, %s4797_s14 }
  0x68   : > { %p4071_p3 = pnand %p4069_p1, %p4355_p8 }
  0x6a   : > { %p4072_p11 = pneg %p4071_p3 }
  0x6c   : > { %p4077_p13 = pnand %p4075_p12, %p4072_p11 }
  0x6e   : > { %4080 = shalt.err (!%p4077_p13)
}
  0x6f   : > { %s4081_s18 = scalar_lea.vmem %s494_s16, 32768  ;;  %p4089_p7 = scmp.lt.s32.totalorder %s494_s16, %s494_s16 }
  0x70   : > { %p4082_p0 = scmp.ne.s32.totalorder %s494_s16, %s4081_s18  ;;  %p4090_p9 = scmp.lt.s32.totalorder %s4081_s18, %s4081_s18 }
  0x72   : > { %p4084_p2 = pnand %p4082_p0, %p4355_p8  ;;  %p4091_p4 = por %p4090_p9, %p4089_p7 }
  0x74   : > { %p4085_p5 = pneg %p4084_p2 }
  0x76   : > { %p4092_p10 = pnand %p4091_p4, %p4085_p5 }
  0x78   : > { %4095 = shalt.err (!%p4092_p10)
}
  0x79   : > { %3888 = dma.hbm_to_vmem [thread:$0]  (!%p4339_p6), %s4797_s14, 32768, %s494_s16, [#allocation10], %s4209_s30, %s4209_s30, %s4210_s10  }
  0x7a   : > { %s3025_s29 = sadd.s32 4294967294, %s4200_s24   ;;  %s4438_s0 = sadd.s32 1, %s4200_s24  }
  0x7b   : > { %s38_s13 = ssub.s32 %s4200_s24, %s4438_s0  ;;  %s41_s3 = sadd.s32 1, %s4196_s23 }
  0x7c   : > { %p39_p8 = scmp.eq.s32.totalorder %s38_s13, 0  ;;  %p48_p1 = scmp.ne.s32.totalorder %s4196_s23, %s4192_s22 }
  0x7d   : > { %p49_p3 = scmp.eq.s32.totalorder %s4200_s24, 0  ;;  %p54_p11 = scmp.ne.s32.totalorder %s4192_s22, %s4188_s21 }
  0x7e   : > { %s4449_s19 = scalar_select %p39_p8, %s4196_s23, %s41_s3  }
  0x7f   : > { %p4451_p12 = por %p49_p3, %p48_p1  ;;  %p4822_p13 = scmp.eq.s32.totalorder %s4323_s27, 0 }
  0x80   : > { %p408_p0 = scmp.eq.s32.totalorder %s4323_s27, 1  ;;  %p414_p2 = scmp.eq.s32.totalorder %s3025_s29, 1 }
  0x81   : > { %p4457_p6 = por %p4822_p13, %p54_p11  ;;  %p3901_p5 = scmp.lt.s32.totalorder %s4200_s24, 2 }
  0x82   : > { %s510_s10 = sand.u32 1, %s4196_s23   ;;  %p4464_p7 = por %p408_p0, %p48_p1 }
  0x83   : > { %p4468_p9 = por %p414_p2, %p54_p11  ;;  %s3032_s17 = sshll.u32 %s510_s10, 4 }
  0x84   : > { %s4824_s16 = scalar_select %p4464_p7, 1, 0 }
  0x85   : > { %s4825_s25 = scalar_select %p4468_p9, 1, 0 }
  0x86   : > { %s3052_s15 = sshll.u32 %s4200_s24, 8  ;;  %s4826_s9 = sld [smem:[#allocation17_spill]] }
  0x87   : > { %s514_s29 = scalar_lea.vmem [#allocation3], %s3032_s17  ;;  %p4482_p4 = pnand %p3901_p5, %p4451_p12 }
  0x88   : > { %s522_s13 = sshll.u32 %s514_s29, 4  ;;  %s511_s6 = scalar_lea.sflag [#allocation4], %s510_s10  ;;  %s4478_s13 = int_to_ptr.vmem [resolvable:$true] %s522_s13 }
  0x89   : > { %p4098_p8 = pneg %p4482_p4 }
  0x8c   : > { %s4476_s11 = scalar_lea.hbm %s4826_s9, %s3052_s15  ;;  %s4101_s26 = scalar_lea.hbm %s4826_s9, 512 }
  0x8d   : > { %s4096_s8 = scalar_lea.hbm %s4476_s11, 256  ;;  %p4102_p11 = scmp.lt.u32.totalorder %s4476_s11, %s4826_s9 }
  0x8e   : > { %p4097_p10 = scmp.ne.s32.totalorder %s4476_s11, %s4096_s8  ;;  %p4103_p12 = scmp.lt.u32.totalorder %s4101_s26, %s4096_s8 }
  0x8f   : > { %p4105_p0 = scmp.lt.u32.totalorder %s4096_s8, %s4476_s11 }
  0x90   : > { %p4099_p1 = pnand %p4098_p8, %p4097_p10  ;;  %p4104_p13 = por %p4103_p12, %p4102_p11 }
  0x92   : > { %p4100_p3 = pneg %p4099_p1  ;;  %p4106_p2 = por %p4105_p0, %p4104_p13 }
  0x94   : > { %p4107_p5 = pnand %p4106_p2, %p4100_p3 }
  0x96   : > { %4110 = shalt.err (!%p4107_p5)
}
  0x97   : > { %s4111_s10 = scalar_lea.vmem %s4478_s13, 256  ;;  %s4212_s29 = smov [#allocation3]  }
  0x98   : > { %p4112_p10 = scmp.ne.s32.totalorder %s4478_s13, %s4111_s10  ;;  %s4116_s17 = sshll.u32 %s4212_s29, 4  ;;  %s4117_s17 = int_to_ptr.vmem [resolvable:$false] %s4116_s17 }
  0x99   : > { %s4118_s15 = scalar_lea.vmem %s4117_s17, 512  ;;  %p4119_p7 = scmp.lt.s32.totalorder %s4478_s13, %s4117_s17 }
  0x9a   : > { %p4114_p1 = pnand %p4112_p10, %p4098_p8  ;;  %p4120_p11 = scmp.lt.s32.totalorder %s4118_s15, %s4111_s10 }
  0x9c   : > { %p4115_p9 = pneg %p4114_p1  ;;  %p4121_p12 = por %p4120_p11, %p4119_p7 }
  0x9e   : > { %p4122_p13 = pnand %p4121_p12, %p4115_p9 }
  0xa0   : > { %4125 = shalt.err (!%p4122_p13)
}
  0xa1   : > { %3892 = dma.hbm_to_vmem [thread:$0]  (!%p4482_p4), %s4476_s11, 256, %s4478_s13, %s511_s6  }
  0xa2   : > { %p4828_p3 = scmp.ne.s32.totalorder %s4816_s28, 0 }
  0xa3   : > { %s4514_s8 = sand.u32 (!%p4828_p3), 1, %s4192_s22  }
  0xa4   : > { %549 = sbr.rel (%p4828_p3) target bundleno = 2786 (0xae2), region = 84  ;;  %s3036_s26 = sshll.u32 (!%p4828_p3), %s4514_s8, 4 }
  0xa5   : > { %s552_s20 = scalar_lea.sflag (!%p4828_p3), [#allocation4], %s4514_s8  ;;  %s4520_s18 = scalar_lea.vmem (!%p4828_p3), [#allocation3], %s3036_s26 }
  0xab   : > { %4171 = dma.done.wait (%p4457_p6), %s552_s20, 256  }
  0xac   : > { %4173 = vsyncadd (%p4457_p6), %s552_s20, 4294967040  ;;  %p4829_p7 = scmp.eq.s32.totalorder %s4323_s27, 0 }
  0xae   : > { %4175 = dma.done.wait (%p4829_p7), [#allocation7], 32768   ;;  %p4830_p9 = pmov %p4829_p7 }
  0xaf   : > { %p4831_p4 = pmov %p4829_p7 }
  0xb0   : > { %4177 = vsyncadd (%p4830_p9), [#allocation7], 4294934528 }
  0xb1   : > { %4179 = dma.done.wait (%p4831_p4), [#allocation10], 65536   ;;  %p4832_p8 = pmov %p4831_p4 }
  0xb2   : > { %v4535_v0 = vld [vmem:[%s4520_s18] sm:$0xff]  ;;  %v4538_v1 = vld [vmem:[%s4520_s18 + $0x8] sm:$0xff]  ;;  %vm4214_vm0 = vmmov 0   ;;  %p629_p6 = scmp.lt.s32.totalorder %s4323_s27, 1  ;;  %vm1201_vm1 = vcmask 64512   ;;  %s4833_s13 = sld [smem:[#allocation21_spill]] }
  0xb3   : > { %4181 = vsyncadd (%p4832_p8), [#allocation10], 4294901760  ;;  %v642_v2 = vadd.f32 %v4538_v1, %v4535_v0  ;;  %v686_v3 = vld [vmem:[#allocation6 + $0x8] sm:$0xff]  ;;  %v692_v4 = vld [vmem:[#allocation6 + $0x38] sm:$0xff]  ;;  %s4834_s29 = sld [smem:[#allocation22_spill]]  ;;  %s4835_s20 = sld [smem:[#allocation23_spill]] }
  0xb4   : > { %v685_v5 = vld [vmem:[#allocation6] sm:$0xff]  ;;  %v3082_v6 = vpack.c.bf16 %v692_v4, %v686_v3  ;;  %v691_v7 = vld [vmem:[#allocation6 + $0x30] sm:$0xff]  ;;  %v698_v8 = vld [vmem:[#allocation6 + $0x68] sm:$0xff]  ;;  %s4598_s10 = scalar_select %p629_p6, %s4323_s27, 1 }
  0xb5   : > { %643 = vadd.xlane.f32.xlu0 %v642_v2  ;;  %v704_v9 = vld [vmem:[#allocation6 + $0x98] sm:$0xff]  ;;  %v3084_v10 = vpack.c.bf16 %v691_v7, %v685_v5  ;;  %v697_v12 = vld [vmem:[#allocation6 + $0x60] sm:$0xff]  ;;  %v703_v13 = vld [vmem:[#allocation6 + $0x90] sm:$0xff]  ;;  %s4836_s30 = sld [smem:[#allocation24_spill]]  ;;  %s3053_s6 = sshll.u32 %s4323_s27, 8 }
  0xb6   : > { %v3086_v11 = vpack.c.bf16 %v704_v9, %v698_v8  ;;  %v710_v14 = vld [vmem:[#allocation6 + $0xc8] sm:$0xff]  ;;  %3083 = vmatprep.subr.bf16.mxu1 %v3082_v6  ;;  %v716_v15 = vld [vmem:[#allocation6 + $0xf8] sm:$0xff]  ;;  %v3088_v16 = vpack.c.bf16 %v703_v13, %v697_v12  ;;  %v709_v18 = vld [vmem:[#allocation6 + $0xc0] sm:$0xff]  ;;  %s631_s15 = scalar_lea.vmem %s4784_s1, %s4598_s10  ;;  %s634_s28 = scalar_lea.vmem %s4785_s2, %s4598_s10 }
  0xb7   : > { %3085 = vmatpush1.bf16.msra.mxu1 %v3084_v10  ;;  %v3090_v17 = vpack.c.bf16 %v716_v15, %v710_v14  ;;  %v715_v19 = vld [vmem:[#allocation6 + $0xf0] sm:$0xff]  ;;  %v722_v20 = vld [vmem:[#allocation6 + $0x128] sm:$0xff]  ;;  %v728_v21 = vld [vmem:[#allocation6 + $0x158] sm:$0xff]  ;;  %s4839_s3 = sld [smem:[#allocation26_spill]]  ;;  %s2876_s27 = scalar_lea.sflag [#allocation5], %s4514_s8 }
  0xb8   : > { %3087 = vmatprep.subr.bf16.mxu1 %v3086_v11  ;;  %v3092_v22 = vpack.c.bf16 %v715_v19, %v709_v18  ;;  %v3094_v23 = vpack.c.bf16 %v728_v21, %v722_v20  ;;  %v721_v24 = vld [vmem:[#allocation6 + $0x120] sm:$0xff]  ;;  %v727_v25 = vld [vmem:[#allocation6 + $0x150] sm:$0xff]  ;;  %v734_v26 = vld [vmem:[#allocation6 + $0x188] sm:$0xff]  ;;  %p4840_p2 = scmp.ne.s32.totalorder %s4824_s16, 0 }
  0xb9   : > { %v740_v27 = vld [vmem:[#allocation6 + $0x1b8] sm:$0xff]  ;;  %v3096_v28 = vpack.c.bf16 %v727_v25, %v721_v24  ;;  %v733_v30 = vld [vmem:[#allocation6 + $0x180] sm:$0xff]  ;;  %v739_v31 = vld [vmem:[#allocation6 + $0x1b0] sm:$0xff] }
  0xba   : > { %v3098_v29 = vpack.c.bf16 %v740_v27, %v734_v26  ;;  %v746_v32 = vld [vmem:[#allocation6 + $0x1e8] sm:$0xff]  ;;  %v752_v33 = vld [vmem:[#allocation6 + $0x218] sm:$0xff]  ;;  %v3100_v34 = vpack.c.bf16 %v739_v31, %v733_v30  ;;  %v745_v36 = vld [vmem:[#allocation6 + $0x1e0] sm:$0xff] }
  0xbb   : > { %3089 = vmatpush1.bf16.msra.mxu1 %v3088_v16  ;;  %v3102_v35 = vpack.c.bf16 %v752_v33, %v746_v32  ;;  %v751_v37 = vld [vmem:[#allocation6 + $0x210] sm:$0xff]  ;;  %v758_v38 = vld [vmem:[#allocation6 + $0x248] sm:$0xff]  ;;  %v764_v39 = vld [vmem:[#allocation6 + $0x278] sm:$0xff] }
  0xbc   : > { %3091 = vmatprep.subr.bf16.mxu1 %v3090_v17  ;;  %v3104_v40 = vpack.c.bf16 %v751_v37, %v745_v36  ;;  %v3106_v41 = vpack.c.bf16 %v764_v39, %v758_v38  ;;  %v757_v42 = vld [vmem:[#allocation6 + $0x240] sm:$0xff]  ;;  %v763_v43 = vld [vmem:[#allocation6 + $0x270] sm:$0xff]  ;;  %v770_v44 = vld [vmem:[#allocation6 + $0x2a8] sm:$0xff] }
  0xbd   : > { %v776_v45 = vld [vmem:[#allocation6 + $0x2d8] sm:$0xff]  ;;  %v3108_v46 = vpack.c.bf16 %v763_v43, %v757_v42  ;;  %v769_v48 = vld [vmem:[#allocation6 + $0x2a0] sm:$0xff]  ;;  %v775_v49 = vld [vmem:[#allocation6 + $0x2d0] sm:$0xff] }
  0xbe   : > { %v3110_v47 = vpack.c.bf16 %v776_v45, %v770_v44  ;;  %v782_v50 = vld [vmem:[#allocation6 + $0x308] sm:$0xff]  ;;  %v788_v51 = vld [vmem:[#allocation6 + $0x338] sm:$0xff]  ;;  %v3112_v52 = vpack.c.bf16 %v775_v49, %v769_v48  ;;  %v781_v54 = vld [vmem:[#allocation6 + $0x300] sm:$0xff] }
  0xbf   : > { %3093 = vmatpush1.bf16.msra.mxu1 %v3092_v22  ;;  %v3114_v53 = vpack.c.bf16 %v788_v51, %v782_v50  ;;  %v787_v55 = vld [vmem:[#allocation6 + $0x330] sm:$0xff]  ;;  %v794_v56 = vld [vmem:[#allocation6 + $0x368] sm:$0xff]  ;;  %v800_v57 = vld [vmem:[#allocation6 + $0x398] sm:$0xff] }
  0xc0   : > { %3095 = vmatprep.subr.bf16.mxu1 %v3094_v23  ;;  %v3116_v58 = vpack.c.bf16 %v787_v55, %v781_v54  ;;  %v3118_v59 = vpack.c.bf16 %v800_v57, %v794_v56  ;;  %v793_v60 = vld [vmem:[#allocation6 + $0x360] sm:$0xff]  ;;  %v799_v61 = vld [vmem:[#allocation6 + $0x390] sm:$0xff]  ;;  %v806_v62 = vld [vmem:[#allocation6 + $0x3c8] sm:$0xff] }
  0xc1   : > { %v812_v63 = vld [vmem:[#allocation6 + $0x3f8] sm:$0xff]  ;;  %v3120_v2 = vpack.c.bf16 %v799_v61, %v793_v60  ;;  %v805_v4 = vld [vmem:[#allocation6 + $0x3c0] sm:$0xff]  ;;  %v811_v5 = vld [vmem:[#allocation6 + $0x3f0] sm:$0xff] }
  0xc2   : > { %v3122_v3 = vpack.c.bf16 %v812_v63, %v806_v62  ;;  %v3124_v6 = vpack.c.bf16 %v811_v5, %v805_v4  ;;  %v818_v14 = vld [vmem:[#allocation6 + $0x428] sm:$0xff]  ;;  %v824_v15 = vld [vmem:[#allocation6 + $0x458] sm:$0xff]  ;;  %v817_v17 = vld [vmem:[#allocation6 + $0x420] sm:$0xff] }
  0xc3   : > { %3097 = vmatpush1.bf16.msra.mxu1 %v3096_v28  ;;  %v3126_v16 = vpack.c.bf16 %v824_v15, %v818_v14  ;;  %v823_v18 = vld [vmem:[#allocation6 + $0x450] sm:$0xff]  ;;  %v830_v20 = vld [vmem:[#allocation6 + $0x488] sm:$0xff]  ;;  %v836_v21 = vld [vmem:[#allocation6 + $0x4b8] sm:$0xff] }
  0xc4   : > { %3099 = vmatprep.subr.bf16.mxu1 %v3098_v29  ;;  %v3128_v19 = vpack.c.bf16 %v823_v18, %v817_v17  ;;  %v829_v22 = vld [vmem:[#allocation6 + $0x480] sm:$0xff]  ;;  %v835_v23 = vld [vmem:[#allocation6 + $0x4b0] sm:$0xff]  ;;  %v842_v24 = vld [vmem:[#allocation6 + $0x4e8] sm:$0xff] }
  0xc5   : > { %v848_v25 = vld [vmem:[#allocation6 + $0x518] sm:$0xff]  ;;  %v841_v26 = vld [vmem:[#allocation6 + $0x4e0] sm:$0xff]  ;;  %v847_v28 = vld [vmem:[#allocation6 + $0x510] sm:$0xff] }
  0xc6   : > { %v3134_v27 = vpack.c.bf16 %v848_v25, %v842_v24  ;;  %v854_v29 = vld [vmem:[#allocation6 + $0x548] sm:$0xff]  ;;  %v860_v30 = vld [vmem:[#allocation6 + $0x578] sm:$0xff]  ;;  %v3136_v31 = vpack.c.bf16 %v847_v28, %v841_v26  ;;  %v853_v33 = vld [vmem:[#allocation6 + $0x540] sm:$0xff] }
  0xc7   : > { %3101 = vmatpush1.bf16.msra.mxu1 %v3100_v34  ;;  %v3138_v32 = vpack.c.bf16 %v860_v30, %v854_v29  ;;  %v859_v34 = vld [vmem:[#allocation6 + $0x570] sm:$0xff]  ;;  %v872_v36 = vld [vmem:[#allocation6 + $0x5d8] sm:$0xff]  ;;  %v865_v39 = vld [vmem:[#allocation6 + $0x5a0] sm:$0xff] }
  0xc8   : > { %3103 = vmatprep.subr.bf16.mxu1 %v3102_v35  ;;  %v866_v35 = vld [vmem:[#allocation6 + $0x5a8] sm:$0xff]  ;;  %v3140_v37 = vpack.c.bf16 %v859_v34, %v853_v33  ;;  %v688_v42 = vld [vmem:[#allocation6 + $0x18] sm:$0xff]  ;;  %v687_v61 = vld [vmem:[#allocation6 + $0x10] sm:$0xff] }
  0xc9   : > { %v3142_v38 = vpack.c.bf16 %v872_v36, %v866_v35  ;;  %v694_v43 = vld [vmem:[#allocation6 + $0x48] sm:$0xff]  ;;  %v693_v62 = vld [vmem:[#allocation6 + $0x40] sm:$0xff]  ;;  %v711_v15 = vld [vmem:[#allocation6 + $0xd0] sm:$0xff] }
  0xca   : > { %v3146_v44 = vpack.c.bf16 %v694_v43, %v688_v42  ;;  %v706_v4 = vld [vmem:[#allocation6 + $0xa8] sm:$0xff]  ;;  %v724_v17 = vld [vmem:[#allocation6 + $0x138] sm:$0xff]  ;;  %v735_v25 = vld [vmem:[#allocation6 + $0x190] sm:$0xff] }
  0xcb   : > { %3105 = vmatpush1.bf16.msra.mxu1 %v3104_v40  ;;  %v871_v40 = vld [vmem:[#allocation6 + $0x5d0] sm:$0xff]  ;;  %v730_v18 = vld [vmem:[#allocation6 + $0x168] sm:$0xff]  ;;  %v741_v26 = vld [vmem:[#allocation6 + $0x1c0] sm:$0xff] }
  0xcc   : > { %3107 = vmatprep.subr.bf16.mxu1 %v3106_v41  ;;  %v3144_v41 = vpack.c.bf16 %v871_v40, %v865_v39  ;;  %v754_v28 = vld [vmem:[#allocation6 + $0x228] sm:$0xff]  ;;  %v3164_v29 = vpack.c.bf16 %v741_v26, %v735_v25  ;;  %v760_v33 = vld [vmem:[#allocation6 + $0x258] sm:$0xff]  ;;  %v771_v43 = vld [vmem:[#allocation6 + $0x2b0] sm:$0xff] }
  0xcd   : > { %v766_v34 = vld [vmem:[#allocation6 + $0x288] sm:$0xff]  ;;  %v772_v39 = vld [vmem:[#allocation6 + $0x2b8] sm:$0xff]  ;;  %v855_v26 = vld [vmem:[#allocation6 + $0x550] sm:$0xff] }
  0xce   : > { %v3170_v36 = vpack.c.bf16 %v766_v34, %v760_v33  ;;  %v778_v40 = vld [vmem:[#allocation6 + $0x2e8] sm:$0xff]  ;;  %v873_v33 = vld [vmem:[#allocation6 + $0x5e0] sm:$0xff] }
  0xcf   : > { %3109 = vmatpush1.bf16.msra.mxu1 %v3108_v46  ;;  %v3174_v42 = vpack.c.bf16 %v778_v40, %v772_v39  ;;  %v690_v34 = vld [vmem:[#allocation6 + $0x28] sm:$0xff]  ;;  %v695_v39 = vld [vmem:[#allocation6 + $0x50] sm:$0xff] }
  0xd0   : > { %3111 = vmatprep.subr.bf16.mxu1 %v3110_v47  ;;  %v660_v47 = vlaneseq  ;;  %v702_v40 = vld [vmem:[#allocation6 + $0x88] sm:$0xff] }
  0xd2   : > { %v4548_v49 = vshrl.u32 %v660_v47, 7 }
  0xd3   : > { %3113 = vmatpush1.bf16.msra.mxu1 %v3112_v52  ;;  %v640_v52 = vld [vmem:[%s4787_s4] sm:$0x3] }
  0xd4   : > { %3115 = vmatprep.subr.bf16.mxu1 %v3114_v53  ;;  %v4551_v50 = vsub.s32 1, %v4548_v49  ;;  %v4554_v51 = vsub.s32 0, %v4548_v49  ;;  %v641_v53 = vld [vmem:[%s4788_s5] sm:$0x3] }
  0xd6   : > { %v667_v54 = vrot.slane %v640_v52, %v4551_v50  ;;  %v663_v55 = vrot.slane %v640_v52, %v4554_v51  ;;  %v676_v60 = vrot.slane %v641_v53, %v4554_v51  ;;  %v783_v52 = vld [vmem:[#allocation6 + $0x310] sm:$0xff] }
  0xd7   : > { %3117 = vmatpush1.bf16.msra.mxu1 %v3116_v58  ;;  %v680_v58 = vrot.slane %v641_v53, %v4551_v50  ;;  %v789_v53 = vld [vmem:[#allocation6 + $0x340] sm:$0xff] }
  0xd8   : > { %3119 = vmatprep.subr.bf16.mxu1 %v3118_v59 }
  0xdb   : > { %3121 = vmatpush1.bf16.msra.mxu1 %v3120_v2 }
  0xdc   : > { %3123 = vmatprep.subr.bf16.mxu1 %v3122_v3  ;;  %v700_v3 = vld [vmem:[#allocation6 + $0x78] sm:$0xff] }
  0xdf   : > { %3125 = vmatpush1.bf16.msra.mxu1 %v3124_v6 }
  0xe0   : > { %3127 = vmatprep.subr.bf16.mxu1 %v3126_v16  ;;  %v717_v16 = vld [vmem:[#allocation6 + $0x100] sm:$0xff] }
  0xe3   : > { %3129 = vmatpush1.bf16.msra.mxu1 %v3128_v19  ;;  %v3156_v19 = vpack.c.bf16 %v717_v16, %v711_v15  ;;  %v831_v16 = vld [vmem:[#allocation6 + $0x490] sm:$0xff] }
 0x142   : > { %v644_v7 = vpop.xlane.xlu0 %643 }
 0x143   : > { %v646_v8 = vmul.f32 0.00390625, %v644_v7  ;;  %v3148_v7 = vpack.c.bf16 %v693_v62, %v687_v61  ;;  %v814_v61 = vld [vmem:[#allocation6 + $0x408] sm:$0xff] }
 0x145   : > { %v4543_v9 = vsub.f32 %v4535_v0, %v646_v8  ;;  %v648_v10 = vsub.f32 %v4538_v1, %v646_v8  ;;  %v3130_v0 = vpack.c.bf16 %v836_v21, %v830_v20  ;;  %v3132_v1 = vpack.c.bf16 %v835_v23, %v829_v22  ;;  %v723_v21 = vld [vmem:[#allocation6 + $0x130] sm:$0xff]  ;;  %v736_v22 = vld [vmem:[#allocation6 + $0x198] sm:$0xff]  ;;  %v742_v23 = vld [vmem:[#allocation6 + $0x1c8] sm:$0xff] }
 0x146   : > { %v3150_v8 = vpack.c.bf16 %v706_v4, %v700_v3  ;;  %v3158_v20 = vpack.c.bf16 %v730_v18, %v724_v17  ;;  %v3162_v24 = vpack.c.bf16 %v742_v23, %v736_v22  ;;  %v813_v3 = vld [vmem:[#allocation6 + $0x400] sm:$0xff]  ;;  %v820_v4 = vld [vmem:[#allocation6 + $0x438] sm:$0xff] }
 0x147   : > { %v649_v11 = vmul.f32 %v4543_v9, %v4543_v9  ;;  %v650_v12 = vmul.f32 %v648_v10, %v648_v10  ;;  %3131 = vmatprep.subr.bf16.mxu1 %v3130_v0  ;;  %v729_v0 = vld [vmem:[#allocation6 + $0x160] sm:$0xff]  ;;  %v844_v18 = vld [vmem:[#allocation6 + $0x4f8] sm:$0xff] }
 0x148   : > { %3133 = vmatpush1.bf16.msra.mxu1 %v3132_v1  ;;  %v3160_v1 = vpack.c.bf16 %v729_v0, %v723_v21  ;;  %v837_v17 = vld [vmem:[#allocation6 + $0x4c0] sm:$0xff]  ;;  %v843_v0 = vld [vmem:[#allocation6 + $0x4f0] sm:$0xff]  ;;  %v856_v23 = vld [vmem:[#allocation6 + $0x558] sm:$0xff] }
 0x149   : > { %v651_v13 = vadd.f32 %v650_v12, %v649_v11  ;;  %3135 = vmatprep.subr.bf16.mxu1 %v3134_v27  ;;  %v699_v11 = vld [vmem:[#allocation6 + $0x70] sm:$0xff]  ;;  %v712_v12 = vld [vmem:[#allocation6 + $0xd8] sm:$0xff]  ;;  %v849_v22 = vld [vmem:[#allocation6 + $0x520] sm:$0xff] }
 0x14a   : > { %v748_v27 = vld [vmem:[#allocation6 + $0x1f8] sm:$0xff] }
 0x14b   : > { %652 = vadd.xlane.f32.xlu0 %v651_v13  ;;  %v3166_v30 = vpack.c.bf16 %v754_v28, %v748_v27  ;;  %v861_v27 = vld [vmem:[#allocation6 + $0x580] sm:$0xff]  ;;  %v868_v28 = vld [vmem:[#allocation6 + $0x5b8] sm:$0xff] }
 0x14c   : > { %3137 = vmatpush1.bf16.msra.mxu1 %v3136_v31  ;;  %v747_v31 = vld [vmem:[#allocation6 + $0x1f0] sm:$0xff] }
 0x14d   : > { %3139 = vmatprep.subr.bf16.mxu1 %v3138_v32  ;;  %v753_v32 = vld [vmem:[#allocation6 + $0x220] sm:$0xff] }
 0x14e   : > { %v3168_v35 = vpack.c.bf16 %v753_v32, %v747_v31  ;;  %v867_v32 = vld [vmem:[#allocation6 + $0x5b0] sm:$0xff] }
 0x150   : > { %3141 = vmatpush1.bf16.msra.mxu1 %v3140_v37  ;;  %v759_v37 = vld [vmem:[#allocation6 + $0x250] sm:$0xff] }
 0x151   : > { %3143 = vmatprep.subr.bf16.mxu1 %v3142_v38  ;;  %v765_v38 = vld [vmem:[#allocation6 + $0x280] sm:$0xff] }
 0x154   : > { %3145 = vmatpush1.bf16.msra.mxu1 %v3144_v41  ;;  %v3172_v41 = vpack.c.bf16 %v765_v38, %v759_v37  ;;  %v689_v38 = vld [vmem:[#allocation6 + $0x20] sm:$0xff] }
 0x155   : > { %3147 = vmatprep.subr.bf16.mxu1 %v3146_v44  ;;  %v777_v44 = vld [vmem:[#allocation6 + $0x2e0] sm:$0xff] }
 0x156   : > { %v3176_v47 = vpack.c.bf16 %v777_v44, %v771_v43  ;;  %v701_v44 = vld [vmem:[#allocation6 + $0x80] sm:$0xff] }
 0x1d8   : > { %v653_v45 = vpop.xlane.xlu0 %652 }
 0x1d9   : > { %v654_v46 = vmul.f32 0.00390625, %v653_v45  ;;  %v784_v45 = vld [vmem:[#allocation6 + $0x318] sm:$0xff] }
 0x1db   : > { %v655_v48 = vadd.f32 1e-05, %v654_v46  ;;  %v790_v46 = vld [vmem:[#allocation6 + $0x348] sm:$0xff] }
 0x1dd   : > { %3954 = vrsqrt.f32 %v655_v48  ;;  %v3178_v48 = vpack.c.bf16 %v790_v46, %v784_v45  ;;  %v707_v45 = vld [vmem:[#allocation6 + $0xb0] sm:$0xff]  ;;  %v714_v46 = vld [vmem:[#allocation6 + $0xe8] sm:$0xff] }
 0x1e7   : > { %v3955_v56 = vpop.eup %3954 }
 0x1e8   : > { %v658_v57 = vmul.f32 %v3955_v56, %v648_v10  ;;  %v657_v59 = vmul.f32 %v3955_v56, %v4543_v9  ;;  %v705_v10 = vld [vmem:[#allocation6 + $0xa0] sm:$0xff]  ;;  %v718_v9 = vld [vmem:[#allocation6 + $0x108] sm:$0xff]  ;;  %v3180_v56 = vpack.c.bf16 %v789_v53, %v783_v52 }
 0x1e9   : > { %v3152_v13 = vpack.c.bf16 %v705_v10, %v699_v11  ;;  %v3154_v14 = vpack.c.bf16 %v718_v9, %v712_v12  ;;  %v819_v10 = vld [vmem:[#allocation6 + $0x430] sm:$0xff]  ;;  %v825_v12 = vld [vmem:[#allocation6 + $0x460] sm:$0xff]  ;;  %v832_v9 = vld [vmem:[#allocation6 + $0x498] sm:$0xff] }
 0x1ea   : > { %v671_v63 = vmul.f32 %v667_v54, %v658_v57  ;;  %v670_v2 = vmul.f32 %v663_v55, %v657_v59  ;;  %v796_v54 = vld [vmem:[#allocation6 + $0x378] sm:$0xff]  ;;  %v802_v55 = vld [vmem:[#allocation6 + $0x3a8] sm:$0xff]  ;;  %v801_v59 = vld [vmem:[#allocation6 + $0x3a0] sm:$0xff] }
 0x1eb   : > { %v3182_v57 = vpack.c.bf16 %v802_v55, %v796_v54  ;;  %v713_v53 = vld [vmem:[#allocation6 + $0xe0] sm:$0xff]  ;;  %v719_v54 = vld [vmem:[#allocation6 + $0x110] sm:$0xff]  ;;  %v726_v55 = vld [vmem:[#allocation6 + $0x148] sm:$0xff] }
 0x1ec   : > { %v4567_v5 = vadd.f32 %v680_v58, %v671_v63  ;;  %v4569_v6 = vadd.f32 %v676_v60, %v670_v2  ;;  %v795_v58 = vld [vmem:[#allocation6 + $0x370] sm:$0xff]  ;;  %v808_v60 = vld [vmem:[#allocation6 + $0x3d8] sm:$0xff] }
 0x1ed   : > { %v3184_v62 = vpack.c.bf16 %v801_v59, %v795_v58  ;;  %v3186_v63 = vpack.c.bf16 %v814_v61, %v808_v60  ;;  %v807_v2 = vld [vmem:[#allocation6 + $0x3d0] sm:$0xff]  ;;  %v725_v59 = vld [vmem:[#allocation6 + $0x140] sm:$0xff]  ;;  %v738_v61 = vld [vmem:[#allocation6 + $0x1a8] sm:$0xff] }
 0x1ee   : > { %973 = vmatprep.mubr.f32.mxu1 %v4567_v5  ;;  %v731_v60 = vld [vmem:[#allocation6 + $0x170] sm:$0xff] }
 0x1ef   : > { %974 = vmatmul.mubr.f32.vlgmr.msra.gmra.mrb[0].mxu1 %v4569_v6 }
 0x1f0   : > { %3149 = vmatpush1.bf16.msra.mxu1 %v3148_v7  ;;  %1044 = vmatprep.mubr.f32.mxu1 %v4567_v5  ;;  %v826_v7 = vld [vmem:[#allocation6 + $0x468] sm:$0xff] }
 0x1f1   : > { %3151 = vmatprep.subr.bf16.mxu1 %v3150_v8  ;;  %v3188_v8 = vpack.c.bf16 %v813_v3, %v807_v2  ;;  %v3190_v11 = vpack.c.bf16 %v826_v7, %v820_v4  ;;  %v743_v3 = vld [vmem:[#allocation6 + $0x1d0] sm:$0xff]  ;;  %v750_v4 = vld [vmem:[#allocation6 + $0x208] sm:$0xff]  ;;  %v756_v7 = vld [vmem:[#allocation6 + $0x238] sm:$0xff] }
 0x1f4   : > { %3153 = vmatpush1.bf16.msra.mxu1 %v3152_v13  ;;  %v838_v13 = vld [vmem:[#allocation6 + $0x4c8] sm:$0xff] }
 0x1f5   : > { %3155 = vmatprep.subr.bf16.mxu1 %v3154_v14  ;;  %v3192_v14 = vpack.c.bf16 %v825_v12, %v819_v10  ;;  %v3194_v15 = vpack.c.bf16 %v838_v13, %v832_v9  ;;  %v749_v10 = vld [vmem:[#allocation6 + $0x200] sm:$0xff]  ;;  %v755_v12 = vld [vmem:[#allocation6 + $0x230] sm:$0xff]  ;;  %v762_v9 = vld [vmem:[#allocation6 + $0x268] sm:$0xff] }
 0x1f6   : > { %v768_v13 = vld [vmem:[#allocation6 + $0x298] sm:$0xff] }
 0x1f8   : > { %3157 = vmatpush1.bf16.msra.mxu1 %v3156_v19  ;;  %v850_v19 = vld [vmem:[#allocation6 + $0x528] sm:$0xff] }
 0x1f9   : > { %3159 = vmatprep.subr.bf16.mxu1 %v3158_v20  ;;  %v3196_v20 = vpack.c.bf16 %v837_v17, %v831_v16  ;;  %v3198_v21 = vpack.c.bf16 %v850_v19, %v844_v18  ;;  %v761_v16 = vld [vmem:[#allocation6 + $0x260] sm:$0xff]  ;;  %v767_v17 = vld [vmem:[#allocation6 + $0x290] sm:$0xff]  ;;  %v774_v18 = vld [vmem:[#allocation6 + $0x2c8] sm:$0xff] }
 0x1fa   : > { %v780_v19 = vld [vmem:[#allocation6 + $0x2f8] sm:$0xff] }
 0x1fc   : > { %3161 = vmatpush1.bf16.msra.mxu1 %v3160_v1  ;;  %v862_v1 = vld [vmem:[#allocation6 + $0x588] sm:$0xff] }
 0x1fd   : > { %3163 = vmatprep.subr.bf16.mxu1 %v3162_v24  ;;  %v3200_v24 = vpack.c.bf16 %v849_v22, %v843_v0  ;;  %v3202_v25 = vpack.c.bf16 %v862_v1, %v856_v23  ;;  %v773_v0 = vld [vmem:[#allocation6 + $0x2c0] sm:$0xff]  ;;  %v779_v22 = vld [vmem:[#allocation6 + $0x2f0] sm:$0xff]  ;;  %v786_v23 = vld [vmem:[#allocation6 + $0x328] sm:$0xff] }
 0x1fe   : > { %v792_v1 = vld [vmem:[#allocation6 + $0x358] sm:$0xff] }
 0x200   : > { %3165 = vmatpush1.bf16.msra.mxu1 %v3164_v29  ;;  %v874_v29 = vld [vmem:[#allocation6 + $0x5e8] sm:$0xff] }
 0x201   : > { %3167 = vmatprep.subr.bf16.mxu1 %v3166_v30  ;;  %v3204_v30 = vpack.c.bf16 %v861_v27, %v855_v26  ;;  %v3206_v31 = vpack.c.bf16 %v874_v29, %v868_v28  ;;  %v785_v26 = vld [vmem:[#allocation6 + $0x320] sm:$0xff]  ;;  %v791_v27 = vld [vmem:[#allocation6 + $0x350] sm:$0xff]  ;;  %v798_v28 = vld [vmem:[#allocation6 + $0x388] sm:$0xff] }
 0x202   : > { %v804_v29 = vld [vmem:[#allocation6 + $0x3b8] sm:$0xff] }
 0x204   : > { %3169 = vmatpush1.bf16.msra.mxu1 %v3168_v35  ;;  %v696_v35 = vld [vmem:[#allocation6 + $0x58] sm:$0xff] }
 0x205   : > { %3171 = vmatprep.subr.bf16.mxu1 %v3170_v36  ;;  %v3208_v36 = vpack.c.bf16 %v873_v33, %v867_v32  ;;  %v3210_v37 = vpack.c.bf16 %v696_v35, %v690_v34  ;;  %v797_v32 = vld [vmem:[#allocation6 + $0x380] sm:$0xff]  ;;  %v803_v33 = vld [vmem:[#allocation6 + $0x3b0] sm:$0xff]  ;;  %v810_v34 = vld [vmem:[#allocation6 + $0x3e8] sm:$0xff] }
 0x206   : > { %v816_v35 = vld [vmem:[#allocation6 + $0x418] sm:$0xff] }
 0x208   : > { %3173 = vmatpush1.bf16.msra.mxu1 %v3172_v41  ;;  %v708_v41 = vld [vmem:[#allocation6 + $0xb8] sm:$0xff] }
 0x209   : > { %3175 = vmatprep.subr.bf16.mxu1 %v3174_v42  ;;  %v3212_v42 = vpack.c.bf16 %v695_v39, %v689_v38  ;;  %v3214_v43 = vpack.c.bf16 %v708_v41, %v702_v40  ;;  %v809_v38 = vld [vmem:[#allocation6 + $0x3e0] sm:$0xff]  ;;  %v815_v39 = vld [vmem:[#allocation6 + $0x410] sm:$0xff]  ;;  %v822_v40 = vld [vmem:[#allocation6 + $0x448] sm:$0xff] }
 0x20a   : > { %v828_v41 = vld [vmem:[#allocation6 + $0x478] sm:$0xff] }
 0x20c   : > { %3177 = vmatpush1.bf16.msra.mxu1 %v3176_v47  ;;  %v720_v47 = vld [vmem:[#allocation6 + $0x118] sm:$0xff] }
 0x20d   : > { %3179 = vmatprep.subr.bf16.mxu1 %v3178_v48  ;;  %v3216_v48 = vpack.c.bf16 %v707_v45, %v701_v44  ;;  %v3218_v52 = vpack.c.bf16 %v720_v47, %v714_v46  ;;  %v821_v44 = vld [vmem:[#allocation6 + $0x440] sm:$0xff]  ;;  %v827_v45 = vld [vmem:[#allocation6 + $0x470] sm:$0xff]  ;;  %v834_v46 = vld [vmem:[#allocation6 + $0x4a8] sm:$0xff] }
 0x20e   : > { %v840_v47 = vld [vmem:[#allocation6 + $0x4d8] sm:$0xff] }
 0x210   : > { %3181 = vmatpush1.bf16.msra.mxu1 %v3180_v56  ;;  %v732_v56 = vld [vmem:[#allocation6 + $0x178] sm:$0xff] }
 0x211   : > { %3183 = vmatprep.subr.bf16.mxu1 %v3182_v57  ;;  %v3220_v57 = vpack.c.bf16 %v719_v54, %v713_v53  ;;  %v3222_v58 = vpack.c.bf16 %v732_v56, %v726_v55  ;;  %v833_v53 = vld [vmem:[#allocation6 + $0x4a0] sm:$0xff]  ;;  %v839_v54 = vld [vmem:[#allocation6 + $0x4d0] sm:$0xff]  ;;  %v846_v55 = vld [vmem:[#allocation6 + $0x508] sm:$0xff] }
 0x212   : > { %v852_v56 = vld [vmem:[#allocation6 + $0x538] sm:$0xff] }
 0x214   : > { %3185 = vmatpush1.bf16.msra.mxu1 %v3184_v62  ;;  %v744_v62 = vld [vmem:[#allocation6 + $0x1d8] sm:$0xff] }
 0x215   : > { %3187 = vmatprep.subr.bf16.mxu1 %v3186_v63  ;;  %v3224_v63 = vpack.c.bf16 %v731_v60, %v725_v59  ;;  %v3226_v2 = vpack.c.bf16 %v744_v62, %v738_v61  ;;  %v845_v59 = vld [vmem:[#allocation6 + $0x500] sm:$0xff]  ;;  %v851_v60 = vld [vmem:[#allocation6 + $0x530] sm:$0xff]  ;;  %v858_v61 = vld [vmem:[#allocation6 + $0x568] sm:$0xff] }
 0x216   : > { %v864_v62 = vld [vmem:[#allocation6 + $0x598] sm:$0xff] }
 0x218   : > { %3189 = vmatpush1.bf16.msra.mxu1 %v3188_v8 }
 0x219   : > { %3191 = vmatprep.subr.bf16.mxu1 %v3190_v11  ;;  %v3230_v11 = vpack.c.bf16 %v756_v7, %v750_v4  ;;  %v870_v4 = vld [vmem:[#allocation6 + $0x5c8] sm:$0xff]  ;;  %v876_v7 = vld [vmem:[#allocation6 + $0x5f8] sm:$0xff] }
 0x21c   : > { %3193 = vmatpush1.bf16.msra.mxu1 %v3192_v14  ;;  %v3232_v14 = vpack.c.bf16 %v755_v12, %v749_v10  ;;  %v869_v10 = vld [vmem:[#allocation6 + $0x5c0] sm:$0xff]  ;;  %v875_v12 = vld [vmem:[#allocation6 + $0x5f0] sm:$0xff] }
 0x21d   : > { %3195 = vmatprep.subr.bf16.mxu1 %v3194_v15  ;;  %v3234_v15 = vpack.c.bf16 %v768_v13, %v762_v9  ;;  %v3272_v9 = vpack.c.bf16 %v875_v12, %v869_v10  ;;  %v4213_v13 = vmov 0.0   ;;  %v1450_v10 = vld [vmem:[#allocation8 + $0x30] sm:$0xff]  ;;  %v1453_v12 = vld [vmem:[#allocation8 + $0x48] sm:$0xff] }
 0x21e   : > { %3062 = vmatprep.subr.mxu0 %v4213_v13  ;;  %3064 = vmatprep.mubr.msk.f32.mxu0 %vm4214_vm0, %v4213_v13 }
 0x220   : > { %3197 = vmatpush1.bf16.msra.mxu1 %v3196_v20  ;;  %v3236_v20 = vpack.c.bf16 %v767_v17, %v761_v16  ;;  %v877_v16 = vld [vmem:[%s4790_s7] sm:$0x3f]  ;;  %v4583_v17 = vsub.s32 2, %v4548_v49 }
 0x221   : > { %3199 = vmatprep.subr.bf16.mxu1 %v3198_v21  ;;  %v3238_v21 = vpack.c.bf16 %v780_v19, %v774_v18  ;;  %v4586_v18 = vsub.s32 3, %v4548_v49  ;;  %v886_v19 = vrot.slane %v877_v16, %v4551_v50 }
 0x224   : > { %3201 = vmatpush1.bf16.msra.mxu1 %v3200_v24  ;;  %v3240_v24 = vpack.c.bf16 %v779_v22, %v773_v0 }
 0x225   : > { %3203 = vmatprep.subr.bf16.mxu1 %v3202_v25  ;;  %v3242_v25 = vpack.c.bf16 %v792_v1, %v786_v23 }
 0x228   : > { %3205 = vmatpush1.bf16.msra.mxu1 %v3204_v30  ;;  %v3244_v30 = vpack.c.bf16 %v791_v27, %v785_v26 }
 0x229   : > { %3207 = vmatprep.subr.bf16.mxu1 %v3206_v31  ;;  %v3246_v31 = vpack.c.bf16 %v804_v29, %v798_v28  ;;  %v897_v28 = vsub.s32 4, %v4548_v49  ;;  %v901_v29 = vsub.s32 5, %v4548_v49 }
 0x22c   : > { %3209 = vmatpush1.bf16.msra.mxu1 %v3208_v36  ;;  %v3248_v36 = vpack.c.bf16 %v803_v33, %v797_v32 }
 0x22d   : > { %3211 = vmatprep.subr.bf16.mxu1 %v3210_v37  ;;  %v3250_v37 = vpack.c.bf16 %v816_v35, %v810_v34 }
 0x22f   : > { %1045 = vmatmul.mubr.f32.vlgmr.msra.gmra.mrb[2].mxu1 %v4569_v6 }
 0x230   : > { %3213 = vmatpush1.bf16.msra.mxu1 %v3212_v42  ;;  %1115 = vmatprep.mubr.f32.mxu1 %v4567_v5  ;;  %v737_v5 = vld [vmem:[#allocation6 + $0x1a0] sm:$0xff]  ;;  %v3252_v42 = vpack.c.bf16 %v815_v39, %v809_v38 }
 0x231   : > { %3215 = vmatprep.subr.bf16.mxu1 %v3214_v43  ;;  %v3228_v8 = vpack.c.bf16 %v743_v3, %v737_v5  ;;  %v3254_v43 = vpack.c.bf16 %v828_v41, %v822_v40  ;;  %v857_v5 = vld [vmem:[#allocation6 + $0x560] sm:$0xff]  ;;  %v863_v3 = vld [vmem:[#allocation6 + $0x590] sm:$0xff] }
 0x234   : > { %3217 = vmatpush1.bf16.msra.mxu1 %v3216_v48  ;;  %v3256_v48 = vpack.c.bf16 %v827_v45, %v821_v44 }
 0x235   : > { %3219 = vmatprep.subr.bf16.mxu1 %v3218_v52  ;;  %v3258_v52 = vpack.c.bf16 %v840_v47, %v834_v46 }
 0x238   : > { %3221 = vmatpush1.bf16.msra.mxu1 %v3220_v57  ;;  %v3260_v57 = vpack.c.bf16 %v839_v54, %v833_v53 }
 0x239   : > { %3223 = vmatprep.subr.bf16.mxu1 %v3222_v58  ;;  %v3262_v58 = vpack.c.bf16 %v852_v56, %v846_v55 }
 0x23c   : > { %3225 = vmatpush1.bf16.msra.mxu1 %v3224_v63  ;;  %v3264_v63 = vpack.c.bf16 %v851_v60, %v845_v59 }
 0x23d   : > { %3227 = vmatprep.subr.bf16.mxu1 %v3226_v2  ;;  %v3266_v2 = vpack.c.bf16 %v864_v62, %v858_v61  ;;  %v1444_v62 = vld [vmem:[#allocation8] sm:$0xff] }
 0x240   : > { %3229 = vmatpush1.bf16.msra.mxu1 %v3228_v8  ;;  %v3268_v8 = vpack.c.bf16 %v863_v3, %v857_v5  ;;  %v1451_v5 = vld [vmem:[#allocation8 + $0x38] sm:$0xff] }
 0x241   : > { %3231 = vmatprep.subr.bf16.mxu1 %v3230_v11  ;;  %v3270_v11 = vpack.c.bf16 %v876_v7, %v870_v4 }
 0x244   : > { %3233 = vmatpush1.bf16.msra.mxu1 %v3232_v14 }
 0x245   : > { %3235 = vmatprep.subr.bf16.mxu1 %v3234_v15 }
 0x248   : > { %3237 = vmatpush1.bf16.msra.mxu1 %v3236_v20  ;;  %v890_v20 = vrot.slane %v877_v16, %v4583_v17 }
 0x249   : > { %3239 = vmatprep.subr.bf16.mxu1 %v3238_v21  ;;  %v894_v21 = vrot.slane %v877_v16, %v4586_v18 }
 0x24c   : > { %3241 = vmatpush1.bf16.msra.mxu1 %v3240_v24 }
 0x24d   : > { %3243 = vmatprep.subr.bf16.mxu1 %v3242_v25 }
 0x250   : > { %3245 = vmatpush1.bf16.msra.mxu1 %v3244_v30  ;;  %v898_v30 = vrot.slane %v877_v16, %v897_v28  ;;  %v1460_v28 = vld [vmem:[#allocation8 + $0x80] sm:$0xff] }
 0x251   : > { %3247 = vmatprep.subr.bf16.mxu1 %v3246_v31  ;;  %v902_v31 = vrot.slane %v877_v16, %v901_v29  ;;  %v1462_v29 = vld [vmem:[#allocation8 + $0x90] sm:$0xff] }
 0x254   : > { %3249 = vmatpush1.bf16.msra.mxu1 %v3248_v36  ;;  %v3042_v36 = vld [vmem:[%s631_s15] ss:$0 sm:$0xff] }
 0x255   : > { %3251 = vmatprep.subr.bf16.mxu1 %v3250_v37 }
 0x258   : > { %3253 = vmatpush1.bf16.msra.mxu1 %v3252_v42 }
 0x259   : > { %3255 = vmatprep.subr.bf16.mxu1 %v3254_v43 }
 0x25c   : > { %3257 = vmatpush1.bf16.msra.mxu1 %v3256_v48 }
 0x25d   : > { %3259 = vmatprep.subr.bf16.mxu1 %v3258_v52 }
 0x260   : > { %3261 = vmatpush1.bf16.msra.mxu1 %v3260_v57  ;;  %v1445_v57 = vld [vmem:[#allocation8 + $0x8] sm:$0xff] }
 0x261   : > { %3263 = vmatprep.subr.bf16.mxu1 %v3262_v58  ;;  %v1447_v58 = vld [vmem:[#allocation8 + $0x18] sm:$0xff] }
 0x262   : > { %v3274_v59 = vpack.c.bf16 %v1447_v58, %v1445_v57  ;;  %v1483_v57 = vld [vmem:[#allocation8 + $0x138] sm:$0xff] }
 0x264   : > { %3265 = vmatpush1.bf16.msra.mxu1 %v3264_v63  ;;  %v1446_v63 = vld [vmem:[#allocation8 + $0x10] sm:$0xff] }
 0x265   : > { %3267 = vmatprep.subr.bf16.mxu1 %v3266_v2  ;;  %v1449_v2 = vld [vmem:[#allocation8 + $0x28] sm:$0xff]  ;;  %v3276_v4 = vpack.c.bf16 %v1446_v63, %v1444_v62  ;;  %v1487_v63 = vld [vmem:[#allocation8 + $0x158] sm:$0xff] }
 0x266   : > { %v1485_v62 = vld [vmem:[#allocation8 + $0x148] sm:$0xff] }
 0x268   : > { %3269 = vmatpush1.bf16.msra.mxu1 %v3268_v8  ;;  %v3278_v8 = vpack.c.bf16 %v1451_v5, %v1449_v2  ;;  %v3314_v5 = vpack.c.bf16 %v1487_v63, %v1485_v62  ;;  %v1652_v62 = vld [vmem:[#allocation9 + $0x18] sm:$0xff] }
 0x269   : > { %3271 = vmatprep.subr.bf16.mxu1 %v3270_v11  ;;  %v1448_v11 = vld [vmem:[#allocation8 + $0x20] sm:$0xff] }
 0x26c   : > { %3273 = vmatpush1.bf16.msra.mxu1 %v3272_v9  ;;  %v1455_v9 = vld [vmem:[#allocation8 + $0x58] sm:$0xff] }
 0x26d   : > { %3072 = vmatprep.subr.mxu1 %v4213_v13 }
 0x26f   : > { %1116 = vmatmul.mubr.f32.vlgmr.msra.gmra.mrb[4].mxu1 %v4569_v6  ;;  %v882_v6 = vrot.slane %v877_v16, %v4554_v51  ;;  %v3282_v16 = vpack.c.bf16 %v1455_v9, %v1453_v12  ;;  %v1488_v12 = vld [vmem:[#allocation8 + $0x160] sm:$0xff]  ;;  %v1490_v9 = vld [vmem:[#allocation8 + $0x170] sm:$0xff] }
 0x270   : > { %3074 = vmatprep.mubr.msk.f32.mxu1 %vm4214_vm0, %v4213_v13 }
 0x2c2   : > { %v975_v14 = vpop.f32.mrb[0].mxu1 }
 0x2c3   : > { %v977_v15 = vpop.f32.mrb[1].mxu1  ;;  %v976_v0 = vadd.f32 %v975_v14, %v882_v6  ;;  %v3280_v14 = vpack.c.bf16 %v1450_v10, %v1448_v11  ;;  %v1452_v6 = vld [vmem:[#allocation8 + $0x40] sm:$0xff] }
 0x2c4   : > { %v978_v23 = vadd.f32 %v977_v15, %v886_v19  ;;  %v1454_v19 = vld [vmem:[#allocation8 + $0x50] sm:$0xff] }
 0x2c5   : > { %v1122_v26 = vmul.f32 0.088388346, %v976_v0  ;;  %v3284_v0 = vpack.c.bf16 %v1454_v19, %v1452_v6  ;;  %v1492_v6 = vld [vmem:[#allocation8 + $0x180] sm:$0xff]  ;;  %v1494_v19 = vld [vmem:[#allocation8 + $0x190] sm:$0xff] }
 0x2c6   : > { %v1123_v27 = vmul.f32 0.088388346, %v978_v23  ;;  %v1456_v23 = vld [vmem:[#allocation8 + $0x60] sm:$0xff] }
 0x302   : > { %v1046_v22 = vpop.f32.mrb[2].mxu1 }
 0x303   : > { %v1047_v1 = vadd.f32 %v1046_v22, %v890_v20  ;;  %v1048_v24 = vpop.f32.mrb[3].mxu1  ;;  %v1457_v20 = vld [vmem:[#allocation8 + $0x68] sm:$0xff] }
 0x304   : > { %v1049_v25 = vadd.f32 %v1048_v24, %v894_v21  ;;  %v1459_v21 = vld [vmem:[#allocation8 + $0x78] sm:$0xff]  ;;  %v1461_v24 = vld [vmem:[#allocation8 + $0x88] sm:$0xff] }
 0x305   : > { %3063 = vmatpush3.xpose.msra.mxu0 %v1047_v1  ;;  %v3286_v22 = vpack.c.bf16 %v1459_v21, %v1457_v20  ;;  %v1458_v1 = vld [vmem:[#allocation8 + $0x70] sm:$0xff]  ;;  %v1497_v20 = vld [vmem:[#allocation8 + $0x1a8] sm:$0xff]  ;;  %v1499_v21 = vld [vmem:[#allocation8 + $0x1b8] sm:$0xff] }
 0x306   : > { %3073 = vmatpush3.xpose.msra.mxu1 %v1049_v25  ;;  %3067 = vmatprep.subr.mxu0 %v4213_v13  ;;  %v1463_v25 = vld [vmem:[#allocation8 + $0x98] sm:$0xff] }
 0x307   : > { %3077 = vmatprep.subr.mxu1 %v4213_v13 }
 0x308   : > { %3065 = vmatmul.mubr.f32.vlgmr.msra.gmra.mrb[0].mxu0 %v1122_v26  ;;  %v3288_v26 = vpack.c.bf16 %v1458_v1, %v1456_v23  ;;  %v1496_v23 = vld [vmem:[#allocation8 + $0x1a0] sm:$0xff]  ;;  %v1498_v1 = vld [vmem:[#allocation8 + $0x1b0] sm:$0xff] }
 0x309   : > { %3075 = vmatmul.mubr.f32.vlgmr.msra.gmra.mrb[6].mxu1 %v1123_v27  ;;  %3069 = vmatprep.mubr.msk.f32.mxu0 %vm4214_vm0, %v4213_v13  ;;  %v3290_v27 = vpack.c.bf16 %v1463_v25, %v1461_v24  ;;  %v1501_v24 = vld [vmem:[#allocation8 + $0x1c8] sm:$0xff]  ;;  %v1503_v25 = vld [vmem:[#allocation8 + $0x1d8] sm:$0xff] }
 0x30a   : > { %3079 = vmatprep.mubr.msk.f32.mxu1 %vm4214_vm0, %v4213_v13 }
 0x342   : > { %v1117_v32 = vpop.f32.mrb[4].mxu1 }
 0x343   : > { %v1118_v33 = vadd.f32 %v1117_v32, %v898_v30  ;;  %v1119_v34 = vpop.f32.mrb[5].mxu1  ;;  %v1465_v30 = vld [vmem:[#allocation8 + $0xa8] sm:$0xff]  ;;  %v3292_v32 = vpack.c.bf16 %v1462_v29, %v1460_v28  ;;  %v1500_v28 = vld [vmem:[#allocation8 + $0x1c0] sm:$0xff]  ;;  %v1502_v29 = vld [vmem:[#allocation8 + $0x1d0] sm:$0xff] }
 0x344   : > { %v1120_v35 = vadd.f32 %v1119_v34, %v902_v31  ;;  %v1467_v31 = vld [vmem:[#allocation8 + $0xb8] sm:$0xff]  ;;  %v1464_v34 = vld [vmem:[#allocation8 + $0xa0] sm:$0xff] }
 0x345   : > { %3068 = vmatpush3.msra.mxu0 %v1118_v33  ;;  %v3294_v33 = vpack.c.bf16 %v1467_v31, %v1465_v30  ;;  %v3332_v30 = vpack.c.bf16 %v1502_v29, %v1500_v28  ;;  %v1505_v31 = vld [vmem:[#allocation8 + $0x1e8] sm:$0xff]  ;;  %v1669_v29 = vld [vmem:[#allocation9 + $0x140] sm:$0xff] }
 0x346   : > { %3078 = vmatpush3.msra.mxu1 %v1120_v35  ;;  %v1466_v35 = vld [vmem:[#allocation8 + $0xb0] sm:$0xff] }
 0x347   : > { %3275 = vmatprep.subr.bf16.mxu1 %v3274_v59 }
 0x3db   : > { %v1197_v37 = vpop.f32.mrb[0].mxu0 }
 0x3dc   : > { %v3066_v38 = vpop.f32.mrb[1].mxu0  ;;  %v1353_v49 = vpop.f32.mrb[6].mxu1  ;;  %v1198_v41 = vadd.f32 %v3042_v36, %v1197_v37  ;;  %v1471_v37 = vld [vmem:[#allocation8 + $0xd8] sm:$0xff] }
 0x3dd   : > { %v1354_v39 = vadd.f32 %v3042_v36, %v1353_v49  ;;  %v3076_v40 = vpop.f32.mrb[7].mxu1  ;;  %v1469_v36 = vld [vmem:[#allocation8 + $0xc8] sm:$0xff]  ;;  %v3296_v38 = vpack.c.bf16 %v1466_v35, %v1464_v34  ;;  %v1504_v34 = vld [vmem:[#allocation8 + $0x1e0] sm:$0xff]  ;;  %v1506_v35 = vld [vmem:[#allocation8 + $0x1f0] sm:$0xff] }
 0x3de   : > { %v1202_v43 = vsel %vm1201_vm1, %v1198_v41, -inf  ;;  %v3298_v49 = vpack.c.bf16 %v1471_v37, %v1469_v36  ;;  %v1470_v40 = vld [vmem:[#allocation8 + $0xd0] sm:$0xff]  ;;  %v3336_v36 = vpack.c.bf16 %v1506_v35, %v1504_v34  ;;  %v4215_v37 = vmov 0   ;;  %v1678_v34 = vld [vmem:[#allocation9 + $0x1c8] sm:$0xff]  ;;  %v1676_v35 = vld [vmem:[#allocation9 + $0x198] sm:$0xff] }
 0x3df   : > { %v1357_v42 = vsel %vm1201_vm1, %v1354_v39, -inf  ;;  %3952 = vset.pattern.permute.xlu0 %v4215_v37  ;;  %3953 = vset.pattern.permute.xlu1 %v4215_v37 }
 0x3e0   : > { %1358 = vmax.xlane.f32.xlu1 %v1357_v42  ;;  %v1475_v42 = vld [vmem:[#allocation8 + $0xf8] sm:$0xff] }
 0x3e4   : > { %1203 = vmax.xlane.f32.xlu1 %v1202_v43 }
 0x46d   : > { %v1359_v44 = vpop.xlane.xlu1 %1358 }
 0x46e   : > { %v1360_v45 = vsub.f32 %v1354_v39, %v1359_v44  ;;  %v1468_v39 = vld [vmem:[#allocation8 + $0xc0] sm:$0xff] }
 0x46f   : > { %v3300_v43 = vpack.c.bf16 %v1470_v40, %v1468_v39 }
 0x470   : > { %v1361_v46 = vmul.f32 1.442695, %v1360_v45  ;;  %v1472_v45 = vld [vmem:[#allocation8 + $0xe0] sm:$0xff] }
 0x471   : > { %v1204_v47 = vpop.xlane.xlu1 %1203 }
 0x472   : > { %3956 = vpow2.f32 %v1361_v46  ;;  %v1205_v48 = vsub.f32 %v1198_v41, %v1204_v47  ;;  %v1473_v41 = vld [vmem:[#allocation8 + $0xe8] sm:$0xff]  ;;  %v1474_v46 = vld [vmem:[#allocation8 + $0xf0] sm:$0xff] }
 0x473   : > { %v3302_v44 = vpack.c.bf16 %v1475_v42, %v1473_v41  ;;  %v1477_v47 = vld [vmem:[#allocation8 + $0x108] sm:$0xff]  ;;  %v1508_v42 = vld [vmem:[%s4833_s13] sm:$0x3] }
 0x474   : > { %v1206_v52 = vmul.f32 1.442695, %v1205_v48  ;;  %v1479_v48 = vld [vmem:[#allocation8 + $0x118] sm:$0xff] }
 0x476   : > { %3958 = vpow2.f32 %v1206_v52  ;;  %v3304_v52 = vpack.c.bf16 %v1474_v46, %v1472_v45 }
 0x47c   : > { %v3957_v53 = vpop.eup %3956 }
 0x47d   : > { %v1363_v54 = vsel %vm1201_vm1, %v3957_v53, 0.0 }
 0x47e   : > { %1364 = vadd.xlane.f32.xlu0 %v1363_v54  ;;  %v1476_v54 = vld [vmem:[#allocation8 + $0x100] sm:$0xff] }
 0x480   : > { %v3959_v55 = vpop.eup %3958 }
 0x481   : > { %v1208_v56 = vsel %vm1201_vm1, %v3959_v55, 0.0 }
 0x482   : > { %1209 = vadd.xlane.f32.xlu1 %v1208_v56  ;;  %v1481_v56 = vld [vmem:[#allocation8 + $0x128] sm:$0xff] }
 0x483   : > { %v3310_v59 = vpack.c.bf16 %v1483_v57, %v1481_v56  ;;  %v3983_v57 = vld [vmem:[%s4520_s18 + $0x8] sm:$0xff] }
 0x50b   : > { %v1365_v60 = vpop.xlane.xlu0 %1364 }
 0x50c   : > { %3960 = vrcp.f32 %v1365_v60  ;;  %v1480_v60 = vld [vmem:[#allocation8 + $0x120] sm:$0xff] }
 0x50f   : > { %v1210_v61 = vpop.xlane.xlu1 %1209 }
 0x510   : > { %3962 = vrcp.f32 %v1210_v61  ;;  %v1482_v61 = vld [vmem:[#allocation8 + $0x130] sm:$0xff] }
 0x511   : > { %v3312_v2 = vpack.c.bf16 %v1482_v61, %v1480_v60  ;;  %v1650_v60 = vld [vmem:[#allocation9 + $0x8] sm:$0xff] }
 0x512   : > { %v1654_v61 = vld [vmem:[#allocation9 + $0x48] sm:$0xff] }
 0x513   : > { %v3338_v63 = vpack.c.bf16 %v1654_v61, %v1650_v60  ;;  %v1690_v60 = vld [vmem:[#allocation9 + $0x288] sm:$0xff] }
 0x514   : > { %v1694_v61 = vld [vmem:[#allocation9 + $0x2c8] sm:$0xff] }
 0x515   : > { %3339 = vmatprep.subr.bf16.mxu0 %v3338_v63  ;;  %v1696_v63 = vld [vmem:[#allocation9 + $0x2d8] sm:$0xff] }
 0x516   : > { %v3961_v3 = vpop.eup %3960 }
 0x517   : > { %v1367_v7 = vmul.f32 %v3961_v3, %v3957_v53  ;;  %v3306_v53 = vpack.c.bf16 %v1479_v48, %v1477_v47  ;;  %v1484_v3 = vld [vmem:[#allocation8 + $0x140] sm:$0xff] }
 0x519   : > { %3080 = vmatmul.mubr.msk.f32.vlgmr.msra.gmra.mrb[8].mxu1 %vm1201_vm1, %v1367_v7  ;;  %v1489_v7 = vld [vmem:[#allocation8 + $0x168] sm:$0xff] }
 0x51a   : > { %v3963_v13 = vpop.eup %3962  ;;  %3277 = vmatpush1.bf16.msra.mxu1 %v3276_v4  ;;  %v1486_v4 = vld [vmem:[#allocation8 + $0x150] sm:$0xff] }
 0x51b   : > { %v1212_v15 = vmul.f32 %v3963_v13, %v3959_v55  ;;  %3279 = vmatprep.subr.bf16.mxu1 %v3278_v8  ;;  %v1478_v55 = vld [vmem:[#allocation8 + $0x110] sm:$0xff]  ;;  %v1491_v8 = vld [vmem:[#allocation8 + $0x178] sm:$0xff]  ;;  %v3316_v11 = vpack.c.bf16 %v1486_v4, %v1484_v3  ;;  %v1493_v13 = vld [vmem:[#allocation8 + $0x188] sm:$0xff] }
 0x51c   : > { %v3308_v58 = vpack.c.bf16 %v1478_v55, %v1476_v54  ;;  %v3318_v10 = vpack.c.bf16 %v1491_v8, %v1489_v7  ;;  %v3982_v55 = vld [vmem:[%s4520_s18] sm:$0xff] }
 0x51d   : > { %3070 = vmatmul.mubr.msk.f32.vlgmr.msra.gmra.mrb[2].mxu0 %vm1201_vm1, %v1212_v15  ;;  %v3320_v15 = vpack.c.bf16 %v1490_v9, %v1488_v12  ;;  %v1653_v3 = vld [vmem:[#allocation9 + $0x40] sm:$0xff]  ;;  %v1651_v8 = vld [vmem:[#allocation9 + $0x10] sm:$0xff]  ;;  %v1662_v9 = vld [vmem:[#allocation9 + $0xc8] sm:$0xff] }
 0x51e   : > { %3281 = vmatpush1.bf16.msra.mxu1 %v3280_v14  ;;  %v1495_v14 = vld [vmem:[#allocation8 + $0x198] sm:$0xff] }
 0x51f   : > { %3283 = vmatprep.subr.bf16.mxu1 %v3282_v16  ;;  %v3322_v16 = vpack.c.bf16 %v1495_v14, %v1493_v13  ;;  %v1660_v13 = vld [vmem:[#allocation9 + $0x98] sm:$0xff] }
 0x520   : > { %v1664_v14 = vld [vmem:[#allocation9 + $0xd8] sm:$0xff] }
 0x522   : > { %3285 = vmatpush1.bf16.msra.mxu1 %v3284_v0  ;;  %v3324_v0 = vpack.c.bf16 %v1494_v19, %v1492_v6  ;;  %v1657_v6 = vld [vmem:[#allocation9 + $0x80] sm:$0xff] }
 0x523   : > { %3287 = vmatprep.subr.bf16.mxu1 %v3286_v22  ;;  %v3326_v22 = vpack.c.bf16 %v1499_v21, %v1497_v20  ;;  %v1661_v19 = vld [vmem:[#allocation9 + $0xc0] sm:$0xff]  ;;  %v1659_v20 = vld [vmem:[#allocation9 + $0x90] sm:$0xff] }
 0x524   : > { %v3344_v21 = vpack.c.bf16 %v1661_v19, %v1657_v6  ;;  %v1697_v19 = vld [vmem:[#allocation9 + $0x300] sm:$0xff] }
 0x526   : > { %3289 = vmatpush1.bf16.msra.mxu1 %v3288_v26  ;;  %v3328_v26 = vpack.c.bf16 %v1498_v1, %v1496_v23  ;;  %v1670_v23 = vld [vmem:[#allocation9 + $0x148] sm:$0xff] }
 0x527   : > { %3291 = vmatprep.subr.bf16.mxu1 %v3290_v27  ;;  %v3330_v27 = vpack.c.bf16 %v1503_v25, %v1501_v24  ;;  %v1668_v25 = vld [vmem:[#allocation9 + $0x118] sm:$0xff] }
 0x52a   : > { %3293 = vmatpush1.bf16.msra.mxu1 %v3292_v32  ;;  %v1507_v32 = vld [vmem:[#allocation8 + $0x1f8] sm:$0xff] }
 0x52b   : > { %3295 = vmatprep.subr.bf16.mxu1 %v3294_v33  ;;  %v3334_v33 = vpack.c.bf16 %v1507_v32, %v1505_v31  ;;  %v1671_v31 = vld [vmem:[#allocation9 + $0x150] sm:$0xff] }
 0x52e   : > { %3297 = vmatpush1.bf16.msra.mxu1 %v3296_v38  ;;  %v3045_v38 = vld [vmem:[%s634_s28] ss:$0 sm:$0xff]  ;;  %s628_s28 = scalar_lea.vmem [#allocation12], %s3036_s26 }
 0x52f   : > { %3299 = vmatprep.subr.bf16.mxu1 %v3298_v49  ;;  %1598 = vperm.xlu0 %3952, %v3045_v38   ;;  %v1680_v38 = vld [vmem:[#allocation9 + $0x1d8] sm:$0xff]  ;;  %s2890_s11 = sshll.u32 %s628_s28, 4  ;;  %s4741_s11 = int_to_ptr.vmem [resolvable:$true] %s2890_s11 }
 0x530   : > { %s4126_s26 = scalar_lea.vmem %s4741_s11, 256 }
 0x531   : > { %p4127_p0 = scmp.ne.s32.totalorder %s4741_s11, %s4126_s26 }
 0x532   : > { %3301 = vmatpush1.bf16.msra.mxu1 %v3300_v43  ;;  %v1513_v43 = vrot.slane %v1508_v42, %v4554_v51 }
 0x533   : > { %3303 = vmatprep.subr.bf16.mxu1 %v3302_v44  ;;  %v1517_v44 = vrot.slane %v1508_v42, %v4551_v50  ;;  %v1679_v42 = vld [vmem:[#allocation9 + $0x1d0] sm:$0xff]  ;;  %p4128_p5 = pnand %p4127_p0, %p4840_p2 }
 0x535   : > { %p4129_p10 = pneg %p4128_p5 }
 0x536   : > { %3305 = vmatpush1.bf16.msra.mxu1 %v3304_v52 }
 0x537   : > { %3307 = vmatprep.subr.bf16.mxu1 %v3306_v53 }
 0x53a   : > { %3309 = vmatpush1.bf16.msra.mxu1 %v3308_v58 }
 0x53b   : > { %3311 = vmatprep.subr.bf16.mxu1 %v3310_v59 }
 0x53e   : > { %3313 = vmatpush1.bf16.msra.mxu1 %v3312_v2  ;;  %v1656_v2 = vld [vmem:[#allocation9 + $0x58] sm:$0xff] }
 0x53f   : > { %3315 = vmatprep.subr.bf16.mxu1 %v3314_v5  ;;  %v1649_v5 = vld [vmem:[#allocation9] sm:$0xff]  ;;  %v3402_v4 = vpack.c.bf16 %v1656_v2, %v1652_v62  ;;  %v1692_v62 = vld [vmem:[#allocation9 + $0x298] sm:$0xff] }
 0x540   : > { %v3340_v7 = vpack.c.bf16 %v1653_v3, %v1649_v5  ;;  %v3358_v3 = vpack.c.bf16 %v1694_v61, %v1690_v60  ;;  %v1727_v61 = vld [vmem:[#allocation9 + $0x4d0] sm:$0xff] }
 0x542   : > { %3317 = vmatpush1.bf16.msra.mxu1 %v3316_v11  ;;  %v1655_v11 = vld [vmem:[#allocation9 + $0x50] sm:$0xff]  ;;  %3341 = vmatpush1.bf16.msra.mxu0 %v3340_v7  ;;  %v1693_v7 = vld [vmem:[#allocation9 + $0x2c0] sm:$0xff] }
 0x543   : > { %3319 = vmatprep.subr.bf16.mxu1 %v3318_v10  ;;  %v1658_v10 = vld [vmem:[#allocation9 + $0x88] sm:$0xff]  ;;  %v3404_v12 = vpack.c.bf16 %v1655_v11, %v1651_v8  ;;  %v1691_v8 = vld [vmem:[#allocation9 + $0x290] sm:$0xff]  ;;  %v3422_v11 = vpack.c.bf16 %v1696_v63, %v1692_v62 }
 0x544   : > { %v1730_v62 = vld [vmem:[#allocation9 + $0x508] sm:$0xff] }
 0x545   : > { %v1734_v63 = vld [vmem:[#allocation9 + $0x548] sm:$0xff] }
 0x546   : > { %3321 = vmatpush1.bf16.msra.mxu1 %v3320_v15  ;;  %v3342_v15 = vpack.c.bf16 %v1662_v9, %v1658_v10  ;;  %v1695_v10 = vld [vmem:[#allocation9 + $0x2d0] sm:$0xff]  ;;  %v1702_v9 = vld [vmem:[#allocation9 + $0x348] sm:$0xff] }
 0x547   : > { %3323 = vmatprep.subr.bf16.mxu1 %v3322_v16  ;;  %v3406_v16 = vpack.c.bf16 %v1664_v14, %v1660_v13  ;;  %v1700_v13 = vld [vmem:[#allocation9 + $0x318] sm:$0xff] }
 0x548   : > { %3343 = vmatprep.subr.bf16.mxu0 %v3342_v15  ;;  %v1704_v14 = vld [vmem:[#allocation9 + $0x358] sm:$0xff] }
 0x549   : > { %3345 = vmatpush1.bf16.msra.mxu0 %v3344_v21  ;;  %v1699_v21 = vld [vmem:[#allocation9 + $0x310] sm:$0xff] }
 0x54a   : > { %3325 = vmatpush1.bf16.msra.mxu1 %v3324_v0  ;;  %v1663_v0 = vld [vmem:[#allocation9 + $0xd0] sm:$0xff] }
 0x54b   : > { %3327 = vmatprep.subr.bf16.mxu1 %v3326_v22  ;;  %v1666_v22 = vld [vmem:[#allocation9 + $0x108] sm:$0xff]  ;;  %v3408_v1 = vpack.c.bf16 %v1663_v0, %v1659_v20  ;;  %v1701_v20 = vld [vmem:[#allocation9 + $0x340] sm:$0xff]  ;;  %v3426_v0 = vpack.c.bf16 %v1704_v14, %v1700_v13 }
 0x54c   : > { %v3346_v24 = vpack.c.bf16 %v1670_v23, %v1666_v22  ;;  %v1703_v22 = vld [vmem:[#allocation9 + $0x350] sm:$0xff]  ;;  %v1706_v23 = vld [vmem:[#allocation9 + $0x388] sm:$0xff] }
 0x54e   : > { %3329 = vmatpush1.bf16.msra.mxu1 %v3328_v26  ;;  %v1672_v26 = vld [vmem:[#allocation9 + $0x158] sm:$0xff]  ;;  %3347 = vmatprep.subr.bf16.mxu0 %v3346_v24 }
 0x54f   : > { %3331 = vmatprep.subr.bf16.mxu1 %v3330_v27  ;;  %v1665_v27 = vld [vmem:[#allocation9 + $0x100] sm:$0xff]  ;;  %v3410_v28 = vpack.c.bf16 %v1672_v26, %v1668_v25  ;;  %v1708_v24 = vld [vmem:[#allocation9 + $0x398] sm:$0xff]  ;;  %v3364_v26 = vpack.c.bf16 %v1701_v20, %v1697_v19 }
 0x550   : > { %v3348_v32 = vpack.c.bf16 %v1669_v29, %v1665_v27  ;;  %v1712_v25 = vld [vmem:[#allocation9 + $0x3d8] sm:$0xff]  ;;  %v3428_v27 = vpack.c.bf16 %v1703_v22, %v1699_v21  ;;  %v1705_v29 = vld [vmem:[#allocation9 + $0x380] sm:$0xff]  ;;  %v1738_v22 = vld [vmem:[#allocation9 + $0x588] sm:$0xff] }
 0x552   : > { %3333 = vmatpush1.bf16.msra.mxu1 %v3332_v30  ;;  %v1667_v30 = vld [vmem:[#allocation9 + $0x110] sm:$0xff]  ;;  %3349 = vmatpush1.bf16.msra.mxu0 %v3348_v32  ;;  %v3430_v32 = vpack.c.bf16 %v1712_v25, %v1708_v24  ;;  %v1744_v25 = vld [vmem:[#allocation9 + $0x5d8] sm:$0xff] }
 0x553   : > { %3335 = vmatprep.subr.bf16.mxu1 %v3334_v33  ;;  %v1674_v33 = vld [vmem:[#allocation9 + $0x188] sm:$0xff] }
 0x554   : > { %v3350_v37 = vpack.c.bf16 %v1678_v34, %v1674_v33  ;;  %v1711_v33 = vld [vmem:[#allocation9 + $0x3d0] sm:$0xff]  ;;  %v1714_v34 = vld [vmem:[#allocation9 + $0x408] sm:$0xff] }
 0x556   : > { %3337 = vmatpush1.bf16.msra.mxu1 %v3336_v36  ;;  %v3412_v36 = vpack.c.bf16 %v1671_v31, %v1667_v30  ;;  %3351 = vmatprep.subr.bf16.mxu0 %v3350_v37  ;;  %v1709_v30 = vld [vmem:[#allocation9 + $0x3c0] sm:$0xff]  ;;  %v1707_v31 = vld [vmem:[#allocation9 + $0x390] sm:$0xff]  ;;  %v1720_v37 = vld [vmem:[#allocation9 + $0x458] sm:$0xff] }
 0x557   : > { %3403 = vmatprep.subr.bf16.mxu1 %v3402_v4  ;;  %v1689_v4 = vld [vmem:[#allocation9 + $0x280] sm:$0xff] }
 0x558   : > { %v3360_v15 = vpack.c.bf16 %v1693_v7, %v1689_v4  ;;  %v3378_v7 = vpack.c.bf16 %v1734_v63, %v1730_v62 }
 0x5ae   : > { %v1599_v46 = vpop.permute.xlu0 %1598 }
 0x5ec   : > { %v1437_v49 = vpop.f32.mrb[8].mxu1 }
 0x5ed   : > { %v3081_v39 = vpop.f32.mrb[9].mxu1  ;;  %1584 = vmatprep.mubr.f32.mxu1 %v1437_v49  ;;  %v1673_v49 = vld [vmem:[#allocation9 + $0x180] sm:$0xff] }
 0x5ee   : > { %v1677_v39 = vld [vmem:[#allocation9 + $0x1c0] sm:$0xff] }
 0x5f0   : > { %v1282_v40 = vpop.f32.mrb[2].mxu0 }
 0x5f1   : > { %v3071_v41 = vpop.f32.mrb[3].mxu0  ;;  %1585 = vmatmul.mubr.f32.vlgmr.msra.gmra.mrb[10].mxu1 %v1282_v40  ;;  %v3414_v40 = vpack.c.bf16 %v1680_v38, %v1676_v35  ;;  %v1718_v35 = vld [vmem:[#allocation9 + $0x448] sm:$0xff]  ;;  %v3368_v38 = vpack.c.bf16 %v1709_v30, %v1705_v29  ;;  %v1739_v30 = vld [vmem:[#allocation9 + $0x590] sm:$0xff] }
 0x5f2   : > { %3405 = vmatpush1.bf16.msra.mxu1 %v3404_v12  ;;  %v1675_v41 = vld [vmem:[#allocation9 + $0x190] sm:$0xff]  ;;  %v1698_v12 = vld [vmem:[#allocation9 + $0x308] sm:$0xff] }
 0x5f3   : > { %3407 = vmatprep.subr.bf16.mxu1 %v3406_v16  ;;  %v3424_v16 = vpack.c.bf16 %v1695_v10, %v1691_v8  ;;  %v3362_v6 = vpack.c.bf16 %v1702_v9, %v1698_v12  ;;  %v1729_v8 = vld [vmem:[#allocation9 + $0x500] sm:$0xff]  ;;  %v1731_v12 = vld [vmem:[#allocation9 + $0x510] sm:$0xff] }
 0x5f4   : > { %v1735_v9 = vld [vmem:[#allocation9 + $0x550] sm:$0xff] }
 0x5f5   : > { %v3444_v14 = vpack.c.bf16 %v1735_v9, %v1731_v12  ;;  %v1770_v12 = vld [vmem:[#allocation9 + $0x788] sm:$0xff] }
 0x5f6   : > { %3409 = vmatpush1.bf16.msra.mxu1 %v3408_v1  ;;  %v1710_v1 = vld [vmem:[#allocation9 + $0x3c8] sm:$0xff] }
 0x5f7   : > { %3411 = vmatprep.subr.bf16.mxu1 %v3410_v28  ;;  %v3366_v28 = vpack.c.bf16 %v1710_v1, %v1706_v23  ;;  %v1742_v23 = vld [vmem:[#allocation9 + $0x5c8] sm:$0xff]  ;;  %v1740_v1 = vld [vmem:[#allocation9 + $0x598] sm:$0xff] }
 0x5f8   : > { %v3382_v24 = vpack.c.bf16 %v1742_v23, %v1738_v22  ;;  %v1774_v9 = vld [vmem:[#allocation9 + $0x7c8] sm:$0xff]  ;;  %v1771_v22 = vld [vmem:[#allocation9 + $0x790] sm:$0xff] }
 0x5f9   : > { %v1775_v23 = vld [vmem:[#allocation9 + $0x7d0] sm:$0xff] }
 0x5fa   : > { %3413 = vmatpush1.bf16.msra.mxu1 %v3412_v36  ;;  %v1716_v36 = vld [vmem:[#allocation9 + $0x418] sm:$0xff] }
 0x5fb   : > { %3415 = vmatprep.subr.bf16.mxu1 %v3414_v40  ;;  %v1713_v40 = vld [vmem:[#allocation9 + $0x400] sm:$0xff] }
 0x6c4   : > { %v1586_v45 = vpop.f32.mrb[10].mxu1 }
 0x6c5   : > { %v1587_v47 = vadd.f32 %v1586_v45, %v1513_v43  ;;  %v1588_v48 = vpop.f32.mrb[11].mxu1  ;;  %v1682_v43 = vld [vmem:[#allocation9 + $0x208] sm:$0xff]  ;;  %v1684_v45 = vld [vmem:[#allocation9 + $0x218] sm:$0xff] }
 0x6c6   : > { %v1589_v52 = vadd.f32 %v1588_v48, %v1517_v44  ;;  %v1686_v44 = vld [vmem:[#allocation9 + $0x248] sm:$0xff]  ;;  %v3416_v48 = vpack.c.bf16 %v1679_v42, %v1675_v41  ;;  %v1717_v41 = vld [vmem:[#allocation9 + $0x440] sm:$0xff]  ;;  %v1715_v42 = vld [vmem:[#allocation9 + $0x410] sm:$0xff] }
 0x6c7   : > { %v1601_v53 = vmul.f32 %v1599_v46, %v1587_v47  ;;  %v3352_v47 = vpack.c.bf16 %v1677_v39, %v1673_v49  ;;  %v3432_v49 = vpack.c.bf16 %v1711_v33, %v1707_v31  ;;  %v3370_v39 = vpack.c.bf16 %v1718_v35, %v1714_v34  ;;  %v1743_v31 = vld [vmem:[#allocation9 + $0x5d0] sm:$0xff]  ;;  %v1746_v33 = vld [vmem:[#allocation9 + $0x608] sm:$0xff]  ;;  %v1748_v35 = vld [vmem:[#allocation9 + $0x618] sm:$0xff] }
 0x6c8   : > { %v1602_v54 = vmul.f32 %v1599_v46, %v1589_v52  ;;  %v1688_v46 = vld [vmem:[#allocation9 + $0x258] sm:$0xff]  ;;  %v3354_v52 = vpack.c.bf16 %v1686_v44, %v1682_v43  ;;  %3417 = vmatpush1.bf16.msra.mxu1 %v3416_v48  ;;  %v3434_v43 = vpack.c.bf16 %v1720_v37, %v1716_v36  ;;  %v1719_v44 = vld [vmem:[#allocation9 + $0x450] sm:$0xff]  ;;  %v1750_v34 = vld [vmem:[#allocation9 + $0x648] sm:$0xff] }
 0x6c9   : > { %v4620_v56 = vadd.f32 %v3982_v55, %v1601_v53  ;;  %v1681_v53 = vld [vmem:[#allocation9 + $0x200] sm:$0xff]  ;;  %v1683_v55 = vld [vmem:[#allocation9 + $0x210] sm:$0xff]  ;;  %3353 = vmatpush1.bf16.msra.mxu0 %v3352_v47  ;;  %v1724_v47 = vld [vmem:[#allocation9 + $0x498] sm:$0xff]  ;;  %v3386_v36 = vpack.c.bf16 %v1750_v34, %v1746_v33 }
 0x6ca   : > { %v4623_v58 = vadd.f32 %v3983_v57, %v1602_v54  ;;  %v1685_v54 = vld [vmem:[#allocation9 + $0x240] sm:$0xff]  ;;  %v3418_v57 = vpack.c.bf16 %v1688_v46, %v1684_v45  ;;  %3355 = vmatprep.subr.bf16.mxu0 %v3354_v52  ;;  %v1722_v45 = vld [vmem:[#allocation9 + $0x488] sm:$0xff]  ;;  %v1728_v48 = vld [vmem:[#allocation9 + $0x4d8] sm:$0xff]  ;;  %v3372_v52 = vpack.c.bf16 %v1717_v41, %v1713_v40 }
 0x6cb   : > { %v3356_v2 = vpack.c.bf16 %v1685_v54, %v1681_v53  ;;  %v1726_v46 = vld [vmem:[#allocation9 + $0x4c8] sm:$0xff]  ;;  %v3436_v53 = vpack.c.bf16 %v1719_v44, %v1715_v42  ;;  %v3438_v60 = vpack.c.bf16 %v1728_v48, %v1724_v47  ;;  %v1752_v37 = vld [vmem:[#allocation9 + $0x658] sm:$0xff]  ;;  %v1747_v41 = vld [vmem:[#allocation9 + $0x610] sm:$0xff] }
 0x6cc   : > { %v1607_v59 = vadd.f32 %v4623_v58, %v4620_v56  ;;  %3419 = vmatprep.subr.bf16.mxu1 %v3418_v57  ;;  %v3374_v54 = vpack.c.bf16 %v1726_v46, %v1722_v45  ;;  %v1725_v57 = vld [vmem:[#allocation9 + $0x4c0] sm:$0xff]  ;;  %v1751_v42 = vld [vmem:[#allocation9 + $0x650] sm:$0xff]  ;;  %v1758_v45 = vld [vmem:[#allocation9 + $0x6c8] sm:$0xff] }
 0x6cd   : > { %3357 = vmatpush1.bf16.msra.mxu0 %v3356_v2  ;;  %v1732_v2 = vld [vmem:[#allocation9 + $0x518] sm:$0xff]  ;;  %v3452_v44 = vpack.c.bf16 %v1751_v42, %v1747_v41  ;;  %v1605_v34 = vld [vmem:[%s4834_s29] sm:$0x3]  ;;  %s4837_s29 = sld [smem:[#allocation18_spill]] }
 0x6ce   : > { %1608 = vadd.xlane.f32.xlu1 %v1607_v59  ;;  %v1687_v59 = vld [vmem:[#allocation9 + $0x250] sm:$0xff]  ;;  %3359 = vmatprep.subr.bf16.mxu0 %v3358_v3  ;;  %v1756_v46 = vld [vmem:[#allocation9 + $0x698] sm:$0xff]  ;;  %v2105_v42 = vld [vmem:[#allocation9 + $0x20] sm:$0xff] }
 0x6cf   : > { %v3420_v5 = vpack.c.bf16 %v1687_v59, %v1683_v55  ;;  %v1721_v55 = vld [vmem:[#allocation9 + $0x480] sm:$0xff]  ;;  %v1723_v59 = vld [vmem:[#allocation9 + $0x490] sm:$0xff]  ;;  %v1760_v47 = vld [vmem:[#allocation9 + $0x6d8] sm:$0xff] }
 0x6d0   : > { %v3376_v3 = vpack.c.bf16 %v1725_v57, %v1721_v55  ;;  %v3440_v4 = vpack.c.bf16 %v1727_v61, %v1723_v59  ;;  %v1755_v55 = vld [vmem:[#allocation9 + $0x690] sm:$0xff]  ;;  %v1766_v61 = vld [vmem:[#allocation9 + $0x748] sm:$0xff] }
 0x6d1   : > { %3421 = vmatpush1.bf16.msra.mxu1 %v3420_v5  ;;  %3361 = vmatpush1.bf16.msra.mxu0 %v3360_v15  ;;  %v1736_v5 = vld [vmem:[#allocation9 + $0x558] sm:$0xff]  ;;  %v1759_v59 = vld [vmem:[#allocation9 + $0x6d0] sm:$0xff] }
 0x6d2   : > { %3423 = vmatprep.subr.bf16.mxu1 %v3422_v11  ;;  %3363 = vmatprep.subr.bf16.mxu0 %v3362_v6  ;;  %v1733_v11 = vld [vmem:[#allocation9 + $0x540] sm:$0xff]  ;;  %v3442_v10 = vpack.c.bf16 %v1736_v5, %v1732_v2  ;;  %v3456_v62 = vpack.c.bf16 %v1759_v59, %v1755_v55  ;;  %v1764_v2 = vld [vmem:[#allocation9 + $0x718] sm:$0xff] }
 0x6d3   : > { %v3380_v13 = vpack.c.bf16 %v1733_v11, %v1729_v8  ;;  %v1768_v5 = vld [vmem:[#allocation9 + $0x758] sm:$0xff]  ;;  %v1763_v8 = vld [vmem:[#allocation9 + $0x710] sm:$0xff]  ;;  %s637_s17 = scalar_lea.vmem %s4837_s29, %s4598_s10  ;;  %s4739_s29 = scalar_lea.hbm %s4839_s3, %s3053_s6 }
 0x6d4   : > { %v1767_v11 = vld [vmem:[#allocation9 + $0x750] sm:$0xff] }
 0x6d5   : > { %3425 = vmatpush1.bf16.msra.mxu1 %v3424_v16  ;;  %3365 = vmatpush1.bf16.msra.mxu0 %v3364_v26  ;;  %v1737_v26 = vld [vmem:[#allocation9 + $0x580] sm:$0xff] }
 0x6d6   : > { %3427 = vmatprep.subr.bf16.mxu1 %v3426_v0  ;;  %3367 = vmatprep.subr.bf16.mxu0 %v3366_v28  ;;  %v3446_v28 = vpack.c.bf16 %v1744_v25, %v1740_v1  ;;  %v2106_v25 = vld [vmem:[#allocation9 + $0x28] sm:$0xff] }
 0x6d9   : > { %3429 = vmatpush1.bf16.msra.mxu1 %v3428_v27  ;;  %3369 = vmatpush1.bf16.msra.mxu0 %v3368_v38  ;;  %v1741_v27 = vld [vmem:[#allocation9 + $0x5c0] sm:$0xff] }
 0x6da   : > { %3431 = vmatprep.subr.bf16.mxu1 %v3430_v32  ;;  %3371 = vmatprep.subr.bf16.mxu0 %v3370_v39  ;;  %v3384_v29 = vpack.c.bf16 %v1741_v27, %v1737_v26  ;;  %v3448_v32 = vpack.c.bf16 %v1743_v31, %v1739_v30  ;;  %v1745_v38 = vld [vmem:[#allocation9 + $0x600] sm:$0xff]  ;;  %v3450_v39 = vpack.c.bf16 %v1752_v37, %v1748_v35  ;;  %v2110_v26 = vld [vmem:[#allocation9 + $0x68] sm:$0xff]  ;;  %v2108_v27 = vld [vmem:[#allocation9 + $0x38] sm:$0xff] }
 0x6db   : > { %v1606_v35 = vld [vmem:[%s4835_s20] sm:$0x3]  ;;  %v1627_v37 = vrot.slane %v1605_v34, %v4554_v51  ;;  %s4838_s20 = sld [smem:[#allocation25_spill]] }
 0x6dc   : > { %v1640_v41 = vrot.slane %v1606_v35, %v4554_v51 }
 0x6dd   : > { %3433 = vmatpush1.bf16.msra.mxu1 %v3432_v49  ;;  %3373 = vmatpush1.bf16.msra.mxu0 %v3372_v52  ;;  %v1749_v49 = vld [vmem:[#allocation9 + $0x640] sm:$0xff]  ;;  %v3454_v52 = vpack.c.bf16 %v1760_v47, %v1756_v46 }
 0x6de   : > { %3435 = vmatprep.subr.bf16.mxu1 %v3434_v43  ;;  %3375 = vmatprep.subr.bf16.mxu0 %v3374_v54  ;;  %v3388_v40 = vpack.c.bf16 %v1749_v49, %v1745_v38  ;;  %v1754_v43 = vld [vmem:[#allocation9 + $0x688] sm:$0xff]  ;;  %v1757_v54 = vld [vmem:[#allocation9 + $0x6c0] sm:$0xff] }
 0x6df   : > { %v3390_v48 = vpack.c.bf16 %v1758_v45, %v1754_v43  ;;  %v2109_v43 = vld [vmem:[#allocation9 + $0x60] sm:$0xff]  ;;  %v2111_v45 = vld [vmem:[#allocation9 + $0x70] sm:$0xff] }
 0x6e1   : > { %3437 = vmatpush1.bf16.msra.mxu1 %v3436_v53  ;;  %3377 = vmatpush1.bf16.msra.mxu0 %v3376_v3  ;;  %v1753_v53 = vld [vmem:[#allocation9 + $0x680] sm:$0xff] }
 0x6e2   : > { %3439 = vmatprep.subr.bf16.mxu1 %v3438_v60  ;;  %3379 = vmatprep.subr.bf16.mxu0 %v3378_v7  ;;  %v3392_v57 = vpack.c.bf16 %v1757_v54, %v1753_v53  ;;  %v1762_v60 = vld [vmem:[#allocation9 + $0x708] sm:$0xff]  ;;  %v1761_v3 = vld [vmem:[#allocation9 + $0x700] sm:$0xff]  ;;  %v2116_v53 = vld [vmem:[#allocation9 + $0xb8] sm:$0xff] }
 0x6e3   : > { %v3394_v63 = vpack.c.bf16 %v1766_v61, %v1762_v60  ;;  %v1765_v7 = vld [vmem:[#allocation9 + $0x740] sm:$0xff]  ;;  %v2120_v54 = vld [vmem:[#allocation9 + $0xf8] sm:$0xff] }
 0x6e4   : > { %v2113_v60 = vld [vmem:[#allocation9 + $0xa0] sm:$0xff] }
 0x6e5   : > { %3441 = vmatpush1.bf16.msra.mxu1 %v3440_v4  ;;  %3381 = vmatpush1.bf16.msra.mxu0 %v3380_v13  ;;  %v3458_v4 = vpack.c.bf16 %v1768_v5, %v1764_v2  ;;  %v1772_v13 = vld [vmem:[#allocation9 + $0x798] sm:$0xff]  ;;  %v2117_v61 = vld [vmem:[#allocation9 + $0xe0] sm:$0xff]  ;;  %v3534_v5 = vpack.c.bf16 %v2120_v54, %v2116_v53  ;;  %v2147_v53 = vld [vmem:[#allocation9 + $0x2b0] sm:$0xff] }
 0x6e6   : > { %3443 = vmatprep.subr.bf16.mxu1 %v3442_v10  ;;  %3383 = vmatprep.subr.bf16.mxu0 %v3382_v24  ;;  %v3396_v10 = vpack.c.bf16 %v1765_v7, %v1761_v3  ;;  %v3464_v24 = vpack.c.bf16 %v1775_v23, %v1771_v22  ;;  %v2126_v3 = vld [vmem:[#allocation9 + $0x168] sm:$0xff]  ;;  %v2128_v7 = vld [vmem:[#allocation9 + $0x178] sm:$0xff]  ;;  %v2151_v54 = vld [vmem:[#allocation9 + $0x2f0] sm:$0xff] }
 0x6e9   : > { %3445 = vmatpush1.bf16.msra.mxu1 %v3444_v14  ;;  %3385 = vmatpush1.bf16.msra.mxu0 %v3384_v29  ;;  %v3460_v14 = vpack.c.bf16 %v1767_v11, %v1763_v8  ;;  %v2112_v29 = vld [vmem:[#allocation9 + $0x78] sm:$0xff]  ;;  %v3472_v8 = vpack.c.bf16 %v2117_v61, %v2113_v60 }
 0x6ea   : > { %3447 = vmatprep.subr.bf16.mxu1 %v3446_v28  ;;  %3387 = vmatprep.subr.bf16.mxu0 %v3386_v36  ;;  %v3466_v28 = vpack.c.bf16 %v2110_v26, %v2106_v25  ;;  %v3530_v30 = vpack.c.bf16 %v2112_v29, %v2108_v27  ;;  %v1631_v36 = vrot.slane %v1605_v34, %v4551_v50  ;;  %v2131_v27 = vld [vmem:[#allocation9 + $0x1b0] sm:$0xff]  ;;  %v2138_v29 = vld [vmem:[#allocation9 + $0x228] sm:$0xff]  ;;  %v2160_v60 = vld [vmem:[#allocation9 + $0x378] sm:$0xff] }
 0x6ed   : > { %3449 = vmatpush1.bf16.msra.mxu1 %v3448_v32  ;;  %3389 = vmatpush1.bf16.msra.mxu0 %v3388_v40 }
 0x6ee   : > { %3451 = vmatprep.subr.bf16.mxu1 %v3450_v39  ;;  %3391 = vmatprep.subr.bf16.mxu0 %v3390_v48  ;;  %v1644_v39 = vrot.slane %v1606_v35, %v4551_v50  ;;  %v2114_v48 = vld [vmem:[#allocation9 + $0xa8] sm:$0xff]  ;;  %v2137_v35 = vld [vmem:[#allocation9 + $0x220] sm:$0xff] }
 0x6f1   : > { %3453 = vmatpush1.bf16.msra.mxu1 %v3452_v44  ;;  %3393 = vmatpush1.bf16.msra.mxu0 %v3392_v57  ;;  %v2107_v44 = vld [vmem:[#allocation9 + $0x30] sm:$0xff] }
 0x6f2   : > { %3455 = vmatprep.subr.bf16.mxu1 %v3454_v52  ;;  %3395 = vmatprep.subr.bf16.mxu0 %v3394_v63  ;;  %v2118_v52 = vld [vmem:[#allocation9 + $0xe8] sm:$0xff]  ;;  %v3532_v59 = vpack.c.bf16 %v2111_v45, %v2107_v44 }
 0x6f3   : > { %v2122_v63 = vld [vmem:[#allocation9 + $0x128] sm:$0xff]  ;;  %v3470_v2 = vpack.c.bf16 %v2118_v52, %v2114_v48 }
 0x6f5   : > { %3457 = vmatpush1.bf16.msra.mxu1 %v3456_v62  ;;  %3397 = vmatpush1.bf16.msra.mxu0 %v3396_v10  ;;  %v2119_v62 = vld [vmem:[#allocation9 + $0xf0] sm:$0xff]  ;;  %v2121_v10 = vld [vmem:[#allocation9 + $0x120] sm:$0xff] }
 0x6f6   : > { %3459 = vmatprep.subr.bf16.mxu1 %v3458_v4  ;;  %v2124_v4 = vld [vmem:[#allocation9 + $0x138] sm:$0xff] }
 0x6f9   : > { %3461 = vmatpush1.bf16.msra.mxu1 %v3460_v14  ;;  %v2123_v14 = vld [vmem:[#allocation9 + $0x130] sm:$0xff] }
 0x75b   : > { %v1609_v15 = vpop.xlane.xlu1 %1608 }
 0x75c   : > { %v1610_v16 = vmul.f32 0.00390625, %v1609_v15  ;;  %v3398_v15 = vpack.c.bf16 %v1774_v9, %v1770_v12  ;;  %v2125_v12 = vld [vmem:[#allocation9 + $0x160] sm:$0xff]  ;;  %v3474_v9 = vpack.c.bf16 %v2126_v3, %v2122_v63  ;;  %v2155_v3 = vld [vmem:[#allocation9 + $0x330] sm:$0xff] }
 0x75d   : > { %v3476_v22 = vpack.c.bf16 %v2125_v12, %v2121_v10  ;;  %v2157_v63 = vld [vmem:[#allocation9 + $0x360] sm:$0xff]  ;;  %v2168_v10 = vld [vmem:[#allocation9 + $0x3f8] sm:$0xff] }
 0x75e   : > { %v4628_v6 = vsub.f32 %v4620_v56, %v1610_v16  ;;  %v4631_v19 = vsub.f32 %v4623_v58, %v1610_v16  ;;  %v1776_v16 = vld [vmem:[#allocation9 + $0x7d8] sm:$0xff]  ;;  %3399 = vmatprep.subr.bf16.mxu0 %v3398_v15  ;;  %v2127_v15 = vld [vmem:[#allocation9 + $0x170] sm:$0xff] }
 0x75f   : > { %v3540_v23 = vpack.c.bf16 %v2127_v15, %v2123_v14  ;;  %v2165_v14 = vld [vmem:[#allocation9 + $0x3e0] sm:$0xff] }
 0x760   : > { %v1613_v20 = vmul.f32 %v4628_v6, %v4628_v6  ;;  %v1614_v21 = vmul.f32 %v4631_v19, %v4631_v19 }
 0x762   : > { %v1615_v0 = vadd.f32 %v1614_v21, %v1613_v20  ;;  %v1769_v20 = vld [vmem:[#allocation9 + $0x780] sm:$0xff] }
 0x763   : > { %v1773_v21 = vld [vmem:[#allocation9 + $0x7c0] sm:$0xff] }
 0x764   : > { %1616 = vadd.xlane.f32.xlu1 %v1615_v0  ;;  %v3462_v0 = vpack.c.bf16 %v1776_v16, %v1772_v13  ;;  %v3400_v1 = vpack.c.bf16 %v1773_v21, %v1769_v20  ;;  %v3538_v13 = vpack.c.bf16 %v2128_v7, %v2124_v4  ;;  %v2130_v16 = vld [vmem:[#allocation9 + $0x1a8] sm:$0xff]  ;;  %v2132_v21 = vld [vmem:[#allocation9 + $0x1b8] sm:$0xff]  ;;  %v2159_v4 = vld [vmem:[#allocation9 + $0x370] sm:$0xff] }
 0x765   : > { %v2134_v20 = vld [vmem:[#allocation9 + $0x1e8] sm:$0xff] }
 0x766   : > { %3463 = vmatprep.subr.bf16.mxu1 %v3462_v0  ;;  %3401 = vmatpush1.bf16.msra.mxu0 %v3400_v1  ;;  %v2136_v0 = vld [vmem:[#allocation9 + $0x1f8] sm:$0xff]  ;;  %v2129_v1 = vld [vmem:[#allocation9 + $0x1a0] sm:$0xff]  ;;  %v3478_v25 = vpack.c.bf16 %v2134_v20, %v2130_v16  ;;  %v2162_v7 = vld [vmem:[#allocation9 + $0x3a8] sm:$0xff] }
 0x767   : > { %3465 = vmatpush1.bf16.msra.mxu1 %v3464_v24  ;;  %3467 = vmatprep.subr.bf16.mxu0 %v3466_v28  ;;  %v2133_v24 = vld [vmem:[#allocation9 + $0x1e0] sm:$0xff]  ;;  %v3542_v26 = vpack.c.bf16 %v2136_v0, %v2132_v21  ;;  %v2135_v28 = vld [vmem:[#allocation9 + $0x1f0] sm:$0xff]  ;;  %v2170_v0 = vld [vmem:[#allocation9 + $0x428] sm:$0xff] }
 0x768   : > { %3531 = vmatprep.subr.bf16.mxu1 %v3530_v30  ;;  %v2142_v30 = vld [vmem:[#allocation9 + $0x268] sm:$0xff]  ;;  %v3544_v34 = vpack.c.bf16 %v2135_v28, %v2131_v27  ;;  %v2163_v20 = vld [vmem:[#allocation9 + $0x3b0] sm:$0xff]  ;;  %v2173_v27 = vld [vmem:[#allocation9 + $0x460] sm:$0xff] }
 0x769   : > { %v2167_v21 = vld [vmem:[#allocation9 + $0x3f0] sm:$0xff] }
 0x7f1   : > { %v1617_v31 = vpop.xlane.xlu1 %1616 }
 0x7f2   : > { %v1618_v32 = vmul.f32 0.00390625, %v1617_v31  ;;  %v2140_v31 = vld [vmem:[#allocation9 + $0x238] sm:$0xff] }
 0x7f4   : > { %v1619_v33 = vadd.f32 1e-05, %v1618_v32  ;;  %v2144_v32 = vld [vmem:[#allocation9 + $0x278] sm:$0xff] }
 0x7f6   : > { %3964 = vrsqrt.f32 %v1619_v33  ;;  %v3480_v33 = vpack.c.bf16 %v2133_v24, %v2129_v1  ;;  %v2176_v1 = vld [vmem:[#allocation9 + $0x478] sm:$0xff] }
 0x800   : > { %v3965_v38 = vpop.eup %3964 }
 0x801   : > { %v1622_v49 = vmul.f32 %v3965_v38, %v4631_v19  ;;  %v1621_v40 = vmul.f32 %v3965_v38, %v4628_v6  ;;  %v3468_v19 = vpack.c.bf16 %v2109_v43, %v2105_v42  ;;  %v2115_v6 = vld [vmem:[#allocation9 + $0xb0] sm:$0xff]  ;;  %v3546_v38 = vpack.c.bf16 %v2144_v32, %v2140_v31  ;;  %v2148_v42 = vld [vmem:[#allocation9 + $0x2b8] sm:$0xff]  ;;  %v2178_v32 = vld [vmem:[#allocation9 + $0x4a8] sm:$0xff] }
 0x802   : > { %v3536_v11 = vpack.c.bf16 %v2119_v62, %v2115_v6  ;;  %v2152_v43 = vld [vmem:[#allocation9 + $0x2f8] sm:$0xff]  ;;  %v3552_v6 = vpack.c.bf16 %v2151_v54, %v2147_v53  ;;  %v2153_v62 = vld [vmem:[#allocation9 + $0x320] sm:$0xff]  ;;  %v2175_v31 = vld [vmem:[#allocation9 + $0x470] sm:$0xff] }
 0x803   : > { %v1635_v46 = vmul.f32 %v1631_v36, %v1622_v49  ;;  %v1634_v47 = vmul.f32 %v1627_v37, %v1621_v40  ;;  %v2141_v36 = vld [vmem:[#allocation9 + $0x260] sm:$0xff]  ;;  %v3482_v37 = vpack.c.bf16 %v2142_v30, %v2138_v29  ;;  %v2139_v49 = vld [vmem:[#allocation9 + $0x230] sm:$0xff]  ;;  %v2146_v40 = vld [vmem:[#allocation9 + $0x2a8] sm:$0xff]  ;;  %v3550_v52 = vpack.c.bf16 %v2152_v43, %v2148_v42 }
 0x804   : > { %v3484_v44 = vpack.c.bf16 %v2141_v36, %v2137_v35  ;;  %v3492_v12 = vpack.c.bf16 %v2157_v63, %v2153_v62  ;;  %v2171_v30 = vld [vmem:[#allocation9 + $0x430] sm:$0xff]  ;;  %v2184_v35 = vld [vmem:[#allocation9 + $0x4f8] sm:$0xff]  ;;  %v2186_v43 = vld [vmem:[#allocation9 + $0x528] sm:$0xff] }
 0x805   : > { %v1648_v55 = vadd.f32 %v1644_v39, %v1635_v46  ;;  %v4649_v57 = vadd.f32 %v1640_v41, %v1634_v47  ;;  %v2143_v39 = vld [vmem:[#allocation9 + $0x270] sm:$0xff]  ;;  %v2150_v41 = vld [vmem:[#allocation9 + $0x2e8] sm:$0xff]  ;;  %v2145_v46 = vld [vmem:[#allocation9 + $0x2a0] sm:$0xff] }
 0x806   : > { %v3548_v45 = vpack.c.bf16 %v2143_v39, %v2139_v49  ;;  %v2149_v47 = vld [vmem:[#allocation9 + $0x2e0] sm:$0xff]  ;;  %v3486_v48 = vpack.c.bf16 %v2150_v41, %v2146_v40  ;;  %v2179_v41 = vld [vmem:[#allocation9 + $0x4b0] sm:$0xff]  ;;  %v2200_v62 = vld [vmem:[#allocation9 + $0x5f8] sm:$0xff] }
 0x807   : > { %1863 = vmatprep.mubr.f32.mxu0 %v1648_v55  ;;  %1934 = vmatprep.mubr.f32.mxu1 %v1648_v55  ;;  %v3488_v61 = vpack.c.bf16 %v2149_v47, %v2145_v46  ;;  %v2181_v49 = vld [vmem:[#allocation9 + $0x4e0] sm:$0xff]  ;;  %v2183_v42 = vld [vmem:[#allocation9 + $0x4f0] sm:$0xff]  ;;  %v2192_v46 = vld [vmem:[#allocation9 + $0x578] sm:$0xff] }
 0x808   : > { %1864 = vmatmul.mubr.f32.vlgmr.msra.gmra.mrb[4].mxu0 %v4649_v57  ;;  %1935 = vmatmul.mubr.f32.vlgmr.msra.gmra.mrb[12].mxu1 %v4649_v57  ;;  %v2189_v53 = vld [vmem:[#allocation9 + $0x560] sm:$0xff] }
 0x809   : > { %3469 = vmatpush1.bf16.msra.mxu0 %v3468_v19  ;;  %3533 = vmatpush1.bf16.msra.mxu1 %v3532_v59  ;;  %v2158_v19 = vld [vmem:[#allocation9 + $0x368] sm:$0xff]  ;;  %v2156_v59 = vld [vmem:[#allocation9 + $0x338] sm:$0xff] }
 0x80a   : > { %2319 = vmatprep.mubr.f32.mxu0 %v1648_v55  ;;  %2390 = vmatprep.mubr.f32.mxu1 %v1648_v55  ;;  %v2154_v55 = vld [vmem:[#allocation9 + $0x328] sm:$0xff] }
 0x80b   : > { %3471 = vmatprep.subr.bf16.mxu0 %v3470_v2  ;;  %3535 = vmatprep.subr.bf16.mxu1 %v3534_v5  ;;  %v3490_v2 = vpack.c.bf16 %v2158_v19, %v2154_v55  ;;  %v3554_v5 = vpack.c.bf16 %v2160_v60, %v2156_v59  ;;  %v2187_v19 = vld [vmem:[#allocation9 + $0x530] sm:$0xff]  ;;  %v2194_v60 = vld [vmem:[#allocation9 + $0x5a8] sm:$0xff] }
 0x80c   : > { %v2191_v59 = vld [vmem:[#allocation9 + $0x570] sm:$0xff] }
 0x80d   : > { %3473 = vmatpush1.bf16.msra.mxu0 %v3472_v8  ;;  %3537 = vmatpush1.bf16.msra.mxu1 %v3536_v11  ;;  %v2166_v8 = vld [vmem:[#allocation9 + $0x3e8] sm:$0xff]  ;;  %v2164_v11 = vld [vmem:[#allocation9 + $0x3b8] sm:$0xff] }
 0x80e   : > { %3475 = vmatprep.subr.bf16.mxu0 %v3474_v9  ;;  %3539 = vmatprep.subr.bf16.mxu1 %v3538_v13  ;;  %v3556_v9 = vpack.c.bf16 %v2159_v4, %v2155_v3  ;;  %v2161_v13 = vld [vmem:[#allocation9 + $0x3a0] sm:$0xff]  ;;  %v3494_v15 = vpack.c.bf16 %v2166_v8, %v2162_v7  ;;  %v3558_v16 = vpack.c.bf16 %v2168_v10, %v2164_v11  ;;  %v2195_v8 = vld [vmem:[#allocation9 + $0x5b0] sm:$0xff]  ;;  %v2202_v10 = vld [vmem:[#allocation9 + $0x628] sm:$0xff] }
 0x80f   : > { %v3496_v24 = vpack.c.bf16 %v2165_v14, %v2161_v13  ;;  %v2197_v3 = vld [vmem:[#allocation9 + $0x5e0] sm:$0xff]  ;;  %v2199_v11 = vld [vmem:[#allocation9 + $0x5f0] sm:$0xff]  ;;  %v2208_v13 = vld [vmem:[#allocation9 + $0x678] sm:$0xff] }
 0x811   : > { %3477 = vmatpush1.bf16.msra.mxu0 %v3476_v22  ;;  %3541 = vmatpush1.bf16.msra.mxu1 %v3540_v23  ;;  %v2174_v22 = vld [vmem:[#allocation9 + $0x468] sm:$0xff]  ;;  %v2172_v23 = vld [vmem:[#allocation9 + $0x438] sm:$0xff] }
 0x812   : > { %3479 = vmatprep.subr.bf16.mxu0 %v3478_v25  ;;  %3543 = vmatprep.subr.bf16.mxu1 %v3542_v26  ;;  %v3560_v25 = vpack.c.bf16 %v2167_v21, %v2163_v20  ;;  %v2169_v26 = vld [vmem:[#allocation9 + $0x420] sm:$0xff]  ;;  %v3498_v28 = vpack.c.bf16 %v2174_v22, %v2170_v0  ;;  %v3562_v29 = vpack.c.bf16 %v2176_v1, %v2172_v23  ;;  %v2203_v22 = vld [vmem:[#allocation9 + $0x630] sm:$0xff]  ;;  %v2210_v1 = vld [vmem:[#allocation9 + $0x6a8] sm:$0xff] }
 0x813   : > { %v3500_v36 = vpack.c.bf16 %v2173_v27, %v2169_v26  ;;  %v2205_v20 = vld [vmem:[#allocation9 + $0x660] sm:$0xff]  ;;  %v2207_v23 = vld [vmem:[#allocation9 + $0x670] sm:$0xff]  ;;  %v2216_v26 = vld [vmem:[#allocation9 + $0x6f8] sm:$0xff] }
 0x815   : > { %3481 = vmatpush1.bf16.msra.mxu0 %v3480_v33  ;;  %3545 = vmatpush1.bf16.msra.mxu1 %v3544_v34  ;;  %v2182_v33 = vld [vmem:[#allocation9 + $0x4e8] sm:$0xff]  ;;  %v2180_v34 = vld [vmem:[#allocation9 + $0x4b8] sm:$0xff] }
 0x816   : > { %3483 = vmatprep.subr.bf16.mxu0 %v3482_v37  ;;  %3547 = vmatprep.subr.bf16.mxu1 %v3546_v38  ;;  %v3564_v37 = vpack.c.bf16 %v2175_v31, %v2171_v30  ;;  %v2177_v38 = vld [vmem:[#allocation9 + $0x4a0] sm:$0xff]  ;;  %v3502_v39 = vpack.c.bf16 %v2182_v33, %v2178_v32  ;;  %v3566_v40 = vpack.c.bf16 %v2184_v35, %v2180_v34  ;;  %v2211_v33 = vld [vmem:[#allocation9 + $0x6b0] sm:$0xff]  ;;  %v2218_v35 = vld [vmem:[#allocation9 + $0x728] sm:$0xff] }
 0x817   : > { %v3504_v47 = vpack.c.bf16 %v2181_v49, %v2177_v38  ;;  %v2213_v30 = vld [vmem:[#allocation9 + $0x6e0] sm:$0xff]  ;;  %v2215_v34 = vld [vmem:[#allocation9 + $0x6f0] sm:$0xff]  ;;  %v2224_v38 = vld [vmem:[#allocation9 + $0x778] sm:$0xff] }
 0x819   : > { %3485 = vmatpush1.bf16.msra.mxu0 %v3484_v44  ;;  %3549 = vmatpush1.bf16.msra.mxu1 %v3548_v45  ;;  %v2190_v44 = vld [vmem:[#allocation9 + $0x568] sm:$0xff]  ;;  %v2188_v45 = vld [vmem:[#allocation9 + $0x538] sm:$0xff] }
 0x81a   : > { %3487 = vmatprep.subr.bf16.mxu0 %v3486_v48  ;;  %3551 = vmatprep.subr.bf16.mxu1 %v3550_v52  ;;  %v3568_v48 = vpack.c.bf16 %v2183_v42, %v2179_v41  ;;  %v2185_v52 = vld [vmem:[#allocation9 + $0x520] sm:$0xff]  ;;  %v3506_v54 = vpack.c.bf16 %v2190_v44, %v2186_v43  ;;  %v3570_v55 = vpack.c.bf16 %v2192_v46, %v2188_v45  ;;  %v2219_v44 = vld [vmem:[#allocation9 + $0x730] sm:$0xff]  ;;  %v2226_v46 = vld [vmem:[#allocation9 + $0x7a8] sm:$0xff] }
 0x81b   : > { %v3508_v63 = vpack.c.bf16 %v2189_v53, %v2185_v52  ;;  %v2221_v41 = vld [vmem:[#allocation9 + $0x760] sm:$0xff]  ;;  %v2223_v45 = vld [vmem:[#allocation9 + $0x770] sm:$0xff]  ;;  %v2232_v52 = vld [vmem:[#allocation9 + $0x7f8] sm:$0xff] }
 0x81d   : > { %3489 = vmatpush1.bf16.msra.mxu0 %v3488_v61  ;;  %3553 = vmatpush1.bf16.msra.mxu1 %v3552_v6  ;;  %v2198_v61 = vld [vmem:[#allocation9 + $0x5e8] sm:$0xff]  ;;  %v2196_v6 = vld [vmem:[#allocation9 + $0x5b8] sm:$0xff] }
 0x81e   : > { %3491 = vmatprep.subr.bf16.mxu0 %v3490_v2  ;;  %3555 = vmatprep.subr.bf16.mxu1 %v3554_v5  ;;  %v3572_v2 = vpack.c.bf16 %v2191_v59, %v2187_v19  ;;  %v2193_v5 = vld [vmem:[#allocation9 + $0x5a0] sm:$0xff]  ;;  %v3510_v4 = vpack.c.bf16 %v2198_v61, %v2194_v60  ;;  %v3574_v7 = vpack.c.bf16 %v2200_v62, %v2196_v6  ;;  %v2227_v61 = vld [vmem:[#allocation9 + $0x7b0] sm:$0xff] }
 0x81f   : > { %v3512_v14 = vpack.c.bf16 %v2197_v3, %v2193_v5  ;;  %v2229_v60 = vld [vmem:[#allocation9 + $0x7e0] sm:$0xff]  ;;  %v2231_v6 = vld [vmem:[#allocation9 + $0x7f0] sm:$0xff]  ;;  %v2436_v5 = vld [vmem:[#allocation11 + $0x418] sm:$0xff] }
 0x820   : > { %v2433_v3 = vld [vmem:[#allocation11 + $0x400] sm:$0xff] }
 0x821   : > { %3493 = vmatpush1.bf16.msra.mxu0 %v3492_v12  ;;  %3557 = vmatpush1.bf16.msra.mxu1 %v3556_v9  ;;  %v2206_v12 = vld [vmem:[#allocation9 + $0x668] sm:$0xff]  ;;  %v2204_v9 = vld [vmem:[#allocation9 + $0x638] sm:$0xff] }
 0x822   : > { %3495 = vmatprep.subr.bf16.mxu0 %v3494_v15  ;;  %3559 = vmatprep.subr.bf16.mxu1 %v3558_v16  ;;  %v3576_v15 = vpack.c.bf16 %v2199_v11, %v2195_v8  ;;  %v2201_v16 = vld [vmem:[#allocation9 + $0x620] sm:$0xff]  ;;  %v3514_v21 = vpack.c.bf16 %v2206_v12, %v2202_v10  ;;  %v3578_v0 = vpack.c.bf16 %v2208_v13, %v2204_v9  ;;  %v2438_v8 = vld [vmem:[#allocation11 + $0x428] sm:$0xff]  ;;  %v2440_v11 = vld [vmem:[#allocation11 + $0x438] sm:$0xff] }
 0x823   : > { %v3516_v27 = vpack.c.bf16 %v2205_v20, %v2201_v16  ;;  %v3598_v12 = vpack.c.bf16 %v2440_v11, %v2438_v8  ;;  %v2437_v9 = vld [vmem:[#allocation11 + $0x420] sm:$0xff]  ;;  %v2439_v13 = vld [vmem:[#allocation11 + $0x430] sm:$0xff] }
 0x824   : > { %v3600_v16 = vpack.c.bf16 %v2439_v13, %v2437_v9  ;;  %v2473_v8 = vld [vmem:[#allocation11 + $0x540] sm:$0xff]  ;;  %v2475_v11 = vld [vmem:[#allocation11 + $0x550] sm:$0xff]  ;;  %v2480_v9 = vld [vmem:[#allocation11 + $0x578] sm:$0xff] }
 0x825   : > { %3497 = vmatpush1.bf16.msra.mxu0 %v3496_v24  ;;  %3561 = vmatpush1.bf16.msra.mxu1 %v3560_v25  ;;  %v2214_v24 = vld [vmem:[#allocation9 + $0x6e8] sm:$0xff]  ;;  %v2212_v25 = vld [vmem:[#allocation9 + $0x6b8] sm:$0xff] }
 0x826   : > { %3499 = vmatprep.subr.bf16.mxu0 %v3498_v28  ;;  %3563 = vmatprep.subr.bf16.mxu1 %v3562_v29  ;;  %v3580_v28 = vpack.c.bf16 %v2207_v23, %v2203_v22  ;;  %v2209_v29 = vld [vmem:[#allocation9 + $0x6a0] sm:$0xff]  ;;  %v3518_v31 = vpack.c.bf16 %v2214_v24, %v2210_v1  ;;  %v3582_v32 = vpack.c.bf16 %v2216_v26, %v2212_v25  ;;  %v2448_v22 = vld [vmem:[#allocation11 + $0x478] sm:$0xff]  ;;  %v2447_v25 = vld [vmem:[#allocation11 + $0x470] sm:$0xff] }
 0x827   : > { %v3520_v49 = vpack.c.bf16 %v2213_v30, %v2209_v29  ;;  %v2445_v24 = vld [vmem:[#allocation11 + $0x460] sm:$0xff]  ;;  %v2450_v26 = vld [vmem:[#allocation11 + $0x488] sm:$0xff] }
 0x828   : > { %v2449_v30 = vld [vmem:[#allocation11 + $0x480] sm:$0xff] }
 0x829   : > { %3501 = vmatpush1.bf16.msra.mxu0 %v3500_v36  ;;  %3565 = vmatpush1.bf16.msra.mxu1 %v3564_v37  ;;  %v2222_v36 = vld [vmem:[#allocation9 + $0x768] sm:$0xff]  ;;  %v2220_v37 = vld [vmem:[#allocation9 + $0x738] sm:$0xff] }
 0x82a   : > { %3503 = vmatprep.subr.bf16.mxu0 %v3502_v39  ;;  %3567 = vmatprep.subr.bf16.mxu1 %v3566_v40  ;;  %v3584_v39 = vpack.c.bf16 %v2215_v34, %v2211_v33  ;;  %v2217_v40 = vld [vmem:[#allocation9 + $0x720] sm:$0xff]  ;;  %v3522_v42 = vpack.c.bf16 %v2222_v36, %v2218_v35  ;;  %v3586_v43 = vpack.c.bf16 %v2224_v38, %v2220_v37  ;;  %v2456_v33 = vld [vmem:[#allocation11 + $0x4b8] sm:$0xff]  ;;  %v2455_v37 = vld [vmem:[#allocation11 + $0x4b0] sm:$0xff] }
 0x82b   : > { %v3524_v53 = vpack.c.bf16 %v2221_v41, %v2217_v40  ;;  %v2453_v36 = vld [vmem:[#allocation11 + $0x4a0] sm:$0xff]  ;;  %v2458_v38 = vld [vmem:[#allocation11 + $0x4c8] sm:$0xff] }
 0x82c   : > { %v2457_v41 = vld [vmem:[#allocation11 + $0x4c0] sm:$0xff] }
 0x82d   : > { %3505 = vmatpush1.bf16.msra.mxu0 %v3504_v47  ;;  %3569 = vmatpush1.bf16.msra.mxu1 %v3568_v48  ;;  %v2230_v47 = vld [vmem:[#allocation9 + $0x7e8] sm:$0xff]  ;;  %v2228_v48 = vld [vmem:[#allocation9 + $0x7b8] sm:$0xff] }
 0x82e   : > { %3507 = vmatprep.subr.bf16.mxu0 %v3506_v54  ;;  %3571 = vmatprep.subr.bf16.mxu1 %v3570_v55  ;;  %v3588_v54 = vpack.c.bf16 %v2223_v45, %v2219_v44  ;;  %v2225_v55 = vld [vmem:[#allocation9 + $0x7a0] sm:$0xff]  ;;  %v3526_v19 = vpack.c.bf16 %v2230_v47, %v2226_v46  ;;  %v3590_v59 = vpack.c.bf16 %v2232_v52, %v2228_v48  ;;  %v2464_v44 = vld [vmem:[#allocation11 + $0x4f8] sm:$0xff]  ;;  %v2463_v48 = vld [vmem:[#allocation11 + $0x4f0] sm:$0xff] }
 0x82f   : > { %v3528_v62 = vpack.c.bf16 %v2229_v60, %v2225_v55  ;;  %v2461_v47 = vld [vmem:[#allocation11 + $0x4e0] sm:$0xff]  ;;  %v2466_v52 = vld [vmem:[#allocation11 + $0x508] sm:$0xff] }
 0x831   : > { %3509 = vmatpush1.bf16.msra.mxu0 %v3508_v63  ;;  %3573 = vmatpush1.bf16.msra.mxu1 %v3572_v2  ;;  %v3592_v63 = vpack.c.bf16 %v2231_v6, %v2227_v61  ;;  %v2434_v2 = vld [vmem:[#allocation11 + $0x408] sm:$0xff]  ;;  %v2472_v6 = vld [vmem:[#allocation11 + $0x538] sm:$0xff] }
 0x832   : > { %3511 = vmatprep.subr.bf16.mxu0 %v3510_v4  ;;  %3575 = vmatprep.subr.bf16.mxu1 %v3574_v7  ;;  %v3594_v4 = vpack.c.bf16 %v2436_v5, %v2434_v2  ;;  %v2435_v7 = vld [vmem:[#allocation11 + $0x410] sm:$0xff]  ;;  %v2470_v61 = vld [vmem:[#allocation11 + $0x528] sm:$0xff] }
 0x833   : > { %v3596_v10 = vpack.c.bf16 %v2435_v7, %v2433_v3  ;;  %v2471_v2 = vld [vmem:[#allocation11 + $0x530] sm:$0xff]  ;;  %v2474_v3 = vld [vmem:[#allocation11 + $0x548] sm:$0xff] }
 0x835   : > { %3513 = vmatpush1.bf16.msra.mxu0 %v3512_v14  ;;  %3577 = vmatpush1.bf16.msra.mxu1 %v3576_v15  ;;  %v2442_v14 = vld [vmem:[#allocation11 + $0x448] sm:$0xff]  ;;  %v2444_v15 = vld [vmem:[#allocation11 + $0x458] sm:$0xff] }
 0x836   : > { %3515 = vmatprep.subr.bf16.mxu0 %v3514_v21  ;;  %3579 = vmatprep.subr.bf16.mxu1 %v3578_v0  ;;  %v3602_v20 = vpack.c.bf16 %v2444_v15, %v2442_v14  ;;  %v2441_v21 = vld [vmem:[#allocation11 + $0x440] sm:$0xff]  ;;  %v2446_v0 = vld [vmem:[#allocation11 + $0x468] sm:$0xff]  ;;  %v2479_v15 = vld [vmem:[#allocation11 + $0x570] sm:$0xff] }
 0x837   : > { %v3606_v1 = vpack.c.bf16 %v2448_v22, %v2446_v0  ;;  %v2477_v14 = vld [vmem:[#allocation11 + $0x560] sm:$0xff]  ;;  %v2483_v22 = vld [vmem:[#allocation11 + $0x590] sm:$0xff] }
 0x839   : > { %3517 = vmatpush1.bf16.msra.mxu0 %v3516_v27  ;;  %3581 = vmatpush1.bf16.msra.mxu1 %v3580_v28  ;;  %v2452_v27 = vld [vmem:[#allocation11 + $0x498] sm:$0xff]  ;;  %v3608_v28 = vpack.c.bf16 %v2447_v25, %v2445_v24 }
 0x83a   : > { %3519 = vmatprep.subr.bf16.mxu0 %v3518_v31  ;;  %3583 = vmatprep.subr.bf16.mxu1 %v3582_v32  ;;  %v3610_v29 = vpack.c.bf16 %v2452_v27, %v2450_v26  ;;  %v2451_v31 = vld [vmem:[#allocation11 + $0x490] sm:$0xff]  ;;  %v2454_v32 = vld [vmem:[#allocation11 + $0x4a8] sm:$0xff]  ;;  %v2485_v26 = vld [vmem:[#allocation11 + $0x5a0] sm:$0xff] }
 0x83b   : > { %v3612_v34 = vpack.c.bf16 %v2451_v31, %v2449_v30  ;;  %v3614_v35 = vpack.c.bf16 %v2456_v33, %v2454_v32  ;;  %v2487_v27 = vld [vmem:[#allocation11 + $0x5b0] sm:$0xff]  ;;  %v2489_v32 = vld [vmem:[#allocation11 + $0x5c0] sm:$0xff] }
 0x83c   : > { %v3648_v30 = vpack.c.bf16 %v2487_v27, %v2485_v26  ;;  %v2491_v33 = vld [vmem:[#allocation11 + $0x5d0] sm:$0xff]  ;;  %v2502_v26 = vld [vmem:[#allocation11 + $0x628] sm:$0xff]  ;;  %v2504_v27 = vld [vmem:[#allocation11 + $0x638] sm:$0xff] }
 0x83d   : > { %3521 = vmatpush1.bf16.msra.mxu0 %v3520_v49  ;;  %3585 = vmatpush1.bf16.msra.mxu1 %v3584_v39  ;;  %v2460_v49 = vld [vmem:[#allocation11 + $0x4d8] sm:$0xff]  ;;  %v3616_v39 = vpack.c.bf16 %v2455_v37, %v2453_v36  ;;  %v3652_v36 = vpack.c.bf16 %v2491_v33, %v2489_v32 }
 0x83e   : > { %3523 = vmatprep.subr.bf16.mxu0 %v3522_v42  ;;  %3587 = vmatprep.subr.bf16.mxu1 %v3586_v43  ;;  %v3618_v40 = vpack.c.bf16 %v2460_v49, %v2458_v38  ;;  %v2459_v42 = vld [vmem:[#allocation11 + $0x4d0] sm:$0xff]  ;;  %v2462_v43 = vld [vmem:[#allocation11 + $0x4e8] sm:$0xff]  ;;  %v2493_v38 = vld [vmem:[#allocation11 + $0x5e0] sm:$0xff] }
 0x83f   : > { %v3620_v45 = vpack.c.bf16 %v2459_v42, %v2457_v41  ;;  %v3622_v46 = vpack.c.bf16 %v2464_v44, %v2462_v43  ;;  %v2495_v49 = vld [vmem:[#allocation11 + $0x5f0] sm:$0xff]  ;;  %v2500_v41 = vld [vmem:[#allocation11 + $0x618] sm:$0xff] }
 0x841   : > { %3525 = vmatpush1.bf16.msra.mxu0 %v3524_v53  ;;  %3589 = vmatpush1.bf16.msra.mxu1 %v3588_v54  ;;  %v2468_v53 = vld [vmem:[#allocation11 + $0x518] sm:$0xff]  ;;  %v3624_v54 = vpack.c.bf16 %v2463_v48, %v2461_v47  ;;  %v2233_v47 = vld [vmem:[%s4836_s30 + $0x4] sm:$0xf] }
 0x842   : > { %3527 = vmatprep.subr.bf16.mxu0 %v3526_v19  ;;  %3591 = vmatprep.subr.bf16.mxu1 %v3590_v59  ;;  %v3626_v55 = vpack.c.bf16 %v2468_v53, %v2466_v52  ;;  %v2465_v19 = vld [vmem:[#allocation11 + $0x500] sm:$0xff]  ;;  %v2467_v59 = vld [vmem:[#allocation11 + $0x510] sm:$0xff]  ;;  %v2238_v48 = vrot.slane %v2233_v47, %v4554_v51  ;;  %v2246_v52 = vrot.slane %v2233_v47, %v4583_v17 }
 0x843   : > { %v3628_v60 = vpack.c.bf16 %v2467_v59, %v2465_v19  ;;  %v2242_v53 = vrot.slane %v2233_v47, %v4551_v50 }
 0x845   : > { %3529 = vmatpush1.bf16.msra.mxu0 %v3528_v62  ;;  %3593 = vmatpush1.bf16.msra.mxu1 %v3592_v63  ;;  %v3630_v62 = vpack.c.bf16 %v2472_v6, %v2470_v61  ;;  %v2469_v63 = vld [vmem:[#allocation11 + $0x520] sm:$0xff] }
 0x846   : > { %3595 = vmatprep.subr.bf16.mxu0 %v3594_v4  ;;  %v3632_v5 = vpack.c.bf16 %v2471_v2, %v2469_v63  ;;  %v2476_v4 = vld [vmem:[#allocation11 + $0x558] sm:$0xff] }
 0x847   : > { %v3634_v7 = vpack.c.bf16 %v2476_v4, %v2474_v3 }
 0x848   : > { %2320 = vmatmul.mubr.f32.vlgmr.msra.gmra.mrb[6].mxu0 %v4649_v57  ;;  %2391 = vmatmul.mubr.f32.vlgmr.msra.gmra.mrb[14].mxu1 %v4649_v57  ;;  %v2443_v57 = vld [vmem:[#allocation11 + $0x450] sm:$0xff] }
 0x849   : > { %3597 = vmatpush1.bf16.msra.mxu0 %v3596_v10  ;;  %v3604_v23 = vpack.c.bf16 %v2443_v57, %v2441_v21  ;;  %v3636_v10 = vpack.c.bf16 %v2475_v11, %v2473_v8  ;;  %v2484_v21 = vld [vmem:[#allocation11 + $0x598] sm:$0xff]  ;;  %v2481_v57 = vld [vmem:[#allocation11 + $0x580] sm:$0xff] }
 0x84a   : > { %3599 = vmatprep.subr.bf16.mxu0 %v3598_v12  ;;  %v2478_v12 = vld [vmem:[#allocation11 + $0x568] sm:$0xff]  ;;  %v3644_v24 = vpack.c.bf16 %v2483_v22, %v2481_v57  ;;  %v2497_v22 = vld [vmem:[#allocation11 + $0x600] sm:$0xff] }
 0x84b   : > { %v3638_v13 = vpack.c.bf16 %v2480_v9, %v2478_v12 }
 0x84d   : > { %3601 = vmatpush1.bf16.msra.mxu0 %v3600_v16  ;;  %v3640_v16 = vpack.c.bf16 %v2479_v15, %v2477_v14 }
 0x84e   : > { %3603 = vmatprep.subr.bf16.mxu0 %v3602_v20  ;;  %v2482_v20 = vld [vmem:[#allocation11 + $0x588] sm:$0xff] }
 0x84f   : > { %v3642_v0 = vpack.c.bf16 %v2484_v21, %v2482_v20 }
 0x851   : > { %3605 = vmatpush1.bf16.msra.mxu0 %v3604_v23  ;;  %v2486_v23 = vld [vmem:[#allocation11 + $0x5a8] sm:$0xff] }
 0x852   : > { %3607 = vmatprep.subr.bf16.mxu0 %v3606_v1  ;;  %v2488_v1 = vld [vmem:[#allocation11 + $0x5b8] sm:$0xff] }
 0x853   : > { %v3646_v25 = vpack.c.bf16 %v2488_v1, %v2486_v23  ;;  %v2499_v23 = vld [vmem:[#allocation11 + $0x610] sm:$0xff] }
 0x855   : > { %3609 = vmatpush1.bf16.msra.mxu0 %v3608_v28  ;;  %v2490_v28 = vld [vmem:[#allocation11 + $0x5c8] sm:$0xff] }
 0x856   : > { %3611 = vmatprep.subr.bf16.mxu0 %v3610_v29  ;;  %v2492_v29 = vld [vmem:[#allocation11 + $0x5d8] sm:$0xff] }
 0x857   : > { %v3650_v31 = vpack.c.bf16 %v2492_v29, %v2490_v28 }
 0x859   : > { %3613 = vmatpush1.bf16.msra.mxu0 %v3612_v34  ;;  %v2494_v34 = vld [vmem:[#allocation11 + $0x5e8] sm:$0xff] }
 0x85a   : > { %3615 = vmatprep.subr.bf16.mxu0 %v3614_v35  ;;  %v2496_v35 = vld [vmem:[#allocation11 + $0x5f8] sm:$0xff] }
 0x85b   : > { %v3654_v37 = vpack.c.bf16 %v2496_v35, %v2494_v34  ;;  %v3662_v34 = vpack.c.bf16 %v2504_v27, %v2502_v26  ;;  %v2501_v35 = vld [vmem:[#allocation11 + $0x620] sm:$0xff] }
 0x85d   : > { %3617 = vmatpush1.bf16.msra.mxu0 %v3616_v39  ;;  %v3656_v39 = vpack.c.bf16 %v2495_v49, %v2493_v38  ;;  %v2506_v38 = vld [vmem:[#allocation11 + $0x648] sm:$0xff]  ;;  %v2508_v49 = vld [vmem:[#allocation11 + $0x658] sm:$0xff] }
 0x85e   : > { %3619 = vmatprep.subr.bf16.mxu0 %v3618_v40  ;;  %v2498_v40 = vld [vmem:[#allocation11 + $0x608] sm:$0xff] }
 0x85f   : > { %v3658_v42 = vpack.c.bf16 %v2500_v41, %v2498_v40  ;;  %v3666_v40 = vpack.c.bf16 %v2508_v49, %v2506_v38  ;;  %v2505_v41 = vld [vmem:[#allocation11 + $0x640] sm:$0xff]  ;;  %v2535_v38 = vld [vmem:[#allocation11 + $0x730] sm:$0xff]  ;;  %v2538_v49 = vld [vmem:[#allocation11 + $0x748] sm:$0xff] }
 0x861   : > { %3621 = vmatpush1.bf16.msra.mxu0 %v3620_v45 }
 0x862   : > { %3623 = vmatprep.subr.bf16.mxu0 %v3622_v46 }
 0x865   : > { %3625 = vmatpush1.bf16.msra.mxu0 %v3624_v54  ;;  %v2250_v54 = vrot.slane %v2233_v47, %v4586_v18  ;;  %v2510_v47 = vld [vmem:[#allocation11 + $0x668] sm:$0xff] }
 0x866   : > { %3627 = vmatprep.subr.bf16.mxu0 %v3626_v55 }
 0x869   : > { %3629 = vmatpush1.bf16.msra.mxu0 %v3628_v60 }
 0x86a   : > { %3631 = vmatprep.subr.bf16.mxu0 %v3630_v62 }
 0x86d   : > { %3633 = vmatpush1.bf16.msra.mxu0 %v3632_v5 }
 0x86e   : > { %3635 = vmatprep.subr.bf16.mxu0 %v3634_v7 }
 0x871   : > { %3637 = vmatpush1.bf16.msra.mxu0 %v3636_v10 }
 0x872   : > { %3639 = vmatprep.subr.bf16.mxu0 %v3638_v13 }
 0x875   : > { %3641 = vmatpush1.bf16.msra.mxu0 %v3640_v16 }
 0x876   : > { %3643 = vmatprep.subr.bf16.mxu0 %v3642_v0 }
 0x879   : > { %3645 = vmatpush1.bf16.msra.mxu0 %v3644_v24 }
 0x87a   : > { %3647 = vmatprep.subr.bf16.mxu0 %v3646_v25 }
 0x87d   : > { %3649 = vmatpush1.bf16.msra.mxu0 %v3648_v30 }
 0x87e   : > { %3651 = vmatprep.subr.bf16.mxu0 %v3650_v31  ;;  %v3660_v31 = vpack.c.bf16 %v2499_v23, %v2497_v22  ;;  %v2525_v23 = vld [vmem:[#allocation11 + $0x6e0] sm:$0xff] }
 0x881   : > { %3653 = vmatpush1.bf16.msra.mxu0 %v3652_v36  ;;  %v2503_v36 = vld [vmem:[#allocation11 + $0x630] sm:$0xff] }
 0x882   : > { %3655 = vmatprep.subr.bf16.mxu0 %v3654_v37 }
 0x885   : > { %3657 = vmatpush1.bf16.msra.mxu0 %v3656_v39  ;;  %v3664_v39 = vpack.c.bf16 %v2503_v36, %v2501_v35 }
 0x886   : > { %3659 = vmatprep.subr.bf16.mxu0 %v3658_v42  ;;  %v2507_v42 = vld [vmem:[#allocation11 + $0x650] sm:$0xff] }
 0x8db   : > { %v4655_v43 = vpop.f32.mrb[4].mxu0  ;;  %v4657_v44 = vpop.f32.mrb[12].mxu1 }
 0x8dc   : > { %v4659_v45 = vpop.f32.mrb[5].mxu0  ;;  %v4661_v46 = vpop.f32.mrb[13].mxu1 }
 0x91b   : > { %v2321_v55 = vpop.f32.mrb[6].mxu0  ;;  %v2392_v19 = vpop.f32.mrb[14].mxu1 }
 0x91c   : > { %v2322_v59 = vadd.f32 %v2321_v55, %v2238_v48  ;;  %v4670_v60 = vadd.f32 %v2392_v19, %v2246_v52  ;;  %v2323_v61 = vpop.f32.mrb[7].mxu0  ;;  %v2394_v6 = vpop.f32.mrb[15].mxu1  ;;  %v2512_v48 = vld [vmem:[#allocation11 + $0x678] sm:$0xff]  ;;  %v3668_v52 = vpack.c.bf16 %v2507_v42, %v2505_v41  ;;  %v2511_v55 = vld [vmem:[#allocation11 + $0x670] sm:$0xff]  ;;  %v2514_v19 = vld [vmem:[#allocation11 + $0x688] sm:$0xff] }
 0x91d   : > { %v2324_v62 = vadd.f32 %v2323_v61, %v2242_v53  ;;  %v2395_v63 = vadd.f32 %v2394_v6, %v2250_v54  ;;  %v3670_v53 = vpack.c.bf16 %v2512_v48, %v2510_v47  ;;  %v2509_v54 = vld [vmem:[#allocation11 + $0x660] sm:$0xff]  ;;  %v2539_v48 = vld [vmem:[#allocation11 + $0x750] sm:$0xff] }
 0x91e   : > { %v2401_v2 = vmul.f32 0.044715, %v2322_v59  ;;  %v2397_v28 = vmul.f32 0.5, %v2322_v59  ;;  %v3672_v61 = vpack.c.bf16 %v2511_v55, %v2509_v54  ;;  %v2403_v26 = vmul.f32 0.044715, %v4670_v60  ;;  %v2537_v47 = vld [vmem:[#allocation11 + $0x740] sm:$0xff] }
 0x91f   : > { %v2402_v5 = vmul.f32 0.044715, %v2324_v62  ;;  %v2404_v3 = vmul.f32 0.044715, %v2395_v63  ;;  %v2398_v24 = vmul.f32 0.5, %v2324_v62  ;;  %v2400_v32 = vmul.f32 0.5, %v2395_v63 }
 0x920   : > { %v2405_v4 = vmul.f32 %v2401_v2, %v2322_v59  ;;  %v2518_v2 = vld [vmem:[#allocation11 + $0x6a8] sm:$0xff]  ;;  %v2544_v54 = vld [vmem:[#allocation11 + $0x778] sm:$0xff] }
 0x921   : > { %v2406_v7 = vmul.f32 %v2402_v5, %v2324_v62  ;;  %v2408_v8 = vmul.f32 %v2404_v3, %v2395_v63  ;;  %v2520_v5 = vld [vmem:[#allocation11 + $0x6b8] sm:$0xff] }
 0x922   : > { %v2409_v11 = vmul.f32 %v2405_v4, %v2322_v59  ;;  %v3678_v4 = vpack.c.bf16 %v2520_v5, %v2518_v2  ;;  %v2548_v2 = vld [vmem:[#allocation11 + $0x798] sm:$0xff] }
 0x923   : > { %v2410_v10 = vmul.f32 %v2406_v7, %v2324_v62  ;;  %v2412_v12 = vmul.f32 %v2408_v8, %v2395_v63  ;;  %v2517_v7 = vld [vmem:[#allocation11 + $0x6a0] sm:$0xff]  ;;  %v2519_v8 = vld [vmem:[#allocation11 + $0x6b0] sm:$0xff] }
 0x924   : > { %v2413_v9 = vadd.f32 %v2409_v11, %v2322_v59  ;;  %v2516_v59 = vld [vmem:[#allocation11 + $0x698] sm:$0xff]  ;;  %v4675_v11 = vld [vmem:[%s4836_s30] sm:$0xf] }
 0x925   : > { %v2414_v13 = vadd.f32 %v2410_v10, %v2324_v62  ;;  %v2416_v14 = vadd.f32 %v2412_v12, %v2395_v63  ;;  %v3674_v6 = vpack.c.bf16 %v2516_v59, %v2514_v19  ;;  %v2513_v62 = vld [vmem:[#allocation11 + $0x680] sm:$0xff]  ;;  %v2515_v63 = vld [vmem:[#allocation11 + $0x690] sm:$0xff]  ;;  %v2522_v10 = vld [vmem:[#allocation11 + $0x6c8] sm:$0xff]  ;;  %v3700_v19 = vpack.c.bf16 %v2539_v48, %v2537_v47 }
 0x926   : > { %v2417_v15 = vmul.f32 0.7978846, %v2413_v9  ;;  %v3676_v3 = vpack.c.bf16 %v2515_v63, %v2513_v62  ;;  %v2524_v12 = vld [vmem:[#allocation11 + $0x6d8] sm:$0xff]  ;;  %v3680_v9 = vpack.c.bf16 %v2519_v8, %v2517_v7  ;;  %v2546_v63 = vld [vmem:[#allocation11 + $0x788] sm:$0xff]  ;;  %v2545_v7 = vld [vmem:[#allocation11 + $0x780] sm:$0xff] }
 0x927   : > { %v2418_v16 = vmul.f32 0.7978846, %v2414_v13  ;;  %v2420_v20 = vmul.f32 0.7978846, %v2416_v14  ;;  %v1786_v13 = vrot.slane %v4675_v11, %v4551_v50  ;;  %v3682_v14 = vpack.c.bf16 %v2524_v12, %v2522_v10  ;;  %v2547_v8 = vld [vmem:[#allocation11 + $0x790] sm:$0xff]  ;;  %v2550_v12 = vld [vmem:[#allocation11 + $0x7a8] sm:$0xff] }
 0x928   : > { %3966 = vtanh.f32 %v2417_v15  ;;  %v2521_v15 = vld [vmem:[#allocation11 + $0x6c0] sm:$0xff] }
 0x929   : > { %3968 = vtanh.f32 %v2418_v16  ;;  %v2523_v16 = vld [vmem:[#allocation11 + $0x6d0] sm:$0xff] }
 0x92a   : > { %3970 = vtanh.f32 %v2420_v20  ;;  %v2526_v20 = vld [vmem:[#allocation11 + $0x6e8] sm:$0xff] }
 0x932   : > { %v3967_v21 = vpop.eup %3966 }
 0x933   : > { %v3969_v57 = vpop.eup %3968  ;;  %v2425_v0 = vadd.f32 1.0, %v3967_v21  ;;  %v2528_v21 = vld [vmem:[#allocation11 + $0x6f8] sm:$0xff] }
 0x934   : > { %v3971_v1 = vpop.eup %3970  ;;  %v2426_v25 = vadd.f32 1.0, %v3969_v57  ;;  %v3684_v57 = vpack.c.bf16 %v2523_v16, %v2521_v15  ;;  %v3686_v22 = vpack.c.bf16 %v2528_v21, %v2526_v20  ;;  %v2549_v15 = vld [vmem:[#allocation11 + $0x7a0] sm:$0xff]  ;;  %v2551_v16 = vld [vmem:[#allocation11 + $0x7b0] sm:$0xff]  ;;  %v2554_v20 = vld [vmem:[#allocation11 + $0x7c8] sm:$0xff] }
 0x935   : > { %v2428_v29 = vadd.f32 1.0, %v3971_v1  ;;  %v2429_v33 = vmul.f32 %v2425_v0, %v2397_v28  ;;  %v4680_v0 = vadd.f32 %v4659_v45, %v1786_v13  ;;  %v2527_v1 = vld [vmem:[#allocation11 + $0x6f0] sm:$0xff]  ;;  %v2407_v45 = vmul.f32 %v2403_v26, %v4670_v60  ;;  %v2556_v21 = vld [vmem:[#allocation11 + $0x7d8] sm:$0xff] }
 0x936   : > { %v2430_v30 = vmul.f32 %v2426_v25, %v2398_v24  ;;  %v2530_v24 = vld [vmem:[#allocation11 + $0x708] sm:$0xff]  ;;  %v2532_v25 = vld [vmem:[#allocation11 + $0x718] sm:$0xff]  ;;  %v3688_v27 = vpack.c.bf16 %v2527_v1, %v2525_v23  ;;  %v3708_v13 = vpack.c.bf16 %v2547_v8, %v2545_v7  ;;  %v2553_v23 = vld [vmem:[#allocation11 + $0x7c0] sm:$0xff] }
 0x937   : > { %v2432_v37 = vmul.f32 %v2428_v29, %v2400_v32  ;;  %v1946_v28 = vmul.f32 0.044715, %v4680_v0  ;;  %v3690_v29 = vpack.c.bf16 %v2532_v25, %v2530_v24  ;;  %v2534_v32 = vld [vmem:[#allocation11 + $0x728] sm:$0xff]  ;;  %v2555_v1 = vld [vmem:[#allocation11 + $0x7d0] sm:$0xff]  ;;  %v2560_v25 = vld [vmem:[#allocation11 + $0x7f8] sm:$0xff] }
 0x938   : > { %2625 = vmatprep.mubr.f32.mxu0 %v2430_v30  ;;  %v2529_v30 = vld [vmem:[#allocation11 + $0x700] sm:$0xff]  ;;  %v2558_v24 = vld [vmem:[#allocation11 + $0x7e8] sm:$0xff]  ;;  %v3716_v26 = vpack.c.bf16 %v2555_v1, %v2553_v23  ;;  %v1996_v8 = vld [vmem:[#allocation11 + $0x98] sm:$0xff]  ;;  %v1782_v1 = vrot.slane %v4675_v11, %v4554_v51 }
 0x939   : > { %2626 = vmatmul.mubr.f32.vlgmr.msra.gmra.mrb[8].mxu0 %v2429_v33  ;;  %v2536_v33 = vld [vmem:[#allocation11 + $0x738] sm:$0xff]  ;;  %v1950_v35 = vmul.f32 %v1946_v28, %v4680_v0  ;;  %v2557_v28 = vld [vmem:[#allocation11 + $0x7e0] sm:$0xff]  ;;  %v1994_v7 = vld [vmem:[#allocation11 + $0x88] sm:$0xff] }
 0x93a   : > { %3661 = vmatpush1.bf16.msra.mxu0 %v3660_v31  ;;  %2696 = vmatprep.mubr.f32.mxu0 %v2432_v37  ;;  %v2531_v31 = vld [vmem:[#allocation11 + $0x710] sm:$0xff]  ;;  %v3694_v36 = vpack.c.bf16 %v2536_v33, %v2534_v32  ;;  %v2533_v37 = vld [vmem:[#allocation11 + $0x720] sm:$0xff]  ;;  %v1980_v32 = vld [vmem:[#allocation11 + $0x18] sm:$0xff] }
 0x93b   : > { %3663 = vmatprep.subr.bf16.mxu0 %v3662_v34  ;;  %v3692_v34 = vpack.c.bf16 %v2531_v31, %v2529_v30  ;;  %v3696_v41 = vpack.c.bf16 %v2535_v38, %v2533_v37  ;;  %v1978_v31 = vld [vmem:[#allocation11 + $0x8] sm:$0xff]  ;;  %v1979_v37 = vld [vmem:[#allocation11 + $0x10] sm:$0xff]  ;;  %v2004_v23 = vld [vmem:[#allocation11 + $0xd8] sm:$0xff] }
 0x93e   : > { %3665 = vmatpush1.bf16.msra.mxu0 %v3664_v39  ;;  %v2540_v39 = vld [vmem:[#allocation11 + $0x758] sm:$0xff] }
 0x93f   : > { %3667 = vmatprep.subr.bf16.mxu0 %v3666_v40  ;;  %v2411_v40 = vmul.f32 %v2407_v45, %v4670_v60  ;;  %v3698_v42 = vpack.c.bf16 %v2540_v39, %v2538_v49  ;;  %v1982_v49 = vld [vmem:[#allocation11 + $0x28] sm:$0xff]  ;;  %v1984_v39 = vld [vmem:[#allocation11 + $0x38] sm:$0xff] }
 0x940   : > { %v3726_v48 = vpack.c.bf16 %v1984_v39, %v1982_v49  ;;  %v2009_v39 = vld [vmem:[#allocation11 + $0x100] sm:$0xff] }
 0x941   : > { %v2415_v55 = vadd.f32 %v2411_v40, %v4670_v60  ;;  %v2399_v40 = vmul.f32 0.5, %v4670_v60 }
 0x942   : > { %3669 = vmatpush1.bf16.msra.mxu0 %v3668_v52  ;;  %v1954_v52 = vmul.f32 %v1950_v35, %v4680_v0  ;;  %v3722_v35 = vpack.c.bf16 %v1980_v32, %v1978_v31  ;;  %v4701_v31 = vadd.f32 %v4655_v43, %v1782_v1 }
 0x943   : > { %3671 = vmatprep.subr.bf16.mxu0 %v3670_v53  ;;  %v2542_v53 = vld [vmem:[#allocation11 + $0x768] sm:$0xff] }
 0x944   : > { %v3702_v59 = vpack.c.bf16 %v2544_v54, %v2542_v53  ;;  %v1958_v62 = vadd.f32 %v1954_v52, %v4680_v0  ;;  %v1981_v52 = vld [vmem:[#allocation11 + $0x20] sm:$0xff]  ;;  %v1983_v53 = vld [vmem:[#allocation11 + $0x30] sm:$0xff] }
 0x945   : > { %v3728_v60 = vpack.c.bf16 %v1983_v53, %v1981_v52  ;;  %v2013_v53 = vld [vmem:[#allocation11 + $0x120] sm:$0xff] }
 0x946   : > { %3673 = vmatpush1.bf16.msra.mxu0 %v3672_v61  ;;  %v2541_v61 = vld [vmem:[#allocation11 + $0x760] sm:$0xff]  ;;  %v1962_v10 = vmul.f32 0.7978846, %v1958_v62  ;;  %v1990_v62 = vld [vmem:[#allocation11 + $0x68] sm:$0xff] }
 0x947   : > { %3675 = vmatprep.subr.bf16.mxu0 %v3674_v6  ;;  %v2543_v6 = vld [vmem:[#allocation11 + $0x770] sm:$0xff] }
 0x948   : > { %v3704_v5 = vpack.c.bf16 %v2543_v6, %v2541_v61  ;;  %v1987_v6 = vld [vmem:[#allocation11 + $0x50] sm:$0xff] }
 0x94a   : > { %3677 = vmatpush1.bf16.msra.mxu0 %v3676_v3  ;;  %v2419_v3 = vmul.f32 0.7978846, %v2415_v55  ;;  %v1986_v55 = vld [vmem:[#allocation11 + $0x48] sm:$0xff] }
 0x94b   : > { %3679 = vmatprep.subr.bf16.mxu0 %v3678_v4  ;;  %v3706_v4 = vpack.c.bf16 %v2548_v2, %v2546_v63  ;;  %v1992_v63 = vld [vmem:[#allocation11 + $0x78] sm:$0xff] }
 0x94c   : > { %3972 = vtanh.f32 %v2419_v3  ;;  %v1989_v3 = vld [vmem:[#allocation11 + $0x60] sm:$0xff] }
 0x94d   : > { %3974 = vtanh.f32 %v1962_v10 }
 0x94e   : > { %3681 = vmatpush1.bf16.msra.mxu0 %v3680_v9  ;;  %v2552_v9 = vld [vmem:[#allocation11 + $0x7b8] sm:$0xff] }
 0x94f   : > { %3683 = vmatprep.subr.bf16.mxu0 %v3682_v14  ;;  %v3710_v14 = vpack.c.bf16 %v2552_v9, %v2550_v12  ;;  %v3738_v12 = vpack.c.bf16 %v1996_v8, %v1994_v7  ;;  %v1993_v9 = vld [vmem:[#allocation11 + $0x80] sm:$0xff]  ;;  %v2023_v8 = vld [vmem:[#allocation11 + $0x170] sm:$0xff] }
 0x950   : > { %v2021_v7 = vld [vmem:[#allocation11 + $0x160] sm:$0xff] }
 0x952   : > { %3685 = vmatpush1.bf16.msra.mxu0 %v3684_v57  ;;  %v3712_v57 = vpack.c.bf16 %v2551_v16, %v2549_v15  ;;  %v2000_v15 = vld [vmem:[#allocation11 + $0xb8] sm:$0xff] }
 0x953   : > { %3687 = vmatprep.subr.bf16.mxu0 %v3686_v22  ;;  %v3714_v22 = vpack.c.bf16 %v2556_v21, %v2554_v20  ;;  %v1997_v21 = vld [vmem:[#allocation11 + $0xa0] sm:$0xff] }
 0x956   : > { %3689 = vmatpush1.bf16.msra.mxu0 %v3688_v27  ;;  %v3718_v27 = vpack.c.bf16 %v2560_v25, %v2558_v24  ;;  %v3973_v30 = vpop.eup %3972  ;;  %v1794_v25 = vrot.slane %v4675_v11, %v4586_v18  ;;  %v2012_v18 = vld [vmem:[#allocation11 + $0x118] sm:$0xff] }
 0x957   : > { %3691 = vmatprep.subr.bf16.mxu0 %v3690_v29  ;;  %v2559_v29 = vld [vmem:[#allocation11 + $0x7f0] sm:$0xff]  ;;  %v3975_v33 = vpop.eup %3974 }
 0x958   : > { %v3720_v45 = vpack.c.bf16 %v2559_v29, %v2557_v28  ;;  %v1970_v38 = vadd.f32 1.0, %v3975_v33  ;;  %v2003_v28 = vld [vmem:[#allocation11 + $0xd0] sm:$0xff]  ;;  %v2006_v29 = vld [vmem:[#allocation11 + $0xe8] sm:$0xff]  ;;  %v4704_v33 = vadd.f32 %v4661_v46, %v1794_v25 }
 0x959   : > { %v2031_v25 = vld [vmem:[#allocation11 + $0x1b0] sm:$0xff] }
 0x95a   : > { %3693 = vmatpush1.bf16.msra.mxu0 %v3692_v34  ;;  %v2427_v34 = vadd.f32 1.0, %v3973_v30  ;;  %v2008_v30 = vld [vmem:[#allocation11 + $0xf8] sm:$0xff]  ;;  %v1948_v49 = vmul.f32 0.044715, %v4704_v33 }
 0x95b   : > { %3695 = vmatprep.subr.bf16.mxu0 %v3694_v36  ;;  %v1977_v36 = vld [vmem:[#allocation11] sm:$0xff] }
 0x95c   : > { %v2431_v47 = vmul.f32 %v2427_v34, %v2399_v40  ;;  %v2005_v34 = vld [vmem:[#allocation11 + $0xe0] sm:$0xff]  ;;  %v2011_v40 = vld [vmem:[#allocation11 + $0x110] sm:$0xff] }
 0x95e   : > { %3697 = vmatpush1.bf16.msra.mxu0 %v3696_v41  ;;  %v3724_v41 = vpack.c.bf16 %v1979_v37, %v1977_v36  ;;  %v2010_v36 = vld [vmem:[#allocation11 + $0x108] sm:$0xff]  ;;  %v1945_v37 = vmul.f32 0.044715, %v4701_v31 }
 0x95f   : > { %3699 = vmatprep.subr.bf16.mxu0 %v3698_v42  ;;  %v1942_v42 = vmul.f32 0.5, %v4680_v0  ;;  %v1985_v0 = vld [vmem:[#allocation11 + $0x40] sm:$0xff]  ;;  %v3754_v43 = vpack.c.bf16 %v2012_v18, %v2010_v36 }
 0x960   : > { %v3732_v2 = vpack.c.bf16 %v1987_v6, %v1985_v0  ;;  %v1949_v46 = vmul.f32 %v1945_v37, %v4701_v31  ;;  %v2017_v0 = vld [vmem:[#allocation11 + $0x140] sm:$0xff]  ;;  %v2019_v6 = vld [vmem:[#allocation11 + $0x150] sm:$0xff] }
 0x961   : > { %v1974_v54 = vmul.f32 %v1970_v38, %v1942_v42  ;;  %v2016_v42 = vld [vmem:[#allocation11 + $0x138] sm:$0xff]  ;;  %v2037_v18 = vld [vmem:[#allocation11 + $0x1e0] sm:$0xff]  ;;  %v2039_v37 = vld [vmem:[#allocation11 + $0x1f0] sm:$0xff] }
 0x962   : > { %3701 = vmatpush1.bf16.msra.mxu0 %v3700_v19  ;;  %v1988_v19 = vld [vmem:[#allocation11 + $0x58] sm:$0xff] }
 0x963   : > { %3703 = vmatprep.subr.bf16.mxu0 %v3702_v59  ;;  %v3046_v59 = vld [vmem:[%s637_s17] ss:$0 sm:$0xff]  ;;  %v3730_v61 = vpack.c.bf16 %v1988_v19, %v1986_v55  ;;  %v2018_v55 = vld [vmem:[#allocation11 + $0x148] sm:$0xff]  ;;  %v2020_v19 = vld [vmem:[#allocation11 + $0x158] sm:$0xff]  ;;  %s4216_s17 = smov [#allocation12]  }
 0x964   : > { %2866 = vperm.xlu1 %3953, %v3046_v59   ;;  %s4130_s10 = sshll.u32 %s4216_s17, 4  ;;  %s4131_s10 = int_to_ptr.vmem [resolvable:$false] %s4130_s10 }
 0x965   : > { %s4132_s15 = scalar_lea.vmem %s4131_s10, 512  ;;  %p4133_p1 = scmp.lt.s32.totalorder %s4741_s11, %s4131_s10 }
 0x966   : > { %3705 = vmatpush1.bf16.msra.mxu0 %v3704_v5  ;;  %v3734_v5 = vpack.c.bf16 %v1992_v63, %v1990_v62  ;;  %v2022_v63 = vld [vmem:[#allocation11 + $0x168] sm:$0xff]  ;;  %p4134_p11 = scmp.lt.s32.totalorder %s4132_s15, %s4126_s26 }
 0x967   : > { %3707 = vmatprep.subr.bf16.mxu0 %v3706_v4  ;;  %v1991_v4 = vld [vmem:[#allocation11 + $0x70] sm:$0xff] }
 0x968   : > { %v3736_v10 = vpack.c.bf16 %v1991_v4, %v1989_v3  ;;  %v3764_v3 = vpack.c.bf16 %v2019_v6, %v2017_v0  ;;  %v2047_v0 = vld [vmem:[#allocation11 + $0x230] sm:$0xff]  ;;  %p4135_p12 = por %p4134_p11, %p4133_p1 }
 0x96a   : > { %3709 = vmatpush1.bf16.msra.mxu0 %v3708_v13  ;;  %v1995_v13 = vld [vmem:[#allocation11 + $0x90] sm:$0xff]  ;;  %p4136_p13 = pnand %p4135_p12, %p4129_p10 }
 0x96b   : > { %3711 = vmatprep.subr.bf16.mxu0 %v3710_v14  ;;  %v1998_v14 = vld [vmem:[#allocation11 + $0xa8] sm:$0xff]  ;;  %v3740_v16 = vpack.c.bf16 %v1995_v13, %v1993_v9  ;;  %v2028_v9 = vld [vmem:[#allocation11 + $0x198] sm:$0xff]  ;;  %v3768_v13 = vpack.c.bf16 %v2023_v8, %v2021_v7 }
 0x96c   : > { %v3742_v20 = vpack.c.bf16 %v2000_v15, %v1998_v14  ;;  %v2056_v7 = vld [vmem:[#allocation11 + $0x278] sm:$0xff] }
 0x96e   : > { %3713 = vmatpush1.bf16.msra.mxu0 %v3712_v57  ;;  %v1999_v57 = vld [vmem:[#allocation11 + $0xb0] sm:$0xff] }
 0x96f   : > { %3715 = vmatprep.subr.bf16.mxu0 %v3714_v22  ;;  %v2002_v22 = vld [vmem:[#allocation11 + $0xc8] sm:$0xff]  ;;  %v3744_v24 = vpack.c.bf16 %v1999_v57, %v1997_v21 }
 0x970   : > { %v2030_v57 = vld [vmem:[#allocation11 + $0x1a8] sm:$0xff] }
 0x972   : > { %3717 = vmatpush1.bf16.msra.mxu0 %v3716_v26  ;;  %v3746_v26 = vpack.c.bf16 %v2004_v23, %v2002_v22  ;;  %v2032_v22 = vld [vmem:[#allocation11 + $0x1b8] sm:$0xff] }
 0x973   : > { %3719 = vmatprep.subr.bf16.mxu0 %v3718_v27  ;;  %v2001_v27 = vld [vmem:[#allocation11 + $0xc0] sm:$0xff]  ;;  %v3774_v1 = vpack.c.bf16 %v2032_v22, %v2030_v57  ;;  %v2064_v57 = vld [vmem:[#allocation11 + $0x2b8] sm:$0xff] }
 0x974   : > { %v3748_v32 = vpack.c.bf16 %v2003_v28, %v2001_v27  ;;  %v2036_v27 = vld [vmem:[#allocation11 + $0x1d8] sm:$0xff] }
 0x976   : > { %3721 = vmatpush1.bf16.msra.mxu0 %v3720_v45  ;;  %v3750_v45 = vpack.c.bf16 %v2008_v30, %v2006_v29  ;;  %v2033_v30 = vld [vmem:[#allocation11 + $0x1c0] sm:$0xff] }
 0x977   : > { %3723 = vmatprep.subr.bf16.mxu0 %v3722_v35  ;;  %v2007_v35 = vld [vmem:[#allocation11 + $0xf0] sm:$0xff] }
 0x978   : > { %v3752_v38 = vpack.c.bf16 %v2007_v35, %v2005_v34  ;;  %v2040_v34 = vld [vmem:[#allocation11 + $0x1f8] sm:$0xff] }
 0x979   : > { %2697 = vmatmul.mubr.f32.vlgmr.msra.gmra.mrb[8].mxu0 %v2431_v47  ;;  %v3756_v47 = vpack.c.bf16 %v2011_v40, %v2009_v39  ;;  %v3784_v40 = vpack.c.bf16 %v2039_v37, %v2037_v18  ;;  %v2069_v37 = vld [vmem:[#allocation11 + $0x2e0] sm:$0xff] }
 0x97a   : > { %3725 = vmatpush1.bf16.msra.mxu0 %v3724_v41  ;;  %2767 = vmatprep.mubr.f32.mxu0 %v1974_v54  ;;  %v2014_v41 = vld [vmem:[#allocation11 + $0x128] sm:$0xff]  ;;  %v2015_v54 = vld [vmem:[#allocation11 + $0x130] sm:$0xff] }
 0x97b   : > { %3727 = vmatprep.subr.bf16.mxu0 %v3726_v48  ;;  %v1952_v48 = vmul.f32 %v1948_v49, %v4704_v33  ;;  %v3758_v52 = vpack.c.bf16 %v2016_v42, %v2014_v41  ;;  %v3760_v59 = vpack.c.bf16 %v2015_v54, %v2013_v53  ;;  %v2042_v49 = vld [vmem:[#allocation11 + $0x208] sm:$0xff]  ;;  %v2048_v53 = vld [vmem:[#allocation11 + $0x238] sm:$0xff]  ;;  %v1941_v54 = vmul.f32 0.5, %v4701_v31 }
 0x97d   : > { %v1956_v62 = vmul.f32 %v1952_v48, %v4704_v33 }
 0x97e   : > { %3729 = vmatpush1.bf16.msra.mxu0 %v3728_v60  ;;  %v1953_v60 = vmul.f32 %v1949_v46, %v4701_v31  ;;  %v2041_v46 = vld [vmem:[#allocation11 + $0x200] sm:$0xff] }
 0x97f   : > { %3731 = vmatprep.subr.bf16.mxu0 %v3730_v61  ;;  %v3762_v61 = vpack.c.bf16 %v2020_v19, %v2018_v55  ;;  %v1944_v19 = vmul.f32 0.5, %v4704_v33 }
 0x982   : > { %3733 = vmatpush1.bf16.msra.mxu0 %v3732_v2  ;;  %v2024_v2 = vld [vmem:[#allocation11 + $0x178] sm:$0xff] }
 0x983   : > { %3735 = vmatprep.subr.bf16.mxu0 %v3734_v5  ;;  %v1957_v5 = vadd.f32 %v1953_v60, %v4701_v31  ;;  %v3766_v4 = vpack.c.bf16 %v2024_v2, %v2022_v63  ;;  %v2052_v63 = vld [vmem:[#allocation11 + $0x258] sm:$0xff]  ;;  %v2051_v31 = vld [vmem:[#allocation11 + $0x250] sm:$0xff] }
 0x985   : > { %v1961_v14 = vmul.f32 0.7978846, %v1957_v5 }
 0x986   : > { %3737 = vmatpush1.bf16.msra.mxu0 %v3736_v10  ;;  %v1960_v10 = vadd.f32 %v1956_v62, %v4704_v33  ;;  %v2050_v62 = vld [vmem:[#allocation11 + $0x248] sm:$0xff] }
 0x987   : > { %3739 = vmatprep.subr.bf16.mxu0 %v3738_v12  ;;  %v2026_v12 = vld [vmem:[#allocation11 + $0x188] sm:$0xff]  ;;  %3976 = vtanh.f32 %v1961_v14  ;;  %v3794_v5 = vpack.c.bf16 %v2052_v63, %v2050_v62  ;;  %v2088_v62 = vld [vmem:[#allocation11 + $0x378] sm:$0xff] }
 0x988   : > { %v3770_v15 = vpack.c.bf16 %v2028_v9, %v2026_v12  ;;  %v1964_v21 = vmul.f32 0.7978846, %v1960_v10  ;;  %v2053_v10 = vld [vmem:[#allocation11 + $0x260] sm:$0xff]  ;;  %v2055_v12 = vld [vmem:[#allocation11 + $0x270] sm:$0xff]  ;;  %v2058_v9 = vld [vmem:[#allocation11 + $0x288] sm:$0xff] }
 0x989   : > { %v3800_v14 = vpack.c.bf16 %v2055_v12, %v2053_v10  ;;  %v2089_v12 = vld [vmem:[#allocation11 + $0x380] sm:$0xff] }
 0x98a   : > { %3741 = vmatpush1.bf16.msra.mxu0 %v3740_v16  ;;  %v2025_v16 = vld [vmem:[#allocation11 + $0x180] sm:$0xff]  ;;  %3978 = vtanh.f32 %v1964_v21  ;;  %v2062_v21 = vld [vmem:[#allocation11 + $0x2a8] sm:$0xff] }
 0x98b   : > { %3743 = vmatprep.subr.bf16.mxu0 %v3742_v20  ;;  %v2027_v20 = vld [vmem:[#allocation11 + $0x190] sm:$0xff] }
 0x98c   : > { %v3772_v23 = vpack.c.bf16 %v2027_v20, %v2025_v16  ;;  %v2057_v16 = vld [vmem:[#allocation11 + $0x280] sm:$0xff]  ;;  %v2059_v20 = vld [vmem:[#allocation11 + $0x290] sm:$0xff] }
 0x98d   : > { %v3804_v22 = vpack.c.bf16 %v2059_v20, %v2057_v16  ;;  %v2093_v20 = vld [vmem:[#allocation11 + $0x3a0] sm:$0xff] }
 0x98e   : > { %3745 = vmatpush1.bf16.msra.mxu0 %v3744_v24  ;;  %v2029_v24 = vld [vmem:[#allocation11 + $0x1a0] sm:$0xff] }
 0x98f   : > { %3747 = vmatprep.subr.bf16.mxu0 %v3746_v26  ;;  %v2034_v26 = vld [vmem:[#allocation11 + $0x1c8] sm:$0xff]  ;;  %v3776_v28 = vpack.c.bf16 %v2031_v25, %v2029_v24  ;;  %v2063_v24 = vld [vmem:[#allocation11 + $0x2b0] sm:$0xff] }
 0x990   : > { %v3778_v29 = vpack.c.bf16 %v2036_v27, %v2034_v26  ;;  %v2066_v25 = vld [vmem:[#allocation11 + $0x2c8] sm:$0xff]  ;;  %v2068_v26 = vld [vmem:[#allocation11 + $0x2d8] sm:$0xff]  ;;  %v1790_v27 = vrot.slane %v4675_v11, %v4583_v17 }
 0x992   : > { %3749 = vmatpush1.bf16.msra.mxu0 %v3748_v32  ;;  %v2035_v32 = vld [vmem:[#allocation11 + $0x1d0] sm:$0xff] }
 0x993   : > { %3751 = vmatprep.subr.bf16.mxu0 %v3750_v45  ;;  %v2038_v45 = vld [vmem:[#allocation11 + $0x1e8] sm:$0xff]  ;;  %v3780_v35 = vpack.c.bf16 %v2035_v32, %v2033_v30  ;;  %v2065_v30 = vld [vmem:[#allocation11 + $0x2c0] sm:$0xff]  ;;  %v2067_v32 = vld [vmem:[#allocation11 + $0x2d0] sm:$0xff] }
 0x994   : > { %v3782_v36 = vpack.c.bf16 %v2040_v34, %v2038_v45  ;;  %v2070_v45 = vld [vmem:[#allocation11 + $0x2e8] sm:$0xff]  ;;  %v2072_v34 = vld [vmem:[#allocation11 + $0x2f8] sm:$0xff] }
 0x995   : > { %v3814_v18 = vpack.c.bf16 %v2072_v34, %v2070_v45 }
 0x996   : > { %3753 = vmatpush1.bf16.msra.mxu0 %v3752_v38  ;;  %v3977_v38 = vpop.eup %3976 }
 0x997   : > { %3755 = vmatprep.subr.bf16.mxu0 %v3754_v43  ;;  %v2044_v43 = vld [vmem:[#allocation11 + $0x218] sm:$0xff]  ;;  %v3979_v39 = vpop.eup %3978  ;;  %v1969_v41 = vadd.f32 1.0, %v3977_v38  ;;  %v2071_v38 = vld [vmem:[#allocation11 + $0x2f0] sm:$0xff] }
 0x998   : > { %v3786_v42 = vpack.c.bf16 %v2044_v43, %v2042_v49  ;;  %v1972_v48 = vadd.f32 1.0, %v3979_v39  ;;  %v2074_v49 = vld [vmem:[#allocation11 + $0x308] sm:$0xff]  ;;  %v2076_v43 = vld [vmem:[#allocation11 + $0x318] sm:$0xff]  ;;  %v3816_v11 = vpack.c.bf16 %v2071_v38, %v2069_v37  ;;  %v2845_v38 = vld [vmem:[%s4838_s20] sm:$0x3] }
 0x999   : > { %v1973_v60 = vmul.f32 %v1969_v41, %v1941_v54  ;;  %v3818_v39 = vpack.c.bf16 %v2076_v43, %v2074_v49  ;;  %v2075_v41 = vld [vmem:[#allocation11 + $0x310] sm:$0xff]  ;;  %v2082_v54 = vld [vmem:[#allocation11 + $0x348] sm:$0xff]  ;;  %v2850_v49 = vrot.slane %v2845_v38, %v4554_v51  ;;  %v2854_v43 = vrot.slane %v2845_v38, %v4551_v50 }
 0x99a   : > { %3757 = vmatpush1.bf16.msra.mxu0 %v3756_v47  ;;  %v2043_v47 = vld [vmem:[#allocation11 + $0x210] sm:$0xff]  ;;  %v1976_v6 = vmul.f32 %v1972_v48, %v1944_v19 }
 0x99b   : > { %3759 = vmatprep.subr.bf16.mxu0 %v3758_v52  ;;  %v2046_v52 = vld [vmem:[#allocation11 + $0x228] sm:$0xff]  ;;  %v3788_v55 = vpack.c.bf16 %v2043_v47, %v2041_v46  ;;  %v2080_v46 = vld [vmem:[#allocation11 + $0x338] sm:$0xff] }
 0x99e   : > { %3761 = vmatpush1.bf16.msra.mxu0 %v3760_v59  ;;  %v3790_v59 = vpack.c.bf16 %v2048_v53, %v2046_v52  ;;  %v2077_v52 = vld [vmem:[#allocation11 + $0x320] sm:$0xff]  ;;  %v2079_v53 = vld [vmem:[#allocation11 + $0x330] sm:$0xff] }
 0x99f   : > { %3763 = vmatprep.subr.bf16.mxu0 %v3762_v61  ;;  %v2045_v61 = vld [vmem:[#allocation11 + $0x220] sm:$0xff] }
 0x9a0   : > { %v3792_v2 = vpack.c.bf16 %v2047_v0, %v2045_v61  ;;  %v2081_v61 = vld [vmem:[#allocation11 + $0x340] sm:$0xff]  ;;  %v2083_v0 = vld [vmem:[#allocation11 + $0x350] sm:$0xff] }
 0x9a2   : > { %3765 = vmatpush1.bf16.msra.mxu0 %v3764_v3  ;;  %v2049_v3 = vld [vmem:[#allocation11 + $0x240] sm:$0xff] }
 0x9a3   : > { %3767 = vmatprep.subr.bf16.mxu0 %v3766_v4  ;;  %v2054_v4 = vld [vmem:[#allocation11 + $0x268] sm:$0xff]  ;;  %v3796_v33 = vpack.c.bf16 %v2051_v31, %v2049_v3  ;;  %v2085_v3 = vld [vmem:[#allocation11 + $0x360] sm:$0xff]  ;;  %v2087_v31 = vld [vmem:[#allocation11 + $0x370] sm:$0xff] }
 0x9a4   : > { %v3798_v8 = vpack.c.bf16 %v2056_v7, %v2054_v4  ;;  %v2090_v4 = vld [vmem:[#allocation11 + $0x388] sm:$0xff]  ;;  %v2092_v7 = vld [vmem:[#allocation11 + $0x398] sm:$0xff] }
 0x9a5   : > { %v3834_v10 = vpack.c.bf16 %v2092_v7, %v2090_v4 }
 0x9a6   : > { %3769 = vmatpush1.bf16.msra.mxu0 %v3768_v13  ;;  %v2060_v13 = vld [vmem:[#allocation11 + $0x298] sm:$0xff] }
 0x9a7   : > { %3771 = vmatprep.subr.bf16.mxu0 %v3770_v15  ;;  %v3802_v15 = vpack.c.bf16 %v2060_v13, %v2058_v9  ;;  %v2091_v9 = vld [vmem:[#allocation11 + $0x390] sm:$0xff]  ;;  %v2094_v13 = vld [vmem:[#allocation11 + $0x3a8] sm:$0xff] }
 0x9aa   : > { %3773 = vmatpush1.bf16.msra.mxu0 %v3772_v23  ;;  %v3806_v23 = vpack.c.bf16 %v2064_v57, %v2062_v21  ;;  %v2095_v21 = vld [vmem:[#allocation11 + $0x3b0] sm:$0xff]  ;;  %v2098_v57 = vld [vmem:[#allocation11 + $0x3c8] sm:$0xff] }
 0x9ab   : > { %3775 = vmatprep.subr.bf16.mxu0 %v3774_v1  ;;  %v2061_v1 = vld [vmem:[#allocation11 + $0x2a0] sm:$0xff] }
 0x9ae   : > { %3777 = vmatpush1.bf16.msra.mxu0 %v3776_v28  ;;  %v3808_v28 = vpack.c.bf16 %v2063_v24, %v2061_v1  ;;  %v2097_v24 = vld [vmem:[#allocation11 + $0x3c0] sm:$0xff] }
 0x9af   : > { %3779 = vmatprep.subr.bf16.mxu0 %v3778_v29  ;;  %v3810_v29 = vpack.c.bf16 %v2068_v26, %v2066_v25  ;;  %v2099_v25 = vld [vmem:[#allocation11 + $0x3d0] sm:$0xff]  ;;  %v2102_v26 = vld [vmem:[#allocation11 + $0x3e8] sm:$0xff] }
 0x9b2   : > { %3781 = vmatpush1.bf16.msra.mxu0 %v3780_v35  ;;  %v4719_v35 = vadd.f32 %v4657_v44, %v1790_v27  ;;  %v2104_v27 = vld [vmem:[#allocation11 + $0x3f8] sm:$0xff] }
 0x9b3   : > { %3783 = vmatprep.subr.bf16.mxu0 %v3782_v36  ;;  %v3812_v36 = vpack.c.bf16 %v2067_v32, %v2065_v30  ;;  %v2101_v30 = vld [vmem:[#allocation11 + $0x3e0] sm:$0xff]  ;;  %v2103_v32 = vld [vmem:[#allocation11 + $0x3f0] sm:$0xff] }
 0x9b4   : > { %v1947_v17 = vmul.f32 0.044715, %v4719_v35  ;;  %v3848_v34 = vpack.c.bf16 %v2103_v32, %v2101_v30 }
 0x9b6   : > { %3785 = vmatpush1.bf16.msra.mxu0 %v3784_v40  ;;  %v2073_v40 = vld [vmem:[#allocation11 + $0x300] sm:$0xff]  ;;  %v1951_v44 = vmul.f32 %v1947_v17, %v4719_v35 }
 0x9b7   : > { %3787 = vmatprep.subr.bf16.mxu0 %v3786_v42  ;;  %v2078_v42 = vld [vmem:[#allocation11 + $0x328] sm:$0xff]  ;;  %v3820_v47 = vpack.c.bf16 %v2075_v41, %v2073_v40 }
 0x9b8   : > { %v3822_v48 = vpack.c.bf16 %v2080_v46, %v2078_v42  ;;  %v1955_v19 = vmul.f32 %v1951_v44, %v4719_v35 }
 0x9b9   : > { %2768 = vmatmul.mubr.f32.vlgmr.msra.gmra.mrb[8].mxu0 %v1973_v60  ;;  %v3824_v60 = vpack.c.bf16 %v2079_v53, %v2077_v52 }
 0x9ba   : > { %3789 = vmatpush1.bf16.msra.mxu0 %v3788_v55  ;;  %2838 = vmatprep.mubr.f32.mxu0 %v1976_v6  ;;  %v2084_v55 = vld [vmem:[#allocation11 + $0x358] sm:$0xff]  ;;  %v2086_v6 = vld [vmem:[#allocation11 + $0x368] sm:$0xff]  ;;  %v1959_v63 = vadd.f32 %v1955_v19, %v4719_v35 }
 0x9bb   : > { %3791 = vmatprep.subr.bf16.mxu0 %v3790_v59  ;;  %v3826_v59 = vpack.c.bf16 %v2084_v55, %v2082_v54 }
 0x9be   : > { %3793 = vmatpush1.bf16.msra.mxu0 %v3792_v2  ;;  %v3828_v2 = vpack.c.bf16 %v2083_v0, %v2081_v61 }
 0x9bf   : > { %3795 = vmatprep.subr.bf16.mxu0 %v3794_v5  ;;  %v3830_v5 = vpack.c.bf16 %v2088_v62, %v2086_v6 }
 0x9c2   : > { %3797 = vmatpush1.bf16.msra.mxu0 %v3796_v33  ;;  %v3832_v33 = vpack.c.bf16 %v2087_v31, %v2085_v3 }
 0x9c3   : > { %3799 = vmatprep.subr.bf16.mxu0 %v3798_v8  ;;  %v1963_v8 = vmul.f32 0.7978846, %v1959_v63 }
 0x9c5   : > { %3980 = vtanh.f32 %v1963_v8 }
 0x9c6   : > { %3801 = vmatpush1.bf16.msra.mxu0 %v3800_v14  ;;  %v2096_v14 = vld [vmem:[#allocation11 + $0x3b8] sm:$0xff] }
 0x9c7   : > { %3803 = vmatprep.subr.bf16.mxu0 %v3802_v15  ;;  %v3836_v15 = vpack.c.bf16 %v2091_v9, %v2089_v12  ;;  %v3838_v16 = vpack.c.bf16 %v2096_v14, %v2094_v13 }
 0x9ca   : > { %3805 = vmatpush1.bf16.msra.mxu0 %v3804_v22  ;;  %v2100_v22 = vld [vmem:[#allocation11 + $0x3d8] sm:$0xff] }
 0x9cb   : > { %3807 = vmatprep.subr.bf16.mxu0 %v3806_v23  ;;  %v3840_v23 = vpack.c.bf16 %v2095_v21, %v2093_v20  ;;  %v3842_v1 = vpack.c.bf16 %v2100_v22, %v2098_v57 }
 0x9ce   : > { %3809 = vmatpush1.bf16.msra.mxu0 %v3808_v28  ;;  %v3844_v28 = vpack.c.bf16 %v2099_v25, %v2097_v24 }
 0x9cf   : > { %3811 = vmatprep.subr.bf16.mxu0 %v3810_v29  ;;  %v3846_v29 = vpack.c.bf16 %v2104_v27, %v2102_v26  ;;  %v3981_v45 = vpop.eup %3980 }
 0x9d2   : > { %3813 = vmatpush1.bf16.msra.mxu0 %v3812_v36  ;;  %v1971_v36 = vadd.f32 1.0, %v3981_v45 }
 0x9d3   : > { %3815 = vmatprep.subr.bf16.mxu0 %v3814_v18  ;;  %v1943_v18 = vmul.f32 0.5, %v4719_v35 }
 0x9d5   : > { %v1975_v37 = vmul.f32 %v1971_v36, %v1943_v18 }
 0x9d6   : > { %3817 = vmatpush1.bf16.msra.mxu0 %v3816_v11 }
 0x9d7   : > { %3819 = vmatprep.subr.bf16.mxu0 %v3818_v39 }
 0x9da   : > { %3821 = vmatpush1.bf16.msra.mxu0 %v3820_v47 }
 0x9db   : > { %3823 = vmatprep.subr.bf16.mxu0 %v3822_v48 }
 0x9de   : > { %3825 = vmatpush1.bf16.msra.mxu0 %v3824_v60 }
 0x9df   : > { %3827 = vmatprep.subr.bf16.mxu0 %v3826_v59 }
 0x9e2   : > { %3829 = vmatpush1.bf16.msra.mxu0 %v3828_v2 }
 0x9e3   : > { %3831 = vmatprep.subr.bf16.mxu0 %v3830_v5  ;;  %v2867_v11 = vpop.permute.xlu1 %2866 }
 0x9e6   : > { %3833 = vmatpush1.bf16.msra.mxu0 %v3832_v33 }
 0x9e7   : > { %3835 = vmatprep.subr.bf16.mxu0 %v3834_v10 }
 0x9ea   : > { %3837 = vmatpush1.bf16.msra.mxu0 %v3836_v15 }
 0x9eb   : > { %3839 = vmatprep.subr.bf16.mxu0 %v3838_v16 }
 0x9ee   : > { %3841 = vmatpush1.bf16.msra.mxu0 %v3840_v23 }
 0x9ef   : > { %3843 = vmatprep.subr.bf16.mxu0 %v3842_v1 }
 0x9f2   : > { %3845 = vmatpush1.bf16.msra.mxu0 %v3844_v28 }
 0x9f3   : > { %3847 = vmatprep.subr.bf16.mxu0 %v3846_v29 }
 0x9f6   : > { %3849 = vmatpush1.bf16.msra.mxu0 %v3848_v34 }
 0x9f9   : > { %2839 = vmatmul.mubr.f32.vlgmr.msra.gmra.mrb[8].mxu0 %v1975_v37 }
 0xacc   : > { %v2840_v17 = vpop.f32.mrb[8].mxu0 }
 0xacd   : > { %v2857_v39 = vadd.f32 %v2850_v49, %v2840_v17  ;;  %v2842_v40 = vpop.f32.mrb[9].mxu0 }
 0xace   : > { %v2858_v41 = vadd.f32 %v2854_v43, %v2842_v40 }
 0xacf   : > { %v2869_v42 = vmul.f32 %v2867_v11, %v2857_v39 }
 0xad0   : > { %v2870_v35 = vmul.f32 %v2867_v11, %v2858_v41 }
 0xad1   : > { %v2871_v46 = vadd.f32 %v2869_v42, %v4620_v56 }
 0xad2   : > { %v2872_v44 = vadd.f32 %v2870_v35, %v4623_v58 }
 0xad3   : > { %2873 = vst [vmem:[%s628_s28] sm:$0xff] %v2871_v46 }
 0xad4   : > { %2874 = vst [vmem:[%s628_s28 + $0x8] sm:$0xff] %v2872_v44 }
 0xad5   : > { %4139 = shalt.err (!%p4136_p13)
}
 0xad6   : > { %s4140_s8 = scalar_lea.hbm %s4739_s29, 256  ;;  %s4144_s28 = scalar_lea.hbm %s4839_s3, 512 }
 0xad7   : > { %p4141_p3 = scmp.ne.s32.totalorder %s4739_s29, %s4140_s8  ;;  %p4145_p4 = scmp.lt.u32.totalorder %s4739_s29, %s4839_s3 }
 0xad8   : > { %p4146_p8 = scmp.lt.u32.totalorder %s4144_s28, %s4140_s8  ;;  %p4148_p0 = scmp.lt.u32.totalorder %s4140_s8, %s4739_s29 }
 0xad9   : > { %p4142_p7 = pnand %p4141_p3, %p4840_p2 }
 0xada   : > { %p4147_p6 = por %p4146_p8, %p4145_p4 }
 0xadb   : > { %p4143_p9 = pneg %p4142_p7 }
 0xadc   : > { %p4149_p5 = por %p4148_p0, %p4147_p6 }
 0xade   : > { %p4150_p10 = pnand %p4149_p5, %p4143_p9 }
 0xae0   : > { %4153 = shalt.err (!%p4150_p10)
}
 0xae1   : > { %3874 = dma.vmem_to_hbm [thread:$0]  (%p4840_p2), %s4741_s11, 256, %s4739_s29, %s2876_s27  }
 0xae2 PF: > { %s2902_s26 = sand.u32 1, %s4188_s21   ;;  %p4841_p1 = scmp.ne.s32.totalorder %s4825_s25, 0 }
 0xae3   : > { %p4842_p11 = scmp.ge.s32.totalorder %s4200_s24, 2  ;;  %s2903_s17 = scalar_lea.sflag [#allocation5], %s2902_s26 }
 0xae5   : > { %p3894_p12 = pnand %p4842_p11, %p4841_p1 }
 0xae7   : > { %4183 = dma.done.wait (!%p3894_p12), %s2903_s17, 256  }
 0xae8   : > { %4185 = vsyncadd (!%p3894_p12), %s2903_s17, 4294967040  ;;  %p31_p13 = scmp.ge.s32.totalorder %s4438_s0, 4   ;;  %s4843_s21 = smov %s4192_s22 }
 0xae9   : > { %s4844_s22 = smov %s4196_s23  ;;  %s4845_s23 = smov %s4449_s19 }
 0xaea   : > { %s4846_s24 = smov %s4438_s0  ;;  %33 = sbr.rel (!%p31_p13) target bundleno = 18 (0x12), region = 154 }
 0xaf1   :  { %2908 = vsyncpa [#allocation4], 1 }
 0xaf2   :  { %2910 = vsyncpa [#allocation4 + $0x1], 1 }
 0xaf3   :  { %2911 = vsyncpa [#allocation7], 1 }
 0xaf4   :  { %2912 = vsyncpa [#allocation10], 1 }
 0xaf5   :  { %2913 = vsyncpa [#allocation5], 1 }
 0xaf6   :  { %2915 = vsyncpa [#allocation5 + $0x1], 1 }

</bundles_post_ra>
